<compile_context>
chip_gen: v6e
topology: v6e:2x2x1
jax: 0.10.0
libtpu: 0.0.40
codegen_flags: <defaults>
</compile_context>

<pallas_src>
import jax
import jax.numpy as jnp
from jax.experimental import pallas as pl
from jax.experimental.pallas import tpu as pltpu


def _round_up(x, m):
    return ((x + m - 1) // m) * m


# ----------------------------------------------------------------------------
# Kernel
# ----------------------------------------------------------------------------
def cnn_kernel(x_ref, w1_ref, b1_ref, wg2_ref, bg2_ref, wg3_ref, bg3_ref,
               wf1_ref, bf1_ref, wf2_ref, bf2_ref, out_ref):
    def mm(a, w_ref, b_ref):
        # bf16 operands on the MXU; f32 accumulate; f32 bias add on the VPU.
        return jnp.dot(a, w_ref[...], preferred_element_type=jnp.float32) + b_ref[...]

    # conv1: dense (contraction padded to 128, output time padded 17 -> 18) + ReLU.
    h1 = jnp.maximum(mm(x_ref[...], w1_ref, b1_ref), 0.0)           # (bt, 1152) f32
    h1 = h1.astype(jnp.bfloat16)

    # conv2 (+ folded bn1): 7 paired-output window matmuls. Window for output
    # times (2g, 2g+1) is the 128-aligned lane slice [128g, 128g+384) of h1.
    h2 = jnp.concatenate(
        [mm(h1[:, 128 * g:128 * g + 384], wg2_ref, bg2_ref) for g in range(7)],
        axis=1)                                                      # (bt, 1792)
    h2 = jnp.maximum(h2, 0.0).astype(jnp.bfloat16)

    # conv3 (+ folded bn2): 5 paired-output window matmuls, slices [256g, 256g+768).
    h3 = jnp.concatenate(
        [mm(h2[:, 256 * g:256 * g + 768], wg3_ref, bg3_ref) for g in range(5)],
        axis=1)                                                      # (bt, 1280)
    h3 = jnp.maximum(h3, 0.0)

    # dropout1 / dropout2 are identity at inference.
    z = jnp.maximum(mm(h3[:, :1152].astype(jnp.bfloat16), wf1_ref, bf1_ref), 0.0)
    out_ref[...] = mm(z.astype(jnp.bfloat16), wf2_ref, bf2_ref)      # (bt, 128) lane-dense


# ----------------------------------------------------------------------------
# Wrapper
# ----------------------------------------------------------------------------
def cnn_forward(x_ncl, kp, *, b_tile=512):
    """x_ncl: (N, C_in, 21) float32 like the PyTorch module. Returns (N, num_classes)."""
    n, c_in, seq_len = x_ncl.shape
    k1p = kp["w1"].shape[0]                       # padded conv1 contraction dim
    k1 = c_in * seq_len
    # NCL -> flat (c-major) is a plain reshape; the channel/time permutation is
    # folded into w1's row order at parameter-prep time.  x cast to bf16 here.
    x = x_ncl.reshape(n, k1).astype(jnp.bfloat16)
    x = jnp.pad(x, ((0, 0), (0, k1p - k1)))

    # Batch tile: multiple of 16 (bf16 sublane tile), <= b_tile, and >= 2 grid
    # steps when the batch allows it (keeps both v7x TensorCores busy).
    bt = max(16, min(b_tile, _round_up(-(-n // 2), 16)))
    n_pad = _round_up(n, bt)
    if n_pad != n:
        x = jnp.pad(x, ((0, n_pad - n), (0, 0)))
    grid = (n_pad // bt,)

    weights = (kp["w1"], kp["b1"], kp["wg2"], kp["bg2"], kp["wg3"], kp["bg3"],
               kp["wf1"], kp["bf1"], kp["wf2"], kp["bf2"])
    wbytes = sum(int(w.size) * w.dtype.itemsize for w in weights)

    # Exact MACs of the matmuls actually issued (scheduler hint only).
    macs_per_row = (k1p * 1152 + 7 * 384 * 256 + 5 * 768 * 256
                    + 1152 * 128 + 128 * 128)
    cost = pl.CostEstimate(flops=2 * n_pad * macs_per_row, transcendentals=0,
                           bytes_accessed=int(x.size) * 2 + n_pad * 128 * 4 + wbytes)

    # f32 temporaries are < ~26 KiB/row; budget 64 KiB/row + weights + slack,
    # capped well under v7x's 64 MiB per TensorCore.
    vmem_limit = int(min(56 << 20, 2 * wbytes + bt * 64 * 1024 + (4 << 20)))

    def build(single_buffer_weights):
        def const_spec(shape):
            idx = lambda i: (0,) * len(shape)
            if single_buffer_weights and hasattr(pl, "Buffered"):
                # Constant block index -> one DMA total; no need to double-buffer.
                return pl.BlockSpec(shape, idx, pipeline_mode=pl.Buffered(1))
            return pl.BlockSpec(shape, idx)

        in_specs = [pl.BlockSpec((bt, k1p), lambda i: (i, 0))]
        in_specs += [const_spec(tuple(w.shape)) for w in weights]
        return pl.pallas_call(
            cnn_kernel,
            out_shape=jax.ShapeDtypeStruct((n_pad, 128), jnp.float32),
            grid=grid,
            in_specs=in_specs,
            out_specs=pl.BlockSpec((bt, 128), lambda i: (i, 0)),
            compiler_params=pltpu.CompilerParams(
                dimension_semantics=("parallel",),
                vmem_limit_bytes=vmem_limit),
            cost_estimate=cost,
        )

    try:
        out = build(True)(x, *weights)      # single-buffered constant weights
    except Exception:                        # fallback if Buffered(1) unsupported
        out = build(False)(x, *weights)
    return out[:n, :kp["num_classes"]]


# ----------------------------------------------------------------------------
# Parameter preparation (done once; not part of the forward pass)
# ----------------------------------------------------------------------------
def prepare_kernel_params(tp, num_classes):
    f32 = jnp.float32
    L0, L1, L2, L3, K = 21, 17, 13, 9, 5
    c_in = tp["conv1_w"].shape[1]

    # conv1 as a dense matrix acting on the c-major flattened input.
    # rows: c*L0 + t_in (matches x.reshape(n, c_in*L0));  cols: t_out*64 + c_out,
    # with t_out padded 17 -> 18 (zero block) so conv2's last window is in-bounds.
    shifts = jnp.stack([jnp.eye(L0, L1, -j, dtype=f32) for j in range(K)])   # (K,L0,L1)
    taps1 = jnp.transpose(tp["conv1_w"], (2, 1, 0)).astype(f32)              # (K,c_in,64)
    w1 = jnp.einsum("kab,kio->iabo", shifts, taps1).reshape(c_in * L0, L1 * 64)
    w1 = jnp.pad(w1, ((0, _round_up(c_in * L0, 128) - c_in * L0), (0, 64)))
    b1 = jnp.pad(jnp.tile(tp["conv1_b"], L1), (0, 64))                       # (1152,)

    # Paired-output window weight for a conv whose *input* is bn(relu(prev)):
    # fold the BN scale into each tap's rows and the BN shift into the bias.
    def pair_weights(conv_w, conv_b, scale, shift):
        c_out, ci, k = conv_w.shape
        taps = jnp.transpose(conv_w, (2, 1, 0)).astype(f32)        # (K, ci, c_out)
        stacked = (scale[None, :, None] * taps).reshape(k * ci, c_out)
        zeros = jnp.zeros((ci, c_out), f32)
        wg = jnp.concatenate(
            [jnp.concatenate([stacked, zeros], 0),                 # output time 2t
             jnp.concatenate([zeros, stacked], 0)], axis=1)        # output time 2t+1
        bias = conv_b + shift @ taps.sum(0)
        return wg, jnp.concatenate([bias, bias])

    wg2, bg2 = pair_weights(tp["conv2_w"], tp["conv2_b"], tp["s1"], tp["sh1"])  # (384,256)
    wg3, bg3 = pair_weights(tp["conv3_w"], tp["conv3_b"], tp["s2"], tp["sh2"])  # (768,256)

    # fc1: PyTorch flattens (C=128, T=9) as c*9 + t; activation layout is t*128 + c.
    wf1 = jnp.transpose(tp["fc1_w"].reshape(128, 128, L3), (2, 1, 0)).reshape(128 * L3, 128)
    bf1 = tp["fc1_b"]

    # fc2 padded to 128 output lanes (lane-dense store); wrapper slices back.
    wf2 = jnp.zeros((128, 128), f32).at[:, :num_classes].set(tp["fc2_w"].T)
    bf2 = jnp.zeros((128,), f32).at[:num_classes].set(tp["fc2_b"])

    bf16 = lambda a: a.astype(jnp.bfloat16)
    row = lambda a: a.astype(f32)[None, :]
    return dict(
        w1=bf16(w1), b1=row(b1),
        wg2=bf16(wg2), bg2=row(bg2),
        wg3=bf16(wg3), bg3=row(bg3),
        wf1=bf16(wf1), bf1=row(bf1),
        wf2=bf16(wf2), bf2=row(bf2),
        num_classes=num_classes,
    )


def init_torch_params(key, input_size, num_classes, eps=1e-5):
    """Deterministic synthetic parameters in PyTorch layout (+ folded BN affine)."""
    ks = jax.random.split(key, 18)

    def u(k, shape, lo=-0.1, hi=0.1):
        return jax.random.uniform(k, shape, jnp.float32, lo, hi)

    tp = dict(
        conv1_w=u(ks[0], (64, input_size, 5)), conv1_b=u(ks[1], (64,)),
        conv2_w=u(ks[2], (128, 64, 5)),        conv2_b=u(ks[3], (128,)),
        conv3_w=u(ks[4], (128, 128, 5)),       conv3_b=u(ks[5], (128,)),
        fc1_w=u(ks[6], (128, 128 * 9)),        fc1_b=u(ks[7], (128,)),
        fc2_w=u(ks[8], (num_classes, 128)),    fc2_b=u(ks[9], (num_classes,)),
        bn1_gamma=1.0 + u(ks[10], (64,)),  bn1_beta=u(ks[11], (64,)),
        bn1_mean=u(ks[12], (64,)),         bn1_var=u(ks[13], (64,), 0.5, 1.5),
        bn2_gamma=1.0 + u(ks[14], (128,)), bn2_beta=u(ks[15], (128,)),
        bn2_mean=u(ks[16], (128,)),        bn2_var=u(ks[17], (128,), 0.5, 1.5),
    )
    tp["s1"] = tp["bn1_gamma"] / jnp.sqrt(tp["bn1_var"] + eps)
    tp["sh1"] = tp["bn1_beta"] - tp["bn1_mean"] * tp["s1"]
    tp["s2"] = tp["bn2_gamma"] / jnp.sqrt(tp["bn2_var"] + eps)
    tp["sh2"] = tp["bn2_beta"] - tp["bn2_mean"] * tp["s2"]
    return tp


# ----------------------------------------------------------------------------
# Pure-JAX reference mirroring the PyTorch forward (eval mode):
#   x = bn1(relu(conv1(x))); x = bn2(relu(conv2(x))); x = relu(conv3(x));
#   x = x.view(-1, 128*9); fc1+relu; fc2.   (dropout = identity)
# ----------------------------------------------------------------------------
def cnn_reference(x_ncl, tp):
    def conv1d(x, w, b):
        y = jax.lax.conv_general_dilated(
            x, w, window_strides=(1,), padding="VALID",
            dimension_numbers=("NCH", "OIH", "NCH"))
        return y + b[None, :, None]

    h = jnp.maximum(conv1d(x_ncl, tp["conv1_w"], tp["conv1_b"]), 0.0)
    h = h * tp["s1"][None, :, None] + tp["sh1"][None, :, None]
    h = jnp.maximum(conv1d(h, tp["conv2_w"], tp["conv2_b"]), 0.0)
    h = h * tp["s2"][None, :, None] + tp["sh2"][None, :, None]
    h = jnp.maximum(conv1d(h, tp["conv3_w"], tp["conv3_b"]), 0.0)   # (N, 128, 9)
    h = h.reshape(h.shape[0], 128 * 9)                              # c*9 + t order
    z = jnp.maximum(h @ tp["fc1_w"].T + tp["fc1_b"], 0.0)
    return z @ tp["fc2_w"].T + tp["fc2_b"]


if __name__ == "__main__":
    # Three valid k=5 convs ending at length 9 imply an input sequence length of 21.
    input_size, num_classes = 4, 10
    batch, seq_len = 2, 21

    key = jax.random.PRNGKey(0)
    kx, kparams = jax.random.split(key)
    x = jax.random.normal(kx, (batch, input_size, seq_len), jnp.float32)  # NCL

    tp = init_torch_params(kparams, input_size, num_classes)
    kp = prepare_kernel_params(tp, num_classes)

    out = jax.block_until_ready(cnn_forward(x, kp))
    ref = cnn_reference(x, tp)

    assert out.shape == (batch, num_classes)
    max_err = float(jnp.max(jnp.abs(out - ref)))
    # bf16 MXU operands (f32 accumulate) -> small numeric delta vs f32 reference.
    assert jnp.allclose(out, ref, atol=2e-2, rtol=2e-2), (max_err, out, ref)
    print("KERNEL_OK")
</pallas_src>

<mosaic_0001>
module attributes {stable_mosaic.version = 11 : i64} {
  func.func @cnn_kernel(%arg0: i32, %arg1: memref<16x128xbf16, #tpu.memory_space<vmem>>, %arg2: memref<128x1152xbf16, #tpu.memory_space<vmem>>, %arg3: memref<1x1152xf32, #tpu.memory_space<vmem>>, %arg4: memref<384x256xbf16, #tpu.memory_space<vmem>>, %arg5: memref<1x256xf32, #tpu.memory_space<vmem>>, %arg6: memref<768x256xbf16, #tpu.memory_space<vmem>>, %arg7: memref<1x256xf32, #tpu.memory_space<vmem>>, %arg8: memref<1152x128xbf16, #tpu.memory_space<vmem>>, %arg9: memref<1x128xf32, #tpu.memory_space<vmem>>, %arg10: memref<128x128xbf16, #tpu.memory_space<vmem>>, %arg11: memref<1x128xf32, #tpu.memory_space<vmem>>, %arg12: memref<16x128xf32, #tpu.memory_space<vmem>>) attributes {dimension_semantics = [#tpu.dimension_semantics<parallel>], iteration_bounds = array<i64: 1>, scalar_prefetch = 0 : i64, scratch_operands = 0 : i64, tpu.core_type = #tpu.core_type<tc>, window_params = [{transform_indices = @transform_0, window_bounds = array<i64: 16, 128>}, {pipeline_mode = #tpu.pipeline_mode<synchronous>, transform_indices = @transform_1, window_bounds = array<i64: 128, 1152>}, {pipeline_mode = #tpu.pipeline_mode<synchronous>, transform_indices = @transform_2, window_bounds = array<i64: 1, 1152>}, {pipeline_mode = #tpu.pipeline_mode<synchronous>, transform_indices = @transform_3, window_bounds = array<i64: 384, 256>}, {pipeline_mode = #tpu.pipeline_mode<synchronous>, transform_indices = @transform_4, window_bounds = array<i64: 1, 256>}, {pipeline_mode = #tpu.pipeline_mode<synchronous>, transform_indices = @transform_5, window_bounds = array<i64: 768, 256>}, {pipeline_mode = #tpu.pipeline_mode<synchronous>, transform_indices = @transform_6, window_bounds = array<i64: 1, 256>}, {pipeline_mode = #tpu.pipeline_mode<synchronous>, transform_indices = @transform_7, window_bounds = array<i64: 1152, 128>}, {pipeline_mode = #tpu.pipeline_mode<synchronous>, transform_indices = @transform_8, window_bounds = array<i64: 1, 128>}, {pipeline_mode = #tpu.pipeline_mode<synchronous>, transform_indices = @transform_9, window_bounds = array<i64: 128, 128>}, {pipeline_mode = #tpu.pipeline_mode<synchronous>, transform_indices = @transform_10, window_bounds = array<i64: 1, 128>}, {transform_indices = @transform_11, window_bounds = array<i64: 16, 128>}]} {
    %c0 = arith.constant 0 : index
    %c0_0 = arith.constant 0 : index
    %0 = vector.load %arg1[%c0, %c0_0] : memref<16x128xbf16, #tpu.memory_space<vmem>>, vector<16x128xbf16>
    %c0_1 = arith.constant 0 : index
    %c0_2 = arith.constant 0 : index
    %1 = vector.load %arg2[%c0_1, %c0_2] : memref<128x1152xbf16, #tpu.memory_space<vmem>>, vector<128x1152xbf16>
    %cst = arith.constant dense<0.000000e+00> : vector<16x1152xf32>
    %2 = tpu.matmul %0, %1, %cst {dimension_numbers = #tpu.dot_dimension_numbers<[1], [0], [0], [1], [0, 0, 1, 1], [], []>} : vector<16x128xbf16>, vector<128x1152xbf16>, vector<16x1152xf32> -> vector<16x1152xf32>
    %c0_3 = arith.constant 0 : index
    %c0_4 = arith.constant 0 : index
    %3 = vector.load %arg3[%c0_3, %c0_4] : memref<1x1152xf32, #tpu.memory_space<vmem>>, vector<1x1152xf32>
    %4 = vector.broadcast %3 : vector<1x1152xf32> to vector<16x1152xf32>
    %5 = arith.addf %2, %4 : vector<16x1152xf32>
    %cst_5 = arith.constant 0.000000e+00 : f32
    %6 = vector.broadcast %cst_5 : f32 to vector<16x1152xf32>
    %7 = arith.maximumf %5, %6 : vector<16x1152xf32>
    %8 = arith.truncf %7 : vector<16x1152xf32> to vector<16x1152xbf16>
    %9 = vector.extract_strided_slice %8 {offsets = [0, 0], sizes = [16, 384], strides = [1, 1]} : vector<16x1152xbf16> to vector<16x384xbf16>
    %c0_6 = arith.constant 0 : index
    %c0_7 = arith.constant 0 : index
    %10 = vector.load %arg4[%c0_6, %c0_7] : memref<384x256xbf16, #tpu.memory_space<vmem>>, vector<384x256xbf16>
    %cst_8 = arith.constant dense<0.000000e+00> : vector<16x256xf32>
    %11 = tpu.matmul %9, %10, %cst_8 {dimension_numbers = #tpu.dot_dimension_numbers<[1], [0], [0], [1], [0, 0, 1, 1], [], []>} : vector<16x384xbf16>, vector<384x256xbf16>, vector<16x256xf32> -> vector<16x256xf32>
    %c0_9 = arith.constant 0 : index
    %c0_10 = arith.constant 0 : index
    %12 = vector.load %arg5[%c0_9, %c0_10] : memref<1x256xf32, #tpu.memory_space<vmem>>, vector<1x256xf32>
    %13 = vector.broadcast %12 : vector<1x256xf32> to vector<16x256xf32>
    %14 = arith.addf %11, %13 : vector<16x256xf32>
    %15 = vector.extract_strided_slice %8 {offsets = [0, 128], sizes = [16, 384], strides = [1, 1]} : vector<16x1152xbf16> to vector<16x384xbf16>
    %c0_11 = arith.constant 0 : index
    %c0_12 = arith.constant 0 : index
    %16 = vector.load %arg4[%c0_11, %c0_12] : memref<384x256xbf16, #tpu.memory_space<vmem>>, vector<384x256xbf16>
    %cst_13 = arith.constant dense<0.000000e+00> : vector<16x256xf32>
    %17 = tpu.matmul %15, %16, %cst_13 {dimension_numbers = #tpu.dot_dimension_numbers<[1], [0], [0], [1], [0, 0, 1, 1], [], []>} : vector<16x384xbf16>, vector<384x256xbf16>, vector<16x256xf32> -> vector<16x256xf32>
    %c0_14 = arith.constant 0 : index
    %c0_15 = arith.constant 0 : index
    %18 = vector.load %arg5[%c0_14, %c0_15] : memref<1x256xf32, #tpu.memory_space<vmem>>, vector<1x256xf32>
    %19 = vector.broadcast %18 : vector<1x256xf32> to vector<16x256xf32>
    %20 = arith.addf %17, %19 : vector<16x256xf32>
    %21 = vector.extract_strided_slice %8 {offsets = [0, 256], sizes = [16, 384], strides = [1, 1]} : vector<16x1152xbf16> to vector<16x384xbf16>
    %c0_16 = arith.constant 0 : index
    %c0_17 = arith.constant 0 : index
    %22 = vector.load %arg4[%c0_16, %c0_17] : memref<384x256xbf16, #tpu.memory_space<vmem>>, vector<384x256xbf16>
    %cst_18 = arith.constant dense<0.000000e+00> : vector<16x256xf32>
    %23 = tpu.matmul %21, %22, %cst_18 {dimension_numbers = #tpu.dot_dimension_numbers<[1], [0], [0], [1], [0, 0, 1, 1], [], []>} : vector<16x384xbf16>, vector<384x256xbf16>, vector<16x256xf32> -> vector<16x256xf32>
    %c0_19 = arith.constant 0 : index
    %c0_20 = arith.constant 0 : index
    %24 = vector.load %arg5[%c0_19, %c0_20] : memref<1x256xf32, #tpu.memory_space<vmem>>, vector<1x256xf32>
    %25 = vector.broadcast %24 : vector<1x256xf32> to vector<16x256xf32>
    %26 = arith.addf %23, %25 : vector<16x256xf32>
    %27 = vector.extract_strided_slice %8 {offsets = [0, 384], sizes = [16, 384], strides = [1, 1]} : vector<16x1152xbf16> to vector<16x384xbf16>
    %c0_21 = arith.constant 0 : index
    %c0_22 = arith.constant 0 : index
    %28 = vector.load %arg4[%c0_21, %c0_22] : memref<384x256xbf16, #tpu.memory_space<vmem>>, vector<384x256xbf16>
    %cst_23 = arith.constant dense<0.000000e+00> : vector<16x256xf32>
    %29 = tpu.matmul %27, %28, %cst_23 {dimension_numbers = #tpu.dot_dimension_numbers<[1], [0], [0], [1], [0, 0, 1, 1], [], []>} : vector<16x384xbf16>, vector<384x256xbf16>, vector<16x256xf32> -> vector<16x256xf32>
    %c0_24 = arith.constant 0 : index
    %c0_25 = arith.constant 0 : index
    %30 = vector.load %arg5[%c0_24, %c0_25] : memref<1x256xf32, #tpu.memory_space<vmem>>, vector<1x256xf32>
    %31 = vector.broadcast %30 : vector<1x256xf32> to vector<16x256xf32>
    %32 = arith.addf %29, %31 : vector<16x256xf32>
    %33 = vector.extract_strided_slice %8 {offsets = [0, 512], sizes = [16, 384], strides = [1, 1]} : vector<16x1152xbf16> to vector<16x384xbf16>
    %c0_26 = arith.constant 0 : index
    %c0_27 = arith.constant 0 : index
    %34 = vector.load %arg4[%c0_26, %c0_27] : memref<384x256xbf16, #tpu.memory_space<vmem>>, vector<384x256xbf16>
    %cst_28 = arith.constant dense<0.000000e+00> : vector<16x256xf32>
    %35 = tpu.matmul %33, %34, %cst_28 {dimension_numbers = #tpu.dot_dimension_numbers<[1], [0], [0], [1], [0, 0, 1, 1], [], []>} : vector<16x384xbf16>, vector<384x256xbf16>, vector<16x256xf32> -> vector<16x256xf32>
    %c0_29 = arith.constant 0 : index
    %c0_30 = arith.constant 0 : index
    %36 = vector.load %arg5[%c0_29, %c0_30] : memref<1x256xf32, #tpu.memory_space<vmem>>, vector<1x256xf32>
    %37 = vector.broadcast %36 : vector<1x256xf32> to vector<16x256xf32>
    %38 = arith.addf %35, %37 : vector<16x256xf32>
    %39 = vector.extract_strided_slice %8 {offsets = [0, 640], sizes = [16, 384], strides = [1, 1]} : vector<16x1152xbf16> to vector<16x384xbf16>
    %c0_31 = arith.constant 0 : index
    %c0_32 = arith.constant 0 : index
    %40 = vector.load %arg4[%c0_31, %c0_32] : memref<384x256xbf16, #tpu.memory_space<vmem>>, vector<384x256xbf16>
    %cst_33 = arith.constant dense<0.000000e+00> : vector<16x256xf32>
    %41 = tpu.matmul %39, %40, %cst_33 {dimension_numbers = #tpu.dot_dimension_numbers<[1], [0], [0], [1], [0, 0, 1, 1], [], []>} : vector<16x384xbf16>, vector<384x256xbf16>, vector<16x256xf32> -> vector<16x256xf32>
    %c0_34 = arith.constant 0 : index
    %c0_35 = arith.constant 0 : index
    %42 = vector.load %arg5[%c0_34, %c0_35] : memref<1x256xf32, #tpu.memory_space<vmem>>, vector<1x256xf32>
    %43 = vector.broadcast %42 : vector<1x256xf32> to vector<16x256xf32>
    %44 = arith.addf %41, %43 : vector<16x256xf32>
    %45 = vector.extract_strided_slice %8 {offsets = [0, 768], sizes = [16, 384], strides = [1, 1]} : vector<16x1152xbf16> to vector<16x384xbf16>
    %c0_36 = arith.constant 0 : index
    %c0_37 = arith.constant 0 : index
    %46 = vector.load %arg4[%c0_36, %c0_37] : memref<384x256xbf16, #tpu.memory_space<vmem>>, vector<384x256xbf16>
    %cst_38 = arith.constant dense<0.000000e+00> : vector<16x256xf32>
    %47 = tpu.matmul %45, %46, %cst_38 {dimension_numbers = #tpu.dot_dimension_numbers<[1], [0], [0], [1], [0, 0, 1, 1], [], []>} : vector<16x384xbf16>, vector<384x256xbf16>, vector<16x256xf32> -> vector<16x256xf32>
    %c0_39 = arith.constant 0 : index
    %c0_40 = arith.constant 0 : index
    %48 = vector.load %arg5[%c0_39, %c0_40] : memref<1x256xf32, #tpu.memory_space<vmem>>, vector<1x256xf32>
    %49 = vector.broadcast %48 : vector<1x256xf32> to vector<16x256xf32>
    %50 = arith.addf %47, %49 : vector<16x256xf32>
    %51 = tpu.concatenate %14, %20, %26, %32, %38, %44, %50 in 1 : vector<16x256xf32>, vector<16x256xf32>, vector<16x256xf32>, vector<16x256xf32>, vector<16x256xf32>, vector<16x256xf32>, vector<16x256xf32> -> vector<16x1792xf32>
    %cst_41 = arith.constant 0.000000e+00 : f32
    %52 = vector.broadcast %cst_41 : f32 to vector<16x1792xf32>
    %53 = arith.maximumf %51, %52 : vector<16x1792xf32>
    %54 = arith.truncf %53 : vector<16x1792xf32> to vector<16x1792xbf16>
    %55 = vector.extract_strided_slice %54 {offsets = [0, 0], sizes = [16, 768], strides = [1, 1]} : vector<16x1792xbf16> to vector<16x768xbf16>
    %c0_42 = arith.constant 0 : index
    %c0_43 = arith.constant 0 : index
    %56 = vector.load %arg6[%c0_42, %c0_43] : memref<768x256xbf16, #tpu.memory_space<vmem>>, vector<768x256xbf16>
    %cst_44 = arith.constant dense<0.000000e+00> : vector<16x256xf32>
    %57 = tpu.matmul %55, %56, %cst_44 {dimension_numbers = #tpu.dot_dimension_numbers<[1], [0], [0], [1], [0, 0, 1, 1], [], []>} : vector<16x768xbf16>, vector<768x256xbf16>, vector<16x256xf32> -> vector<16x256xf32>
    %c0_45 = arith.constant 0 : index
    %c0_46 = arith.constant 0 : index
    %58 = vector.load %arg7[%c0_45, %c0_46] : memref<1x256xf32, #tpu.memory_space<vmem>>, vector<1x256xf32>
    %59 = vector.broadcast %58 : vector<1x256xf32> to vector<16x256xf32>
    %60 = arith.addf %57, %59 : vector<16x256xf32>
    %61 = vector.extract_strided_slice %54 {offsets = [0, 256], sizes = [16, 768], strides = [1, 1]} : vector<16x1792xbf16> to vector<16x768xbf16>
    %c0_47 = arith.constant 0 : index
    %c0_48 = arith.constant 0 : index
    %62 = vector.load %arg6[%c0_47, %c0_48] : memref<768x256xbf16, #tpu.memory_space<vmem>>, vector<768x256xbf16>
    %cst_49 = arith.constant dense<0.000000e+00> : vector<16x256xf32>
    %63 = tpu.matmul %61, %62, %cst_49 {dimension_numbers = #tpu.dot_dimension_numbers<[1], [0], [0], [1], [0, 0, 1, 1], [], []>} : vector<16x768xbf16>, vector<768x256xbf16>, vector<16x256xf32> -> vector<16x256xf32>
    %c0_50 = arith.constant 0 : index
    %c0_51 = arith.constant 0 : index
    %64 = vector.load %arg7[%c0_50, %c0_51] : memref<1x256xf32, #tpu.memory_space<vmem>>, vector<1x256xf32>
    %65 = vector.broadcast %64 : vector<1x256xf32> to vector<16x256xf32>
    %66 = arith.addf %63, %65 : vector<16x256xf32>
    %67 = vector.extract_strided_slice %54 {offsets = [0, 512], sizes = [16, 768], strides = [1, 1]} : vector<16x1792xbf16> to vector<16x768xbf16>
    %c0_52 = arith.constant 0 : index
    %c0_53 = arith.constant 0 : index
    %68 = vector.load %arg6[%c0_52, %c0_53] : memref<768x256xbf16, #tpu.memory_space<vmem>>, vector<768x256xbf16>
    %cst_54 = arith.constant dense<0.000000e+00> : vector<16x256xf32>
    %69 = tpu.matmul %67, %68, %cst_54 {dimension_numbers = #tpu.dot_dimension_numbers<[1], [0], [0], [1], [0, 0, 1, 1], [], []>} : vector<16x768xbf16>, vector<768x256xbf16>, vector<16x256xf32> -> vector<16x256xf32>
    %c0_55 = arith.constant 0 : index
    %c0_56 = arith.constant 0 : index
    %70 = vector.load %arg7[%c0_55, %c0_56] : memref<1x256xf32, #tpu.memory_space<vmem>>, vector<1x256xf32>
    %71 = vector.broadcast %70 : vector<1x256xf32> to vector<16x256xf32>
    %72 = arith.addf %69, %71 : vector<16x256xf32>
    %73 = vector.extract_strided_slice %54 {offsets = [0, 768], sizes = [16, 768], strides = [1, 1]} : vector<16x1792xbf16> to vector<16x768xbf16>
    %c0_57 = arith.constant 0 : index
    %c0_58 = arith.constant 0 : index
    %74 = vector.load %arg6[%c0_57, %c0_58] : memref<768x256xbf16, #tpu.memory_space<vmem>>, vector<768x256xbf16>
    %cst_59 = arith.constant dense<0.000000e+00> : vector<16x256xf32>
    %75 = tpu.matmul %73, %74, %cst_59 {dimension_numbers = #tpu.dot_dimension_numbers<[1], [0], [0], [1], [0, 0, 1, 1], [], []>} : vector<16x768xbf16>, vector<768x256xbf16>, vector<16x256xf32> -> vector<16x256xf32>
    %c0_60 = arith.constant 0 : index
    %c0_61 = arith.constant 0 : index
    %76 = vector.load %arg7[%c0_60, %c0_61] : memref<1x256xf32, #tpu.memory_space<vmem>>, vector<1x256xf32>
    %77 = vector.broadcast %76 : vector<1x256xf32> to vector<16x256xf32>
    %78 = arith.addf %75, %77 : vector<16x256xf32>
    %79 = vector.extract_strided_slice %54 {offsets = [0, 1024], sizes = [16, 768], strides = [1, 1]} : vector<16x1792xbf16> to vector<16x768xbf16>
    %c0_62 = arith.constant 0 : index
    %c0_63 = arith.constant 0 : index
    %80 = vector.load %arg6[%c0_62, %c0_63] : memref<768x256xbf16, #tpu.memory_space<vmem>>, vector<768x256xbf16>
    %cst_64 = arith.constant dense<0.000000e+00> : vector<16x256xf32>
    %81 = tpu.matmul %79, %80, %cst_64 {dimension_numbers = #tpu.dot_dimension_numbers<[1], [0], [0], [1], [0, 0, 1, 1], [], []>} : vector<16x768xbf16>, vector<768x256xbf16>, vector<16x256xf32> -> vector<16x256xf32>
    %c0_65 = arith.constant 0 : index
    %c0_66 = arith.constant 0 : index
    %82 = vector.load %arg7[%c0_65, %c0_66] : memref<1x256xf32, #tpu.memory_space<vmem>>, vector<1x256xf32>
    %83 = vector.broadcast %82 : vector<1x256xf32> to vector<16x256xf32>
    %84 = arith.addf %81, %83 : vector<16x256xf32>
    %85 = tpu.concatenate %60, %66, %72, %78, %84 in 1 : vector<16x256xf32>, vector<16x256xf32>, vector<16x256xf32>, vector<16x256xf32>, vector<16x256xf32> -> vector<16x1280xf32>
    %cst_67 = arith.constant 0.000000e+00 : f32
    %86 = vector.broadcast %cst_67 : f32 to vector<16x1280xf32>
    %87 = arith.maximumf %85, %86 : vector<16x1280xf32>
    %88 = vector.extract_strided_slice %87 {offsets = [0, 0], sizes = [16, 1152], strides = [1, 1]} : vector<16x1280xf32> to vector<16x1152xf32>
    %89 = arith.truncf %88 : vector<16x1152xf32> to vector<16x1152xbf16>
    %c0_68 = arith.constant 0 : index
    %c0_69 = arith.constant 0 : index
    %90 = vector.load %arg8[%c0_68, %c0_69] : memref<1152x128xbf16, #tpu.memory_space<vmem>>, vector<1152x128xbf16>
    %cst_70 = arith.constant dense<0.000000e+00> : vector<16x128xf32>
    %91 = tpu.matmul %89, %90, %cst_70 {dimension_numbers = #tpu.dot_dimension_numbers<[1], [0], [0], [1], [0, 0, 1, 1], [], []>} : vector<16x1152xbf16>, vector<1152x128xbf16>, vector<16x128xf32> -> vector<16x128xf32>
    %c0_71 = arith.constant 0 : index
    %c0_72 = arith.constant 0 : index
    %92 = vector.load %arg9[%c0_71, %c0_72] : memref<1x128xf32, #tpu.memory_space<vmem>>, vector<1x128xf32>
    %93 = vector.broadcast %92 : vector<1x128xf32> to vector<16x128xf32>
    %94 = arith.addf %91, %93 : vector<16x128xf32>
    %cst_73 = arith.constant 0.000000e+00 : f32
    %95 = vector.broadcast %cst_73 : f32 to vector<16x128xf32>
    %96 = arith.maximumf %94, %95 : vector<16x128xf32>
    %97 = arith.truncf %96 : vector<16x128xf32> to vector<16x128xbf16>
    %c0_74 = arith.constant 0 : index
    %c0_75 = arith.constant 0 : index
    %98 = vector.load %arg10[%c0_74, %c0_75] : memref<128x128xbf16, #tpu.memory_space<vmem>>, vector<128x128xbf16>
    %cst_76 = arith.constant dense<0.000000e+00> : vector<16x128xf32>
    %99 = tpu.matmul %97, %98, %cst_76 {dimension_numbers = #tpu.dot_dimension_numbers<[1], [0], [0], [1], [0, 0, 1, 1], [], []>} : vector<16x128xbf16>, vector<128x128xbf16>, vector<16x128xf32> -> vector<16x128xf32>
    %c0_77 = arith.constant 0 : index
    %c0_78 = arith.constant 0 : index
    %100 = vector.load %arg11[%c0_77, %c0_78] : memref<1x128xf32, #tpu.memory_space<vmem>>, vector<1x128xf32>
    %101 = vector.broadcast %100 : vector<1x128xf32> to vector<16x128xf32>
    %102 = arith.addf %99, %101 : vector<16x128xf32>
    %c0_79 = arith.constant 0 : index
    %c0_80 = arith.constant 0 : index
    %103 = vector.load %arg12[%c0_79, %c0_80] : memref<16x128xf32, #tpu.memory_space<vmem>>, vector<16x128xf32>
    tpu.vector_store %arg12[%c0_79, %c0_80], %102 {strides = array<i32>} : memref<16x128xf32, #tpu.memory_space<vmem>>, vector<16x128xf32>,
    return
  }
  func.func @transform_0(%arg0: i32) -> (i32, i32) {
    %c0_i32 = arith.constant 0 : i32
    %c0_i32_0 = arith.constant 0 : i32
    return %arg0, %c0_i32 : i32, i32
  }
  func.func @transform_1(%arg0: i32) -> (i32, i32) {
    %c0_i32 = arith.constant 0 : i32
    %c0_i32_0 = arith.constant 0 : i32
    %c0_i32_1 = arith.constant 0 : i32
    return %c0_i32, %c0_i32_0 : i32, i32
  }
  func.func @transform_2(%arg0: i32) -> (i32, i32) {
    %c0_i32 = arith.constant 0 : i32
    %c0_i32_0 = arith.constant 0 : i32
    %c0_i32_1 = arith.constant 0 : i32
    return %c0_i32, %c0_i32_0 : i32, i32
  }
  func.func @transform_3(%arg0: i32) -> (i32, i32) {
    %c0_i32 = arith.constant 0 : i32
    %c0_i32_0 = arith.constant 0 : i32
    %c0_i32_1 = arith.constant 0 : i32
    return %c0_i32, %c0_i32_0 : i32, i32
  }
  func.func @transform_4(%arg0: i32) -> (i32, i32) {
    %c0_i32 = arith.constant 0 : i32
    %c0_i32_0 = arith.constant 0 : i32
    %c0_i32_1 = arith.constant 0 : i32
    return %c0_i32, %c0_i32_0 : i32, i32
  }
  func.func @transform_5(%arg0: i32) -> (i32, i32) {
    %c0_i32 = arith.constant 0 : i32
    %c0_i32_0 = arith.constant 0 : i32
    %c0_i32_1 = arith.constant 0 : i32
    return %c0_i32, %c0_i32_0 : i32, i32
  }
  func.func @transform_6(%arg0: i32) -> (i32, i32) {
    %c0_i32 = arith.constant 0 : i32
    %c0_i32_0 = arith.constant 0 : i32
    %c0_i32_1 = arith.constant 0 : i32
    return %c0_i32, %c0_i32_0 : i32, i32
  }
  func.func @transform_7(%arg0: i32) -> (i32, i32) {
    %c0_i32 = arith.constant 0 : i32
    %c0_i32_0 = arith.constant 0 : i32
    %c0_i32_1 = arith.constant 0 : i32
    return %c0_i32, %c0_i32_0 : i32, i32
  }
  func.func @transform_8(%arg0: i32) -> (i32, i32) {
    %c0_i32 = arith.constant 0 : i32
    %c0_i32_0 = arith.constant 0 : i32
    %c0_i32_1 = arith.constant 0 : i32
    return %c0_i32, %c0_i32_0 : i32, i32
  }
  func.func @transform_9(%arg0: i32) -> (i32, i32) {
    %c0_i32 = arith.constant 0 : i32
    %c0_i32_0 = arith.constant 0 : i32
    %c0_i32_1 = arith.constant 0 : i32
    return %c0_i32, %c0_i32_0 : i32, i32
  }
  func.func @transform_10(%arg0: i32) -> (i32, i32) {
    %c0_i32 = arith.constant 0 : i32
    %c0_i32_0 = arith.constant 0 : i32
    %c0_i32_1 = arith.constant 0 : i32
    return %c0_i32, %c0_i32_0 : i32, i32
  }
  func.func @transform_11(%arg0: i32) -> (i32, i32) {
    %c0_i32 = arith.constant 0 : i32
    %c0_i32_0 = arith.constant 0 : i32
    return %arg0, %c0_i32 : i32, i32
  }
}

module attributes {stable_mosaic.version = 11 : i64} {
  func.func @cnn_kernel(%arg0: i32, %arg1: memref<16x128xbf16, #tpu.memory_space<vmem>>, %arg2: memref<128x1152xbf16, #tpu.memory_space<vmem>>, %arg3: memref<1x1152xf32, #tpu.memory_space<vmem>>, %arg4: memref<384x256xbf16, #tpu.memory_space<vmem>>, %arg5: memref<1x256xf32, #tpu.memory_space<vmem>>, %arg6: memref<768x256xbf16, #tpu.memory_space<vmem>>, %arg7: memref<1x256xf32, #tpu.memory_space<vmem>>, %arg8: memref<1152x128xbf16, #tpu.memory_space<vmem>>, %arg9: memref<1x128xf32, #tpu.memory_space<vmem>>, %arg10: memref<128x128xbf16, #tpu.memory_space<vmem>>, %arg11: memref<1x128xf32, #tpu.memory_space<vmem>>, %arg12: memref<16x128xf32, #tpu.memory_space<vmem>>) attributes {dimension_semantics = [#tpu.dimension_semantics<parallel>], iteration_bounds = array<i64: 1>, scalar_prefetch = 0 : i64, scratch_operands = 0 : i64, tpu.core_type = #tpu.core_type<tc>, window_params = [{transform_indices = @transform_0, window_bounds = array<i64: 16, 128>}, {pipeline_mode = #tpu.pipeline_mode<synchronous>, transform_indices = @transform_1, window_bounds = array<i64: 128, 1152>}, {pipeline_mode = #tpu.pipeline_mode<synchronous>, transform_indices = @transform_2, window_bounds = array<i64: 1, 1152>}, {pipeline_mode = #tpu.pipeline_mode<synchronous>, transform_indices = @transform_3, window_bounds = array<i64: 384, 256>}, {pipeline_mode = #tpu.pipeline_mode<synchronous>, transform_indices = @transform_4, window_bounds = array<i64: 1, 256>}, {pipeline_mode = #tpu.pipeline_mode<synchronous>, transform_indices = @transform_5, window_bounds = array<i64: 768, 256>}, {pipeline_mode = #tpu.pipeline_mode<synchronous>, transform_indices = @transform_6, window_bounds = array<i64: 1, 256>}, {pipeline_mode = #tpu.pipeline_mode<synchronous>, transform_indices = @transform_7, window_bounds = array<i64: 1152, 128>}, {pipeline_mode = #tpu.pipeline_mode<synchronous>, transform_indices = @transform_8, window_bounds = array<i64: 1, 128>}, {pipeline_mode = #tpu.pipeline_mode<synchronous>, transform_indices = @transform_9, window_bounds = array<i64: 128, 128>}, {pipeline_mode = #tpu.pipeline_mode<synchronous>, transform_indices = @transform_10, window_bounds = array<i64: 1, 128>}, {transform_indices = @transform_11, window_bounds = array<i64: 16, 128>}]} {
    %c0 = arith.constant 0 : index
    %c0_0 = arith.constant 0 : index
    %0 = vector.load %arg1[%c0, %c0_0] : memref<16x128xbf16, #tpu.memory_space<vmem>>, vector<16x128xbf16>
    %c0_1 = arith.constant 0 : index
    %c0_2 = arith.constant 0 : index
    %1 = vector.load %arg2[%c0_1, %c0_2] : memref<128x1152xbf16, #tpu.memory_space<vmem>>, vector<128x1152xbf16>
    %cst = arith.constant dense<0.000000e+00> : vector<16x1152xf32>
    %2 = tpu.matmul %0, %1, %cst {dimension_numbers = #tpu.dot_dimension_numbers<[1], [0], [0], [1], [0, 0, 1, 1], [], []>} : vector<16x128xbf16>, vector<128x1152xbf16>, vector<16x1152xf32> -> vector<16x1152xf32>
    %c0_3 = arith.constant 0 : index
    %c0_4 = arith.constant 0 : index
    %3 = vector.load %arg3[%c0_3, %c0_4] : memref<1x1152xf32, #tpu.memory_space<vmem>>, vector<1x1152xf32>
    %4 = vector.broadcast %3 : vector<1x1152xf32> to vector<16x1152xf32>
    %5 = arith.addf %2, %4 : vector<16x1152xf32>
    %cst_5 = arith.constant 0.000000e+00 : f32
    %6 = vector.broadcast %cst_5 : f32 to vector<16x1152xf32>
    %7 = arith.maximumf %5, %6 : vector<16x1152xf32>
    %8 = arith.truncf %7 : vector<16x1152xf32> to vector<16x1152xbf16>
    %9 = vector.extract_strided_slice %8 {offsets = [0, 0], sizes = [16, 384], strides = [1, 1]} : vector<16x1152xbf16> to vector<16x384xbf16>
    %c0_6 = arith.constant 0 : index
    %c0_7 = arith.constant 0 : index
    %10 = vector.load %arg4[%c0_6, %c0_7] : memref<384x256xbf16, #tpu.memory_space<vmem>>, vector<384x256xbf16>
    %cst_8 = arith.constant dense<0.000000e+00> : vector<16x256xf32>
    %11 = tpu.matmul %9, %10, %cst_8 {dimension_numbers = #tpu.dot_dimension_numbers<[1], [0], [0], [1], [0, 0, 1, 1], [], []>} : vector<16x384xbf16>, vector<384x256xbf16>, vector<16x256xf32> -> vector<16x256xf32>
    %c0_9 = arith.constant 0 : index
    %c0_10 = arith.constant 0 : index
    %12 = vector.load %arg5[%c0_9, %c0_10] : memref<1x256xf32, #tpu.memory_space<vmem>>, vector<1x256xf32>
    %13 = vector.broadcast %12 : vector<1x256xf32> to vector<16x256xf32>
    %14 = arith.addf %11, %13 : vector<16x256xf32>
    %15 = vector.extract_strided_slice %8 {offsets = [0, 128], sizes = [16, 384], strides = [1, 1]} : vector<16x1152xbf16> to vector<16x384xbf16>
    %c0_11 = arith.constant 0 : index
    %c0_12 = arith.constant 0 : index
    %16 = vector.load %arg4[%c0_11, %c0_12] : memref<384x256xbf16, #tpu.memory_space<vmem>>, vector<384x256xbf16>
    %cst_13 = arith.constant dense<0.000000e+00> : vector<16x256xf32>
    %17 = tpu.matmul %15, %16, %cst_13 {dimension_numbers = #tpu.dot_dimension_numbers<[1], [0], [0], [1], [0, 0, 1, 1], [], []>} : vector<16x384xbf16>, vector<384x256xbf16>, vector<16x256xf32> -> vector<16x256xf32>
    %c0_14 = arith.constant 0 : index
    %c0_15 = arith.constant 0 : index
    %18 = vector.load %arg5[%c0_14, %c0_15] : memref<1x256xf32, #tpu.memory_space<vmem>>, vector<1x256xf32>
    %19 = vector.broadcast %18 : vector<1x256xf32> to vector<16x256xf32>
    %20 = arith.addf %17, %19 : vector<16x256xf32>
    %21 = vector.extract_strided_slice %8 {offsets = [0, 256], sizes = [16, 384], strides = [1, 1]} : vector<16x1152xbf16> to vector<16x384xbf16>
    %c0_16 = arith.constant 0 : index
    %c0_17 = arith.constant 0 : index
    %22 = vector.load %arg4[%c0_16, %c0_17] : memref<384x256xbf16, #tpu.memory_space<vmem>>, vector<384x256xbf16>
    %cst_18 = arith.constant dense<0.000000e+00> : vector<16x256xf32>
    %23 = tpu.matmul %21, %22, %cst_18 {dimension_numbers = #tpu.dot_dimension_numbers<[1], [0], [0], [1], [0, 0, 1, 1], [], []>} : vector<16x384xbf16>, vector<384x256xbf16>, vector<16x256xf32> -> vector<16x256xf32>
    %c0_19 = arith.constant 0 : index
    %c0_20 = arith.constant 0 : index
    %24 = vector.load %arg5[%c0_19, %c0_20] : memref<1x256xf32, #tpu.memory_space<vmem>>, vector<1x256xf32>
    %25 = vector.broadcast %24 : vector<1x256xf32> to vector<16x256xf32>
    %26 = arith.addf %23, %25 : vector<16x256xf32>
    %27 = vector.extract_strided_slice %8 {offsets = [0, 384], sizes = [16, 384], strides = [1, 1]} : vector<16x1152xbf16> to vector<16x384xbf16>
    %c0_21 = arith.constant 0 : index
    %c0_22 = arith.constant 0 : index
    %28 = vector.load %arg4[%c0_21, %c0_22] : memref<384x256xbf16, #tpu.memory_space<vmem>>, vector<384x256xbf16>
    %cst_23 = arith.constant dense<0.000000e+00> : vector<16x256xf32>
    %29 = tpu.matmul %27, %28, %cst_23 {dimension_numbers = #tpu.dot_dimension_numbers<[1], [0], [0], [1], [0, 0, 1, 1], [], []>} : vector<16x384xbf16>, vector<384x256xbf16>, vector<16x256xf32> -> vector<16x256xf32>
    %c0_24 = arith.constant 0 : index
    %c0_25 = arith.constant 0 : index
    %30 = vector.load %arg5[%c0_24, %c0_25] : memref<1x256xf32, #tpu.memory_space<vmem>>, vector<1x256xf32>
    %31 = vector.broadcast %30 : vector<1x256xf32> to vector<16x256xf32>
    %32 = arith.addf %29, %31 : vector<16x256xf32>
    %33 = vector.extract_strided_slice %8 {offsets = [0, 512], sizes = [16, 384], strides = [1, 1]} : vector<16x1152xbf16> to vector<16x384xbf16>
    %c0_26 = arith.constant 0 : index
    %c0_27 = arith.constant 0 : index
    %34 = vector.load %arg4[%c0_26, %c0_27] : memref<384x256xbf16, #tpu.memory_space<vmem>>, vector<384x256xbf16>
    %cst_28 = arith.constant dense<0.000000e+00> : vector<16x256xf32>
    %35 = tpu.matmul %33, %34, %cst_28 {dimension_numbers = #tpu.dot_dimension_numbers<[1], [0], [0], [1], [0, 0, 1, 1], [], []>} : vector<16x384xbf16>, vector<384x256xbf16>, vector<16x256xf32> -> vector<16x256xf32>
    %c0_29 = arith.constant 0 : index
    %c0_30 = arith.constant 0 : index
    %36 = vector.load %arg5[%c0_29, %c0_30] : memref<1x256xf32, #tpu.memory_space<vmem>>, vector<1x256xf32>
    %37 = vector.broadcast %36 : vector<1x256xf32> to vector<16x256xf32>
    %38 = arith.addf %35, %37 : vector<16x256xf32>
    %39 = vector.extract_strided_slice %8 {offsets = [0, 640], sizes = [16, 384], strides = [1, 1]} : vector<16x1152xbf16> to vector<16x384xbf16>
    %c0_31 = arith.constant 0 : index
    %c0_32 = arith.constant 0 : index
    %40 = vector.load %arg4[%c0_31, %c0_32] : memref<384x256xbf16, #tpu.memory_space<vmem>>, vector<384x256xbf16>
    %cst_33 = arith.constant dense<0.000000e+00> : vector<16x256xf32>
    %41 = tpu.matmul %39, %40, %cst_33 {dimension_numbers = #tpu.dot_dimension_numbers<[1], [0], [0], [1], [0, 0, 1, 1], [], []>} : vector<16x384xbf16>, vector<384x256xbf16>, vector<16x256xf32> -> vector<16x256xf32>
    %c0_34 = arith.constant 0 : index
    %c0_35 = arith.constant 0 : index
    %42 = vector.load %arg5[%c0_34, %c0_35] : memref<1x256xf32, #tpu.memory_space<vmem>>, vector<1x256xf32>
    %43 = vector.broadcast %42 : vector<1x256xf32> to vector<16x256xf32>
    %44 = arith.addf %41, %43 : vector<16x256xf32>
    %45 = vector.extract_strided_slice %8 {offsets = [0, 768], sizes = [16, 384], strides = [1, 1]} : vector<16x1152xbf16> to vector<16x384xbf16>
    %c0_36 = arith.constant 0 : index
    %c0_37 = arith.constant 0 : index
    %46 = vector.load %arg4[%c0_36, %c0_37] : memref<384x256xbf16, #tpu.memory_space<vmem>>, vector<384x256xbf16>
    %cst_38 = arith.constant dense<0.000000e+00> : vector<16x256xf32>
    %47 = tpu.matmul %45, %46, %cst_38 {dimension_numbers = #tpu.dot_dimension_numbers<[1], [0], [0], [1], [0, 0, 1, 1], [], []>} : vector<16x384xbf16>, vector<384x256xbf16>, vector<16x256xf32> -> vector<16x256xf32>
    %c0_39 = arith.constant 0 : index
    %c0_40 = arith.constant 0 : index
    %48 = vector.load %arg5[%c0_39, %c0_40] : memref<1x256xf32, #tpu.memory_space<vmem>>, vector<1x256xf32>
    %49 = vector.broadcast %48 : vector<1x256xf32> to vector<16x256xf32>
    %50 = arith.addf %47, %49 : vector<16x256xf32>
    %51 = tpu.concatenate %14, %20, %26, %32, %38, %44, %50 in 1 : vector<16x256xf32>, vector<16x256xf32>, vector<16x256xf32>, vector<16x256xf32>, vector<16x256xf32>, vector<16x256xf32>, vector<16x256xf32> -> vector<16x1792xf32>
    %cst_41 = arith.constant 0.000000e+00 : f32
    %52 = vector.broadcast %cst_41 : f32 to vector<16x1792xf32>
    %53 = arith.maximumf %51, %52 : vector<16x1792xf32>
    %54 = arith.truncf %53 : vector<16x1792xf32> to vector<16x1792xbf16>
    %55 = vector.extract_strided_slice %54 {offsets = [0, 0], sizes = [16, 768], strides = [1, 1]} : vector<16x1792xbf16> to vector<16x768xbf16>
    %c0_42 = arith.constant 0 : index
    %c0_43 = arith.constant 0 : index
    %56 = vector.load %arg6[%c0_42, %c0_43] : memref<768x256xbf16, #tpu.memory_space<vmem>>, vector<768x256xbf16>
    %cst_44 = arith.constant dense<0.000000e+00> : vector<16x256xf32>
    %57 = tpu.matmul %55, %56, %cst_44 {dimension_numbers = #tpu.dot_dimension_numbers<[1], [0], [0], [1], [0, 0, 1, 1], [], []>} : vector<16x768xbf16>, vector<768x256xbf16>, vector<16x256xf32> -> vector<16x256xf32>
    %c0_45 = arith.constant 0 : index
    %c0_46 = arith.constant 0 : index
    %58 = vector.load %arg7[%c0_45, %c0_46] : memref<1x256xf32, #tpu.memory_space<vmem>>, vector<1x256xf32>
    %59 = vector.broadcast %58 : vector<1x256xf32> to vector<16x256xf32>
    %60 = arith.addf %57, %59 : vector<16x256xf32>
    %61 = vector.extract_strided_slice %54 {offsets = [0, 256], sizes = [16, 768], strides = [1, 1]} : vector<16x1792xbf16> to vector<16x768xbf16>
    %c0_47 = arith.constant 0 : index
    %c0_48 = arith.constant 0 : index
    %62 = vector.load %arg6[%c0_47, %c0_48] : memref<768x256xbf16, #tpu.memory_space<vmem>>, vector<768x256xbf16>
    %cst_49 = arith.constant dense<0.000000e+00> : vector<16x256xf32>
    %63 = tpu.matmul %61, %62, %cst_49 {dimension_numbers = #tpu.dot_dimension_numbers<[1], [0], [0], [1], [0, 0, 1, 1], [], []>} : vector<16x768xbf16>, vector<768x256xbf16>, vector<16x256xf32> -> vector<16x256xf32>
    %c0_50 = arith.constant 0 : index
    %c0_51 = arith.constant 0 : index
    %64 = vector.load %arg7[%c0_50, %c0_51] : memref<1x256xf32, #tpu.memory_space<vmem>>, vector<1x256xf32>
    %65 = vector.broadcast %64 : vector<1x256xf32> to vector<16x256xf32>
    %66 = arith.addf %63, %65 : vector<16x256xf32>
    %67 = vector.extract_strided_slice %54 {offsets = [0, 512], sizes = [16, 768], strides = [1, 1]} : vector<16x1792xbf16> to vector<16x768xbf16>
    %c0_52 = arith.constant 0 : index
    %c0_53 = arith.constant 0 : index
    %68 = vector.load %arg6[%c0_52, %c0_53] : memref<768x256xbf16, #tpu.memory_space<vmem>>, vector<768x256xbf16>
    %cst_54 = arith.constant dense<0.000000e+00> : vector<16x256xf32>
    %69 = tpu.matmul %67, %68, %cst_54 {dimension_numbers = #tpu.dot_dimension_numbers<[1], [0], [0], [1], [0, 0, 1, 1], [], []>} : vector<16x768xbf16>, vector<768x256xbf16>, vector<16x256xf32> -> vector<16x256xf32>
    %c0_55 = arith.constant 0 : index
    %c0_56 = arith.constant 0 : index
    %70 = vector.load %arg7[%c0_55, %c0_56] : memref<1x256xf32, #tpu.memory_space<vmem>>, vector<1x256xf32>
    %71 = vector.broadcast %70 : vector<1x256xf32> to vector<16x256xf32>
    %72 = arith.addf %69, %71 : vector<16x256xf32>
    %73 = vector.extract_strided_slice %54 {offsets = [0, 768], sizes = [16, 768], strides = [1, 1]} : vector<16x1792xbf16> to vector<16x768xbf16>
    %c0_57 = arith.constant 0 : index
    %c0_58 = arith.constant 0 : index
    %74 = vector.load %arg6[%c0_57, %c0_58] : memref<768x256xbf16, #tpu.memory_space<vmem>>, vector<768x256xbf16>
    %cst_59 = arith.constant dense<0.000000e+00> : vector<16x256xf32>
    %75 = tpu.matmul %73, %74, %cst_59 {dimension_numbers = #tpu.dot_dimension_numbers<[1], [0], [0], [1], [0, 0, 1, 1], [], []>} : vector<16x768xbf16>, vector<768x256xbf16>, vector<16x256xf32> -> vector<16x256xf32>
    %c0_60 = arith.constant 0 : index
    %c0_61 = arith.constant 0 : index
    %76 = vector.load %arg7[%c0_60, %c0_61] : memref<1x256xf32, #tpu.memory_space<vmem>>, vector<1x256xf32>
    %77 = vector.broadcast %76 : vector<1x256xf32> to vector<16x256xf32>
    %78 = arith.addf %75, %77 : vector<16x256xf32>
    %79 = vector.extract_strided_slice %54 {offsets = [0, 1024], sizes = [16, 768], strides = [1, 1]} : vector<16x1792xbf16> to vector<16x768xbf16>
    %c0_62 = arith.constant 0 : index
    %c0_63 = arith.constant 0 : index
    %80 = vector.load %arg6[%c0_62, %c0_63] : memref<768x256xbf16, #tpu.memory_space<vmem>>, vector<768x256xbf16>
    %cst_64 = arith.constant dense<0.000000e+00> : vector<16x256xf32>
    %81 = tpu.matmul %79, %80, %cst_64 {dimension_numbers = #tpu.dot_dimension_numbers<[1], [0], [0], [1], [0, 0, 1, 1], [], []>} : vector<16x768xbf16>, vector<768x256xbf16>, vector<16x256xf32> -> vector<16x256xf32>
    %c0_65 = arith.constant 0 : index
    %c0_66 = arith.constant 0 : index
    %82 = vector.load %arg7[%c0_65, %c0_66] : memref<1x256xf32, #tpu.memory_space<vmem>>, vector<1x256xf32>
    %83 = vector.broadcast %82 : vector<1x256xf32> to vector<16x256xf32>
    %84 = arith.addf %81, %83 : vector<16x256xf32>
    %85 = tpu.concatenate %60, %66, %72, %78, %84 in 1 : vector<16x256xf32>, vector<16x256xf32>, vector<16x256xf32>, vector<16x256xf32>, vector<16x256xf32> -> vector<16x1280xf32>
    %cst_67 = arith.constant 0.000000e+00 : f32
    %86 = vector.broadcast %cst_67 : f32 to vector<16x1280xf32>
    %87 = arith.maximumf %85, %86 : vector<16x1280xf32>
    %88 = vector.extract_strided_slice %87 {offsets = [0, 0], sizes = [16, 1152], strides = [1, 1]} : vector<16x1280xf32> to vector<16x1152xf32>
    %89 = arith.truncf %88 : vector<16x1152xf32> to vector<16x1152xbf16>
    %c0_68 = arith.constant 0 : index
    %c0_69 = arith.constant 0 : index
    %90 = vector.load %arg8[%c0_68, %c0_69] : memref<1152x128xbf16, #tpu.memory_space<vmem>>, vector<1152x128xbf16>
    %cst_70 = arith.constant dense<0.000000e+00> : vector<16x128xf32>
    %91 = tpu.matmul %89, %90, %cst_70 {dimension_numbers = #tpu.dot_dimension_numbers<[1], [0], [0], [1], [0, 0, 1, 1], [], []>} : vector<16x1152xbf16>, vector<1152x128xbf16>, vector<16x128xf32> -> vector<16x128xf32>
    %c0_71 = arith.constant 0 : index
    %c0_72 = arith.constant 0 : index
    %92 = vector.load %arg9[%c0_71, %c0_72] : memref<1x128xf32, #tpu.memory_space<vmem>>, vector<1x128xf32>
    %93 = vector.broadcast %92 : vector<1x128xf32> to vector<16x128xf32>
    %94 = arith.addf %91, %93 : vector<16x128xf32>
    %cst_73 = arith.constant 0.000000e+00 : f32
    %95 = vector.broadcast %cst_73 : f32 to vector<16x128xf32>
    %96 = arith.maximumf %94, %95 : vector<16x128xf32>
    %97 = arith.truncf %96 : vector<16x128xf32> to vector<16x128xbf16>
    %c0_74 = arith.constant 0 : index
    %c0_75 = arith.constant 0 : index
    %98 = vector.load %arg10[%c0_74, %c0_75] : memref<128x128xbf16, #tpu.memory_space<vmem>>, vector<128x128xbf16>
    %cst_76 = arith.constant dense<0.000000e+00> : vector<16x128xf32>
    %99 = tpu.matmul %97, %98, %cst_76 {dimension_numbers = #tpu.dot_dimension_numbers<[1], [0], [0], [1], [0, 0, 1, 1], [], []>} : vector<16x128xbf16>, vector<128x128xbf16>, vector<16x128xf32> -> vector<16x128xf32>
    %c0_77 = arith.constant 0 : index
    %c0_78 = arith.constant 0 : index
    %100 = vector.load %arg11[%c0_77, %c0_78] : memref<1x128xf32, #tpu.memory_space<vmem>>, vector<1x128xf32>
    %101 = vector.broadcast %100 : vector<1x128xf32> to vector<16x128xf32>
    %102 = arith.addf %99, %101 : vector<16x128xf32>
    %c0_79 = arith.constant 0 : index
    %c0_80 = arith.constant 0 : index
    %103 = vector.load %arg12[%c0_79, %c0_80] : memref<16x128xf32, #tpu.memory_space<vmem>>, vector<16x128xf32>
    tpu.vector_store %arg12[%c0_79, %c0_80], %102 {strides = array<i32>} : memref<16x128xf32, #tpu.memory_space<vmem>>, vector<16x128xf32>,
    return
  }
  func.func @transform_0(%arg0: i32) -> (i32, i32) {
    %c0_i32 = arith.constant 0 : i32
    %c0_i32_0 = arith.constant 0 : i32
    return %arg0, %c0_i32 : i32, i32
  }
  func.func @transform_1(%arg0: i32) -> (i32, i32) {
    %c0_i32 = arith.constant 0 : i32
    %c0_i32_0 = arith.constant 0 : i32
    %c0_i32_1 = arith.constant 0 : i32
    return %c0_i32, %c0_i32_0 : i32, i32
  }
  func.func @transform_2(%arg0: i32) -> (i32, i32) {
    %c0_i32 = arith.constant 0 : i32
    %c0_i32_0 = arith.constant 0 : i32
    %c0_i32_1 = arith.constant 0 : i32
    return %c0_i32, %c0_i32_0 : i32, i32
  }
  func.func @transform_3(%arg0: i32) -> (i32, i32) {
    %c0_i32 = arith.constant 0 : i32
    %c0_i32_0 = arith.constant 0 : i32
    %c0_i32_1 = arith.constant 0 : i32
    return %c0_i32, %c0_i32_0 : i32, i32
  }
  func.func @transform_4(%arg0: i32) -> (i32, i32) {
    %c0_i32 = arith.constant 0 : i32
    %c0_i32_0 = arith.constant 0 : i32
    %c0_i32_1 = arith.constant 0 : i32
    return %c0_i32, %c0_i32_0 : i32, i32
  }
  func.func @transform_5(%arg0: i32) -> (i32, i32) {
    %c0_i32 = arith.constant 0 : i32
    %c0_i32_0 = arith.constant 0 : i32
    %c0_i32_1 = arith.constant 0 : i32
    return %c0_i32, %c0_i32_0 : i32, i32
  }
  func.func @transform_6(%arg0: i32) -> (i32, i32) {
    %c0_i32 = arith.constant 0 : i32
    %c0_i32_0 = arith.constant 0 : i32
    %c0_i32_1 = arith.constant 0 : i32
    return %c0_i32, %c0_i32_0 : i32, i32
  }
  func.func @transform_7(%arg0: i32) -> (i32, i32) {
    %c0_i32 = arith.constant 0 : i32
    %c0_i32_0 = arith.constant 0 : i32
    %c0_i32_1 = arith.constant 0 : i32
    return %c0_i32, %c0_i32_0 : i32, i32
  }
  func.func @transform_8(%arg0: i32) -> (i32, i32) {
    %c0_i32 = arith.constant 0 : i32
    %c0_i32_0 = arith.constant 0 : i32
    %c0_i32_1 = arith.constant 0 : i32
    return %c0_i32, %c0_i32_0 : i32, i32
  }
  func.func @transform_9(%arg0: i32) -> (i32, i32) {
    %c0_i32 = arith.constant 0 : i32
    %c0_i32_0 = arith.constant 0 : i32
    %c0_i32_1 = arith.constant 0 : i32
    return %c0_i32, %c0_i32_0 : i32, i32
  }
  func.func @transform_10(%arg0: i32) -> (i32, i32) {
    %c0_i32 = arith.constant 0 : i32
    %c0_i32_0 = arith.constant 0 : i32
    %c0_i32_1 = arith.constant 0 : i32
    return %c0_i32, %c0_i32_0 : i32, i32
  }
  func.func @transform_11(%arg0: i32) -> (i32, i32) {
    %c0_i32 = arith.constant 0 : i32
    %c0_i32_0 = arith.constant 0 : i32
    return %arg0, %c0_i32 : i32, i32
  }
}

</mosaic_0001>

<bundles_post_ra>
// kernel: tpu_custom_call.1
= control target key start
LH: loop header
LB: loop body
LE: loop exit
PB: predicated region body
PF: predicated region fallthrough
CT: control target
= control target key end

     0   :  { %16 = vsyncpa [#allocation3], 0  ;;  %s6758_s0 = inlined_call_operand.hbm [shape: bf16[16,128], index: 0, kind: input, shape index: {}]   ;;  %s6759_s1 = inlined_call_operand.hbm [shape: bf16[128,1152], index: 1, kind: input, shape index: {}]   ;;  %s6760_s2 = inlined_call_operand.hbm [shape: f32[1,1152], index: 2, kind: input, shape index: {}]   ;;  %s6761_s3 = inlined_call_operand.hbm [shape: bf16[384,256], index: 3, kind: input, shape index: {}]   ;;  %s6762_s4 = inlined_call_operand.vmem [shape: f32[1,256], index: 4, kind: input, shape index: {}]   ;;  %s6763_s5 = inlined_call_operand.hbm [shape: bf16[768,256], index: 5, kind: input, shape index: {}]   ;;  %s6764_s6 = inlined_call_operand.vmem [shape: f32[1,256], index: 6, kind: input, shape index: {}]   ;;  %s6765_s7 = inlined_call_operand.hbm [shape: bf16[1152,128], index: 7, kind: input, shape index: {}]   ;;  %s6766_s8 = inlined_call_operand.vmem [shape: f32[1,128], index: 8, kind: input, shape index: {}]   ;;  %s6767_s9 = inlined_call_operand.hbm [shape: bf16[128,128], index: 9, kind: input, shape index: {}]   ;;  %s6768_s10 = inlined_call_operand.vmem [shape: f32[1,128], index: 10, kind: input, shape index: {}]   ;;  %s6769_s11 = inlined_call_operand.hbm [shape: f32[16,128], index: 11, kind: output, shape index: {}]  }
   0x1   :  { %17 = vsyncpa [#allocation6], 0 }
   0x2   :  { %18 = vsyncpa [#allocation9], 0 }
   0x3   :  { %19 = vsyncpa [#allocation12], 0 }
   0x4   :  { %20 = vsyncpa [#allocation4], 0  ;;  %s5208_s17 = smov [#allocation5]  }
   0x5   :  { %s38_s18 = sshll.u32 %s5208_s17, 4  ;;  %s39_s18 = int_to_ptr.vmem [resolvable:$true] %s38_s18 }
   0x6   :  { %s5046_s19 = scalar_lea.vmem %s39_s18, 9216  ;;  %p5051_p1 = scmp.lt.s32.totalorder %s39_s18, %s39_s18 }
   0x7   :  { %p5047_p0 = scmp.ne.s32.totalorder %s39_s18, %s5046_s19  ;;  %p5052_p2 = scmp.lt.s32.totalorder %s5046_s19, %s5046_s19 }
   0x9   :  { %p5053_p3 = por %p5052_p2, %p5051_p1 }
   0xb   :  { %p5054_p4 = pnand %p5053_p3, %p5047_p0 }
   0xd   :  { %5057 = shalt.err (!%p5054_p4)
}
   0xe   :  { %s5209_s20 = smov 576   ;;  %s5210_s21 = smov 36  }
   0xf   :  { %44 = dma.hbm_to_vmem [thread:$0]  %s6759_s1, 9216, %s39_s18, [#allocation6], %s5209_s20, %s5209_s20, %s5210_s21  }
  0x10   :  { %s5211_s24 = smov [#allocation8]  }
  0x11   :  { %s60_s25 = sshll.u32 %s5211_s24, 4  ;;  %s61_s25 = int_to_ptr.vmem [resolvable:$true] %s60_s25 }
  0x12   :  { %s5066_s26 = scalar_lea.vmem %s61_s25, 6144  ;;  %p5071_p6 = scmp.lt.s32.totalorder %s61_s25, %s61_s25 }
  0x13   :  { %p5067_p5 = scmp.ne.s32.totalorder %s61_s25, %s5066_s26  ;;  %p5072_p7 = scmp.lt.s32.totalorder %s5066_s26, %s5066_s26 }
  0x15   :  { %p5073_p8 = por %p5072_p7, %p5071_p6 }
  0x17   :  { %p5074_p9 = pnand %p5073_p8, %p5067_p5 }
  0x19   :  { %5077 = shalt.err (!%p5074_p9)
}
  0x1a   :  { %s5212_s27 = smov 128   ;;  %s5213_s28 = smov 8  }
  0x1b   :  { %66 = dma.hbm_to_vmem [thread:$0]  %s6761_s3, 6144, %s61_s25, [#allocation9], %s5212_s27, %s5212_s27, %s5213_s28  }
  0x1c   :  { %s5214_s1 = smov [#allocation11]   ;;  %s5215_s13 = smov [#allocation2]  }
  0x1d   :  { %s88_s12 = sshll.u32 %s5214_s1, 4  ;;  %s26_s14 = sshll.u32 %s5215_s13, 4  ;;  %s89_s12 = int_to_ptr.vmem [resolvable:$true] %s88_s12  ;;  %s27_s14 = int_to_ptr.vmem [resolvable:$true] %s26_s14 }
  0x1e   :  { %s5086_s15 = scalar_lea.vmem %s89_s12, 9216  ;;  %p5091_p11 = scmp.lt.s32.totalorder %s89_s12, %s89_s12 }
  0x1f   :  { %p5087_p10 = scmp.ne.s32.totalorder %s89_s12, %s5086_s15  ;;  %p5092_p12 = scmp.lt.s32.totalorder %s5086_s15, %s5086_s15 }
  0x21   :  { %p5093_p13 = por %p5092_p12, %p5091_p11 }
  0x23   :  { %p5094_p0 = pnand %p5093_p13, %p5087_p10 }
  0x25   :  { %5097 = shalt.err (!%p5094_p0)
}
  0x26   :  { %s5216_s16 = smov 64   ;;  %s5217_s17 = smov 4  }
  0x27   :  { %94 = dma.hbm_to_vmem [thread:$0]  %s6765_s7, 9216, %s89_s12, [#allocation12], %s5216_s16, %s5216_s16, %s5217_s17  }
  0x28   :  { %s5106_s19 = scalar_lea.vmem %s27_s14, 128  ;;  %p5111_p2 = scmp.lt.s32.totalorder %s27_s14, %s27_s14 }
  0x29   :  { %p5107_p1 = scmp.ne.s32.totalorder %s27_s14, %s5106_s19  ;;  %p5112_p3 = scmp.lt.s32.totalorder %s5106_s19, %s5106_s19 }
  0x2b   :  { %p5113_p4 = por %p5112_p3, %p5111_p2 }
  0x2d   :  { %p5114_p5 = pnand %p5113_p4, %p5107_p1 }
  0x2f   :  { %5117 = shalt.err (!%p5114_p5)
}
  0x30   :  { %32 = dma.hbm_to_vmem [thread:$0]  %s6758_s0, 128, %s27_s14, [#allocation3], %s5216_s16, %s5216_s16, %s5217_s17  }
  0x31   :  { %s5218_s22 = smov [#allocation7]   ;;  %s5219_s24 = smov [#allocation10]  }
  0x32   :  { %s51_s23 = sshll.u32 %s5218_s22, 4  ;;  %s74_s25 = sshll.u32 %s5219_s24, 4  ;;  %s52_s23 = int_to_ptr.vmem [resolvable:$true] %s51_s23  ;;  %s75_s25 = int_to_ptr.vmem [resolvable:$true] %s74_s25 }
  0x33   :  { %s5126_s7 = scalar_lea.vmem %s52_s23, 144  ;;  %s5130_s26 = scalar_lea.vmem %s52_s23, 160 }
  0x34   :  { %p5127_p6 = scmp.ne.s32.totalorder %s52_s23, %s5126_s7  ;;  %p5131_p7 = scmp.lt.s32.totalorder %s52_s23, %s52_s23 }
  0x35   :  { %p5132_p8 = scmp.lt.s32.totalorder %s5130_s26, %s5126_s7 }
  0x37   :  { %p5133_p9 = por %p5132_p8, %p5131_p7 }
  0x39   :  { %p5134_p10 = pnand %p5133_p9, %p5127_p6 }
  0x3b   :  { %5137 = shalt.err (!%p5134_p10)
}
  0x3c   :  { %54 = dma.hbm_to_vmem [thread:$0]  %s6760_s2, 144, %s52_s23, [#allocation6]  }
  0x3d   :  { %s5146_s1 = scalar_lea.vmem %s75_s25, 12288  ;;  %p5151_p12 = scmp.lt.s32.totalorder %s75_s25, %s75_s25 }
  0x3e   :  { %p5147_p11 = scmp.ne.s32.totalorder %s75_s25, %s5146_s1  ;;  %p5152_p13 = scmp.lt.s32.totalorder %s5146_s1, %s5146_s1 }
  0x40   :  { %p5153_p0 = por %p5152_p13, %p5151_p12 }
  0x42   :  { %p5154_p1 = pnand %p5153_p0, %p5147_p11 }
  0x44   :  { %5157 = shalt.err (!%p5154_p1)
}
  0x45   :  { %80 = dma.hbm_to_vmem [thread:$0]  %s6763_s5, 12288, %s75_s25, [#allocation9], %s5212_s27, %s5212_s27, %s5213_s28  }
  0x46   :  { %s5220_s13 = smov [#allocation13]  }
  0x47   :  { %s102_s14 = sshll.u32 %s5220_s13, 4  ;;  %s103_s14 = int_to_ptr.vmem [resolvable:$true] %s102_s14 }
  0x48   :  { %s5166_s15 = scalar_lea.vmem %s103_s14, 1024  ;;  %p5171_p3 = scmp.lt.s32.totalorder %s103_s14, %s103_s14 }
  0x49   :  { %p5167_p2 = scmp.ne.s32.totalorder %s103_s14, %s5166_s15  ;;  %p5172_p4 = scmp.lt.s32.totalorder %s5166_s15, %s5166_s15 }
  0x4b   :  { %p5173_p5 = por %p5172_p4, %p5171_p3 }
  0x4d   :  { %p5174_p6 = pnand %p5173_p5, %p5167_p2 }
  0x4f   :  { %5177 = shalt.err (!%p5174_p6)
}
  0x50   :  { %108 = dma.hbm_to_vmem [thread:$0]  %s6767_s9, 1024, %s103_s14, [#allocation12], %s5216_s16, %s5216_s16, %s5217_s17  }
  0x51   :  { %5198 = dma.done.wait [#allocation3], 128  }
  0x52   :  { %5199 = vsyncadd [#allocation3], 4294967168 }
  0x53   :  { %5200 = dma.done.wait [#allocation6], 9360  }
  0x54   :  { %5201 = vsyncadd [#allocation6], 4294957936 }
  0x55   :  { %5202 = dma.done.wait [#allocation9], 18432  }
  0x56   :  { %5203 = vsyncadd [#allocation9], 4294948864 }
  0x57   :  { %5204 = dma.done.wait [#allocation12], 10240  }
  0x58   :  { %5205 = vsyncadd [#allocation12], 4294957056  ;;  %v6772_v0 = vmov 0   ;;  %v4493_v1 = vld [vmem:[#allocation5 + $0x1fc] ss:$36 sps:$4 sm:$0xff]   ;;  %vm5223_vm0 = vmmov 0  }
  0x59   :  { %670 = vmatprep.mubr.bf16.mxu0 %v6772_v0  ;;  %713 = vmatprep.mubr.bf16.mxu1 %v6772_v0  ;;  %v4495_v2 = vld [vmem:[#allocation5 + $0x204] ss:$36 sps:$4 sm:$0xff]   ;;  %v4497_v3 = vld [vmem:[#allocation5 + $0x1f8] ss:$36 sps:$4 sm:$0xff]   ;;  %v4503_v7 = vld [vmem:[#allocation5 + $0x1b0] ss:$36 sps:$4 sm:$0xff]  }
  0x5a   :  { %638 = vmatprep.subr.bf16.mxu0 %v4493_v1  ;;  %v4498_v4 = vld [vmem:[#allocation5 + $0x200] ss:$36 sps:$4 sm:$0xff]   ;;  %681 = vmatprep.subr.bf16.mxu1 %v4495_v2  ;;  %v4499_v5 = vld [vmem:[#allocation5 + $0x1b4] ss:$36 sps:$4 sm:$0xff]   ;;  %v4505_v9 = vld [vmem:[#allocation5 + $0x16c] ss:$36 sps:$4 sm:$0xff]  }
  0x5b   :  { %639 = vmatpush1.bf16.msra.mxu0 %v4497_v3  ;;  %682 = vmatpush1.bf16.msra.mxu1 %v4498_v4  ;;  %v4501_v6 = vld [vmem:[#allocation5 + $0x1bc] ss:$36 sps:$4 sm:$0xff]   ;;  %v4507_v10 = vld [vmem:[#allocation5 + $0x174] ss:$36 sps:$4 sm:$0xff]   ;;  %v4509_v11 = vld [vmem:[#allocation5 + $0x168] ss:$36 sps:$4 sm:$0xff]  }
  0x5c   :  { %640 = vmatprep.subr.bf16.mxu0 %v4499_v5  ;;  %v4504_v8 = vld [vmem:[#allocation5 + $0x1b8] ss:$36 sps:$4 sm:$0xff]   ;;  %683 = vmatprep.subr.bf16.mxu1 %v4501_v6  ;;  %v4510_v12 = vld [vmem:[#allocation5 + $0x170] ss:$36 sps:$4 sm:$0xff]   ;;  %v4511_v13 = vld [vmem:[#allocation5 + $0x124] ss:$36 sps:$4 sm:$0xff]  }
  0x5d   :  { %v4513_v14 = vld [vmem:[#allocation5 + $0x12c] ss:$36 sps:$4 sm:$0xff]   ;;  %v4515_v15 = vld [vmem:[#allocation5 + $0x120] ss:$36 sps:$4 sm:$0xff]   ;;  %v4521_v19 = vld [vmem:[#allocation5 + $0xd8] ss:$36 sps:$4 sm:$0xff]  }
  0x5e   :  { %v4516_v16 = vld [vmem:[#allocation5 + $0x128] ss:$36 sps:$4 sm:$0xff]   ;;  %v4517_v17 = vld [vmem:[#allocation5 + $0xdc] ss:$36 sps:$4 sm:$0xff]   ;;  %v4523_v21 = vld [vmem:[#allocation5 + $0x94] ss:$36 sps:$4 sm:$0xff]  }
  0x5f   :  { %641 = vmatpush1.bf16.msra.mxu0 %v4503_v7  ;;  %684 = vmatpush1.bf16.msra.mxu1 %v4504_v8  ;;  %v4519_v18 = vld [vmem:[#allocation5 + $0xe4] ss:$36 sps:$4 sm:$0xff]   ;;  %v4525_v22 = vld [vmem:[#allocation5 + $0x9c] ss:$36 sps:$4 sm:$0xff]   ;;  %v4527_v23 = vld [vmem:[#allocation5 + $0x90] ss:$36 sps:$4 sm:$0xff]  }
  0x60   :  { %642 = vmatprep.subr.bf16.mxu0 %v4505_v9  ;;  %685 = vmatprep.subr.bf16.mxu1 %v4507_v10  ;;  %v4522_v20 = vld [vmem:[#allocation5 + $0xe0] ss:$36 sps:$4 sm:$0xff]   ;;  %v4528_v24 = vld [vmem:[#allocation5 + $0x98] ss:$36 sps:$4 sm:$0xff]   ;;  %v4529_v25 = vld [vmem:[#allocation5 + $0x4c] ss:$36 sps:$4 sm:$0xff]  }
  0x61   :  { %v4531_v26 = vld [vmem:[#allocation5 + $0x54] ss:$36 sps:$4 sm:$0xff]   ;;  %v4533_v27 = vld [vmem:[#allocation5 + $0x48] ss:$36 sps:$4 sm:$0xff]   ;;  %v4539_v31 = vld [vmem:[#allocation5] ss:$36 sps:$4 sm:$0xff]  }
  0x62   :  { %v4534_v28 = vld [vmem:[#allocation5 + $0x50] ss:$36 sps:$4 sm:$0xff]   ;;  %v4535_v29 = vld [vmem:[#allocation5 + $0x4] ss:$36 sps:$4 sm:$0xff]   ;;  %v5323_v34 = vld [vmem:[#allocation2] sm:$0xff]   ;;  %v6770_v5 = vmov 0.0  }
  0x63   :  { %643 = vmatpush1.bf16.msra.mxu0 %v4509_v11  ;;  %686 = vmatpush1.bf16.msra.mxu1 %v4510_v12  ;;  %v4537_v30 = vld [vmem:[#allocation5 + $0xc] ss:$36 sps:$4 sm:$0xff]   ;;  %v4547_v36 = vld [vmem:[#allocation5 + $0x1c4] ss:$36 sps:$4 sm:$0xff]   ;;  %v4568_v38 = vld [vmem:[#allocation5 + $0x214] ss:$36 sps:$4 sm:$0xff]  }
  0x64   :  { %644 = vmatprep.subr.bf16.mxu0 %v4511_v13  ;;  %687 = vmatprep.subr.bf16.mxu1 %v4513_v14  ;;  %v4540_v32 = vld [vmem:[#allocation5 + $0x8] ss:$36 sps:$4 sm:$0xff]   ;;  %v4566_v37 = vld [vmem:[#allocation5 + $0x210] ss:$36 sps:$4 sm:$0xff]   ;;  %v4545_v40 = vld [vmem:[#allocation5 + $0x1c0] ss:$36 sps:$4 sm:$0xff]  }
  0x65   :  { %v4544_v33 = vld [vmem:[#allocation5 + $0x20c] ss:$36 sps:$4 sm:$0xff]   ;;  %v4550_v41 = vld [vmem:[#allocation5 + $0x17c] ss:$36 sps:$4 sm:$0xff]   ;;  %v4574_v43 = vld [vmem:[#allocation5 + $0x184] ss:$36 sps:$4 sm:$0xff]  }
  0x66   :  { %v4542_v35 = vld [vmem:[#allocation5 + $0x208] ss:$36 sps:$4 sm:$0xff]   ;;  %v4548_v44 = vld [vmem:[#allocation5 + $0x178] ss:$36 sps:$4 sm:$0xff]   ;;  %v4572_v46 = vld [vmem:[#allocation5 + $0x180] ss:$36 sps:$4 sm:$0xff]  }
  0x67   :  { %645 = vmatpush1.bf16.msra.mxu0 %v4515_v15  ;;  %688 = vmatpush1.bf16.msra.mxu1 %v4516_v16  ;;  %v4571_v39 = vld [vmem:[#allocation5 + $0x1cc] ss:$36 sps:$4 sm:$0xff]   ;;  %v4553_v45 = vld [vmem:[#allocation5 + $0x134] ss:$36 sps:$4 sm:$0xff]   ;;  %v4577_v47 = vld [vmem:[#allocation5 + $0x13c] ss:$36 sps:$4 sm:$0xff]  }
  0x68   :  { %646 = vmatprep.subr.bf16.mxu0 %v4517_v17  ;;  %689 = vmatprep.subr.bf16.mxu1 %v4519_v18  ;;  %v4569_v42 = vld [vmem:[#allocation5 + $0x1c8] ss:$36 sps:$4 sm:$0xff]   ;;  %v4551_v48 = vld [vmem:[#allocation5 + $0x130] ss:$36 sps:$4 sm:$0xff]   ;;  %v4575_v50 = vld [vmem:[#allocation5 + $0x138] ss:$36 sps:$4 sm:$0xff]  }
  0x69   :  { %v4556_v49 = vld [vmem:[#allocation5 + $0xec] ss:$36 sps:$4 sm:$0xff]   ;;  %v4580_v51 = vld [vmem:[#allocation5 + $0xf4] ss:$36 sps:$4 sm:$0xff]   ;;  %v4559_v53 = vld [vmem:[#allocation5 + $0xa4] ss:$36 sps:$4 sm:$0xff]  }
  0x6a   :  { %v4554_v52 = vld [vmem:[#allocation5 + $0xe8] ss:$36 sps:$4 sm:$0xff]   ;;  %v4578_v54 = vld [vmem:[#allocation5 + $0xf0] ss:$36 sps:$4 sm:$0xff]   ;;  %v4557_v56 = vld [vmem:[#allocation5 + $0xa0] ss:$36 sps:$4 sm:$0xff]  }
  0x6b   :  { %647 = vmatpush1.bf16.msra.mxu0 %v4521_v19  ;;  %690 = vmatpush1.bf16.msra.mxu1 %v4522_v20  ;;  %v4583_v55 = vld [vmem:[#allocation5 + $0xac] ss:$36 sps:$4 sm:$0xff]   ;;  %v4562_v57 = vld [vmem:[#allocation5 + $0x5c] ss:$36 sps:$4 sm:$0xff]   ;;  %v4586_v59 = vld [vmem:[#allocation5 + $0x64] ss:$36 sps:$4 sm:$0xff]  }
  0x6c   :  { %648 = vmatprep.subr.bf16.mxu0 %v4523_v21  ;;  %691 = vmatprep.subr.bf16.mxu1 %v4525_v22  ;;  %v4581_v58 = vld [vmem:[#allocation5 + $0xa8] ss:$36 sps:$4 sm:$0xff]   ;;  %v4560_v60 = vld [vmem:[#allocation5 + $0x58] ss:$36 sps:$4 sm:$0xff]   ;;  %v4584_v62 = vld [vmem:[#allocation5 + $0x60] ss:$36 sps:$4 sm:$0xff]  }
  0x6d   :  { %v4565_v61 = vld [vmem:[#allocation5 + $0x14] ss:$36 sps:$4 sm:$0xff]   ;;  %v4590_v63 = vld [vmem:[#allocation5 + $0x1c] ss:$36 sps:$4 sm:$0xff]   ;;  %v4594_v11 = vld [vmem:[#allocation5 + $0x188] ss:$36 sps:$4 sm:$0xff]  }
  0x6e   :  { %v4563_v1 = vld [vmem:[#allocation5 + $0x10] ss:$36 sps:$4 sm:$0xff]   ;;  %v4588_v2 = vld [vmem:[#allocation5 + $0x18] ss:$36 sps:$4 sm:$0xff]   ;;  %v4598_v14 = vld [vmem:[#allocation5 + $0x140] ss:$36 sps:$4 sm:$0xff]  }
  0x6f   :  { %649 = vmatpush1.bf16.msra.mxu0 %v4527_v23  ;;  %692 = vmatpush1.bf16.msra.mxu1 %v4528_v24  ;;  %v5329_v3 = vld [vmem:[#allocation8 + $0x74] ss:$8 sps:$4 sm:$0xff]   ;;  %v5332_v6 = vld [vmem:[#allocation8 + $0x70] ss:$8 sps:$4 sm:$0xff]   ;;  %v5336_v7 = vld [vmem:[#allocation8 + $0x64] ss:$8 sps:$4 sm:$0xff]  }
  0x70   :  { %650 = vmatprep.subr.bf16.mxu0 %v4529_v25  ;;  %693 = vmatprep.subr.bf16.mxu1 %v4531_v26  ;;  %v4587_v4 = vld [vmem:[#allocation5 + $0x218] ss:$36 sps:$4 sm:$0xff]   ;;  %v4591_v8 = vld [vmem:[#allocation5 + $0x1d0] ss:$36 sps:$4 sm:$0xff]   ;;  %v4610_v23 = vld [vmem:[#allocation5 + $0x68] ss:$36 sps:$4 sm:$0xff]  }
  0x71   :  { %v5343_v9 = vld [vmem:[#allocation8 + $0x60] ss:$8 sps:$4 sm:$0xff]   ;;  %v5346_v10 = vld [vmem:[#allocation8 + $0x54] ss:$8 sps:$4 sm:$0xff]   ;;  %v5350_v12 = vld [vmem:[#allocation8 + $0x50] ss:$8 sps:$4 sm:$0xff]  }
  0x72   :  { %v5353_v13 = vld [vmem:[#allocation8 + $0x44] ss:$8 sps:$4 sm:$0xff]   ;;  %v5355_v15 = vld [vmem:[#allocation8 + $0x40] ss:$8 sps:$4 sm:$0xff]   ;;  %v5358_v16 = vld [vmem:[#allocation8 + $0x34] ss:$8 sps:$4 sm:$0xff]  }
  0x73   :  { %651 = vmatpush1.bf16.msra.mxu0 %v4533_v27  ;;  %694 = vmatpush1.bf16.msra.mxu1 %v4534_v28  ;;  %v4602_v17 = vld [vmem:[#allocation5 + $0xf8] ss:$36 sps:$4 sm:$0xff]   ;;  %v4606_v20 = vld [vmem:[#allocation5 + $0xb0] ss:$36 sps:$4 sm:$0xff]   ;;  %v4614_v26 = vld [vmem:[#allocation5 + $0x20] ss:$36 sps:$4 sm:$0xff]  }
  0x74   :  { %652 = vmatprep.subr.bf16.mxu0 %v4535_v29  ;;  %695 = vmatprep.subr.bf16.mxu1 %v4537_v30  ;;  %v5362_v18 = vld [vmem:[#allocation8 + $0x30] ss:$8 sps:$4 sm:$0xff]   ;;  %v5365_v19 = vld [vmem:[#allocation8 + $0x24] ss:$8 sps:$4 sm:$0xff]   ;;  %v5369_v21 = vld [vmem:[#allocation8 + $0x20] ss:$8 sps:$4 sm:$0xff]  }
  0x75   :  { %v5372_v22 = vld [vmem:[#allocation8 + $0x14] ss:$8 sps:$4 sm:$0xff]   ;;  %v5376_v24 = vld [vmem:[#allocation8 + $0x10] ss:$8 sps:$4 sm:$0xff]   ;;  %v5379_v25 = vld [vmem:[#allocation8 + $0x4] ss:$8 sps:$4 sm:$0xff]  }
  0x76   :  { %v5383_v27 = vld [vmem:[#allocation8 + $0x174] ss:$8 sps:$4 sm:$0xff]   ;;  %v5385_v28 = vld [vmem:[#allocation8] ss:$8 sps:$4 sm:$0xff]   ;;  %v5391_v30 = vld [vmem:[#allocation8 + $0x170] ss:$8 sps:$4 sm:$0xff]  }
  0x77   :  { %653 = vmatpush1.bf16.msra.mxu0 %v4539_v31  ;;  %696 = vmatpush1.bf16.msra.mxu1 %v4540_v32  ;;  %6958 = vst [vmem:[#allocation20_spill] sm:$0xff] %v5383_v27  ;;  %v5388_v29 = vld [vmem:[#allocation8 + $0xf4] ss:$8 sps:$4 sm:$0xff]   ;;  %v5394_v31 = vld [vmem:[#allocation8 + $0x164] ss:$8 sps:$4 sm:$0xff]   ;;  %s5224_s19 = smov [#allocation14]  }
  0x78   :  { %724 = vmatprep.subr.bf16.mxu0 %v4544_v33  ;;  %767 = vmatprep.subr.bf16.mxu1 %v4568_v38  ;;  %v5398_v32 = vld [vmem:[#allocation8 + $0xf0] ss:$8 sps:$4 sm:$0xff]   ;;  %v5402_v33 = vld [vmem:[#allocation8 + $0x160] ss:$8 sps:$4 sm:$0xff]   ;;  %v5417_v38 = vld [vmem:[#allocation8 + $0xd4] ss:$8 sps:$4 sm:$0xff]  }
  0x79   :  { %s3986_s20 = sshll.u32 %s5224_s19, 4  ;;  %s3987_s20 = int_to_ptr.vmem [resolvable:$true] %s3986_s20 }
  0x7a   :  { %671 = vmatmul.mubr.bf16.vlgmr.msra.gmra.mxu0 %v5323_v34  ;;  %714 = vmatmul.mubr.bf16.vlgmr.msra.gmra.mxu1 %v5323_v34  ;;  %s5178_s21 = scalar_lea.vmem %s3987_s20, 256  ;;  %p5183_p8 = scmp.lt.s32.totalorder %s3987_s20, %s3987_s20 }
  0x7b   :  { %725 = vmatpush1.bf16.msra.mxu0 %v4542_v35  ;;  %756 = vmatprep.mubr.bf16.mxu0 %v6772_v0  ;;  %v5404_v35 = vld [vmem:[#allocation8 + $0xe4] ss:$8 sps:$4 sm:$0xff]   ;;  %p5179_p7 = scmp.ne.s32.totalorder %s3987_s20, %s5178_s21  ;;  %p5184_p9 = scmp.lt.s32.totalorder %s5178_s21, %s5178_s21 }
  0x7c   :  { %726 = vmatprep.subr.bf16.mxu0 %v4547_v36  ;;  %768 = vmatpush1.bf16.msra.mxu1 %v4566_v37  ;;  %v5407_v36 = vld [vmem:[#allocation8 + $0x154] ss:$8 sps:$4 sm:$0xff]   ;;  %v5412_v37 = vld [vmem:[#allocation8 + $0xe0] ss:$8 sps:$4 sm:$0xff]  }
  0x7d   :  { %799 = vmatprep.mubr.bf16.mxu1 %v6772_v0  ;;  %769 = vmatprep.subr.bf16.mxu1 %v4571_v39  ;;  %v5420_v39 = vld [vmem:[#allocation8 + $0xd0] ss:$8 sps:$4 sm:$0xff]   ;;  %p5185_p10 = por %p5184_p9, %p5183_p8 }
  0x7f   :  { %727 = vmatpush1.bf16.msra.mxu0 %v4545_v40  ;;  %v5422_v40 = vld [vmem:[#allocation8 + $0x144] ss:$8 sps:$4 sm:$0xff]   ;;  %p5186_p11 = pnand %p5185_p10, %p5179_p7 }
  0x80   :  { %728 = vmatprep.subr.bf16.mxu0 %v4550_v41  ;;  %770 = vmatpush1.bf16.msra.mxu1 %v4569_v42  ;;  %v5426_v41 = vld [vmem:[#allocation8 + $0x140] ss:$8 sps:$4 sm:$0xff]   ;;  %v5428_v42 = vld [vmem:[#allocation8 + $0xc4] ss:$8 sps:$4 sm:$0xff]  }
  0x81   :  { %771 = vmatprep.subr.bf16.mxu1 %v4574_v43  ;;  %v5431_v43 = vld [vmem:[#allocation8 + $0x134] ss:$8 sps:$4 sm:$0xff]  }
  0x83   :  { %729 = vmatpush1.bf16.msra.mxu0 %v4548_v44  ;;  %v5434_v44 = vld [vmem:[#allocation8 + $0xc0] ss:$8 sps:$4 sm:$0xff]  }
  0x84   :  { %730 = vmatprep.subr.bf16.mxu0 %v4553_v45  ;;  %772 = vmatpush1.bf16.msra.mxu1 %v4572_v46  ;;  %6959 = vst [vmem:[#allocation21_spill] sm:$0xff] %v5434_v44  ;;  %v5437_v45 = vld [vmem:[#allocation8 + $0xb4] ss:$8 sps:$4 sm:$0xff]   ;;  %v5440_v46 = vld [vmem:[#allocation8 + $0x130] ss:$8 sps:$4 sm:$0xff]  }
  0x85   :  { %773 = vmatprep.subr.bf16.mxu1 %v4577_v47  ;;  %6960 = vst [vmem:[#allocation22_spill] sm:$0xff] %v5437_v45  ;;  %v5443_v47 = vld [vmem:[#allocation8 + $0x124] ss:$8 sps:$4 sm:$0xff]  }
  0x87   :  { %731 = vmatpush1.bf16.msra.mxu0 %v4551_v48  ;;  %v5446_v48 = vld [vmem:[#allocation8 + $0xb0] ss:$8 sps:$4 sm:$0xff]  }
  0x88   :  { %732 = vmatprep.subr.bf16.mxu0 %v4556_v49  ;;  %774 = vmatpush1.bf16.msra.mxu1 %v4575_v50  ;;  %6961 = vst [vmem:[#allocation23_spill] sm:$0xff] %v5446_v48  ;;  %v5449_v49 = vld [vmem:[#allocation8 + $0xa4] ss:$8 sps:$4 sm:$0xff]   ;;  %v5452_v50 = vld [vmem:[#allocation8 + $0x120] ss:$8 sps:$4 sm:$0xff]  }
  0x89   :  { %775 = vmatprep.subr.bf16.mxu1 %v4580_v51  ;;  %6962 = vst [vmem:[#allocation24_spill] sm:$0xff] %v5449_v49  ;;  %v5455_v51 = vld [vmem:[#allocation8 + $0x114] ss:$8 sps:$4 sm:$0xff]  }
  0x8b   :  { %733 = vmatpush1.bf16.msra.mxu0 %v4554_v52  ;;  %v5458_v52 = vld [vmem:[#allocation8 + $0xa0] ss:$8 sps:$4 sm:$0xff]  }
  0x8c   :  { %734 = vmatprep.subr.bf16.mxu0 %v4559_v53  ;;  %776 = vmatpush1.bf16.msra.mxu1 %v4578_v54  ;;  %6963 = vst [vmem:[#allocation25_spill] sm:$0xff] %v5458_v52  ;;  %v5461_v53 = vld [vmem:[#allocation8 + $0x94] ss:$8 sps:$4 sm:$0xff]   ;;  %v5464_v54 = vld [vmem:[#allocation8 + $0x110] ss:$8 sps:$4 sm:$0xff]  }
  0x8d   :  { %777 = vmatprep.subr.bf16.mxu1 %v4583_v55  ;;  %6964 = vst [vmem:[#allocation26_spill] sm:$0xff] %v5461_v53  ;;  %v5467_v55 = vld [vmem:[#allocation8 + $0x104] ss:$8 sps:$4 sm:$0xff]  }
  0x8f   :  { %735 = vmatpush1.bf16.msra.mxu0 %v4557_v56  ;;  %v5470_v56 = vld [vmem:[#allocation8 + $0x90] ss:$8 sps:$4 sm:$0xff]  }
  0x90   :  { %736 = vmatprep.subr.bf16.mxu0 %v4562_v57  ;;  %778 = vmatpush1.bf16.msra.mxu1 %v4581_v58  ;;  %6965 = vst [vmem:[#allocation27_spill] sm:$0xff] %v5470_v56  ;;  %v5473_v57 = vld [vmem:[#allocation8 + $0x84] ss:$8 sps:$4 sm:$0xff]   ;;  %v5476_v58 = vld [vmem:[#allocation8 + $0x100] ss:$8 sps:$4 sm:$0xff]  }
  0x91   :  { %779 = vmatprep.subr.bf16.mxu1 %v4586_v59  ;;  %6966 = vst [vmem:[#allocation28_spill] sm:$0xff] %v5473_v57  ;;  %v5480_v59 = vld [vmem:[#allocation8 + $0x80] ss:$8 sps:$4 sm:$0xff]  }
  0x92   :  { %6967 = vst [vmem:[#allocation29_spill] sm:$0xff] %v5480_v59 }
  0x93   :  { %737 = vmatpush1.bf16.msra.mxu0 %v4560_v60  ;;  %v219_v60 = vlaneseq }
  0x94   :  { %738 = vmatprep.subr.bf16.mxu0 %v4565_v61  ;;  %780 = vmatpush1.bf16.msra.mxu1 %v4584_v62 }
  0x95   :  { %781 = vmatprep.subr.bf16.mxu1 %v4590_v63  ;;  %v5489_v61 = vshrl.u32 %v219_v60, 7 }
  0x97   :  { %739 = vmatpush1.bf16.msra.mxu0 %v4563_v1  ;;  %v5492_v62 = vsub.s32 0, %v5489_v61  ;;  %v229_v63 = vsub.s32 2, %v5489_v61  ;;  %v5495_v1 = vld [vmem:[#allocation7] sm:$0xff] }
  0x98   :  { %4416 = vmatprep.subr.bf16.mxu0 %v6770_v5  ;;  %782 = vmatpush1.bf16.msra.mxu1 %v4588_v2  ;;  %v5498_v2 = vsub.s32 1, %v5489_v61 }
  0x99   :  { %1178 = vmatprep.subr.bf16.mxu1 %v5329_v3  ;;  %6968 = vst [vmem:[#allocation30_spill] sm:$0xff] %v5492_v62 }
  0x9a   :  { %757 = vmatmul.mubr.bf16.vlgmr.msra.gmra.mxu0 %v5323_v34  ;;  %6969 = vst [vmem:[#allocation31_spill] sm:$0xff] %v5498_v2 }
  0x9b   :  { %4417 = vmatpush3.bf16.msra.mxu0 %v4587_v4  ;;  %4432 = vmatprep.mubr.msk.bf16.mxu0 %vm5223_vm0, %v6770_v5  ;;  %v222_v4 = vrot.slane %v5495_v1, %v5492_v62 }
  0x9c   :  { %4418 = vmatprep.subr.bf16.mxu0 %v6770_v5  ;;  %800 = vmatmul.mubr.bf16.vlgmr.msra.gmra.mxu1 %v5323_v34 }
  0x9d   :  { %1179 = vmatpush1.bf16.msra.mxu1 %v5332_v6 }
  0x9e   :  { %1180 = vmatprep.subr.bf16.mxu1 %v5336_v7 }
  0x9f   :  { %4419 = vmatpush3.bf16.msra.mxu0 %v4591_v8  ;;  %v230_v8 = vrot.slane %v5495_v1, %v229_v63 }
  0xa0   :  { %4420 = vmatprep.subr.bf16.mxu0 %v6770_v5 }
  0xa1   :  { %1181 = vmatpush1.bf16.msra.mxu1 %v5343_v9 }
  0xa2   :  { %1182 = vmatprep.subr.bf16.mxu1 %v5346_v10 }
  0xa3   :  { %4421 = vmatpush3.bf16.msra.mxu0 %v4594_v11  ;;  %v226_v11 = vrot.slane %v5495_v1, %v5498_v2 }
  0xa4   :  { %4422 = vmatprep.subr.bf16.mxu0 %v6770_v5 }
  0xa5   :  { %1183 = vmatpush1.bf16.msra.mxu1 %v5350_v12 }
  0xa6   :  { %1184 = vmatprep.subr.bf16.mxu1 %v5353_v13 }
  0xa7   :  { %4423 = vmatpush3.bf16.msra.mxu0 %v4598_v14 }
  0xa8   :  { %4424 = vmatprep.subr.bf16.mxu0 %v6770_v5 }
  0xa9   :  { %1185 = vmatpush1.bf16.msra.mxu1 %v5355_v15 }
  0xaa   :  { %1186 = vmatprep.subr.bf16.mxu1 %v5358_v16 }
  0xab   :  { %4425 = vmatpush3.bf16.msra.mxu0 %v4602_v17 }
  0xac   :  { %4426 = vmatprep.subr.bf16.mxu0 %v6770_v5 }
  0xad   :  { %1187 = vmatpush1.bf16.msra.mxu1 %v5362_v18 }
  0xae   :  { %1188 = vmatprep.subr.bf16.mxu1 %v5365_v19 }
  0xaf   :  { %4427 = vmatpush3.bf16.msra.mxu0 %v4606_v20 }
  0xb0   :  { %4428 = vmatprep.subr.bf16.mxu0 %v6770_v5 }
  0xb1   :  { %1189 = vmatpush1.bf16.msra.mxu1 %v5369_v21 }
  0xb2   :  { %1190 = vmatprep.subr.bf16.mxu1 %v5372_v22 }
  0xb3   :  { %4429 = vmatpush3.bf16.msra.mxu0 %v4610_v23 }
  0xb4   :  { %4430 = vmatprep.subr.bf16.mxu0 %v6770_v5 }
  0xb5   :  { %1191 = vmatpush1.bf16.msra.mxu1 %v5376_v24 }
  0xb6   :  { %1192 = vmatprep.subr.bf16.mxu1 %v5379_v25 }
  0xb7   :  { %4431 = vmatpush3.bf16.msra.mxu0 %v4614_v26 }
  0xb8   :  { %1221 = vmatprep.subr.bf16.mxu0 %v5383_v27 }
  0xb9   :  { %1193 = vmatpush1.bf16.msra.mxu1 %v5385_v28 }
  0xba   :  { %4433 = vmatmul.mubr.bf16.vlgmr.msra.gmra.mxu0 %v5323_v34  ;;  %1194 = vmatprep.subr.bf16.mxu1 %v5388_v29  ;;  %v5415_v34 = vld [vmem:[#allocation8 + $0x150] ss:$8 sps:$4 sm:$0xff]  }
  0xbb   :  { %1222 = vmatpush1.bf16.msra.mxu0 %v5391_v30  ;;  %1253 = vmatprep.mubr.bf16.mxu0 %v6772_v0 }
  0xbc   :  { %1223 = vmatprep.subr.bf16.mxu0 %v5394_v31 }
  0xbd   :  { %1195 = vmatpush2.bf16.msra.mxu1 %v5398_v32 }
  0xbe   :  { %1196 = vmatprep.subr.bf16.mxu1 %v5404_v35 }
  0xbf   :  { %1224 = vmatpush1.bf16.msra.mxu0 %v5402_v33 }
  0xc0   :  { %1225 = vmatprep.subr.bf16.mxu0 %v5407_v36 }
  0xc1   :  { %1197 = vmatpush2.bf16.msra.mxu1 %v5412_v37 }
  0xc2   :  { %1198 = vmatprep.subr.bf16.mxu1 %v5417_v38 }
  0xc3   :  { %1226 = vmatpush1.bf16.msra.mxu0 %v5415_v34 }
  0xc4   :  { %1227 = vmatprep.subr.bf16.mxu0 %v5422_v40 }
  0xc5   :  { %1199 = vmatpush2.bf16.msra.mxu1 %v5420_v39 }
  0xc6   :  { %1200 = vmatprep.subr.bf16.mxu1 %v5428_v42 }
  0xc7   :  { %1228 = vmatpush1.bf16.msra.mxu0 %v5426_v41 }
  0xc8   :  { %1229 = vmatprep.subr.bf16.mxu0 %v5431_v43 }
  0xc9   :  { %1201 = vmatpush2.bf16.msra.mxu1 %v5434_v44 }
  0xca   :  { %1202 = vmatprep.subr.bf16.mxu1 %v5437_v45 }
  0xcb   :  { %1230 = vmatpush1.bf16.msra.mxu0 %v5440_v46 }
  0xcc   :  { %1231 = vmatprep.subr.bf16.mxu0 %v5443_v47 }
  0xcd   :  { %1203 = vmatpush2.bf16.msra.mxu1 %v5446_v48 }
  0xce   :  { %1204 = vmatprep.subr.bf16.mxu1 %v5449_v49 }
  0xcf   :  { %1232 = vmatpush1.bf16.msra.mxu0 %v5452_v50 }
  0xd0   :  { %1233 = vmatprep.subr.bf16.mxu0 %v5455_v51 }
  0xd1   :  { %1205 = vmatpush2.bf16.msra.mxu1 %v5458_v52 }
  0xd2   :  { %1206 = vmatprep.subr.bf16.mxu1 %v5461_v53 }
  0xd3   :  { %1234 = vmatpush1.bf16.msra.mxu0 %v5464_v54 }
  0xd4   :  { %1235 = vmatprep.subr.bf16.mxu0 %v5467_v55 }
  0xd5   :  { %1207 = vmatpush2.bf16.msra.mxu1 %v5470_v56 }
  0xd6   :  { %1208 = vmatprep.subr.bf16.mxu1 %v5473_v57 }
  0xd7   :  { %1236 = vmatpush1.bf16.msra.mxu0 %v5476_v58 }
  0xd8   :  { %1264 = vmatprep.subr.bf16.mxu0 %v5329_v3 }
  0xd9   :  { %1209 = vmatpush2.bf16.msra.mxu1 %v5480_v59 }
  0xda   :  { %1307 = vmatprep.subr.bf16.mxu1 %v5383_v27 }
 0x13a   :  { %v672_v14 = vpop.f32.mrf.mxu0  ;;  %v715_v17 = vpop.f32.mrf.mxu1 }
 0x13b   :  { %v673_v20 = vadd.f32 %v672_v14, %v222_v4  ;;  %v716_v23 = vadd.f32 %v715_v17, %v230_v8 }
 0x13c   :  { %v674_v26 = vpop.f32.mrf.mxu0  ;;  %v717_v60 = vpop.f32.mrf.mxu1 }
 0x13d   :  { %v675_v5 = vadd.f32 %v674_v26, %v226_v11  ;;  %v851_v56 = vmax.f32 %v673_v20, 0.0  ;;  %v853_v53 = vmax.f32 %v716_v23, 0.0 }
 0x13e   :  { %v676_v0 = vpop.f32.mrf.mxu0  ;;  %v719_v27 = vpop.f32.mrf.mxu1 }
 0x13f   :  { %v677_v59 = vadd.f32 %v676_v0, %v222_v4  ;;  %v720_v57 = vadd.f32 %v719_v27, %v230_v8  ;;  %v852_v62 = vmax.f32 %v675_v5, 0.0  ;;  %v6970_v0 = vmov 0  }
 0x140   :  { %v678_v52 = vpop.f32.mrf.mxu0  ;;  %v241_v5 = vsub.s32 5, %v5489_v61  ;;  %v233_v27 = vsub.s32 3, %v5489_v61 }
 0x141   :  { %v860_v49 = vmax.f32 %v677_v59, 0.0  ;;  %v862_v63 = vmax.f32 %v720_v57, 0.0  ;;  %v679_v48 = vadd.f32 %v678_v52, %v226_v11 }
 0x142   :  { %v234_v52 = vrot.slane %v5495_v1, %v233_v27  ;;  %v6978_v27 = vld [vmem:[#allocation28_spill] sm:$0xff] }
 0x143   :  { %v5505_v45 = vpack.c.bf16 %v862_v63, %v853_v53  ;;  %v861_v2 = vmax.f32 %v679_v48, 0.0  ;;  %v869_v44 = vpack.c.bf16 %v860_v49, %v851_v56  ;;  %v721_v49 = vpop.f32.mrf.mxu1  ;;  %v6976_v63 = vld [vmem:[#allocation26_spill] sm:$0xff] }
 0x144   :  { %v722_v57 = vadd.f32 %v721_v49, %v234_v52 }
 0x145   :  { %v5507_v14 = vpack.c.bf16 %v861_v2, %v852_v62  ;;  %1254 = vmatmul.mubr.bf16.vlgmr.msra.gmra.mxu0 %v5505_v45  ;;  %v718_v62 = vadd.f32 %v717_v60, %v234_v52  ;;  %v4001_v60 = vld [vmem:[#allocation7 + $0x8] ss:$0 sm:$0xff] }
 0x146   :  { %1265 = vmatpush1.bf16.msra.mxu0 %v5332_v6  ;;  %1296 = vmatprep.mubr.bf16.mxu0 %v5505_v45  ;;  %v863_v11 = vmax.f32 %v722_v57, 0.0  ;;  %v6979_v52 = vld [vmem:[#allocation29_spill] sm:$0xff] }
 0x147   :  { %1210 = vmatprep.mubr.bf16.mxu1 %v5507_v14  ;;  %1266 = vmatprep.subr.bf16.mxu0 %v5336_v7  ;;  %v854_v20 = vmax.f32 %v718_v62, 0.0 }
 0x148   :  { %1211 = vmatmul.mubr.bf16.vlgmr.msra.gmra.mxu1 %v869_v44  ;;  %v242_v44 = vrot.slane %v5495_v1, %v241_v5 }
 0x149   :  { %1308 = vmatpush1.bf16.msra.mxu1 %v5391_v30  ;;  %1339 = vmatprep.mubr.bf16.mxu1 %v6970_v0  ;;  %v5554_v26 = vpack.c.bf16 %v863_v11, %v854_v20  ;;  %v5650_v11 = vld [vmem:[#allocation8 + $0x54] ss:$8 sps:$4 sm:$0xff]   ;;  %v5670_v20 = vld [vmem:[#allocation8 + $0x30] ss:$8 sps:$4 sm:$0xff]  }
 0x14a   :  { %1267 = vmatpush1.bf16.msra.mxu0 %v5343_v9  ;;  %1309 = vmatprep.subr.bf16.mxu1 %v5394_v31 }
 0x14b   :  { %1268 = vmatprep.subr.bf16.mxu0 %v5346_v10 }
 0x14d   :  { %1310 = vmatpush1.bf16.msra.mxu1 %v5402_v33 }
 0x14e   :  { %1269 = vmatpush1.bf16.msra.mxu0 %v5350_v12  ;;  %1311 = vmatprep.subr.bf16.mxu1 %v5407_v36 }
 0x14f   :  { %1270 = vmatprep.subr.bf16.mxu0 %v5353_v13 }
 0x151   :  { %1312 = vmatpush1.bf16.msra.mxu1 %v5415_v34 }
 0x152   :  { %1271 = vmatpush1.bf16.msra.mxu0 %v5355_v15  ;;  %1313 = vmatprep.subr.bf16.mxu1 %v5422_v40 }
 0x153   :  { %1272 = vmatprep.subr.bf16.mxu0 %v5358_v16 }
 0x155   :  { %1314 = vmatpush1.bf16.msra.mxu1 %v5426_v41 }
 0x156   :  { %1273 = vmatpush1.bf16.msra.mxu0 %v5362_v18  ;;  %1315 = vmatprep.subr.bf16.mxu1 %v5431_v43 }
 0x157   :  { %1274 = vmatprep.subr.bf16.mxu0 %v5365_v19 }
 0x159   :  { %1316 = vmatpush1.bf16.msra.mxu1 %v5440_v46 }
 0x15a   :  { %1275 = vmatpush1.bf16.msra.mxu0 %v5369_v21  ;;  %1317 = vmatprep.subr.bf16.mxu1 %v5443_v47  ;;  %v5537_v48 = vpop.f32.mrf.mxu0 }
 0x15b   :  { %1276 = vmatprep.subr.bf16.mxu0 %v5372_v22 }
 0x15c   :  { %v760_v53 = vpop.f32.mrf.mxu0 }
 0x15d   :  { %1318 = vmatpush1.bf16.msra.mxu1 %v5452_v50  ;;  %v761_v56 = vadd.f32 %v760_v53, %v242_v44  ;;  %v6980_v53 = vld [vmem:[#allocation20_spill] sm:$0xff] }
 0x15e   :  { %1277 = vmatpush1.bf16.msra.mxu0 %v5376_v24  ;;  %1319 = vmatprep.subr.bf16.mxu1 %v5455_v51  ;;  %v5544_v59 = vpop.f32.mrf.mxu0 }
 0x15f   :  { %1278 = vmatprep.subr.bf16.mxu0 %v5379_v25  ;;  %v856_v4 = vmax.f32 %v761_v56, 0.0 }
 0x160   :  { %v764_v2 = vpop.f32.mrf.mxu0 }
 0x161   :  { %1320 = vmatpush1.bf16.msra.mxu1 %v5464_v54  ;;  %v765_v8 = vadd.f32 %v764_v2, %v242_v44  ;;  %v5635_v2 = vld [vmem:[#allocation8 + $0x70] ss:$8 sps:$4 sm:$0xff]  }
 0x162   :  { %1279 = vmatpush1.bf16.msra.mxu0 %v5385_v28  ;;  %1321 = vmatprep.subr.bf16.mxu1 %v5467_v55 }
 0x163   :  { %1280 = vmatprep.subr.bf16.mxu0 %v5388_v29  ;;  %v865_v17 = vmax.f32 %v765_v8, 0.0  ;;  %v5646_v8 = vld [vmem:[#allocation8 + $0x60] ss:$8 sps:$4 sm:$0xff]  }
 0x165   :  { %1322 = vmatpush1.bf16.msra.mxu1 %v5476_v58  ;;  %v5552_v23 = vpack.c.bf16 %v865_v17, %v856_v4  ;;  %v5640_v4 = vld [vmem:[#allocation8 + $0x64] ss:$8 sps:$4 sm:$0xff]   ;;  %v5654_v17 = vld [vmem:[#allocation8 + $0x50] ss:$8 sps:$4 sm:$0xff]  }
 0x166   :  { %1281 = vmatpush2.bf16.msra.mxu0 %v5398_v32  ;;  %1350 = vmatprep.subr.bf16.mxu1 %v5329_v3  ;;  %v6971_v3 = vld [vmem:[#allocation21_spill] sm:$0xff] }
 0x167   :  { %1282 = vmatprep.subr.bf16.mxu0 %v5404_v35 }
 0x168   :  { %1340 = vmatmul.mubr.bf16.vlgmr.msra.gmra.mxu1 %v5554_v26 }
 0x169   :  { %1351 = vmatpush1.bf16.msra.mxu1 %v5332_v6  ;;  %1382 = vmatprep.mubr.bf16.mxu1 %v5554_v26  ;;  %v6972_v6 = vld [vmem:[#allocation22_spill] sm:$0xff] }
 0x16a   :  { %1283 = vmatpush2.bf16.msra.mxu0 %v5412_v37  ;;  %1352 = vmatprep.subr.bf16.mxu1 %v5336_v7  ;;  %v6973_v7 = vld [vmem:[#allocation23_spill] sm:$0xff] }
 0x16b   :  { %1284 = vmatprep.subr.bf16.mxu0 %v5417_v38 }
 0x16d   :  { %1353 = vmatpush1.bf16.msra.mxu1 %v5343_v9  ;;  %v6974_v9 = vld [vmem:[#allocation24_spill] sm:$0xff] }
 0x16e   :  { %1285 = vmatpush2.bf16.msra.mxu0 %v5420_v39  ;;  %1354 = vmatprep.subr.bf16.mxu1 %v5346_v10  ;;  %v6975_v10 = vld [vmem:[#allocation25_spill] sm:$0xff] }
 0x16f   :  { %1286 = vmatprep.subr.bf16.mxu0 %v5428_v42 }
 0x171   :  { %1355 = vmatpush1.bf16.msra.mxu1 %v5350_v12 }
 0x172   :  { %1287 = vmatpush2.bf16.msra.mxu0 %v6971_v3  ;;  %1356 = vmatprep.subr.bf16.mxu1 %v5353_v13 }
 0x173   :  { %1288 = vmatprep.subr.bf16.mxu0 %v6972_v6 }
 0x175   :  { %1357 = vmatpush1.bf16.msra.mxu1 %v5355_v15  ;;  %v6977_v15 = vld [vmem:[#allocation27_spill] sm:$0xff] }
 0x176   :  { %1289 = vmatpush2.bf16.msra.mxu0 %v6973_v7  ;;  %1358 = vmatprep.subr.bf16.mxu1 %v5358_v16 }
 0x177   :  { %1290 = vmatprep.subr.bf16.mxu0 %v6974_v9 }
 0x179   :  { %1359 = vmatpush1.bf16.msra.mxu1 %v5362_v18 }
 0x17a   :  { %1291 = vmatpush2.bf16.msra.mxu0 %v6975_v10  ;;  %1360 = vmatprep.subr.bf16.mxu1 %v5365_v19  ;;  %v844_v12 = vpop.f32.mrf.mxu0 }
 0x17b   :  { %1292 = vmatprep.subr.bf16.mxu0 %v6976_v63  ;;  %v845_v13 = vadd.f32 %v4001_v60, %v844_v12  ;;  %v5678_v12 = vld [vmem:[#allocation8 + $0x20] ss:$8 sps:$4 sm:$0xff]  }
 0x17c   :  { %v4434_v5 = vpop.f32.mrf.mxu0 }
 0x17d   :  { %1361 = vmatpush1.bf16.msra.mxu1 %v5369_v21  ;;  %v859_v44 = vmax.f32 %v845_v13, 0.0  ;;  %v5682_v13 = vld [vmem:[#allocation8 + $0x14] ss:$8 sps:$4 sm:$0xff]   ;;  %v5686_v5 = vld [vmem:[#allocation8 + $0x10] ss:$8 sps:$4 sm:$0xff]  }
 0x17e   :  { %1293 = vmatpush2.bf16.msra.mxu0 %v6977_v15  ;;  %1362 = vmatprep.subr.bf16.mxu1 %v5372_v22  ;;  %v847_v16 = vpop.f32.mrf.mxu0  ;;  %v237_v22 = vsub.s32 4, %v5489_v61 }
 0x17f   :  { %1294 = vmatprep.subr.bf16.mxu0 %v6978_v27  ;;  %v848_v18 = vadd.f32 %v4001_v60, %v847_v16  ;;  %v5674_v60 = vld [vmem:[#allocation8 + $0x24] ss:$8 sps:$4 sm:$0xff]   ;;  %v5740_v16 = vld [vmem:[#allocation8 + $0xf4] ss:$8 sps:$4 sm:$0xff]  }
 0x180   :  { %v4435_v49 = vpop.f32.mrf.mxu0 }
 0x181   :  { %1363 = vmatpush1.bf16.msra.mxu1 %v5376_v24  ;;  %v868_v19 = vmax.f32 %v848_v18, 0.0  ;;  %v238_v24 = vrot.slane %v5495_v1, %v237_v22  ;;  %v5747_v18 = vld [vmem:[#allocation8 + $0xf0] ss:$8 sps:$4 sm:$0xff]   ;;  %v5814_v49 = vld [vmem:[#allocation8 + $0x154] ss:$8 sps:$4 sm:$0xff]  }
 0x182   :  { %1295 = vmatpush2.bf16.msra.mxu0 %v6979_v52  ;;  %1364 = vmatprep.subr.bf16.mxu1 %v5379_v25  ;;  %v5818_v22 = vld [vmem:[#allocation8 + $0x150] ss:$8 sps:$4 sm:$0xff]  }
 0x183   :  { %1393 = vmatprep.subr.bf16.mxu0 %v6980_v53  ;;  %v5589_v21 = vpack.c.bf16 %v868_v19, %v859_v44  ;;  %v763_v56 = vadd.f32 %v5544_v59, %v238_v24  ;;  %v5630_v59 = vld [vmem:[#allocation8 + $0x74] ss:$8 sps:$4 sm:$0xff]   ;;  %v5743_v44 = vld [vmem:[#allocation8 + $0x164] ss:$8 sps:$4 sm:$0xff]  }
 0x185   :  { %1297 = vmatmul.mubr.bf16.vlgmr.msra.gmra.mxu0 %v5507_v14  ;;  %1365 = vmatpush1.bf16.msra.mxu1 %v5385_v28  ;;  %v759_v14 = vadd.f32 %v5537_v48, %v238_v24  ;;  %v864_v62 = vmax.f32 %v763_v56, 0.0  ;;  %v5822_v24 = vld [vmem:[#allocation8 + $0x144] ss:$8 sps:$4 sm:$0xff]   ;;  %v5828_v56 = vld [vmem:[#allocation8 + $0x140] ss:$8 sps:$4 sm:$0xff]  }
 0x186   :  { %1394 = vmatpush1.bf16.msra.mxu0 %v5391_v30  ;;  %1366 = vmatprep.subr.bf16.mxu1 %v5388_v29 }
 0x187   :  { %1395 = vmatprep.subr.bf16.mxu0 %v5394_v31  ;;  %1425 = vmatprep.mubr.bf16.mxu0 %v6970_v0  ;;  %v855_v57 = vmax.f32 %v759_v14, 0.0 }
 0x189   :  { %1367 = vmatpush2.bf16.msra.mxu1 %v5398_v32  ;;  %v5628_v48 = vpack.c.bf16 %v864_v62, %v855_v57  ;;  %v249_v57 = vsub.s32 7, %v5489_v61  ;;  %v5833_v62 = vld [vmem:[#allocation8 + $0x134] ss:$8 sps:$4 sm:$0xff]  }
 0x18a   :  { %1396 = vmatpush1.bf16.msra.mxu0 %v5402_v33  ;;  %1368 = vmatprep.subr.bf16.mxu1 %v5404_v35 }
 0x18b   :  { %1397 = vmatprep.subr.bf16.mxu0 %v5407_v36 }
 0x18d   :  { %1369 = vmatpush2.bf16.msra.mxu1 %v5412_v37 }
 0x18e   :  { %1398 = vmatpush1.bf16.msra.mxu0 %v5415_v34  ;;  %1370 = vmatprep.subr.bf16.mxu1 %v5417_v38 }
 0x18f   :  { %1399 = vmatprep.subr.bf16.mxu0 %v5422_v40 }
 0x191   :  { %1371 = vmatpush2.bf16.msra.mxu1 %v5420_v39 }
 0x192   :  { %1400 = vmatpush1.bf16.msra.mxu0 %v5426_v41  ;;  %1372 = vmatprep.subr.bf16.mxu1 %v5428_v42 }
 0x193   :  { %1401 = vmatprep.subr.bf16.mxu0 %v5431_v43 }
 0x195   :  { %1373 = vmatpush2.bf16.msra.mxu1 %v6971_v3 }
 0x196   :  { %1402 = vmatpush1.bf16.msra.mxu0 %v5440_v46  ;;  %1374 = vmatprep.subr.bf16.mxu1 %v6972_v6 }
 0x197   :  { %1403 = vmatprep.subr.bf16.mxu0 %v5443_v47 }
 0x199   :  { %1375 = vmatpush2.bf16.msra.mxu1 %v6973_v7 }
 0x19a   :  { %1404 = vmatpush1.bf16.msra.mxu0 %v5452_v50  ;;  %1376 = vmatprep.subr.bf16.mxu1 %v6974_v9 }
 0x19b   :  { %1405 = vmatprep.subr.bf16.mxu0 %v5455_v51 }
 0x19d   :  { %1377 = vmatpush2.bf16.msra.mxu1 %v6975_v10 }
 0x19e   :  { %1406 = vmatpush1.bf16.msra.mxu0 %v5464_v54  ;;  %1378 = vmatprep.subr.bf16.mxu1 %v6976_v63 }
 0x19f   :  { %1407 = vmatprep.subr.bf16.mxu0 %v5467_v55 }
 0x1a1   :  { %1379 = vmatpush2.bf16.msra.mxu1 %v6977_v15 }
 0x1a2   :  { %1408 = vmatpush1.bf16.msra.mxu0 %v5476_v58  ;;  %1380 = vmatprep.subr.bf16.mxu1 %v6978_v27 }
 0x1a3   :  { %1436 = vmatprep.subr.bf16.mxu0 %v5630_v59 }
 0x1a5   :  { %1381 = vmatpush2.bf16.msra.mxu1 %v6979_v52  ;;  %1426 = vmatmul.mubr.bf16.vlgmr.msra.gmra.mxu0 %v5628_v48 }
 0x1a6   :  { %1437 = vmatpush1.bf16.msra.mxu0 %v5635_v2  ;;  %1468 = vmatprep.mubr.bf16.mxu0 %v5628_v48 }
 0x1a7   :  { %1479 = vmatprep.subr.bf16.mxu1 %v6980_v53  ;;  %1438 = vmatprep.subr.bf16.mxu0 %v5640_v4 }
 0x1a8   :  { %1383 = vmatmul.mubr.bf16.vlgmr.msra.gmra.mxu1 %v5505_v45  ;;  %v5662_v45 = vld [vmem:[#allocation8 + $0x40] ss:$8 sps:$4 sm:$0xff]  }
 0x1a9   :  { %1480 = vmatpush1.bf16.msra.mxu1 %v5391_v30  ;;  %1511 = vmatprep.mubr.bf16.mxu1 %v6970_v0  ;;  %v5658_v30 = vld [vmem:[#allocation8 + $0x44] ss:$8 sps:$4 sm:$0xff]  }
 0x1aa   :  { %1439 = vmatpush1.bf16.msra.mxu0 %v5646_v8  ;;  %1481 = vmatprep.subr.bf16.mxu1 %v5394_v31  ;;  %v5666_v31 = vld [vmem:[#allocation8 + $0x34] ss:$8 sps:$4 sm:$0xff]  }
 0x1ab   :  { %1440 = vmatprep.subr.bf16.mxu0 %v5650_v11 }
 0x1ad   :  { %1482 = vmatpush1.bf16.msra.mxu1 %v5402_v33 }
 0x1ae   :  { %1441 = vmatpush1.bf16.msra.mxu0 %v5654_v17  ;;  %1483 = vmatprep.subr.bf16.mxu1 %v5407_v36 }
 0x1af   :  { %1442 = vmatprep.subr.bf16.mxu0 %v5658_v30 }
 0x1b1   :  { %1484 = vmatpush1.bf16.msra.mxu1 %v5415_v34 }
 0x1b2   :  { %1443 = vmatpush1.bf16.msra.mxu0 %v5662_v45  ;;  %1485 = vmatprep.subr.bf16.mxu1 %v5422_v40 }
 0x1b3   :  { %1444 = vmatprep.subr.bf16.mxu0 %v5666_v31 }
 0x1b5   :  { %1486 = vmatpush1.bf16.msra.mxu1 %v5426_v41 }
 0x1b6   :  { %1445 = vmatpush1.bf16.msra.mxu0 %v5670_v20  ;;  %1487 = vmatprep.subr.bf16.mxu1 %v5431_v43 }
 0x1b7   :  { %1446 = vmatprep.subr.bf16.mxu0 %v5674_v60 }
 0x1b9   :  { %1488 = vmatpush1.bf16.msra.mxu1 %v5440_v46 }
 0x1ba   :  { %1447 = vmatpush1.bf16.msra.mxu0 %v5678_v12  ;;  %1489 = vmatprep.subr.bf16.mxu1 %v5443_v47 }
 0x1bb   :  { %1448 = vmatprep.subr.bf16.mxu0 %v5682_v13 }
 0x1bd   :  { %1490 = vmatpush1.bf16.msra.mxu1 %v5452_v50 }
 0x1be   :  { %1449 = vmatpush1.bf16.msra.mxu0 %v5686_v5  ;;  %1491 = vmatprep.subr.bf16.mxu1 %v5455_v51 }
 0x1bf   :  { %1450 = vmatprep.subr.bf16.mxu0 %v5379_v25  ;;  %v5727_v25 = vld [vmem:[#allocation8 + $0x4] ss:$8 sps:$4 sm:$0xff]  }
 0x1c1   :  { %1492 = vmatpush1.bf16.msra.mxu1 %v5464_v54 }
 0x1c2   :  { %1451 = vmatpush1.bf16.msra.mxu0 %v5385_v28  ;;  %1493 = vmatprep.subr.bf16.mxu1 %v5467_v55  ;;  %v5730_v28 = vld [vmem:[#allocation8 + $0x174] ss:$8 sps:$4 sm:$0xff]  }
 0x1c3   :  { %1452 = vmatprep.subr.bf16.mxu0 %v5388_v29  ;;  %v5734_v29 = vld [vmem:[#allocation8] ss:$8 sps:$4 sm:$0xff]  }
 0x1c5   :  { %1494 = vmatpush1.bf16.msra.mxu1 %v5476_v58 }
 0x1c6   :  { %1453 = vmatpush2.bf16.msra.mxu0 %v5398_v32  ;;  %1522 = vmatprep.subr.bf16.mxu1 %v5630_v59  ;;  %v5737_v32 = vld [vmem:[#allocation8 + $0x170] ss:$8 sps:$4 sm:$0xff]  }
 0x1c7   :  { %1454 = vmatprep.subr.bf16.mxu0 %v5404_v35 }
 0x1c8   :  { %1512 = vmatmul.mubr.bf16.vlgmr.msra.gmra.mxu1 %v5552_v23 }
 0x1c9   :  { %1523 = vmatpush1.bf16.msra.mxu1 %v5635_v2  ;;  %1554 = vmatprep.mubr.bf16.mxu1 %v5552_v23 }
 0x1ca   :  { %1455 = vmatpush2.bf16.msra.mxu0 %v5412_v37  ;;  %1524 = vmatprep.subr.bf16.mxu1 %v5640_v4 }
 0x1cb   :  { %1456 = vmatprep.subr.bf16.mxu0 %v5417_v38 }
 0x1cd   :  { %1525 = vmatpush1.bf16.msra.mxu1 %v5646_v8 }
 0x1ce   :  { %1457 = vmatpush2.bf16.msra.mxu0 %v5420_v39  ;;  %1526 = vmatprep.subr.bf16.mxu1 %v5650_v11 }
 0x1cf   :  { %1458 = vmatprep.subr.bf16.mxu0 %v5428_v42 }
 0x1d1   :  { %1527 = vmatpush1.bf16.msra.mxu1 %v5654_v17 }
 0x1d2   :  { %1459 = vmatpush2.bf16.msra.mxu0 %v6971_v3  ;;  %1528 = vmatprep.subr.bf16.mxu1 %v5658_v30 }
 0x1d3   :  { %1460 = vmatprep.subr.bf16.mxu0 %v6972_v6 }
 0x1d5   :  { %1529 = vmatpush1.bf16.msra.mxu1 %v5662_v45 }
 0x1d6   :  { %1461 = vmatpush2.bf16.msra.mxu0 %v6973_v7  ;;  %1530 = vmatprep.subr.bf16.mxu1 %v5666_v31 }
 0x1d7   :  { %1462 = vmatprep.subr.bf16.mxu0 %v6974_v9 }
 0x1d9   :  { %1531 = vmatpush1.bf16.msra.mxu1 %v5670_v20 }
 0x1da   :  { %1463 = vmatpush2.bf16.msra.mxu0 %v6975_v10  ;;  %1532 = vmatprep.subr.bf16.mxu1 %v5674_v60 }
 0x1db   :  { %1464 = vmatprep.subr.bf16.mxu0 %v6976_v63 }
 0x1dd   :  { %1533 = vmatpush1.bf16.msra.mxu1 %v5678_v12 }
 0x1de   :  { %1465 = vmatpush2.bf16.msra.mxu0 %v6977_v15  ;;  %1534 = vmatprep.subr.bf16.mxu1 %v5682_v13 }
 0x1df   :  { %1466 = vmatprep.subr.bf16.mxu0 %v6978_v27 }
 0x1e1   :  { %1535 = vmatpush1.bf16.msra.mxu1 %v5686_v5 }
 0x1e2   :  { %1467 = vmatpush2.bf16.msra.mxu0 %v6979_v52  ;;  %1536 = vmatprep.subr.bf16.mxu1 %v5727_v25 }
 0x1e3   :  { %1565 = vmatprep.subr.bf16.mxu0 %v5730_v28 }
 0x1e5   :  { %1469 = vmatmul.mubr.bf16.vlgmr.msra.gmra.mxu0 %v5554_v26  ;;  %1537 = vmatpush1.bf16.msra.mxu1 %v5734_v29  ;;  %v801_v26 = vpop.f32.mrf.mxu1 }
 0x1e6   :  { %1566 = vmatpush1.bf16.msra.mxu0 %v5737_v32  ;;  %1538 = vmatprep.subr.bf16.mxu1 %v5740_v16 }
 0x1e7   :  { %1567 = vmatprep.subr.bf16.mxu0 %v5743_v44  ;;  %1597 = vmatprep.mubr.bf16.mxu0 %v6970_v0 }
 0x1e9   :  { %1539 = vmatpush2.bf16.msra.mxu1 %v5747_v18 }
 0x1ea   :  { %1568 = vmatpush1.bf16.msra.mxu0 %v5402_v33  ;;  %1540 = vmatprep.subr.bf16.mxu1 %v5404_v35  ;;  %v245_v33 = vsub.s32 6, %v5489_v61  ;;  %v5764_v35 = vpop.f32.mrf.mxu1  ;;  %v5846_v61 = vld [vmem:[#allocation8 + $0x120] ss:$8 sps:$4 sm:$0xff]  }
 0x1eb   :  { %1569 = vmatprep.subr.bf16.mxu0 %v5407_v36 }
 0x1ec   :  { %v246_v36 = vrot.slane %v5495_v1, %v245_v33  ;;  %v5842_v33 = vld [vmem:[#allocation8 + $0x124] ss:$8 sps:$4 sm:$0xff]  }
 0x1ed   :  { %1541 = vmatpush2.bf16.msra.mxu1 %v5412_v37  ;;  %v805_v37 = vpop.f32.mrf.mxu1 }
 0x1ee   :  { %1570 = vmatpush1.bf16.msra.mxu0 %v5415_v34  ;;  %1542 = vmatprep.subr.bf16.mxu1 %v5417_v38  ;;  %v802_v34 = vadd.f32 %v801_v26, %v246_v36  ;;  %v806_v38 = vadd.f32 %v805_v37, %v246_v36  ;;  %v250_v26 = vrot.slane %v5495_v1, %v249_v57  ;;  %v4941_v57 = vld [vmem:[#allocation8 + $0x100] ss:$8 sps:$4 sm:$0xff]  }
 0x1ef   :  { %1571 = vmatprep.subr.bf16.mxu0 %v5422_v40 }
 0x1f0   :  { %v866_v40 = vmax.f32 %v806_v38, 0.0  ;;  %v804_v36 = vadd.f32 %v5764_v35, %v250_v26 }
 0x1f1   :  { %1543 = vmatpush2.bf16.msra.mxu1 %v5420_v39  ;;  %v857_v39 = vmax.f32 %v802_v34, 0.0  ;;  %v5851_v34 = vld [vmem:[#allocation8 + $0x114] ss:$8 sps:$4 sm:$0xff]  }
 0x1f2   :  { %1572 = vmatpush1.bf16.msra.mxu0 %v5426_v41  ;;  %1544 = vmatprep.subr.bf16.mxu1 %v5428_v42  ;;  %v5781_v41 = vld [vmem:[%s6762_s4] sm:$0x3]  ;;  %v858_v1 = vmax.f32 %v804_v36, 0.0  ;;  %v5942_v36 = vld [vmem:[#allocation10 + $0x170] ss:$8 sps:$4 sm:$0xff]  }
 0x1f3   :  { %1573 = vmatprep.subr.bf16.mxu0 %v5431_v43  ;;  %v5785_v42 = vpack.c.bf16 %v866_v40, %v857_v39  ;;  %v6981_v43 = vld [vmem:[#allocation30_spill] sm:$0xff]  ;;  %v4931_v40 = vld [vmem:[#allocation8 + $0xb4] ss:$8 sps:$4 sm:$0xff]  }
 0x1f4   :  { %v4925_v39 = vld [vmem:[#allocation8 + $0xe4] ss:$8 sps:$4 sm:$0xff]  }
 0x1f5   :  { %1545 = vmatpush2.bf16.msra.mxu1 %v6971_v3 }
 0x1f6   :  { %1574 = vmatpush1.bf16.msra.mxu0 %v5440_v46  ;;  %1546 = vmatprep.subr.bf16.mxu1 %v6972_v6  ;;  %v5790_v46 = vrot.slane %v5781_v41, %v6981_v43  ;;  %v6102_v43 = vld [vmem:[#allocation10 + $0xa0] ss:$8 sps:$4 sm:$0xff]  }
 0x1f7   :  { %1575 = vmatprep.subr.bf16.mxu0 %v5443_v47  ;;  %v807_v47 = vpop.f32.mrf.mxu1  ;;  %7020 = vst [vmem:[#allocation59_spill] sm:$0xff] %v6102_v43 }
 0x1f8   :  { %v808_v37 = vadd.f32 %v807_v47, %v250_v26  ;;  %v5938_v26 = vld [vmem:[#allocation10 + $0x64] ss:$8 sps:$4 sm:$0xff]  }
 0x1f9   :  { %1547 = vmatpush2.bf16.msra.mxu1 %v6973_v7  ;;  %6986 = vst [vmem:[#allocation24_spill] sm:$0xff] %v5938_v26 }
 0x1fa   :  { %1576 = vmatpush1.bf16.msra.mxu0 %v5452_v50  ;;  %1548 = vmatprep.subr.bf16.mxu1 %v6974_v9  ;;  %v867_v38 = vmax.f32 %v808_v37, 0.0 }
 0x1fb   :  { %1577 = vmatprep.subr.bf16.mxu0 %v5455_v51 }
 0x1fc   :  { %v876_v35 = vpack.c.bf16 %v867_v38, %v858_v1  ;;  %v5947_v1 = vld [vmem:[#allocation10 + $0x164] ss:$8 sps:$4 sm:$0xff]  }
 0x1fd   :  { %1549 = vmatpush2.bf16.msra.mxu1 %v6975_v10 }
 0x1fe   :  { %1578 = vmatpush1.bf16.msra.mxu0 %v5464_v54  ;;  %1550 = vmatprep.subr.bf16.mxu1 %v6976_v63 }
 0x1ff   :  { %1579 = vmatprep.subr.bf16.mxu0 %v5467_v55 }
 0x201   :  { %1551 = vmatpush2.bf16.msra.mxu1 %v6977_v15  ;;  %v5810_v15 = vld [vmem:[#allocation8 + $0x160] ss:$8 sps:$4 sm:$0xff]  }
 0x202   :  { %1580 = vmatpush1.bf16.msra.mxu0 %v5476_v58  ;;  %1552 = vmatprep.subr.bf16.mxu1 %v6978_v27 }
 0x203   :  { %1608 = vmatprep.subr.bf16.mxu0 %v5630_v59 }
 0x205   :  { %1553 = vmatpush2.bf16.msra.mxu1 %v6979_v52  ;;  %1598 = vmatmul.mubr.bf16.vlgmr.msra.gmra.mxu0 %v5785_v42  ;;  %v1255_v50 = vpop.f32.mrf.mxu0 }
 0x206   :  { %1609 = vmatpush1.bf16.msra.mxu0 %v5635_v2  ;;  %1640 = vmatprep.mubr.bf16.mxu0 %v5785_v42 }
 0x207   :  { %1651 = vmatprep.subr.bf16.mxu1 %v5730_v28  ;;  %1610 = vmatprep.subr.bf16.mxu0 %v5640_v4  ;;  %v5802_v6 = vpop.f32.mrf.mxu0 }
 0x208   :  { %1555 = vmatmul.mubr.bf16.vlgmr.msra.gmra.mxu1 %v5628_v48  ;;  %v1212_v51 = vpop.f32.mrf.mxu1  ;;  %v5837_v48 = vld [vmem:[#allocation8 + $0x130] ss:$8 sps:$4 sm:$0xff]  }
 0x209   :  { %v1213_v3 = vadd.f32 %v1212_v51, %v5790_v46  ;;  %1652 = vmatpush1.bf16.msra.mxu1 %v5737_v32  ;;  %1683 = vmatprep.mubr.bf16.mxu1 %v6970_v0  ;;  %v1259_v27 = vpop.f32.mrf.mxu0 }
 0x20a   :  { %1611 = vmatpush1.bf16.msra.mxu0 %v5646_v8  ;;  %v5805_v7 = vpop.f32.mrf.mxu1  ;;  %1653 = vmatprep.subr.bf16.mxu1 %v5743_v44 }
 0x20b   :  { %v1256_v9 = vadd.f32 %v1255_v50, %v1213_v3  ;;  %1612 = vmatprep.subr.bf16.mxu0 %v5650_v11 }
 0x20c   :  { %v1216_v10 = vpop.f32.mrf.mxu1 }
 0x20d   :  { %v1217_v63 = vadd.f32 %v1216_v10, %v5790_v46  ;;  %1654 = vmatpush1.bf16.msra.mxu1 %v5810_v15  ;;  %v1780_v52 = vmax.f32 %v1256_v9, 0.0 }
 0x20e   :  { %1613 = vmatpush1.bf16.msra.mxu0 %v5654_v17  ;;  %1655 = vmatprep.subr.bf16.mxu1 %v5814_v49 }
 0x20f   :  { %v1260_v19 = vadd.f32 %v1259_v27, %v1217_v63  ;;  %1614 = vmatprep.subr.bf16.mxu0 %v5658_v30 }
 0x211   :  { %v1794_v53 = vmax.f32 %v1260_v19, 0.0  ;;  %1656 = vmatpush1.bf16.msra.mxu1 %v5818_v22  ;;  %v4939_v19 = vld [vmem:[#allocation8 + $0x110] ss:$8 sps:$4 sm:$0xff]  }
 0x212   :  { %1615 = vmatpush1.bf16.msra.mxu0 %v5662_v45  ;;  %1657 = vmatprep.subr.bf16.mxu1 %v5822_v24 }
 0x213   :  { %v5825_v14 = vpack.c.bf16 %v1794_v53, %v1780_v52  ;;  %1616 = vmatprep.subr.bf16.mxu0 %v5666_v31  ;;  %v4940_v52 = vld [vmem:[#allocation8 + $0x104] ss:$8 sps:$4 sm:$0xff]   ;;  %v5929_v53 = vld [vmem:[#allocation10 + $0x74] ss:$8 sps:$4 sm:$0xff]  }
 0x214   :  { %6984 = vst [vmem:[#allocation22_spill] sm:$0xff] %v5929_v53 }
 0x215   :  { %1658 = vmatpush1.bf16.msra.mxu1 %v5828_v56 }
 0x216   :  { %1617 = vmatpush1.bf16.msra.mxu0 %v5670_v20  ;;  %1659 = vmatprep.subr.bf16.mxu1 %v5833_v62 }
 0x217   :  { %1618 = vmatprep.subr.bf16.mxu0 %v5674_v60 }
 0x219   :  { %1660 = vmatpush1.bf16.msra.mxu1 %v5837_v48 }
 0x21a   :  { %1619 = vmatpush1.bf16.msra.mxu0 %v5678_v12  ;;  %1661 = vmatprep.subr.bf16.mxu1 %v5842_v33 }
 0x21b   :  { %1620 = vmatprep.subr.bf16.mxu0 %v5682_v13 }
 0x21d   :  { %1662 = vmatpush1.bf16.msra.mxu1 %v5846_v61 }
 0x21e   :  { %1621 = vmatpush1.bf16.msra.mxu0 %v5686_v5  ;;  %1663 = vmatprep.subr.bf16.mxu1 %v5851_v34 }
 0x21f   :  { %1622 = vmatprep.subr.bf16.mxu0 %v5727_v25 }
 0x221   :  { %1664 = vmatpush1.bf16.msra.mxu1 %v5464_v54  ;;  %v4926_v54 = vld [vmem:[#allocation8 + $0xe0] ss:$8 sps:$4 sm:$0xff]  }
 0x222   :  { %1623 = vmatpush1.bf16.msra.mxu0 %v5734_v29  ;;  %1665 = vmatprep.subr.bf16.mxu1 %v5467_v55  ;;  %v4927_v55 = vld [vmem:[#allocation8 + $0xd4] ss:$8 sps:$4 sm:$0xff]  }
 0x223   :  { %1624 = vmatprep.subr.bf16.mxu0 %v5740_v16 }
 0x225   :  { %1666 = vmatpush1.bf16.msra.mxu1 %v5476_v58  ;;  %v5865_v58 = vld [vmem:[#allocation8 + $0xd0] ss:$8 sps:$4 sm:$0xff]  }
 0x226   :  { %1625 = vmatpush2.bf16.msra.mxu0 %v5747_v18  ;;  %1694 = vmatprep.subr.bf16.mxu1 %v5630_v59  ;;  %v4929_v59 = vld [vmem:[#allocation8 + $0xc4] ss:$8 sps:$4 sm:$0xff]  }
 0x227   :  { %1626 = vmatprep.subr.bf16.mxu0 %v4925_v39 }
 0x228   :  { %1684 = vmatmul.mubr.bf16.vlgmr.msra.gmra.mxu1 %v876_v35 }
 0x229   :  { %1695 = vmatpush1.bf16.msra.mxu1 %v5635_v2  ;;  %1726 = vmatprep.mubr.bf16.mxu1 %v876_v35  ;;  %v4930_v2 = vld [vmem:[#allocation8 + $0xc0] ss:$8 sps:$4 sm:$0xff]   ;;  %v5953_v35 = vld [vmem:[#allocation10 + $0x54] ss:$8 sps:$4 sm:$0xff]  }
 0x22a   :  { %1627 = vmatpush2.bf16.msra.mxu0 %v4926_v54  ;;  %1696 = vmatprep.subr.bf16.mxu1 %v5640_v4  ;;  %v4932_v4 = vld [vmem:[#allocation8 + $0xb0] ss:$8 sps:$4 sm:$0xff]   ;;  %6988 = vst [vmem:[#allocation26_spill] sm:$0xff] %v5953_v35 }
 0x22b   :  { %1628 = vmatprep.subr.bf16.mxu0 %v4927_v55 }
 0x22d   :  { %1697 = vmatpush1.bf16.msra.mxu1 %v5646_v8  ;;  %v4933_v8 = vld [vmem:[#allocation8 + $0xa4] ss:$8 sps:$4 sm:$0xff]  }
 0x22e   :  { %1629 = vmatpush2.bf16.msra.mxu0 %v5865_v58  ;;  %1698 = vmatprep.subr.bf16.mxu1 %v5650_v11  ;;  %v5874_v11 = vld [vmem:[#allocation8 + $0xa0] ss:$8 sps:$4 sm:$0xff]  }
 0x22f   :  { %1630 = vmatprep.subr.bf16.mxu0 %v4929_v59 }
 0x231   :  { %1699 = vmatpush1.bf16.msra.mxu1 %v5654_v17  ;;  %v5878_v17 = vld [vmem:[#allocation8 + $0x94] ss:$8 sps:$4 sm:$0xff]  }
 0x232   :  { %1631 = vmatpush2.bf16.msra.mxu0 %v4930_v2  ;;  %1700 = vmatprep.subr.bf16.mxu1 %v5658_v30  ;;  %v5882_v30 = vld [vmem:[#allocation8 + $0x90] ss:$8 sps:$4 sm:$0xff]  }
 0x233   :  { %1632 = vmatprep.subr.bf16.mxu0 %v4931_v40 }
 0x235   :  { %1701 = vmatpush1.bf16.msra.mxu1 %v5662_v45  ;;  %v5886_v45 = vld [vmem:[#allocation8 + $0x84] ss:$8 sps:$4 sm:$0xff]  }
 0x236   :  { %1633 = vmatpush2.bf16.msra.mxu0 %v4932_v4  ;;  %1702 = vmatprep.subr.bf16.mxu1 %v5666_v31  ;;  %v1218_v31 = vpop.f32.mrf.mxu1 }
 0x237   :  { %1634 = vmatprep.subr.bf16.mxu0 %v4933_v8 }
 0x239   :  { %1703 = vmatpush1.bf16.msra.mxu1 %v5670_v20  ;;  %v5890_v20 = vld [vmem:[#allocation8 + $0x80] ss:$8 sps:$4 sm:$0xff]  }
 0x23a   :  { %1635 = vmatpush2.bf16.msra.mxu0 %v5874_v11  ;;  %1704 = vmatprep.subr.bf16.mxu1 %v5674_v60  ;;  %v1261_v60 = vpop.f32.mrf.mxu0 }
 0x23b   :  { %1636 = vmatprep.subr.bf16.mxu0 %v5878_v17 }
 0x23d   :  { %1705 = vmatpush1.bf16.msra.mxu1 %v5678_v12  ;;  %v1341_v12 = vpop.f32.mrf.mxu1 }
 0x23e   :  { %1637 = vmatpush2.bf16.msra.mxu0 %v5882_v30  ;;  %1706 = vmatprep.subr.bf16.mxu1 %v5682_v13 }
 0x23f   :  { %1638 = vmatprep.subr.bf16.mxu0 %v5886_v45 }
 0x241   :  { %1707 = vmatpush1.bf16.msra.mxu1 %v5686_v5  ;;  %v1343_v5 = vpop.f32.mrf.mxu1 }
 0x242   :  { %1639 = vmatpush2.bf16.msra.mxu0 %v5890_v20  ;;  %1708 = vmatprep.subr.bf16.mxu1 %v5727_v25 }
 0x243   :  { %1737 = vmatprep.subr.bf16.mxu0 %v5730_v28  ;;  %v1345_v28 = vpop.f32.mrf.mxu1 }
 0x245   :  { %v1298_v47 = vpop.f32.mrf.mxu0  ;;  %1641 = vmatmul.mubr.bf16.vlgmr.msra.gmra.mxu0 %v5552_v23  ;;  %1709 = vmatpush1.bf16.msra.mxu1 %v5734_v29 }
 0x246   :  { %v1299_v13 = vadd.f32 %v1298_v47, %v5790_v46  ;;  %1738 = vmatpush1.bf16.msra.mxu0 %v5737_v32  ;;  %1710 = vmatprep.subr.bf16.mxu1 %v5740_v16  ;;  %v5988_v47 = vld [vmem:[#allocation10 + $0x140] ss:$8 sps:$4 sm:$0xff]  }
 0x247   :  { %v1300_v50 = vpop.f32.mrf.mxu0  ;;  %1739 = vmatprep.subr.bf16.mxu0 %v5743_v44  ;;  %1769 = vmatprep.mubr.bf16.mxu0 %v6970_v0  ;;  %v6982_v44 = vld [vmem:[#allocation31_spill] sm:$0xff] }
 0x248   :  { %v1342_v25 = vadd.f32 %v1341_v12, %v1299_v13  ;;  %v5992_v13 = vld [vmem:[#allocation10 + $0x30] ss:$8 sps:$4 sm:$0xff]  }
 0x249   :  { %v1302_v51 = vpop.f32.mrf.mxu0  ;;  %1711 = vmatpush2.bf16.msra.mxu1 %v5747_v18  ;;  %v5915_v18 = vrot.slane %v5781_v41, %v6982_v44  ;;  %6993 = vst [vmem:[#allocation32_spill] sm:$0xff] %v5992_v13  ;;  %v6104_v44 = vld [vmem:[#allocation10 + $0x1a4] ss:$8 sps:$4 sm:$0xff]  }
 0x24a   :  { %v1303_v23 = vadd.f32 %v1302_v51, %v5790_v46  ;;  %1740 = vmatpush1.bf16.msra.mxu0 %v5810_v15  ;;  %1712 = vmatprep.subr.bf16.mxu1 %v4925_v39  ;;  %v1782_v32 = vmax.f32 %v1342_v25, 0.0  ;;  %v5999_v25 = vld [vmem:[#allocation10 + $0x24] ss:$8 sps:$4 sm:$0xff]   ;;  %v6002_v51 = vld [vmem:[#allocation10 + $0x130] ss:$8 sps:$4 sm:$0xff]   ;;  %7021 = vst [vmem:[#allocation60_spill] sm:$0xff] %v6104_v44 }
 0x24b   :  { %1741 = vmatprep.subr.bf16.mxu0 %v5814_v49  ;;  %6983 = vst [vmem:[#allocation21_spill] sm:$0xff] %v5915_v18  ;;  %v1219_v3 = vadd.f32 %v1218_v31, %v5915_v18  ;;  %v1304_v9 = vpop.f32.mrf.mxu0  ;;  %v1215_v10 = vadd.f32 %v5805_v7, %v5915_v18  ;;  %v1301_v15 = vadd.f32 %v1300_v50, %v5915_v18  ;;  %v1347_v49 = vpop.f32.mrf.mxu1  ;;  %6994 = vst [vmem:[#allocation33_spill] sm:$0xff] %v5999_v25 }
 0x24c   :  { %v1346_v29 = vadd.f32 %v1345_v28, %v1303_v23  ;;  %v1305_v63 = vadd.f32 %v1304_v9, %v5915_v18  ;;  %v6006_v23 = vld [vmem:[#allocation10 + $0x20] ss:$8 sps:$4 sm:$0xff]   ;;  %v6008_v28 = vld [vmem:[#allocation10 + $0x124] ss:$8 sps:$4 sm:$0xff]  }
 0x24d   :  { %1713 = vmatpush2.bf16.msra.mxu1 %v4926_v54  ;;  %v1262_v41 = vadd.f32 %v1261_v60, %v1219_v3  ;;  %v1258_v27 = vadd.f32 %v5802_v6, %v1215_v10  ;;  %v5933_v6 = vld [vmem:[#allocation10 + $0x70] ss:$8 sps:$4 sm:$0xff]   ;;  %v5959_v54 = vld [vmem:[#allocation10 + $0x160] ss:$8 sps:$4 sm:$0xff]   ;;  %6995 = vst [vmem:[#allocation34_spill] sm:$0xff] %v6006_v23 }
 0x24e   :  { %v1796_v16 = vmax.f32 %v1346_v29, 0.0  ;;  %1742 = vmatpush1.bf16.msra.mxu0 %v5818_v22  ;;  %1714 = vmatprep.subr.bf16.mxu1 %v4927_v55  ;;  %v1348_v7 = vadd.f32 %v1347_v49, %v1305_v63  ;;  %6985 = vst [vmem:[#allocation23_spill] sm:$0xff] %v5933_v6  ;;  %v6011_v29 = vld [vmem:[#allocation10 + $0x14] ss:$8 sps:$4 sm:$0xff]   ;;  %v6023_v9 = vld [vmem:[#allocation10 + $0x4] ss:$8 sps:$4 sm:$0xff]  }
 0x24f   :  { %1743 = vmatprep.subr.bf16.mxu0 %v5822_v24  ;;  %v1795_v22 = vmax.f32 %v1262_v41, 0.0  ;;  %v1344_v24 = vadd.f32 %v1343_v5, %v1301_v15  ;;  %v5994_v5 = vld [vmem:[#allocation10 + $0x134] ss:$8 sps:$4 sm:$0xff]   ;;  %6996 = vst [vmem:[#allocation35_spill] sm:$0xff] %v6011_v29  ;;  %6999 = vst [vmem:[#allocation38_spill] sm:$0xff] %v6023_v9 }
 0x250   :  { %v5908_v0 = vpack.c.bf16 %v1796_v16, %v1782_v32  ;;  %v6014_v32 = vld [vmem:[#allocation10 + $0x120] ss:$8 sps:$4 sm:$0xff]   ;;  %v6018_v16 = vld [vmem:[#allocation10 + $0x10] ss:$8 sps:$4 sm:$0xff]   ;;  %v6020_v3 = vld [vmem:[#allocation10 + $0x114] ss:$8 sps:$4 sm:$0xff]  }
 0x251   :  { %1715 = vmatpush2.bf16.msra.mxu1 %v5865_v58  ;;  %6997 = vst [vmem:[#allocation36_spill] sm:$0xff] %v6018_v16  ;;  %6998 = vst [vmem:[#allocation37_spill] sm:$0xff] %v6020_v3  ;;  %v6026_v10 = vld [vmem:[#allocation10 + $0x110] ss:$8 sps:$4 sm:$0xff]   ;;  %v6030_v63 = vld [vmem:[#allocation10] ss:$8 sps:$4 sm:$0xff]  }
 0x252   :  { %1744 = vmatpush1.bf16.msra.mxu0 %v5828_v56  ;;  %1716 = vmatprep.subr.bf16.mxu1 %v4929_v59  ;;  %v1781_v56 = vmax.f32 %v1258_v27, 0.0  ;;  %v5967_v59 = vld [vmem:[#allocation10 + $0x50] ss:$8 sps:$4 sm:$0xff]   ;;  %7000 = vst [vmem:[#allocation39_spill] sm:$0xff] %v6026_v10  ;;  %7001 = vst [vmem:[#allocation40_spill] sm:$0xff] %v6030_v63 }
 0x253   :  { %1745 = vmatprep.subr.bf16.mxu0 %v5833_v62  ;;  %v1797_v62 = vmax.f32 %v1348_v7, 0.0  ;;  %6989 = vst [vmem:[#allocation27_spill] sm:$0xff] %v5967_v59  ;;  %v6032_v41 = vld [vmem:[#allocation10 + $0x104] ss:$8 sps:$4 sm:$0xff]   ;;  %v6035_v15 = vld [vmem:[#allocation10 + $0xf4] ss:$8 sps:$4 sm:$0xff]  }
 0x254   :  { %7002 = vst [vmem:[#allocation41_spill] sm:$0xff] %v6032_v41  ;;  %7003 = vst [vmem:[#allocation42_spill] sm:$0xff] %v6035_v15  ;;  %v6038_v27 = vld [vmem:[#allocation10 + $0x100] ss:$8 sps:$4 sm:$0xff]   ;;  %v6042_v49 = vld [vmem:[#allocation10 + $0xf0] ss:$8 sps:$4 sm:$0xff]  }
 0x255   :  { %1717 = vmatpush2.bf16.msra.mxu1 %v4930_v2  ;;  %v5969_v2 = vld [vmem:[#allocation10 + $0x154] ss:$8 sps:$4 sm:$0xff]   ;;  %7004 = vst [vmem:[#allocation43_spill] sm:$0xff] %v6038_v27  ;;  %7005 = vst [vmem:[#allocation44_spill] sm:$0xff] %v6042_v49  ;;  %v6047_v7 = vld [vmem:[#allocation10 + $0xe4] ss:$8 sps:$4 sm:$0xff]  }
 0x256   :  { %1746 = vmatpush1.bf16.msra.mxu0 %v5837_v48  ;;  %1718 = vmatprep.subr.bf16.mxu1 %v4931_v40  ;;  %v5936_v48 = vld [vmem:[#allocation10 + $0x174] ss:$8 sps:$4 sm:$0xff]   ;;  %v5972_v40 = vld [vmem:[#allocation10 + $0x44] ss:$8 sps:$4 sm:$0xff]   ;;  %7007 = vst [vmem:[#allocation46_spill] sm:$0xff] %v6047_v7 }
 0x257   :  { %1747 = vmatprep.subr.bf16.mxu0 %v5842_v33  ;;  %v1809_v33 = vpack.c.bf16 %v1795_v22, %v1781_v56  ;;  %6990 = vst [vmem:[#allocation28_spill] sm:$0xff] %v5972_v40  ;;  %v6054_v22 = vld [vmem:[#allocation10 + $0xe0] ss:$8 sps:$4 sm:$0xff]   ;;  %v6059_v56 = vld [vmem:[#allocation10 + $0xd4] ss:$8 sps:$4 sm:$0xff]  }
 0x258   :  { %7009 = vst [vmem:[#allocation48_spill] sm:$0xff] %v6054_v22  ;;  %7011 = vst [vmem:[#allocation50_spill] sm:$0xff] %v6059_v56 }
 0x259   :  { %1719 = vmatpush2.bf16.msra.mxu1 %v4932_v4 }
 0x25a   :  { %1748 = vmatpush1.bf16.msra.mxu0 %v5846_v61  ;;  %1720 = vmatprep.subr.bf16.mxu1 %v4933_v8  ;;  %v1783_v61 = vmax.f32 %v1344_v24, 0.0  ;;  %v6056_v24 = vld [vmem:[#allocation10 + $0x1e4] ss:$8 sps:$4 sm:$0xff]  }
 0x25b   :  { %1749 = vmatprep.subr.bf16.mxu0 %v5851_v34  ;;  %v5945_v34 = vld [vmem:[#allocation10 + $0x60] ss:$8 sps:$4 sm:$0xff]   ;;  %7010 = vst [vmem:[#allocation49_spill] sm:$0xff] %v6056_v24 }
 0x25c   :  { %6987 = vst [vmem:[#allocation25_spill] sm:$0xff] %v5945_v34  ;;  %v5951_v38 = vpack.c.bf16 %v1797_v62, %v1783_v61  ;;  %v6066_v62 = vld [vmem:[#allocation10 + $0xd0] ss:$8 sps:$4 sm:$0xff]   ;;  %v6071_v61 = vld [vmem:[#allocation10 + $0xc4] ss:$8 sps:$4 sm:$0xff]  }
 0x25d   :  { %1721 = vmatpush2.bf16.msra.mxu1 %v5874_v11  ;;  %v5976_v11 = vld [vmem:[#allocation10 + $0x150] ss:$8 sps:$4 sm:$0xff]  }
 0x25e   :  { %1750 = vmatpush1.bf16.msra.mxu0 %v4939_v19  ;;  %1722 = vmatprep.subr.bf16.mxu1 %v5878_v17  ;;  %v6044_v19 = vld [vmem:[#allocation10 + $0x1f4] ss:$8 sps:$4 sm:$0xff]  }
 0x25f   :  { %1751 = vmatprep.subr.bf16.mxu0 %v4940_v52  ;;  %7006 = vst [vmem:[#allocation45_spill] sm:$0xff] %v6044_v19  ;;  %v6050_v52 = vld [vmem:[#allocation10 + $0x1f0] ss:$8 sps:$4 sm:$0xff]  }
 0x260   :  { %7008 = vst [vmem:[#allocation47_spill] sm:$0xff] %v6050_v52 }
 0x261   :  { %1723 = vmatpush2.bf16.msra.mxu1 %v5882_v30  ;;  %v5980_v30 = vld [vmem:[#allocation10 + $0x40] ss:$8 sps:$4 sm:$0xff]  }
 0x262   :  { %1752 = vmatpush1.bf16.msra.mxu0 %v4941_v57  ;;  %1724 = vmatprep.subr.bf16.mxu1 %v5886_v45  ;;  %6991 = vst [vmem:[#allocation29_spill] sm:$0xff] %v5980_v30  ;;  %v5982_v45 = vld [vmem:[#allocation10 + $0x144] ss:$8 sps:$4 sm:$0xff]   ;;  %v6062_v57 = vld [vmem:[#allocation10 + $0x1e0] ss:$8 sps:$4 sm:$0xff]  }
 0x263   :  { %2410 = vmatprep.subr.bf16.mxu0 %v5929_v53  ;;  %7012 = vst [vmem:[#allocation51_spill] sm:$0xff] %v6062_v57 }
 0x265   :  { %1725 = vmatpush2.bf16.msra.mxu1 %v5890_v20  ;;  %1770 = vmatmul.mubr.bf16.vlgmr.msra.gmra.mxu0 %v5589_v21  ;;  %v1427_v37 = vpop.f32.mrf.mxu0  ;;  %v5985_v20 = vld [vmem:[#allocation10 + $0x34] ss:$8 sps:$4 sm:$0xff]  }
 0x266   :  { %2411 = vmatpush1.bf16.msra.mxu0 %v5933_v6  ;;  %2442 = vmatprep.mubr.bf16.mxu0 %v1809_v33  ;;  %6992 = vst [vmem:[#allocation20_spill] sm:$0xff] %v5985_v20  ;;  %v6068_v33 = vld [vmem:[#allocation10 + $0x1d4] ss:$8 sps:$4 sm:$0xff]  }
 0x267   :  { %2453 = vmatprep.subr.bf16.mxu1 %v5936_v48  ;;  %2412 = vmatprep.subr.bf16.mxu0 %v5938_v26  ;;  %v5961_v55 = vpop.f32.mrf.mxu0  ;;  %7013 = vst [vmem:[#allocation52_spill] sm:$0xff] %v6068_v33 }
 0x268   :  { %v1384_v39 = vpop.f32.mrf.mxu1  ;;  %1727 = vmatmul.mubr.bf16.vlgmr.msra.gmra.mxu1 %v5785_v42 }
 0x269   :  { %v1385_v21 = vadd.f32 %v1384_v39, %v5790_v46  ;;  %2454 = vmatpush1.bf16.msra.mxu1 %v5942_v36  ;;  %2485 = vmatprep.mubr.bf16.mxu1 %v5951_v38  ;;  %v1431_v17 = vpop.f32.mrf.mxu0  ;;  %v6078_v39 = vld [vmem:[#allocation10 + $0xc0] ss:$8 sps:$4 sm:$0xff]  }
 0x26a   :  { %v5963_v58 = vpop.f32.mrf.mxu1  ;;  %2413 = vmatpush1.bf16.msra.mxu0 %v5945_v34  ;;  %2455 = vmatprep.subr.bf16.mxu1 %v5947_v1 }
 0x26b   :  { %v1428_v42 = vadd.f32 %v1427_v37, %v1385_v21  ;;  %2414 = vmatprep.subr.bf16.mxu0 %v5953_v35  ;;  %v6074_v37 = vld [vmem:[#allocation10 + $0x1d0] ss:$8 sps:$4 sm:$0xff]   ;;  %v6080_v21 = vld [vmem:[#allocation10 + $0x1c4] ss:$8 sps:$4 sm:$0xff]  }
 0x26c   :  { %v1388_v4 = vpop.f32.mrf.mxu1  ;;  %7014 = vst [vmem:[#allocation53_spill] sm:$0xff] %v6074_v37  ;;  %7015 = vst [vmem:[#allocation54_spill] sm:$0xff] %v6080_v21 }
 0x26d   :  { %v1389_v8 = vadd.f32 %v1388_v4, %v5790_v46  ;;  %2456 = vmatpush1.bf16.msra.mxu1 %v5959_v54  ;;  %v1784_v60 = vmax.f32 %v1428_v42, 0.0  ;;  %v6083_v42 = vld [vmem:[#allocation10 + $0xb4] ss:$8 sps:$4 sm:$0xff]   ;;  %v6086_v4 = vld [vmem:[#allocation10 + $0x1c0] ss:$8 sps:$4 sm:$0xff]  }
 0x26e   :  { %2415 = vmatpush1.bf16.msra.mxu0 %v5967_v59  ;;  %2457 = vmatprep.subr.bf16.mxu1 %v5969_v2  ;;  %7016 = vst [vmem:[#allocation55_spill] sm:$0xff] %v6086_v4 }
 0x26f   :  { %v1432_v31 = vadd.f32 %v1431_v17, %v1389_v8  ;;  %2416 = vmatprep.subr.bf16.mxu0 %v5972_v40  ;;  %v6090_v8 = vld [vmem:[#allocation10 + $0xb0] ss:$8 sps:$4 sm:$0xff]   ;;  %v6092_v17 = vld [vmem:[#allocation10 + $0x1b4] ss:$8 sps:$4 sm:$0xff]  }
 0x270   :  { %7017 = vst [vmem:[#allocation56_spill] sm:$0xff] %v6092_v17 }
 0x271   :  { %v1798_v12 = vmax.f32 %v1432_v31, 0.0  ;;  %2458 = vmatpush1.bf16.msra.mxu1 %v5976_v11  ;;  %v6095_v31 = vld [vmem:[#allocation10 + $0xa4] ss:$8 sps:$4 sm:$0xff]  }
 0x272   :  { %2417 = vmatpush1.bf16.msra.mxu0 %v5980_v30  ;;  %2459 = vmatprep.subr.bf16.mxu1 %v5982_v45  ;;  %7018 = vst [vmem:[#allocation57_spill] sm:$0xff] %v6095_v31 }
 0x273   :  { %v5996_v50 = vpack.c.bf16 %v1798_v12, %v1784_v60  ;;  %2418 = vmatprep.subr.bf16.mxu0 %v5985_v20  ;;  %v1390_v60 = vpop.f32.mrf.mxu1  ;;  %v6098_v12 = vld [vmem:[#allocation10 + $0x1b0] ss:$8 sps:$4 sm:$0xff]  }
 0x274   :  { %7019 = vst [vmem:[#allocation58_spill] sm:$0xff] %v6098_v12 }
 0x275   :  { %2460 = vmatpush1.bf16.msra.mxu1 %v5988_v47 }
 0x276   :  { %2419 = vmatpush1.bf16.msra.mxu0 %v5992_v13  ;;  %2461 = vmatprep.subr.bf16.mxu1 %v5994_v5 }
 0x277   :  { %2420 = vmatprep.subr.bf16.mxu0 %v5999_v25 }
 0x279   :  { %2462 = vmatpush1.bf16.msra.mxu1 %v6002_v51 }
 0x27a   :  { %2421 = vmatpush1.bf16.msra.mxu0 %v6006_v23  ;;  %2463 = vmatprep.subr.bf16.mxu1 %v6008_v28 }
 0x27b   :  { %2422 = vmatprep.subr.bf16.mxu0 %v6011_v29 }
 0x27d   :  { %2464 = vmatpush1.bf16.msra.mxu1 %v6014_v32 }
 0x27e   :  { %2423 = vmatpush1.bf16.msra.mxu0 %v6018_v16  ;;  %2465 = vmatprep.subr.bf16.mxu1 %v6020_v3  ;;  %v6173_v3 = vld [vmem:[#allocation10 + $0x244] ss:$8 sps:$4 sm:$0xff]  }
 0x27f   :  { %2424 = vmatprep.subr.bf16.mxu0 %v6023_v9  ;;  %7031 = vst [vmem:[#allocation70_spill] sm:$0xff] %v6173_v3 }
 0x281   :  { %2466 = vmatpush1.bf16.msra.mxu1 %v6026_v10 }
 0x282   :  { %2425 = vmatpush1.bf16.msra.mxu0 %v6030_v63  ;;  %2467 = vmatprep.subr.bf16.mxu1 %v6032_v41 }
 0x283   :  { %2426 = vmatprep.subr.bf16.mxu0 %v6035_v15 }
 0x285   :  { %2468 = vmatpush1.bf16.msra.mxu1 %v6038_v27  ;;  %v6135_v27 = vld [vmem:[#allocation10 + $0x274] ss:$8 sps:$4 sm:$0xff]  }
 0x286   :  { %2427 = vmatpush2.bf16.msra.mxu0 %v6042_v49  ;;  %2469 = vmatprep.subr.bf16.mxu1 %v6044_v19  ;;  %v6132_v19 = vld [vmem:[#allocation10 + $0x184] ss:$8 sps:$4 sm:$0xff]  }
 0x287   :  { %2428 = vmatprep.subr.bf16.mxu0 %v6047_v7  ;;  %7025 = vst [vmem:[#allocation64_spill] sm:$0xff] %v6132_v19 }
 0x289   :  { %2470 = vmatpush2.bf16.msra.mxu1 %v6050_v52  ;;  %v6122_v52 = vld [vmem:[#allocation10 + $0x84] ss:$8 sps:$4 sm:$0xff]  }
 0x28a   :  { %2429 = vmatpush2.bf16.msra.mxu0 %v6054_v22  ;;  %2471 = vmatprep.subr.bf16.mxu1 %v6056_v24  ;;  %v1433_v24 = vpop.f32.mrf.mxu0 }
 0x28b   :  { %2430 = vmatprep.subr.bf16.mxu0 %v6059_v56 }
 0x28d   :  { %2472 = vmatpush2.bf16.msra.mxu1 %v6062_v57  ;;  %v6119_v57 = vld [vmem:[#allocation10 + $0x194] ss:$8 sps:$4 sm:$0xff]  }
 0x28e   :  { %2431 = vmatpush2.bf16.msra.mxu0 %v6066_v62  ;;  %2473 = vmatprep.subr.bf16.mxu1 %v6068_v33  ;;  %v6111_v33 = vld [vmem:[#allocation10 + $0x1a0] ss:$8 sps:$4 sm:$0xff]   ;;  %7023 = vst [vmem:[#allocation62_spill] sm:$0xff] %v6119_v57 }
 0x28f   :  { %2432 = vmatprep.subr.bf16.mxu0 %v6071_v61  ;;  %7022 = vst [vmem:[#allocation61_spill] sm:$0xff] %v6111_v33 }
 0x291   :  { %2474 = vmatpush2.bf16.msra.mxu1 %v6074_v37  ;;  %v1391_v37 = vadd.f32 %v1390_v60, %v5915_v18 }
 0x292   :  { %2433 = vmatpush2.bf16.msra.mxu0 %v6078_v39  ;;  %2475 = vmatprep.subr.bf16.mxu1 %v6080_v21  ;;  %v6107_v21 = vld [vmem:[#allocation10 + $0x94] ss:$8 sps:$4 sm:$0xff]  }
 0x293   :  { %2434 = vmatprep.subr.bf16.mxu0 %v6083_v42  ;;  %v1434_v60 = vadd.f32 %v1433_v24, %v1391_v37  ;;  %v6138_v24 = vld [vmem:[#allocation10 + $0x180] ss:$8 sps:$4 sm:$0xff]  }
 0x294   :  { %7026 = vst [vmem:[#allocation65_spill] sm:$0xff] %v6138_v24 }
 0x295   :  { %2476 = vmatpush2.bf16.msra.mxu1 %v6086_v4  ;;  %v1387_v4 = vadd.f32 %v5963_v58, %v5915_v18  ;;  %v1799_v41 = vmax.f32 %v1434_v60, 0.0 }
 0x296   :  { %2435 = vmatpush2.bf16.msra.mxu0 %v6090_v8  ;;  %2477 = vmatprep.subr.bf16.mxu1 %v6092_v17  ;;  %v6117_v17 = vld [vmem:[#allocation10 + $0x90] ss:$8 sps:$4 sm:$0xff]  }
 0x297   :  { %2436 = vmatprep.subr.bf16.mxu0 %v6095_v31  ;;  %v1430_v58 = vadd.f32 %v5961_v55, %v1387_v4  ;;  %v6142_v55 = vld [vmem:[#allocation10 + $0x270] ss:$8 sps:$4 sm:$0xff]   ;;  %v1513_v4 = vpop.f32.mrf.mxu1 }
 0x299   :  { %2478 = vmatpush2.bf16.msra.mxu1 %v6098_v12  ;;  %v6125_v12 = vld [vmem:[#allocation10 + $0x190] ss:$8 sps:$4 sm:$0xff]   ;;  %v1785_v37 = vmax.f32 %v1430_v58, 0.0  ;;  %v6154_v58 = vld [vmem:[#allocation10 + $0x260] ss:$8 sps:$4 sm:$0xff]  }
 0x29a   :  { %2437 = vmatpush2.bf16.msra.mxu0 %v6102_v43  ;;  %2479 = vmatprep.subr.bf16.mxu1 %v6104_v44  ;;  %7024 = vst [vmem:[#allocation63_spill] sm:$0xff] %v6125_v12  ;;  %v6130_v44 = vld [vmem:[#allocation10 + $0x80] ss:$8 sps:$4 sm:$0xff]   ;;  %7028 = vst [vmem:[#allocation67_spill] sm:$0xff] %v6154_v58 }
 0x29b   :  { %2438 = vmatprep.subr.bf16.mxu0 %v6107_v21 }
 0x29d   :  { %2480 = vmatpush2.bf16.msra.mxu1 %v6111_v33  ;;  %v6147_v33 = vpack.c.bf16 %v1799_v41, %v1785_v37  ;;  %v6162_v41 = vld [vmem:[#allocation10 + $0x254] ss:$8 sps:$4 sm:$0xff]  }
 0x29e   :  { %2439 = vmatpush2.bf16.msra.mxu0 %v6117_v17  ;;  %2481 = vmatprep.subr.bf16.mxu1 %v6119_v57  ;;  %v6145_v57 = vld [vmem:[#allocation10 + $0x264] ss:$8 sps:$4 sm:$0xff]   ;;  %7029 = vst [vmem:[#allocation68_spill] sm:$0xff] %v6162_v41 }
 0x29f   :  { %2440 = vmatprep.subr.bf16.mxu0 %v6122_v52  ;;  %7027 = vst [vmem:[#allocation66_spill] sm:$0xff] %v6145_v57 }
 0x2a1   :  { %2482 = vmatpush2.bf16.msra.mxu1 %v6125_v12 }
 0x2a2   :  { %2441 = vmatpush2.bf16.msra.mxu0 %v6130_v44  ;;  %2483 = vmatprep.subr.bf16.mxu1 %v6132_v19  ;;  %v6156_v19 = vpop.f32.mrf.mxu1 }
 0x2a3   :  { %2496 = vmatprep.subr.bf16.mxu0 %v6135_v27 }
 0x2a5   :  { %v1470_v10 = vpop.f32.mrf.mxu0  ;;  %2443 = vmatmul.mubr.bf16.vlgmr.msra.gmra.mxu0 %v5825_v14  ;;  %2484 = vmatpush2.bf16.msra.mxu1 %v6138_v24  ;;  %v6170_v24 = vld [vmem:[#allocation10 + $0x250] ss:$8 sps:$4 sm:$0xff]  }
 0x2a6   :  { %v1471_v60 = vadd.f32 %v1470_v10, %v5790_v46  ;;  %2497 = vmatpush1.bf16.msra.mxu0 %v6142_v55  ;;  %2528 = vmatprep.mubr.bf16.mxu0 %v6147_v33  ;;  %7030 = vst [vmem:[#allocation69_spill] sm:$0xff] %v6170_v24 }
 0x2a7   :  { %v6158_v12 = vpop.f32.mrf.mxu0  ;;  %2539 = vmatprep.subr.bf16.mxu1 %v5929_v53  ;;  %2498 = vmatprep.subr.bf16.mxu0 %v6145_v57  ;;  %v1517_v53 = vpop.f32.mrf.mxu1 }
 0x2a8   :  { %v1514_v14 = vadd.f32 %v1513_v4, %v1471_v60  ;;  %2486 = vmatmul.mubr.bf16.vlgmr.msra.gmra.mxu1 %v5908_v0 }
 0x2a9   :  { %v1474_v10 = vpop.f32.mrf.mxu0  ;;  %2540 = vmatpush1.bf16.msra.mxu1 %v5933_v6  ;;  %2571 = vmatprep.mubr.bf16.mxu1 %v5951_v38  ;;  %v6178_v38 = vld [vmem:[#allocation10 + $0x240] ss:$8 sps:$4 sm:$0xff]  }
 0x2aa   :  { %v1475_v37 = vadd.f32 %v1474_v10, %v5790_v46  ;;  %2499 = vmatpush1.bf16.msra.mxu0 %v6154_v58  ;;  %2541 = vmatprep.subr.bf16.mxu1 %v5938_v26  ;;  %v1786_v60 = vmax.f32 %v1514_v14, 0.0  ;;  %7032 = vst [vmem:[#allocation71_spill] sm:$0xff] %v6178_v38  ;;  %v6181_v10 = vld [vmem:[#allocation10 + $0x234] ss:$8 sps:$4 sm:$0xff]   ;;  %v6191_v14 = vld [vmem:[#allocation10 + $0x224] ss:$8 sps:$4 sm:$0xff]  }
 0x2ab   :  { %2500 = vmatprep.subr.bf16.mxu0 %v6162_v41  ;;  %7033 = vst [vmem:[#allocation72_spill] sm:$0xff] %v6181_v10  ;;  %7036 = vst [vmem:[#allocation75_spill] sm:$0xff] %v6191_v14 }
 0x2ac   :  { %v1518_v4 = vadd.f32 %v1517_v53, %v1475_v37  ;;  %v6188_v53 = vld [vmem:[#allocation10 + $0x230] ss:$8 sps:$4 sm:$0xff]   ;;  %v6199_v37 = vld [vmem:[#allocation10 + $0x214] ss:$8 sps:$4 sm:$0xff]  }
 0x2ad   :  { %2542 = vmatpush1.bf16.msra.mxu1 %v5945_v34  ;;  %7035 = vst [vmem:[#allocation74_spill] sm:$0xff] %v6188_v53  ;;  %7038 = vst [vmem:[#allocation77_spill] sm:$0xff] %v6199_v37 }
 0x2ae   :  { %v1800_v6 = vmax.f32 %v1518_v4, 0.0  ;;  %2501 = vmatpush1.bf16.msra.mxu0 %v6170_v24  ;;  %2543 = vmatprep.subr.bf16.mxu1 %v5953_v35  ;;  %v6204_v4 = vld [vmem:[#allocation10 + $0x210] ss:$8 sps:$4 sm:$0xff]  }
 0x2af   :  { %2502 = vmatprep.subr.bf16.mxu0 %v6173_v3  ;;  %7039 = vst [vmem:[#allocation78_spill] sm:$0xff] %v6204_v4 }
 0x2b0   :  { %v6183_v26 = vpack.c.bf16 %v1800_v6, %v1786_v60  ;;  %v6196_v6 = vld [vmem:[#allocation10 + $0x220] ss:$8 sps:$4 sm:$0xff]   ;;  %v6207_v60 = vld [vmem:[#allocation10 + $0x204] ss:$8 sps:$4 sm:$0xff]  }
 0x2b1   :  { %2544 = vmatpush1.bf16.msra.mxu1 %v5967_v59  ;;  %7037 = vst [vmem:[#allocation76_spill] sm:$0xff] %v6196_v6  ;;  %7040 = vst [vmem:[#allocation79_spill] sm:$0xff] %v6207_v60 }
 0x2b2   :  { %7034 = vst [vmem:[#allocation73_spill] sm:$0xff] %v6183_v26  ;;  %2503 = vmatpush1.bf16.msra.mxu0 %v6178_v38  ;;  %2545 = vmatprep.subr.bf16.mxu1 %v5972_v40 }
 0x2b3   :  { %2504 = vmatprep.subr.bf16.mxu0 %v6181_v10 }
 0x2b5   :  { %2546 = vmatpush1.bf16.msra.mxu1 %v5980_v30  ;;  %v1476_v30 = vpop.f32.mrf.mxu0 }
 0x2b6   :  { %2505 = vmatpush1.bf16.msra.mxu0 %v6188_v53  ;;  %2547 = vmatprep.subr.bf16.mxu1 %v5985_v20  ;;  %v6212_v20 = vld [vmem:[#allocation10 + $0x200] ss:$8 sps:$4 sm:$0xff]  }
 0x2b7   :  { %2506 = vmatprep.subr.bf16.mxu0 %v6191_v14  ;;  %7041 = vst [vmem:[#allocation80_spill] sm:$0xff] %v6212_v20 }
 0x2b9   :  { %2548 = vmatpush1.bf16.msra.mxu1 %v5992_v13  ;;  %v6215_v13 = vld [vmem:[#allocation10 + $0x2f4] ss:$8 sps:$4 sm:$0xff]  }
 0x2ba   :  { %2507 = vmatpush1.bf16.msra.mxu0 %v6196_v6  ;;  %2549 = vmatprep.subr.bf16.mxu1 %v5999_v25  ;;  %7042 = vst [vmem:[#allocation81_spill] sm:$0xff] %v6215_v13  ;;  %v6220_v25 = vld [vmem:[#allocation10 + $0x2f0] ss:$8 sps:$4 sm:$0xff]  }
 0x2bb   :  { %2508 = vmatprep.subr.bf16.mxu0 %v6199_v37  ;;  %7043 = vst [vmem:[#allocation82_spill] sm:$0xff] %v6220_v25 }
 0x2bd   :  { %2550 = vmatpush1.bf16.msra.mxu1 %v6006_v23  ;;  %v6223_v23 = vld [vmem:[#allocation10 + $0x2e4] ss:$8 sps:$4 sm:$0xff]  }
 0x2be   :  { %2509 = vmatpush1.bf16.msra.mxu0 %v6204_v4  ;;  %2551 = vmatprep.subr.bf16.mxu1 %v6011_v29  ;;  %7044 = vst [vmem:[#allocation83_spill] sm:$0xff] %v6223_v23  ;;  %v1519_v29 = vpop.f32.mrf.mxu1 }
 0x2bf   :  { %2510 = vmatprep.subr.bf16.mxu0 %v6207_v60 }
 0x2c1   :  { %2552 = vmatpush1.bf16.msra.mxu1 %v6018_v16  ;;  %v6228_v16 = vld [vmem:[#allocation10 + $0x2e0] ss:$8 sps:$4 sm:$0xff]  }
 0x2c2   :  { %2511 = vmatpush1.bf16.msra.mxu0 %v6212_v20  ;;  %2553 = vmatprep.subr.bf16.mxu1 %v6023_v9  ;;  %7045 = vst [vmem:[#allocation84_spill] sm:$0xff] %v6228_v16  ;;  %v6231_v9 = vld [vmem:[#allocation10 + $0x2d4] ss:$8 sps:$4 sm:$0xff]  }
 0x2c3   :  { %2512 = vmatprep.subr.bf16.mxu0 %v6215_v13  ;;  %7046 = vst [vmem:[#allocation85_spill] sm:$0xff] %v6231_v9 }
 0x2c5   :  { %2554 = vmatpush1.bf16.msra.mxu1 %v6030_v63  ;;  %v1599_v40 = vpop.f32.mrf.mxu0 }
 0x2c6   :  { %2513 = vmatpush2.bf16.msra.mxu0 %v6220_v25  ;;  %2555 = vmatprep.subr.bf16.mxu1 %v6035_v15  ;;  %v6241_v15 = vld [vmem:[#allocation10 + $0x2d0] ss:$8 sps:$4 sm:$0xff]  }
 0x2c7   :  { %2514 = vmatprep.subr.bf16.mxu0 %v6223_v23  ;;  %v6235_v34 = vpop.f32.mrf.mxu0  ;;  %7049 = vst [vmem:[#allocation88_spill] sm:$0xff] %v6241_v15  ;;  %v6244_v23 = vld [vmem:[#allocation10 + $0x2c4] ss:$8 sps:$4 sm:$0xff]  }
 0x2c8   :  { %v1556_v59 = vpop.f32.mrf.mxu1  ;;  %7047 = vst [vmem:[#allocation86_spill] sm:$0xff] %v6235_v34  ;;  %7050 = vst [vmem:[#allocation89_spill] sm:$0xff] %v6244_v23  ;;  %v6250_v34 = vld [vmem:[#allocation10 + $0x2c0] ss:$8 sps:$4 sm:$0xff]  }
 0x2c9   :  { %v1557_v35 = vadd.f32 %v1556_v59, %v5790_v46  ;;  %2556 = vmatpush2.bf16.msra.mxu1 %v6042_v49  ;;  %v1603_v49 = vpop.f32.mrf.mxu0  ;;  %7051 = vst [vmem:[#allocation90_spill] sm:$0xff] %v6250_v34 }
 0x2ca   :  { %v6237_v63 = vpop.f32.mrf.mxu1  ;;  %2515 = vmatpush2.bf16.msra.mxu0 %v6228_v16  ;;  %2557 = vmatprep.subr.bf16.mxu1 %v6047_v7 }
 0x2cb   :  { %7048 = vst [vmem:[#allocation87_spill] sm:$0xff] %v6237_v63  ;;  %v1600_v26 = vadd.f32 %v1599_v40, %v1557_v35  ;;  %2516 = vmatprep.subr.bf16.mxu0 %v6231_v9  ;;  %v6253_v35 = vld [vmem:[#allocation10 + $0x2b4] ss:$8 sps:$4 sm:$0xff]  }
 0x2cc   :  { %v1560_v25 = vpop.f32.mrf.mxu1  ;;  %7052 = vst [vmem:[#allocation91_spill] sm:$0xff] %v6253_v35 }
 0x2cd   :  { %v1561_v59 = vadd.f32 %v1560_v25, %v5790_v46  ;;  %2558 = vmatpush2.bf16.msra.mxu1 %v6054_v22  ;;  %v1788_v40 = vmax.f32 %v1600_v26, 0.0  ;;  %v6258_v25 = vld [vmem:[#allocation10 + $0x2b0] ss:$8 sps:$4 sm:$0xff]   ;;  %v6268_v26 = vld [vmem:[#allocation10 + $0x2a0] ss:$8 sps:$4 sm:$0xff]  }
 0x2ce   :  { %2517 = vmatpush2.bf16.msra.mxu0 %v6241_v15  ;;  %2559 = vmatprep.subr.bf16.mxu1 %v6059_v56  ;;  %7053 = vst [vmem:[#allocation92_spill] sm:$0xff] %v6258_v25  ;;  %v6263_v56 = vld [vmem:[#allocation10 + $0x2a4] ss:$8 sps:$4 sm:$0xff]   ;;  %7056 = vst [vmem:[#allocation95_spill] sm:$0xff] %v6268_v26 }
 0x2cf   :  { %v1604_v63 = vadd.f32 %v1603_v49, %v1561_v59  ;;  %2518 = vmatprep.subr.bf16.mxu0 %v6244_v23  ;;  %7055 = vst [vmem:[#allocation94_spill] sm:$0xff] %v6263_v56  ;;  %v6276_v49 = vld [vmem:[#allocation10 + $0x290] ss:$8 sps:$4 sm:$0xff]   ;;  %v6280_v59 = vld [vmem:[#allocation10 + $0x284] ss:$8 sps:$4 sm:$0xff]  }
 0x2d0   :  { %7058 = vst [vmem:[#allocation97_spill] sm:$0xff] %v6276_v49  ;;  %7059 = vst [vmem:[#allocation98_spill] sm:$0xff] %v6280_v59 }
 0x2d1   :  { %v1802_v7 = vmax.f32 %v1604_v63, 0.0  ;;  %2560 = vmatpush2.bf16.msra.mxu1 %v6066_v62  ;;  %v6271_v63 = vld [vmem:[#allocation10 + $0x294] ss:$8 sps:$4 sm:$0xff]  }
 0x2d2   :  { %2519 = vmatpush2.bf16.msra.mxu0 %v6250_v34  ;;  %2561 = vmatprep.subr.bf16.mxu1 %v6071_v61  ;;  %7057 = vst [vmem:[#allocation96_spill] sm:$0xff] %v6271_v63 }
 0x2d3   :  { %v6260_v22 = vpack.c.bf16 %v1802_v7, %v1788_v40  ;;  %2520 = vmatprep.subr.bf16.mxu0 %v6253_v35  ;;  %v1477_v7 = vadd.f32 %v1476_v30, %v5915_v18  ;;  %v1473_v40 = vadd.f32 %v6158_v12, %v5915_v18 }
 0x2d5   :  { %7054 = vst [vmem:[#allocation93_spill] sm:$0xff] %v6260_v22  ;;  %2562 = vmatpush2.bf16.msra.mxu1 %v6078_v39  ;;  %v6287_v22 = vld [vmem:[#allocation10 + $0x280] ss:$8 sps:$4 sm:$0xff]   ;;  %v1516_v30 = vadd.f32 %v6156_v19, %v1473_v40  ;;  %v7063_v19 = vld [vmem:[#allocation41_spill] sm:$0xff]  ;;  %v6334_v40 = vpop.f32.mrf.mxu0 }
 0x2d6   :  { %2521 = vmatpush2.bf16.msra.mxu0 %v6258_v25  ;;  %2563 = vmatprep.subr.bf16.mxu1 %v6083_v42  ;;  %7060 = vst [vmem:[#allocation99_spill] sm:$0xff] %v6287_v22 }
 0x2d7   :  { %2522 = vmatprep.subr.bf16.mxu0 %v6263_v56 }
 0x2d9   :  { %2564 = vmatpush2.bf16.msra.mxu1 %v6090_v8 }
 0x2da   :  { %2523 = vmatpush2.bf16.msra.mxu0 %v6268_v26  ;;  %2565 = vmatprep.subr.bf16.mxu1 %v6095_v31  ;;  %v1520_v31 = vadd.f32 %v1519_v29, %v1477_v7  ;;  %v7064_v7 = vld [vmem:[#allocation43_spill] sm:$0xff] }
 0x2db   :  { %2524 = vmatprep.subr.bf16.mxu0 %v6271_v63 }
 0x2dc   :  { %v1801_v12 = vmax.f32 %v1520_v31, 0.0  ;;  %v6329_v31 = vpop.f32.mrf.mxu1 }
 0x2dd   :  { %2566 = vmatpush2.bf16.msra.mxu1 %v6102_v43  ;;  %v1787_v43 = vmax.f32 %v1516_v30, 0.0 }
 0x2de   :  { %2525 = vmatpush2.bf16.msra.mxu0 %v6276_v49  ;;  %2567 = vmatprep.subr.bf16.mxu1 %v6107_v21 }
 0x2df   :  { %2526 = vmatprep.subr.bf16.mxu0 %v6280_v59  ;;  %v6301_v29 = vpack.c.bf16 %v1801_v12, %v1787_v43  ;;  %v7061_v43 = vld [vmem:[#allocation37_spill] sm:$0xff] }
 0x2e0   :  { %v7065_v12 = vld [vmem:[#allocation45_spill] sm:$0xff] }
 0x2e1   :  { %2568 = vmatpush2.bf16.msra.mxu1 %v6117_v17 }
 0x2e2   :  { %2527 = vmatpush2.bf16.msra.mxu0 %v6287_v22  ;;  %2569 = vmatprep.subr.bf16.mxu1 %v6122_v52 }
 0x2e3   :  { %2582 = vmatprep.subr.bf16.mxu0 %v5936_v48 }
 0x2e5   :  { %2529 = vmatmul.mubr.bf16.vlgmr.msra.gmra.mxu0 %v5996_v50  ;;  %2570 = vmatpush2.bf16.msra.mxu1 %v6130_v44 }
 0x2e6   :  { %2583 = vmatpush1.bf16.msra.mxu0 %v5942_v36  ;;  %2614 = vmatprep.mubr.bf16.mxu0 %v6147_v33 }
 0x2e7   :  { %2625 = vmatprep.subr.bf16.mxu1 %v6135_v27  ;;  %2584 = vmatprep.subr.bf16.mxu0 %v5947_v1 }
 0x2e8   :  { %2572 = vmatmul.mubr.bf16.vlgmr.msra.gmra.mxu1 %v5908_v0  ;;  %v7062_v0 = vld [vmem:[#allocation39_spill] sm:$0xff]  ;;  %v1685_v30 = vpop.f32.mrf.mxu1 }
 0x2e9   :  { %2626 = vmatpush1.bf16.msra.mxu1 %v6142_v55  ;;  %2657 = vmatprep.mubr.bf16.mxu1 %v6301_v29 }
 0x2ea   :  { %2585 = vmatpush1.bf16.msra.mxu0 %v5959_v54  ;;  %2627 = vmatprep.subr.bf16.mxu1 %v6145_v57  ;;  %v7074_v57 = vld [vmem:[#allocation53_spill] sm:$0xff] }
 0x2eb   :  { %2586 = vmatprep.subr.bf16.mxu0 %v5969_v2 }
 0x2ed   :  { %2628 = vmatpush1.bf16.msra.mxu1 %v6154_v58  ;;  %v7073_v58 = vld [vmem:[#allocation52_spill] sm:$0xff] }
 0x2ee   :  { %2587 = vmatpush1.bf16.msra.mxu0 %v5976_v11  ;;  %2629 = vmatprep.subr.bf16.mxu1 %v6162_v41  ;;  %v7071_v41 = vld [vmem:[#allocation51_spill] sm:$0xff] }
 0x2ef   :  { %2588 = vmatprep.subr.bf16.mxu0 %v5982_v45 }
 0x2f1   :  { %2630 = vmatpush1.bf16.msra.mxu1 %v6170_v24 }
 0x2f2   :  { %2589 = vmatpush1.bf16.msra.mxu0 %v5988_v47  ;;  %2631 = vmatprep.subr.bf16.mxu1 %v6173_v3  ;;  %v7070_v3 = vld [vmem:[#allocation82_spill] sm:$0xff] }
 0x2f3   :  { %2590 = vmatprep.subr.bf16.mxu0 %v5994_v5 }
 0x2f5   :  { %2632 = vmatpush1.bf16.msra.mxu1 %v6178_v38 }
 0x2f6   :  { %2591 = vmatpush1.bf16.msra.mxu0 %v6002_v51  ;;  %2633 = vmatprep.subr.bf16.mxu1 %v6181_v10  ;;  %v7069_v10 = vld [vmem:[#allocation49_spill] sm:$0xff] }
 0x2f7   :  { %2592 = vmatprep.subr.bf16.mxu0 %v6008_v28 }
 0x2f9   :  { %2634 = vmatpush1.bf16.msra.mxu1 %v6188_v53  ;;  %v6341_v53 = vpop.f32.mrf.mxu1 }
 0x2fa   :  { %2593 = vmatpush1.bf16.msra.mxu0 %v6014_v32  ;;  %2635 = vmatprep.subr.bf16.mxu1 %v6191_v14  ;;  %v7066_v14 = vld [vmem:[#allocation47_spill] sm:$0xff]  ;;  %7067 = vst [vmem:[#allocation37_spill] sm:$0xff] %v6341_v53 }
 0x2fb   :  { %2594 = vmatprep.subr.bf16.mxu0 %v7061_v43 }
 0x2fd   :  { %2636 = vmatpush1.bf16.msra.mxu1 %v6196_v6 }
 0x2fe   :  { %2595 = vmatpush1.bf16.msra.mxu0 %v7062_v0  ;;  %2637 = vmatprep.subr.bf16.mxu1 %v6199_v37 }
 0x2ff   :  { %2596 = vmatprep.subr.bf16.mxu0 %v7063_v19 }
 0x301   :  { %2638 = vmatpush1.bf16.msra.mxu1 %v6204_v4 }
 0x302   :  { %2597 = vmatpush1.bf16.msra.mxu0 %v7064_v7  ;;  %2639 = vmatprep.subr.bf16.mxu1 %v6207_v60 }
 0x303   :  { %2598 = vmatprep.subr.bf16.mxu0 %v7065_v12 }
 0x305   :  { %v1642_v6 = vpop.f32.mrf.mxu0  ;;  %2640 = vmatpush1.bf16.msra.mxu1 %v6212_v20  ;;  %v7072_v20 = vld [vmem:[#allocation83_spill] sm:$0xff] }
 0x306   :  { %v1643_v37 = vadd.f32 %v1642_v6, %v5790_v46  ;;  %2599 = vmatpush2.bf16.msra.mxu0 %v7066_v14  ;;  %2641 = vmatprep.subr.bf16.mxu1 %v6215_v13  ;;  %v1689_v6 = vpop.f32.mrf.mxu1 }
 0x307   :  { %v6343_v4 = vpop.f32.mrf.mxu0  ;;  %2600 = vmatprep.subr.bf16.mxu0 %v7069_v10 }
 0x308   :  { %7068 = vst [vmem:[#allocation39_spill] sm:$0xff] %v6343_v4  ;;  %v1686_v60 = vadd.f32 %v1685_v30, %v1643_v37  ;;  %v7075_v37 = vld [vmem:[#allocation54_spill] sm:$0xff] }
 0x309   :  { %v1646_v38 = vpop.f32.mrf.mxu0  ;;  %2642 = vmatpush2.bf16.msra.mxu1 %v7070_v3 }
 0x30a   :  { %v1647_v24 = vadd.f32 %v1646_v38, %v5790_v46  ;;  %2601 = vmatpush2.bf16.msra.mxu0 %v7071_v41  ;;  %2643 = vmatprep.subr.bf16.mxu1 %v7072_v20  ;;  %v1790_v53 = vmax.f32 %v1686_v60, 0.0  ;;  %v7077_v38 = vld [vmem:[#allocation55_spill] sm:$0xff]  ;;  %v7078_v20 = vld [vmem:[#allocation56_spill] sm:$0xff] }
 0x30b   :  { %2602 = vmatprep.subr.bf16.mxu0 %v7073_v58  ;;  %v7083_v60 = vld [vmem:[#allocation63_spill] sm:$0xff] }
 0x30c   :  { %v1690_v13 = vadd.f32 %v1689_v6, %v1647_v24  ;;  %v7079_v24 = vld [vmem:[#allocation58_spill] sm:$0xff]  ;;  %v7084_v6 = vld [vmem:[#allocation64_spill] sm:$0xff] }
 0x30d   :  { %2644 = vmatpush2.bf16.msra.mxu1 %v6228_v16  ;;  %v7097_v16 = vld [vmem:[#allocation28_spill] sm:$0xff] }
 0x30e   :  { %v1804_v4 = vmax.f32 %v1690_v13, 0.0  ;;  %2603 = vmatpush2.bf16.msra.mxu0 %v7074_v57  ;;  %2645 = vmatprep.subr.bf16.mxu1 %v6231_v9  ;;  %v7080_v13 = vld [vmem:[#allocation60_spill] sm:$0xff] }
 0x30f   :  { %2604 = vmatprep.subr.bf16.mxu0 %v7075_v37 }
 0x310   :  { %v6355_v30 = vpack.c.bf16 %v1804_v4, %v1790_v53  ;;  %v7081_v53 = vld [vmem:[#allocation61_spill] sm:$0xff]  ;;  %v7082_v4 = vld [vmem:[#allocation62_spill] sm:$0xff] }
 0x311   :  { %2646 = vmatpush2.bf16.msra.mxu1 %v6241_v15 }
 0x312   :  { %7076 = vst [vmem:[#allocation41_spill] sm:$0xff] %v6355_v30  ;;  %2605 = vmatpush2.bf16.msra.mxu0 %v7077_v38  ;;  %2647 = vmatprep.subr.bf16.mxu1 %v6244_v23  ;;  %v7085_v30 = vld [vmem:[#allocation65_spill] sm:$0xff] }
 0x313   :  { %2606 = vmatprep.subr.bf16.mxu0 %v7078_v20  ;;  %v7094_v23 = vld [vmem:[#allocation25_spill] sm:$0xff] }
 0x315   :  { %2648 = vmatpush2.bf16.msra.mxu1 %v6250_v34  ;;  %v7091_v34 = vld [vmem:[#allocation73_spill] sm:$0xff] }
 0x316   :  { %2607 = vmatpush2.bf16.msra.mxu0 %v7079_v24  ;;  %2649 = vmatprep.subr.bf16.mxu1 %v6253_v35  ;;  %v6377_v35 = vpop.f32.mrf.mxu0 }
 0x317   :  { %2608 = vmatprep.subr.bf16.mxu0 %v7080_v13  ;;  %7087 = vst [vmem:[#allocation43_spill] sm:$0xff] %v6377_v35 }
 0x319   :  { %2650 = vmatpush2.bf16.msra.mxu1 %v6258_v25  ;;  %v7086_v25 = vld [vmem:[#allocation22_spill] sm:$0xff] }
 0x31a   :  { %2609 = vmatpush2.bf16.msra.mxu0 %v7081_v53  ;;  %2651 = vmatprep.subr.bf16.mxu1 %v6263_v56 }
 0x31b   :  { %2610 = vmatprep.subr.bf16.mxu0 %v7082_v4 }
 0x31d   :  { %2652 = vmatpush2.bf16.msra.mxu1 %v6268_v26  ;;  %v6381_v26 = vpop.f32.mrf.mxu1 }
 0x31e   :  { %2611 = vmatpush2.bf16.msra.mxu0 %v7083_v60  ;;  %2653 = vmatprep.subr.bf16.mxu1 %v6271_v63  ;;  %7088 = vst [vmem:[#allocation45_spill] sm:$0xff] %v6381_v26  ;;  %v7089_v63 = vld [vmem:[#allocation23_spill] sm:$0xff] }
 0x31f   :  { %2612 = vmatprep.subr.bf16.mxu0 %v7084_v6 }
 0x321   :  { %2654 = vmatpush2.bf16.msra.mxu1 %v6276_v49  ;;  %v7090_v49 = vld [vmem:[#allocation24_spill] sm:$0xff] }
 0x322   :  { %2613 = vmatpush2.bf16.msra.mxu0 %v7085_v30  ;;  %2655 = vmatprep.subr.bf16.mxu1 %v6280_v59 }
 0x323   :  { %2668 = vmatprep.subr.bf16.mxu0 %v7086_v25 }
 0x325   :  { %2615 = vmatmul.mubr.bf16.vlgmr.msra.gmra.mxu0 %v5996_v50  ;;  %2656 = vmatpush2.bf16.msra.mxu1 %v6287_v22  ;;  %v1771_v56 = vpop.f32.mrf.mxu0 }
 0x326   :  { %2669 = vmatpush1.bf16.msra.mxu0 %v7089_v63  ;;  %2700 = vmatprep.mubr.bf16.mxu0 %v6147_v33  ;;  %v7095_v33 = vld [vmem:[#allocation26_spill] sm:$0xff] }
 0x327   :  { %2711 = vmatprep.subr.bf16.mxu1 %v5936_v48  ;;  %2670 = vmatprep.subr.bf16.mxu0 %v7090_v49  ;;  %v6391_v22 = vpop.f32.mrf.mxu0 }
 0x328   :  { %v1728_v59 = vpop.f32.mrf.mxu1  ;;  %2658 = vmatmul.mubr.bf16.vlgmr.msra.gmra.mxu1 %v7091_v34  ;;  %7092 = vst [vmem:[#allocation47_spill] sm:$0xff] %v6391_v22 }
 0x329   :  { %v1729_v35 = vadd.f32 %v1728_v59, %v5790_v46  ;;  %2712 = vmatpush1.bf16.msra.mxu1 %v5942_v36  ;;  %2743 = vmatprep.mubr.bf16.mxu1 %v6301_v29  ;;  %v1775_v59 = vpop.f32.mrf.mxu0  ;;  %v7096_v36 = vld [vmem:[#allocation27_spill] sm:$0xff] }
 0x32a   :  { %v6393_v26 = vpop.f32.mrf.mxu1  ;;  %2671 = vmatpush1.bf16.msra.mxu0 %v7094_v23  ;;  %2713 = vmatprep.subr.bf16.mxu1 %v5947_v1  ;;  %v7098_v1 = vld [vmem:[#allocation29_spill] sm:$0xff] }
 0x32b   :  { %7093 = vst [vmem:[#allocation58_spill] sm:$0xff] %v6393_v26  ;;  %v1772_v48 = vadd.f32 %v1771_v56, %v1729_v35  ;;  %2672 = vmatprep.subr.bf16.mxu0 %v7095_v33  ;;  %v7109_v35 = vld [vmem:[#allocation44_spill] sm:$0xff] }
 0x32c   :  { %v1732_v15 = vpop.f32.mrf.mxu1 }
 0x32d   :  { %v1733_v9 = vadd.f32 %v1732_v15, %v5790_v46  ;;  %2714 = vmatpush1.bf16.msra.mxu1 %v5959_v54  ;;  %v1792_v26 = vmax.f32 %v1772_v48, 0.0  ;;  %v7100_v46 = vld [vmem:[#allocation20_spill] sm:$0xff] }
 0x32e   :  { %2673 = vmatpush1.bf16.msra.mxu0 %v7096_v36  ;;  %2715 = vmatprep.subr.bf16.mxu1 %v5969_v2  ;;  %v7101_v54 = vld [vmem:[#allocation32_spill] sm:$0xff]  ;;  %v7102_v2 = vld [vmem:[#allocation33_spill] sm:$0xff] }
 0x32f   :  { %v1776_v22 = vadd.f32 %v1775_v59, %v1733_v9  ;;  %2674 = vmatprep.subr.bf16.mxu0 %v7097_v16  ;;  %v7103_v9 = vld [vmem:[#allocation34_spill] sm:$0xff]  ;;  %v7107_v15 = vld [vmem:[#allocation40_spill] sm:$0xff] }
 0x330   :  { %v7111_v48 = vld [vmem:[#allocation48_spill] sm:$0xff]  ;;  %v7112_v59 = vld [vmem:[#allocation50_spill] sm:$0xff] }
 0x331   :  { %v1806_v3 = vmax.f32 %v1776_v22, 0.0  ;;  %2716 = vmatpush1.bf16.msra.mxu1 %v5976_v11  ;;  %v7104_v11 = vld [vmem:[#allocation35_spill] sm:$0xff]  ;;  %v7108_v22 = vld [vmem:[#allocation42_spill] sm:$0xff] }
 0x332   :  { %2675 = vmatpush1.bf16.msra.mxu0 %v7098_v1  ;;  %2717 = vmatprep.subr.bf16.mxu1 %v5982_v45  ;;  %v7105_v45 = vld [vmem:[#allocation36_spill] sm:$0xff] }
 0x333   :  { %v6406_v56 = vpack.c.bf16 %v1806_v3, %v1792_v26  ;;  %2676 = vmatprep.subr.bf16.mxu0 %v7100_v46  ;;  %v7106_v3 = vld [vmem:[#allocation38_spill] sm:$0xff] }
 0x334   :  { %v7110_v26 = vld [vmem:[#allocation46_spill] sm:$0xff] }
 0x335   :  { %7099 = vst [vmem:[#allocation60_spill] sm:$0xff] %v6406_v56  ;;  %2718 = vmatpush1.bf16.msra.mxu1 %v5988_v47  ;;  %v7113_v56 = vld [vmem:[#allocation57_spill] sm:$0xff] }
 0x336   :  { %2677 = vmatpush1.bf16.msra.mxu0 %v7101_v54  ;;  %2719 = vmatprep.subr.bf16.mxu1 %v5994_v5 }
 0x337   :  { %2678 = vmatprep.subr.bf16.mxu0 %v7102_v2 }
 0x339   :  { %2720 = vmatpush1.bf16.msra.mxu1 %v6002_v51 }
 0x33a   :  { %2679 = vmatpush1.bf16.msra.mxu0 %v7103_v9  ;;  %2721 = vmatprep.subr.bf16.mxu1 %v6008_v28 }
 0x33b   :  { %2680 = vmatprep.subr.bf16.mxu0 %v7104_v11 }
 0x33d   :  { %2722 = vmatpush1.bf16.msra.mxu1 %v6014_v32 }
 0x33e   :  { %2681 = vmatpush1.bf16.msra.mxu0 %v7105_v45  ;;  %2723 = vmatprep.subr.bf16.mxu1 %v7061_v43 }
 0x33f   :  { %2682 = vmatprep.subr.bf16.mxu0 %v7106_v3 }
 0x341   :  { %2724 = vmatpush1.bf16.msra.mxu1 %v7062_v0 }
 0x342   :  { %2683 = vmatpush1.bf16.msra.mxu0 %v7107_v15  ;;  %2725 = vmatprep.subr.bf16.mxu1 %v7063_v19 }
 0x343   :  { %2684 = vmatprep.subr.bf16.mxu0 %v7108_v22 }
 0x345   :  { %2726 = vmatpush1.bf16.msra.mxu1 %v7064_v7 }
 0x346   :  { %2685 = vmatpush2.bf16.msra.mxu0 %v7109_v35  ;;  %2727 = vmatprep.subr.bf16.mxu1 %v7065_v12 }
 0x347   :  { %2686 = vmatprep.subr.bf16.mxu0 %v7110_v26 }
 0x349   :  { %2728 = vmatpush2.bf16.msra.mxu1 %v7066_v14 }
 0x34a   :  { %2687 = vmatpush2.bf16.msra.mxu0 %v7111_v48  ;;  %2729 = vmatprep.subr.bf16.mxu1 %v7069_v10  ;;  %v7115_v10 = vld [vmem:[#allocation59_spill] sm:$0xff] }
 0x34b   :  { %2688 = vmatprep.subr.bf16.mxu0 %v7112_v59 }
 0x34d   :  { %2730 = vmatpush2.bf16.msra.mxu1 %v7071_v41 }
 0x34e   :  { %2689 = vmatpush2.bf16.msra.mxu0 %v6066_v62  ;;  %2731 = vmatprep.subr.bf16.mxu1 %v7073_v58  ;;  %v1563_v58 = vadd.f32 %v6329_v31, %v5915_v18 }
 0x34f   :  { %2690 = vmatprep.subr.bf16.mxu0 %v6071_v61 }
 0x351   :  { %2732 = vmatpush2.bf16.msra.mxu1 %v7074_v57  ;;  %v7114_v57 = vld [vmem:[#allocation87_spill] sm:$0xff] }
 0x352   :  { %2691 = vmatpush2.bf16.msra.mxu0 %v6078_v39  ;;  %2733 = vmatprep.subr.bf16.mxu1 %v7075_v37  ;;  %v1559_v41 = vadd.f32 %v7114_v57, %v5915_v18 }
 0x353   :  { %2692 = vmatprep.subr.bf16.mxu0 %v6083_v42 }
 0x355   :  { %2734 = vmatpush2.bf16.msra.mxu1 %v7077_v38  ;;  %v1606_v38 = vadd.f32 %v6334_v40, %v1563_v58  ;;  %v7120_v40 = vld [vmem:[#allocation69_spill] sm:$0xff] }
 0x356   :  { %2693 = vmatpush2.bf16.msra.mxu0 %v6090_v8  ;;  %2735 = vmatprep.subr.bf16.mxu1 %v7078_v20  ;;  %v7116_v20 = vld [vmem:[#allocation86_spill] sm:$0xff] }
 0x357   :  { %2694 = vmatprep.subr.bf16.mxu0 %v7113_v56  ;;  %v1602_v37 = vadd.f32 %v7116_v20, %v1559_v41  ;;  %v1803_v31 = vmax.f32 %v1606_v38, 0.0  ;;  %v7117_v20 = vld [vmem:[#allocation66_spill] sm:$0xff]  ;;  %v7118_v41 = vld [vmem:[#allocation67_spill] sm:$0xff]  ;;  %v7127_v38 = vld [vmem:[#allocation77_spill] sm:$0xff] }
 0x359   :  { %2736 = vmatpush2.bf16.msra.mxu1 %v7079_v24  ;;  %v1789_v57 = vmax.f32 %v1602_v37, 0.0  ;;  %v7122_v37 = vld [vmem:[#allocation71_spill] sm:$0xff] }
 0x35a   :  { %2695 = vmatpush2.bf16.msra.mxu0 %v7115_v10  ;;  %2737 = vmatprep.subr.bf16.mxu1 %v7080_v13 }
 0x35b   :  { %2696 = vmatprep.subr.bf16.mxu0 %v6107_v21  ;;  %v6463_v58 = vpack.c.bf16 %v1803_v31, %v1789_v57  ;;  %v7146_v31 = vld [vmem:[#allocation97_spill] sm:$0xff]  ;;  %v7148_v57 = vld [vmem:[#allocation98_spill] sm:$0xff] }
 0x35d   :  { %2738 = vmatpush2.bf16.msra.mxu1 %v7081_v53 }
 0x35e   :  { %2697 = vmatpush2.bf16.msra.mxu0 %v6117_v17  ;;  %2739 = vmatprep.subr.bf16.mxu1 %v7082_v4 }
 0x35f   :  { %2698 = vmatprep.subr.bf16.mxu0 %v6122_v52 }
 0x361   :  { %2740 = vmatpush2.bf16.msra.mxu1 %v7083_v60 }
 0x362   :  { %2699 = vmatpush2.bf16.msra.mxu0 %v6130_v44  ;;  %2741 = vmatprep.subr.bf16.mxu1 %v7084_v6 }
 0x363   :  { %2754 = vmatprep.subr.bf16.mxu0 %v6135_v27 }
 0x365   :  { %2701 = vmatmul.mubr.bf16.vlgmr.msra.gmra.mxu0 %v5996_v50  ;;  %2742 = vmatpush2.bf16.msra.mxu1 %v7085_v30  ;;  %v7119_v50 = vld [vmem:[#allocation68_spill] sm:$0xff]  ;;  %v7149_v30 = vld [vmem:[#allocation37_spill] sm:$0xff] }
 0x366   :  { %2755 = vmatpush1.bf16.msra.mxu0 %v6142_v55  ;;  %2786 = vmatprep.mubr.bf16.mxu0 %v6463_v58 }
 0x367   :  { %2797 = vmatprep.subr.bf16.mxu1 %v7086_v25  ;;  %2756 = vmatprep.subr.bf16.mxu0 %v7117_v20  ;;  %v7121_v25 = vld [vmem:[#allocation70_spill] sm:$0xff] }
 0x368   :  { %2744 = vmatmul.mubr.bf16.vlgmr.msra.gmra.mxu1 %v7091_v34 }
 0x369   :  { %2798 = vmatpush1.bf16.msra.mxu1 %v7089_v63  ;;  %2829 = vmatprep.mubr.bf16.mxu1 %v6301_v29  ;;  %v7123_v63 = vld [vmem:[#allocation72_spill] sm:$0xff] }
 0x36a   :  { %2757 = vmatpush1.bf16.msra.mxu0 %v7118_v41  ;;  %2799 = vmatprep.subr.bf16.mxu1 %v7090_v49  ;;  %v7124_v49 = vld [vmem:[#allocation74_spill] sm:$0xff]  ;;  %v7126_v29 = vld [vmem:[#allocation76_spill] sm:$0xff] }
 0x36b   :  { %2758 = vmatprep.subr.bf16.mxu0 %v7119_v50 }
 0x36d   :  { %2800 = vmatpush1.bf16.msra.mxu1 %v7094_v23  ;;  %v7125_v23 = vld [vmem:[#allocation75_spill] sm:$0xff] }
 0x36e   :  { %2759 = vmatpush1.bf16.msra.mxu0 %v7120_v40  ;;  %2801 = vmatprep.subr.bf16.mxu1 %v7095_v33  ;;  %v7129_v33 = vld [vmem:[#allocation79_spill] sm:$0xff] }
 0x36f   :  { %2760 = vmatprep.subr.bf16.mxu0 %v7121_v25 }
 0x371   :  { %2802 = vmatpush1.bf16.msra.mxu1 %v7096_v36  ;;  %v7130_v36 = vld [vmem:[#allocation80_spill] sm:$0xff] }
 0x372   :  { %2761 = vmatpush1.bf16.msra.mxu0 %v7122_v37  ;;  %2803 = vmatprep.subr.bf16.mxu1 %v7097_v16  ;;  %v7128_v16 = vld [vmem:[#allocation78_spill] sm:$0xff] }
 0x373   :  { %2762 = vmatprep.subr.bf16.mxu0 %v7123_v63 }
 0x375   :  { %2804 = vmatpush1.bf16.msra.mxu1 %v7098_v1  ;;  %v7131_v1 = vld [vmem:[#allocation81_spill] sm:$0xff] }
 0x376   :  { %2763 = vmatpush1.bf16.msra.mxu0 %v7124_v49  ;;  %2805 = vmatprep.subr.bf16.mxu1 %v7100_v46  ;;  %v7132_v46 = vld [vmem:[#allocation82_spill] sm:$0xff] }
 0x377   :  { %2764 = vmatprep.subr.bf16.mxu0 %v7125_v23 }
 0x379   :  { %2806 = vmatpush1.bf16.msra.mxu1 %v7101_v54  ;;  %v7133_v54 = vld [vmem:[#allocation83_spill] sm:$0xff] }
 0x37a   :  { %2765 = vmatpush1.bf16.msra.mxu0 %v7126_v29  ;;  %2807 = vmatprep.subr.bf16.mxu1 %v7102_v2  ;;  %v7134_v2 = vld [vmem:[#allocation84_spill] sm:$0xff] }
 0x37b   :  { %2766 = vmatprep.subr.bf16.mxu0 %v7127_v38 }
 0x37d   :  { %2808 = vmatpush1.bf16.msra.mxu1 %v7103_v9  ;;  %v7135_v9 = vld [vmem:[#allocation85_spill] sm:$0xff] }
 0x37e   :  { %2767 = vmatpush1.bf16.msra.mxu0 %v7128_v16  ;;  %2809 = vmatprep.subr.bf16.mxu1 %v7104_v11  ;;  %v7136_v11 = vld [vmem:[#allocation88_spill] sm:$0xff] }
 0x37f   :  { %2768 = vmatprep.subr.bf16.mxu0 %v7129_v33 }
 0x381   :  { %2810 = vmatpush1.bf16.msra.mxu1 %v7105_v45  ;;  %v7137_v45 = vld [vmem:[#allocation89_spill] sm:$0xff] }
 0x382   :  { %2769 = vmatpush1.bf16.msra.mxu0 %v7130_v36  ;;  %2811 = vmatprep.subr.bf16.mxu1 %v7106_v3  ;;  %v7138_v3 = vld [vmem:[#allocation90_spill] sm:$0xff] }
 0x383   :  { %2770 = vmatprep.subr.bf16.mxu0 %v7131_v1 }
 0x385   :  { %2812 = vmatpush1.bf16.msra.mxu1 %v7107_v15  ;;  %v7139_v15 = vld [vmem:[#allocation91_spill] sm:$0xff] }
 0x386   :  { %2771 = vmatpush2.bf16.msra.mxu0 %v7132_v46  ;;  %2813 = vmatprep.subr.bf16.mxu1 %v7108_v22  ;;  %v7140_v22 = vld [vmem:[#allocation92_spill] sm:$0xff] }
 0x387   :  { %2772 = vmatprep.subr.bf16.mxu0 %v7133_v54 }
 0x389   :  { %2814 = vmatpush2.bf16.msra.mxu1 %v7109_v35  ;;  %v7141_v35 = vld [vmem:[#allocation94_spill] sm:$0xff] }
 0x38a   :  { %2773 = vmatpush2.bf16.msra.mxu0 %v7134_v2  ;;  %2815 = vmatprep.subr.bf16.mxu1 %v7110_v26  ;;  %v7142_v26 = vld [vmem:[#allocation95_spill] sm:$0xff] }
 0x38b   :  { %2774 = vmatprep.subr.bf16.mxu0 %v7135_v9 }
 0x38d   :  { %2816 = vmatpush2.bf16.msra.mxu1 %v7111_v48 }
 0x38e   :  { %2775 = vmatpush2.bf16.msra.mxu0 %v7136_v11  ;;  %2817 = vmatprep.subr.bf16.mxu1 %v7112_v59  ;;  %v7145_v59 = vld [vmem:[#allocation39_spill] sm:$0xff] }
 0x38f   :  { %2776 = vmatprep.subr.bf16.mxu0 %v7137_v45 }
 0x391   :  { %2818 = vmatpush2.bf16.msra.mxu1 %v6066_v62  ;;  %v7143_v62 = vld [vmem:[#allocation43_spill] sm:$0xff] }
 0x392   :  { %2777 = vmatpush2.bf16.msra.mxu0 %v7138_v3  ;;  %2819 = vmatprep.subr.bf16.mxu1 %v6071_v61  ;;  %v1649_v48 = vadd.f32 %v7143_v62, %v5915_v18  ;;  %v7144_v61 = vld [vmem:[#allocation96_spill] sm:$0xff]  ;;  %v7150_v62 = vld [vmem:[#allocation99_spill] sm:$0xff] }
 0x393   :  { %2778 = vmatprep.subr.bf16.mxu0 %v7139_v15 }
 0x395   :  { %2820 = vmatpush2.bf16.msra.mxu1 %v6078_v39  ;;  %v1645_v39 = vadd.f32 %v7145_v59, %v5915_v18  ;;  %v6538_v59 = vld [vmem:[#allocation10 + $0x174] ss:$8 sps:$4 sm:$0xff]  }
 0x396   :  { %2779 = vmatpush2.bf16.msra.mxu0 %v7140_v22  ;;  %2821 = vmatprep.subr.bf16.mxu1 %v6083_v42  ;;  %v7147_v42 = vld [vmem:[#allocation45_spill] sm:$0xff] }
 0x397   :  { %2780 = vmatprep.subr.bf16.mxu0 %v7141_v35  ;;  %v7151_v18 = vld [vmem:[#allocation93_spill] sm:$0xff] }
 0x399   :  { %2822 = vmatpush2.bf16.msra.mxu1 %v6090_v8  ;;  %v1692_v8 = vadd.f32 %v7147_v42, %v1649_v48  ;;  %v4980_v48 = vld [vmem:[#allocation10 + $0x1e4] ss:$8 sps:$4 sm:$0xff]  }
 0x39a   :  { %2781 = vmatpush2.bf16.msra.mxu0 %v7142_v26  ;;  %2823 = vmatprep.subr.bf16.mxu1 %v7113_v56  ;;  %v1688_v56 = vadd.f32 %v7149_v30, %v1645_v39  ;;  %v6560_v30 = vld [vmem:[#allocation10 + $0x154] ss:$8 sps:$4 sm:$0xff]   ;;  %v1734_v39 = vpop.f32.mrf.mxu1 }
 0x39b   :  { %2782 = vmatprep.subr.bf16.mxu0 %v7144_v61  ;;  %v1805_v6 = vmax.f32 %v1692_v8, 0.0 }
 0x39c   :  { %v6640_v42 = vpop.f32.mrf.mxu1 }
 0x39d   :  { %2824 = vmatpush2.bf16.msra.mxu1 %v7115_v10  ;;  %v1791_v10 = vmax.f32 %v1688_v56, 0.0  ;;  %v4984_v56 = vld [vmem:[#allocation10 + $0x1d4] ss:$8 sps:$4 sm:$0xff]  }
 0x39e   :  { %2783 = vmatpush2.bf16.msra.mxu0 %v7146_v31  ;;  %2825 = vmatprep.subr.bf16.mxu1 %v6107_v21  ;;  %v6543_v21 = vld [vmem:[#allocation10 + $0x170] ss:$8 sps:$4 sm:$0xff]  }
 0x39f   :  { %2784 = vmatprep.subr.bf16.mxu0 %v7148_v57 }
 0x3a1   :  { %2826 = vmatpush2.bf16.msra.mxu1 %v6117_v17  ;;  %v6548_v17 = vld [vmem:[#allocation10 + $0x164] ss:$8 sps:$4 sm:$0xff]  }
 0x3a2   :  { %2785 = vmatpush2.bf16.msra.mxu0 %v7150_v62  ;;  %2827 = vmatprep.subr.bf16.mxu1 %v6122_v52  ;;  %v6551_v52 = vpack.c.bf16 %v1805_v6, %v1791_v10  ;;  %v4956_v6 = vld [vmem:[#allocation10 + $0x40] ss:$8 sps:$4 sm:$0xff]   ;;  %v4986_v10 = vld [vmem:[#allocation10 + $0x1d0] ss:$8 sps:$4 sm:$0xff]  }
 0x3a3   :  { %2840 = vmatprep.subr.bf16.mxu0 %v6538_v59 }
 0x3a5   :  { %2787 = vmatmul.mubr.bf16.vlgmr.msra.gmra.mxu0 %v7151_v18  ;;  %2828 = vmatpush2.bf16.msra.mxu1 %v6130_v44  ;;  %v6556_v44 = vld [vmem:[#allocation10 + $0x160] ss:$8 sps:$4 sm:$0xff]  }
 0x3a6   :  { %2841 = vmatpush1.bf16.msra.mxu0 %v6543_v21  ;;  %2872 = vmatprep.mubr.bf16.mxu0 %v6463_v58 }
 0x3a7   :  { %2883 = vmatprep.subr.bf16.mxu1 %v6135_v27  ;;  %2842 = vmatprep.subr.bf16.mxu0 %v6548_v17  ;;  %v6564_v27 = vld [vmem:[#allocation10 + $0x150] ss:$8 sps:$4 sm:$0xff]  }
 0x3a8   :  { %2830 = vmatmul.mubr.bf16.vlgmr.msra.gmra.mxu1 %v7091_v34  ;;  %v6568_v34 = vld [vmem:[#allocation10 + $0x144] ss:$8 sps:$4 sm:$0xff]  }
 0x3a9   :  { %2884 = vmatpush1.bf16.msra.mxu1 %v6142_v55  ;;  %2915 = vmatprep.mubr.bf16.mxu1 %v6551_v52  ;;  %v7157_v55 = vld [vmem:[#allocation55_spill] sm:$0xff] }
 0x3aa   :  { %2843 = vmatpush1.bf16.msra.mxu0 %v6556_v44  ;;  %2885 = vmatprep.subr.bf16.mxu1 %v7117_v20  ;;  %v4958_v20 = vld [vmem:[#allocation10 + $0x140] ss:$8 sps:$4 sm:$0xff]  }
 0x3ab   :  { %2844 = vmatprep.subr.bf16.mxu0 %v6560_v30 }
 0x3ad   :  { %2886 = vmatpush1.bf16.msra.mxu1 %v7118_v41  ;;  %v4959_v41 = vld [vmem:[#allocation10 + $0x30] ss:$8 sps:$4 sm:$0xff]  }
 0x3ae   :  { %2845 = vmatpush1.bf16.msra.mxu0 %v6564_v27  ;;  %2887 = vmatprep.subr.bf16.mxu1 %v7119_v50  ;;  %v4960_v50 = vld [vmem:[#allocation10 + $0x134] ss:$8 sps:$4 sm:$0xff]  }
 0x3af   :  { %2846 = vmatprep.subr.bf16.mxu0 %v6568_v34 }
 0x3b1   :  { %2888 = vmatpush1.bf16.msra.mxu1 %v7120_v40  ;;  %v4961_v40 = vld [vmem:[#allocation10 + $0x24] ss:$8 sps:$4 sm:$0xff]  }
 0x3b2   :  { %2847 = vmatpush1.bf16.msra.mxu0 %v5988_v47  ;;  %2889 = vmatprep.subr.bf16.mxu1 %v7121_v25  ;;  %v7152_v47 = vld [vmem:[#allocation49_spill] sm:$0xff] }
 0x3b3   :  { %2848 = vmatprep.subr.bf16.mxu0 %v5994_v5  ;;  %v7153_v5 = vld [vmem:[#allocation51_spill] sm:$0xff]  ;;  %v4962_v25 = vld [vmem:[#allocation10 + $0x130] ss:$8 sps:$4 sm:$0xff]  }
 0x3b5   :  { %2890 = vmatpush1.bf16.msra.mxu1 %v7122_v37  ;;  %v4963_v37 = vld [vmem:[#allocation10 + $0x20] ss:$8 sps:$4 sm:$0xff]  }
 0x3b6   :  { %2849 = vmatpush1.bf16.msra.mxu0 %v6002_v51  ;;  %2891 = vmatprep.subr.bf16.mxu1 %v7123_v63  ;;  %v7154_v51 = vld [vmem:[#allocation52_spill] sm:$0xff]  ;;  %v4964_v63 = vld [vmem:[#allocation10 + $0x124] ss:$8 sps:$4 sm:$0xff]  }
 0x3b7   :  { %2850 = vmatprep.subr.bf16.mxu0 %v6008_v28  ;;  %v7155_v28 = vld [vmem:[#allocation53_spill] sm:$0xff] }
 0x3b9   :  { %2892 = vmatpush1.bf16.msra.mxu1 %v7124_v49  ;;  %v4965_v49 = vld [vmem:[#allocation10 + $0x14] ss:$8 sps:$4 sm:$0xff]  }
 0x3ba   :  { %2851 = vmatpush1.bf16.msra.mxu0 %v6014_v32  ;;  %2893 = vmatprep.subr.bf16.mxu1 %v7125_v23  ;;  %v7156_v32 = vld [vmem:[#allocation54_spill] sm:$0xff] }
 0x3bb   :  { %2852 = vmatprep.subr.bf16.mxu0 %v7061_v43  ;;  %v7159_v43 = vld [vmem:[#allocation64_spill] sm:$0xff]  ;;  %v4966_v23 = vld [vmem:[#allocation10 + $0x120] ss:$8 sps:$4 sm:$0xff]  }
 0x3bd   :  { %2894 = vmatpush1.bf16.msra.mxu1 %v7126_v29  ;;  %v4967_v29 = vld [vmem:[#allocation10 + $0x10] ss:$8 sps:$4 sm:$0xff]  }
 0x3be   :  { %2853 = vmatpush1.bf16.msra.mxu0 %v7062_v0  ;;  %2895 = vmatprep.subr.bf16.mxu1 %v7127_v38  ;;  %v7160_v0 = vld [vmem:[#allocation65_spill] sm:$0xff] }
 0x3bf   :  { %2854 = vmatprep.subr.bf16.mxu0 %v7063_v19  ;;  %v4949_v19 = vld [vmem:[#allocation10 + $0x74] ss:$8 sps:$4 sm:$0xff]  }
 0x3c0   :  { %v4968_v38 = vld [vmem:[#allocation10 + $0x114] ss:$8 sps:$4 sm:$0xff]  }
 0x3c1   :  { %2896 = vmatpush1.bf16.msra.mxu1 %v7128_v16  ;;  %v4969_v16 = vld [vmem:[#allocation10 + $0x4] ss:$8 sps:$4 sm:$0xff]  }
 0x3c2   :  { %2855 = vmatpush1.bf16.msra.mxu0 %v7064_v7  ;;  %2897 = vmatprep.subr.bf16.mxu1 %v7129_v33  ;;  %v4950_v7 = vld [vmem:[#allocation10 + $0x70] ss:$8 sps:$4 sm:$0xff]   ;;  %v6634_v33 = vpop.f32.mrf.mxu0 }
 0x3c3   :  { %2856 = vmatprep.subr.bf16.mxu0 %v7065_v12  ;;  %v4951_v12 = vld [vmem:[#allocation10 + $0x64] ss:$8 sps:$4 sm:$0xff]  }
 0x3c5   :  { %2898 = vmatpush1.bf16.msra.mxu1 %v7130_v36  ;;  %v4970_v36 = vld [vmem:[#allocation10 + $0x110] ss:$8 sps:$4 sm:$0xff]  }
 0x3c6   :  { %2857 = vmatpush2.bf16.msra.mxu0 %v7066_v14  ;;  %2899 = vmatprep.subr.bf16.mxu1 %v7131_v1  ;;  %v7158_v14 = vld [vmem:[#allocation56_spill] sm:$0xff]  ;;  %v6636_v1 = vpop.f32.mrf.mxu0 }
 0x3c7   :  { %2858 = vmatprep.subr.bf16.mxu0 %v7152_v47 }
 0x3c9   :  { %2900 = vmatpush2.bf16.msra.mxu1 %v7132_v46  ;;  %v4971_v46 = vld [vmem:[#allocation10] ss:$8 sps:$4 sm:$0xff]  }
 0x3ca   :  { %2859 = vmatpush2.bf16.msra.mxu0 %v7153_v5  ;;  %2901 = vmatprep.subr.bf16.mxu1 %v7133_v54  ;;  %v4972_v54 = vld [vmem:[#allocation10 + $0x104] ss:$8 sps:$4 sm:$0xff]   ;;  %v4991_v5 = vld [vmem:[#allocation10 + $0xb0] ss:$8 sps:$4 sm:$0xff]  }
 0x3cb   :  { %2860 = vmatprep.subr.bf16.mxu0 %v7154_v51  ;;  %v4992_v51 = vld [vmem:[#allocation10 + $0x1b4] ss:$8 sps:$4 sm:$0xff]  }
 0x3cd   :  { %2902 = vmatpush2.bf16.msra.mxu1 %v7134_v2  ;;  %v4973_v2 = vld [vmem:[#allocation10 + $0xf4] ss:$8 sps:$4 sm:$0xff]  }
 0x3ce   :  { %2861 = vmatpush2.bf16.msra.mxu0 %v7155_v28  ;;  %2903 = vmatprep.subr.bf16.mxu1 %v7135_v9  ;;  %v4974_v9 = vld [vmem:[#allocation10 + $0x100] ss:$8 sps:$4 sm:$0xff]  }
 0x3cf   :  { %2862 = vmatprep.subr.bf16.mxu0 %v7156_v32  ;;  %v7162_v28 = vld [vmem:[#allocation31_spill] sm:$0xff] }
 0x3d1   :  { %2904 = vmatpush2.bf16.msra.mxu1 %v7136_v11  ;;  %v2446_v11 = vpop.f32.mrf.mxu0 }
 0x3d2   :  { %2863 = vmatpush2.bf16.msra.mxu0 %v7157_v55  ;;  %2905 = vmatprep.subr.bf16.mxu1 %v7137_v45  ;;  %v4975_v45 = vld [vmem:[#allocation10 + $0xf0] ss:$8 sps:$4 sm:$0xff]   ;;  %v4993_v55 = vld [vmem:[#allocation10 + $0xa4] ss:$8 sps:$4 sm:$0xff]  }
 0x3d3   :  { %2864 = vmatprep.subr.bf16.mxu0 %v7158_v14  ;;  %v7163_v14 = vld [vmem:[#allocation21_spill] sm:$0xff] }
 0x3d5   :  { %2906 = vmatpush2.bf16.msra.mxu1 %v7138_v3  ;;  %v4976_v3 = vld [vmem:[#allocation10 + $0x1f4] ss:$8 sps:$4 sm:$0xff]  }
 0x3d6   :  { %2865 = vmatpush2.bf16.msra.mxu0 %v7079_v24  ;;  %2907 = vmatprep.subr.bf16.mxu1 %v7139_v15  ;;  %v7161_v24 = vld [vmem:[#allocation41_spill] sm:$0xff]  ;;  %v4977_v15 = vld [vmem:[#allocation10 + $0xe4] ss:$8 sps:$4 sm:$0xff]  }
 0x3d7   :  { %2866 = vmatprep.subr.bf16.mxu0 %v7080_v13  ;;  %v4952_v13 = vld [vmem:[#allocation10 + $0x60] ss:$8 sps:$4 sm:$0xff]  }
 0x3d9   :  { %2908 = vmatpush2.bf16.msra.mxu1 %v7140_v22  ;;  %v4978_v22 = vld [vmem:[#allocation10 + $0x1f0] ss:$8 sps:$4 sm:$0xff]  }
 0x3da   :  { %2867 = vmatpush2.bf16.msra.mxu0 %v7081_v53  ;;  %2909 = vmatprep.subr.bf16.mxu1 %v7141_v35  ;;  %v4953_v53 = vld [vmem:[#allocation10 + $0x54] ss:$8 sps:$4 sm:$0xff]   ;;  %v6638_v35 = vpop.f32.mrf.mxu0 }
 0x3db   :  { %2868 = vmatprep.subr.bf16.mxu0 %v7082_v4  ;;  %v4954_v4 = vld [vmem:[#allocation10 + $0x50] ss:$8 sps:$4 sm:$0xff]  }
 0x3dc   :  { %v2450_v8 = vpop.f32.mrf.mxu0 }
 0x3dd   :  { %2910 = vmatpush2.bf16.msra.mxu1 %v7142_v26  ;;  %v4979_v26 = vld [vmem:[#allocation10 + $0xe0] ss:$8 sps:$4 sm:$0xff]  }
 0x3de   :  { %2869 = vmatpush2.bf16.msra.mxu0 %v7083_v60  ;;  %2911 = vmatprep.subr.bf16.mxu1 %v7144_v61  ;;  %v4955_v60 = vld [vmem:[#allocation10 + $0x44] ss:$8 sps:$4 sm:$0xff]   ;;  %v4981_v61 = vld [vmem:[#allocation10 + $0xd4] ss:$8 sps:$4 sm:$0xff]  }
 0x3df   :  { %2870 = vmatprep.subr.bf16.mxu0 %v7159_v43  ;;  %v1735_v43 = vadd.f32 %v1734_v39, %v7163_v14  ;;  %v5007_v39 = vld [vmem:[#allocation10 + $0x270] ss:$8 sps:$4 sm:$0xff]  }
 0x3e1   :  { %2912 = vmatpush2.bf16.msra.mxu1 %v7146_v31  ;;  %v4982_v31 = vld [vmem:[#allocation10 + $0x1e0] ss:$8 sps:$4 sm:$0xff]  }
 0x3e2   :  { %2871 = vmatpush2.bf16.msra.mxu0 %v7160_v0  ;;  %2913 = vmatprep.subr.bf16.mxu1 %v7148_v57  ;;  %v4983_v57 = vld [vmem:[#allocation10 + $0xd0] ss:$8 sps:$4 sm:$0xff]  }
 0x3e3   :  { %2926 = vmatprep.subr.bf16.mxu0 %v4949_v19 }
 0x3e5   :  { %2873 = vmatmul.mubr.bf16.vlgmr.msra.gmra.mxu0 %v7151_v18  ;;  %2914 = vmatpush2.bf16.msra.mxu1 %v7150_v62  ;;  %v4985_v62 = vld [vmem:[#allocation10 + $0xc4] ss:$8 sps:$4 sm:$0xff]  }
 0x3e6   :  { %2927 = vmatpush1.bf16.msra.mxu0 %v4950_v7  ;;  %2958 = vmatprep.mubr.bf16.mxu0 %v6463_v58  ;;  %v4957_v58 = vld [vmem:[#allocation10 + $0x34] ss:$8 sps:$4 sm:$0xff]   ;;  %v4994_v7 = vld [vmem:[#allocation10 + $0x1b0] ss:$8 sps:$4 sm:$0xff]  }
 0x3e7   :  { %2967 = vmatprep.subr.bf16.mxu1 %v6538_v59  ;;  %2928 = vmatprep.subr.bf16.mxu0 %v4951_v12  ;;  %v6642_v59 = vpop.f32.mrf.mxu0  ;;  %v7164_v12 = vld [vmem:[#allocation58_spill] sm:$0xff] }
 0x3e8   :  { %2916 = vmatmul.mubr.bf16.vlgmr.msra.gmra.mxu1 %v7161_v24 }
 0x3e9   :  { %2968 = vmatpush1.bf16.msra.mxu1 %v6543_v21  ;;  %2999 = vmatprep.mubr.bf16.mxu1 %v6551_v52  ;;  %v2489_v21 = vpop.f32.mrf.mxu1  ;;  %v4988_v52 = vld [vmem:[#allocation10 + $0x1c4] ss:$8 sps:$4 sm:$0xff]  }
 0x3ea   :  { %2929 = vmatpush1.bf16.msra.mxu0 %v4952_v13  ;;  %2969 = vmatprep.subr.bf16.mxu1 %v6548_v17  ;;  %v4987_v17 = vld [vmem:[#allocation10 + $0xc0] ss:$8 sps:$4 sm:$0xff]   ;;  %v1731_v13 = vadd.f32 %v7164_v12, %v7163_v14  ;;  %v4822_v14 = vld [vmem:[#allocation11 + $0x58] sm:$0xff]  }
 0x3eb   :  { %2930 = vmatprep.subr.bf16.mxu0 %v4953_v53  ;;  %v6649_v47 = vpop.f32.mrf.mxu1  ;;  %v4823_v12 = vld [vmem:[#allocation11 + $0x18] sm:$0xff]  }
 0x3ed   :  { %2970 = vmatpush1.bf16.msra.mxu1 %v6556_v44  ;;  %v4989_v44 = vld [vmem:[#allocation10 + $0xb4] ss:$8 sps:$4 sm:$0xff]   ;;  %v2493_v53 = vpop.f32.mrf.mxu1 }
 0x3ee   :  { %2931 = vmatpush1.bf16.msra.mxu0 %v4954_v4  ;;  %2971 = vmatprep.subr.bf16.mxu1 %v6560_v30  ;;  %v2532_v30 = vpop.f32.mrf.mxu0  ;;  %v4995_v4 = vld [vmem:[#allocation10 + $0xa0] ss:$8 sps:$4 sm:$0xff]  }
 0x3ef   :  { %2932 = vmatprep.subr.bf16.mxu0 %v4955_v60  ;;  %v4996_v60 = vld [vmem:[#allocation10 + $0x1a4] ss:$8 sps:$4 sm:$0xff]  }
 0x3f0   :  { %v6656_v0 = vpop.f32.mrf.mxu0 }
 0x3f1   :  { %2972 = vmatpush1.bf16.msra.mxu1 %v6564_v27  ;;  %v4990_v27 = vld [vmem:[#allocation10 + $0x1c0] ss:$8 sps:$4 sm:$0xff]  }
 0x3f2   :  { %2933 = vmatpush1.bf16.msra.mxu0 %v4956_v6  ;;  %2973 = vmatprep.subr.bf16.mxu1 %v6568_v34  ;;  %v6647_v34 = vld [vmem:[%s6764_s6] sm:$0x3] }
 0x3f3   :  { %2934 = vmatprep.subr.bf16.mxu0 %v4957_v58  ;;  %v6653_v32 = vrot.slane %v6647_v34, %v7162_v28  ;;  %v4997_v58 = vld [vmem:[#allocation10 + $0x94] ss:$8 sps:$4 sm:$0xff]   ;;  %v4821_v28 = vld [vmem:[#allocation11 + $0x20] sm:$0xff]  }
 0x3f5   :  { %2974 = vmatpush1.bf16.msra.mxu1 %v4958_v20  ;;  %v2451_v19 = vadd.f32 %v2450_v8, %v6653_v32  ;;  %v2447_v6 = vadd.f32 %v2446_v11, %v6653_v32  ;;  %v1778_v20 = vadd.f32 %v6634_v33, %v1735_v43  ;;  %v6664_v33 = vpop.f32.mrf.mxu1  ;;  %v5014_v43 = vld [vmem:[#allocation10 + $0x234] ss:$8 sps:$4 sm:$0xff]  }
 0x3f6   :  { %2935 = vmatpush1.bf16.msra.mxu0 %v4959_v41  ;;  %2975 = vmatprep.subr.bf16.mxu1 %v4960_v50  ;;  %v2536_v41 = vpop.f32.mrf.mxu0 }
 0x3f7   :  { %2936 = vmatprep.subr.bf16.mxu0 %v4961_v40  ;;  %v2494_v50 = vadd.f32 %v2493_v53, %v2451_v19  ;;  %v4998_v40 = vld [vmem:[#allocation10 + $0x1a0] ss:$8 sps:$4 sm:$0xff]  }
 0x3f9   :  { %2976 = vmatpush1.bf16.msra.mxu1 %v4962_v25  ;;  %v7165_v25 = vld [vmem:[#allocation47_spill] sm:$0xff] }
 0x3fa   :  { %2937 = vmatpush1.bf16.msra.mxu0 %v4963_v37  ;;  %2977 = vmatprep.subr.bf16.mxu1 %v4964_v63  ;;  %v1774_v37 = vadd.f32 %v7165_v25, %v1731_v13  ;;  %v4999_v63 = vld [vmem:[#allocation10 + $0x90] ss:$8 sps:$4 sm:$0xff]   ;;  %v7166_v13 = vld [vmem:[#allocation30_spill] sm:$0xff] }
 0x3fb   :  { %2938 = vmatprep.subr.bf16.mxu0 %v4965_v49  ;;  %v5000_v49 = vld [vmem:[#allocation10 + $0x194] ss:$8 sps:$4 sm:$0xff]   ;;  %v6678_v53 = vrot.slane %v6647_v34, %v7166_v13  ;;  %v5017_v25 = vld [vmem:[#allocation10 + $0x220] ss:$8 sps:$4 sm:$0xff]   ;;  %v5032_v13 = vld [vmem:[#allocation10 + $0x2a4] ss:$8 sps:$4 sm:$0xff]  }
 0x3fd   :  { %2978 = vmatpush1.bf16.msra.mxu1 %v4966_v23  ;;  %v2490_v23 = vadd.f32 %v2489_v21, %v2447_v6  ;;  %v5010_v21 = vld [vmem:[#allocation10 + $0x254] ss:$8 sps:$4 sm:$0xff]   ;;  %v5016_v6 = vld [vmem:[#allocation10 + $0x224] ss:$8 sps:$4 sm:$0xff]   ;;  %v2445_v34 = vadd.f32 %v6636_v1, %v6678_v53  ;;  %v5019_v1 = vld [vmem:[#allocation10 + $0x210] ss:$8 sps:$4 sm:$0xff]  }
 0x3fe   :  { %2939 = vmatpush1.bf16.msra.mxu0 %v4967_v29  ;;  %2979 = vmatprep.subr.bf16.mxu1 %v4968_v38  ;;  %v2537_v29 = vadd.f32 %v2536_v41, %v2494_v50  ;;  %v5001_v38 = vld [vmem:[#allocation10 + $0x84] ss:$8 sps:$4 sm:$0xff]  }
 0x3ff   :  { %2940 = vmatprep.subr.bf16.mxu0 %v4969_v16  ;;  %v1807_v16 = vmax.f32 %v1778_v20, 0.0 }
 0x400   :  { %v3059_v11 = vmax.f32 %v2537_v29, 0.0 }
 0x401   :  { %2980 = vmatpush1.bf16.msra.mxu1 %v4970_v36  ;;  %v2533_v36 = vadd.f32 %v2532_v30, %v2490_v23  ;;  %v5011_v30 = vld [vmem:[#allocation10 + $0x250] ss:$8 sps:$4 sm:$0xff]   ;;  %v5018_v23 = vld [vmem:[#allocation10 + $0x214] ss:$8 sps:$4 sm:$0xff]  }
 0x402   :  { %2941 = vmatpush1.bf16.msra.mxu0 %v4971_v46  ;;  %2981 = vmatprep.subr.bf16.mxu1 %v4972_v54  ;;  %v5002_v46 = vld [vmem:[#allocation10 + $0x190] ss:$8 sps:$4 sm:$0xff]   ;;  %v1793_v54 = vmax.f32 %v1774_v37, 0.0  ;;  %v4826_v37 = vld [vmem:[#allocation11 + $0x48] sm:$0xff]  }
 0x403   :  { %2942 = vmatprep.subr.bf16.mxu0 %v4973_v2  ;;  %v5003_v2 = vld [vmem:[#allocation10 + $0x80] ss:$8 sps:$4 sm:$0xff]  }
 0x405   :  { %2982 = vmatpush1.bf16.msra.mxu1 %v4974_v9  ;;  %v5004_v9 = vld [vmem:[#allocation10 + $0x184] ss:$8 sps:$4 sm:$0xff]  }
 0x406   :  { %2943 = vmatpush2.bf16.msra.mxu0 %v4975_v45  ;;  %2983 = vmatprep.subr.bf16.mxu1 %v4976_v3  ;;  %v5005_v45 = vld [vmem:[#allocation10 + $0x274] ss:$8 sps:$4 sm:$0xff]  }
 0x407   :  { %2944 = vmatprep.subr.bf16.mxu0 %v4977_v15  ;;  %v4814_v3 = vld [vmem:[#allocation11 + $0x78] sm:$0xff]   ;;  %v1821_v15 = vpack.c.bf16 %v1807_v16, %v1793_v54  ;;  %v4827_v16 = vld [vmem:[#allocation11 + $0x8] sm:$0xff]   ;;  %v4828_v54 = vld [vmem:[#allocation11 + $0x40] sm:$0xff]  }
 0x409   :  { %2984 = vmatpush2.bf16.msra.mxu1 %v4978_v22  ;;  %v3050_v22 = vmax.f32 %v2533_v36, 0.0  ;;  %v2488_v36 = vadd.f32 %v6640_v42, %v2445_v34 }
 0x40a   :  { %2945 = vmatpush2.bf16.msra.mxu0 %v4979_v26  ;;  %2985 = vmatprep.subr.bf16.mxu1 %v4980_v48  ;;  %v5006_v26 = vld [vmem:[#allocation10 + $0x180] ss:$8 sps:$4 sm:$0xff]   ;;  %v4815_v48 = vld [vmem:[#allocation11 + $0x38] sm:$0xff]  }
 0x40b   :  { %2946 = vmatprep.subr.bf16.mxu0 %v4981_v61  ;;  %v2575_v61 = vpop.f32.mrf.mxu1  ;;  %v3068_v8 = vpack.c.bf16 %v3059_v11, %v3050_v22  ;;  %v2531_v11 = vadd.f32 %v6642_v59, %v2488_v36  ;;  %v4830_v22 = vld [vmem:[#allocation11 + $0xf8] sm:$0xff]   ;;  %v4832_v59 = vld [vmem:[#allocation11 + $0xf0] sm:$0xff]  }
 0x40d   :  { %2986 = vmatpush2.bf16.msra.mxu1 %v4982_v31  ;;  %v4816_v31 = vld [vmem:[#allocation11 + $0x70] sm:$0xff]  }
 0x40e   :  { %2947 = vmatpush2.bf16.msra.mxu0 %v4983_v57  ;;  %2987 = vmatprep.subr.bf16.mxu1 %v4984_v56  ;;  %v5008_v57 = vld [vmem:[#allocation10 + $0x264] ss:$8 sps:$4 sm:$0xff]   ;;  %v4817_v56 = vld [vmem:[#allocation11 + $0x30] sm:$0xff]  }
 0x40f   :  { %2948 = vmatprep.subr.bf16.mxu0 %v4985_v62  ;;  %v6668_v62 = vpop.f32.mrf.mxu1 }
 0x411   :  { %2988 = vmatpush2.bf16.msra.mxu1 %v4986_v10  ;;  %v4818_v10 = vld [vmem:[#allocation11 + $0x68] sm:$0xff]  }
 0x412   :  { %2949 = vmatpush2.bf16.msra.mxu0 %v4987_v17  ;;  %2989 = vmatprep.subr.bf16.mxu1 %v4988_v52  ;;  %v6670_v17 = vpop.f32.mrf.mxu0  ;;  %v4819_v52 = vld [vmem:[#allocation11 + $0x28] sm:$0xff]  }
 0x413   :  { %2950 = vmatprep.subr.bf16.mxu0 %v4989_v44  ;;  %v2579_v44 = vpop.f32.mrf.mxu1 }
 0x414   :  { %v2580_v50 = vadd.f32 %v2579_v44, %v6653_v32  ;;  %v5027_v44 = vld [vmem:[#allocation10 + $0x2d0] ss:$8 sps:$4 sm:$0xff]  }
 0x415   :  { %2990 = vmatpush2.bf16.msra.mxu1 %v4990_v27  ;;  %v5012_v27 = vld [vmem:[#allocation10 + $0x244] ss:$8 sps:$4 sm:$0xff]  }
 0x416   :  { %2951 = vmatpush2.bf16.msra.mxu0 %v4991_v5  ;;  %2991 = vmatprep.subr.bf16.mxu1 %v4992_v51  ;;  %v2618_v5 = vpop.f32.mrf.mxu0  ;;  %v6672_v51 = vpop.f32.mrf.mxu1 }
 0x417   :  { %2952 = vmatprep.subr.bf16.mxu0 %v4993_v55  ;;  %v5013_v55 = vld [vmem:[#allocation10 + $0x240] ss:$8 sps:$4 sm:$0xff]  }
 0x418   :  { %v6674_v19 = vpop.f32.mrf.mxu0 }
 0x419   :  { %2992 = vmatpush2.bf16.msra.mxu1 %v4994_v7  ;;  %v2661_v7 = vpop.f32.mrf.mxu1 }
 0x41a   :  { %2953 = vmatpush2.bf16.msra.mxu0 %v4995_v4  ;;  %2993 = vmatprep.subr.bf16.mxu1 %v4996_v60  ;;  %v5015_v4 = vld [vmem:[#allocation10 + $0x230] ss:$8 sps:$4 sm:$0xff]   ;;  %v2622_v20 = vpop.f32.mrf.mxu0 }
 0x41b   :  { %2954 = vmatprep.subr.bf16.mxu0 %v4997_v58  ;;  %v4824_v60 = vld [vmem:[#allocation11 + $0x50] sm:$0xff]   ;;  %v2449_v58 = vadd.f32 %v6638_v35, %v6678_v53  ;;  %v6682_v41 = vpop.f32.mrf.mxu1 }
 0x41d   :  { %2994 = vmatpush2.bf16.msra.mxu1 %v4998_v40  ;;  %v4825_v40 = vld [vmem:[#allocation11 + $0x10] sm:$0xff]   ;;  %v2492_v35 = vadd.f32 %v6649_v47, %v2449_v58  ;;  %v2665_v29 = vpop.f32.mrf.mxu1  ;;  %v4829_v47 = vld [vmem:[#allocation11] sm:$0xff]  }
 0x41e   :  { %2955 = vmatpush2.bf16.msra.mxu0 %v4999_v63  ;;  %2995 = vmatprep.subr.bf16.mxu1 %v5000_v49  ;;  %v2576_v63 = vadd.f32 %v2575_v61, %v6653_v32  ;;  %v2623_v49 = vadd.f32 %v2622_v20, %v2580_v50  ;;  %v4831_v61 = vld [vmem:[#allocation11 + $0xb8] sm:$0xff]   ;;  %v5033_v20 = vld [vmem:[#allocation10 + $0x2a0] ss:$8 sps:$4 sm:$0xff]  }
 0x41f   :  { %2956 = vmatprep.subr.bf16.mxu0 %v5001_v38  ;;  %v4842_v50 = vld [vmem:[#allocation11 + $0xc8] sm:$0xff]  }
 0x420   :  { %v2619_v38 = vadd.f32 %v2618_v5, %v2576_v63  ;;  %v5029_v5 = vld [vmem:[#allocation10 + $0x2c0] ss:$8 sps:$4 sm:$0xff]  }
 0x421   :  { %2996 = vmatpush2.bf16.msra.mxu1 %v5002_v46  ;;  %v2535_v46 = vadd.f32 %v6656_v0, %v2492_v35  ;;  %v3049_v0 = vmax.f32 %v2531_v11, 0.0  ;;  %v5036_v35 = vld [vmem:[#allocation10 + $0x284] ss:$8 sps:$4 sm:$0xff]  }
 0x422   :  { %2957 = vmatpush2.bf16.msra.mxu0 %v5003_v2  ;;  %2997 = vmatprep.subr.bf16.mxu1 %v5004_v9  ;;  %v2666_v2 = vadd.f32 %v2665_v29, %v2623_v49  ;;  %v5020_v9 = vld [vmem:[#allocation10 + $0x204] ss:$8 sps:$4 sm:$0xff]   ;;  %v5035_v49 = vld [vmem:[#allocation10 + $0x290] ss:$8 sps:$4 sm:$0xff]  }
 0x423   :  { %3008 = vmatprep.subr.bf16.mxu0 %v5005_v45  ;;  %v2662_v45 = vadd.f32 %v2661_v7, %v2619_v38  ;;  %v4840_v7 = vld [vmem:[#allocation11 + $0xd0] sm:$0xff]   ;;  %v4846_v29 = vld [vmem:[#allocation11 + $0x178] sm:$0xff]  }
 0x424   :  { %v3061_v42 = vmax.f32 %v2666_v2, 0.0  ;;  %v4848_v2 = vld [vmem:[#allocation11 + $0x170] sm:$0xff]  }
 0x425   :  { %2959 = vmatmul.mubr.bf16.vlgmr.msra.gmra.mxu0 %v7151_v18  ;;  %2998 = vmatpush2.bf16.msra.mxu1 %v5006_v26  ;;  %v5009_v18 = vld [vmem:[#allocation10 + $0x260] ss:$8 sps:$4 sm:$0xff]   ;;  %v5022_v26 = vld [vmem:[#allocation10 + $0x2f4] ss:$8 sps:$4 sm:$0xff]  }
 0x426   :  { %3009 = vmatpush1.bf16.msra.mxu0 %v5007_v39  ;;  %3040 = vmatprep.mubr.bf16.mxu0 %v1821_v15  ;;  %v5021_v15 = vld [vmem:[#allocation10 + $0x200] ss:$8 sps:$4 sm:$0xff]  }
 0x427   :  { %4310 = vmatprep.subr.bf16.mxu1 %v4814_v3  ;;  %3010 = vmatprep.subr.bf16.mxu0 %v5008_v57  ;;  %v3058_v3 = vmax.f32 %v2535_v46, 0.0  ;;  %v5024_v57 = vld [vmem:[#allocation10 + $0x2e4] ss:$8 sps:$4 sm:$0xff]   ;;  %v4847_v46 = vld [vmem:[#allocation11 + $0x138] sm:$0xff]  }
 0x428   :  { %3000 = vmatmul.mubr.bf16.vlgmr.msra.gmra.mxu1 %v7161_v24  ;;  %v4820_v24 = vld [vmem:[#allocation11 + $0x60] sm:$0xff]   ;;  %v6699_v34 = vpop.f32.mrf.mxu1 }
 0x429   :  { %4311 = vmatpush3.bf16.msra.mxu1 %v4815_v48  ;;  %3691 = vmatprep.mubr.bf16.mxu1 %v3068_v8  ;;  %v3052_v48 = vmax.f32 %v2662_v45, 0.0  ;;  %v3067_v39 = vpack.c.bf16 %v3058_v3, %v3049_v0 }
 0x42a   :  { %3011 = vmatpush1.bf16.msra.mxu0 %v5009_v18  ;;  %4312 = vmatprep.subr.bf16.mxu1 %v4816_v31  ;;  %v5023_v31 = vld [vmem:[#allocation10 + $0x2f0] ss:$8 sps:$4 sm:$0xff]   ;;  %v5025_v18 = vld [vmem:[#allocation10 + $0x2e0] ss:$8 sps:$4 sm:$0xff]  }
 0x42b   :  { %3012 = vmatprep.subr.bf16.mxu0 %v5010_v21  ;;  %v3070_v8 = vpack.c.bf16 %v3061_v42, %v3052_v48  ;;  %v5026_v21 = vld [vmem:[#allocation10 + $0x2d4] ss:$8 sps:$4 sm:$0xff]   ;;  %v4850_v48 = vld [vmem:[#allocation11 + $0x168] sm:$0xff]  }
 0x42c   :  { %v4864_v42 = vld [vmem:[#allocation11 + $0x1f0] sm:$0xff]  }
 0x42d   :  { %4313 = vmatpush3.bf16.msra.mxu1 %v4817_v56  ;;  %v4833_v56 = vld [vmem:[#allocation11 + $0xb0] sm:$0xff]  }
 0x42e   :  { %3013 = vmatpush1.bf16.msra.mxu0 %v5011_v30  ;;  %4314 = vmatprep.subr.bf16.mxu1 %v4818_v10  ;;  %v4834_v10 = vld [vmem:[#allocation11 + $0xe8] sm:$0xff]   ;;  %v4836_v30 = vld [vmem:[#allocation11 + $0xe0] sm:$0xff]  }
 0x42f   :  { %3014 = vmatprep.subr.bf16.mxu0 %v5012_v27  ;;  %v4837_v27 = vld [vmem:[#allocation11 + $0xa0] sm:$0xff]  }
 0x431   :  { %4315 = vmatpush3.bf16.msra.mxu1 %v4819_v52  ;;  %v4835_v52 = vld [vmem:[#allocation11 + $0xa8] sm:$0xff]  }
 0x432   :  { %3015 = vmatpush1.bf16.msra.mxu0 %v5013_v55  ;;  %4316 = vmatprep.subr.bf16.mxu1 %v4820_v24  ;;  %v5028_v24 = vld [vmem:[#allocation10 + $0x2c4] ss:$8 sps:$4 sm:$0xff]   ;;  %v5030_v55 = vld [vmem:[#allocation10 + $0x2b4] ss:$8 sps:$4 sm:$0xff]  }
 0x433   :  { %3016 = vmatprep.subr.bf16.mxu0 %v5014_v43  ;;  %v5031_v43 = vld [vmem:[#allocation10 + $0x2b0] ss:$8 sps:$4 sm:$0xff]  }
 0x435   :  { %4317 = vmatpush3.bf16.msra.mxu1 %v4821_v28  ;;  %v4838_v28 = vld [vmem:[#allocation11 + $0xd8] sm:$0xff]  }
 0x436   :  { %3017 = vmatpush1.bf16.msra.mxu0 %v5015_v4  ;;  %4318 = vmatprep.subr.bf16.mxu1 %v4822_v14  ;;  %v4839_v14 = vld [vmem:[#allocation11 + $0x98] sm:$0xff]   ;;  %v2578_v4 = vadd.f32 %v6668_v62, %v6678_v53  ;;  %v4843_v62 = vld [vmem:[#allocation11 + $0x88] sm:$0xff]  }
 0x437   :  { %3018 = vmatprep.subr.bf16.mxu0 %v5016_v6  ;;  %v2574_v6 = vadd.f32 %v6664_v33, %v6678_v53  ;;  %v4844_v33 = vld [vmem:[#allocation11 + $0xc0] sm:$0xff]  }
 0x438   :  { %v2621_v58 = vadd.f32 %v6674_v19, %v2578_v4  ;;  %v4871_v4 = vld [vmem:[#allocation11 + $0x198] sm:$0xff]  }
 0x439   :  { %4319 = vmatpush3.bf16.msra.mxu1 %v4823_v12  ;;  %v6692_v12 = vpop.f32.mrf.mxu0 }
 0x43a   :  { %3019 = vmatpush1.bf16.msra.mxu0 %v5017_v25  ;;  %4320 = vmatprep.subr.bf16.mxu1 %v4824_v60  ;;  %v4841_v60 = vld [vmem:[#allocation11 + $0x90] sm:$0xff]   ;;  %v2664_v63 = vadd.f32 %v6682_v41, %v2621_v58  ;;  %v4862_v41 = vld [vmem:[#allocation11 + $0x1f8] sm:$0xff]   ;;  %v2703_v58 = vadd.f32 %v6692_v12, %v6678_v53  ;;  %v4861_v12 = vld [vmem:[#allocation11 + $0x100] sm:$0xff]  }
 0x43b   :  { %3020 = vmatprep.subr.bf16.mxu0 %v5018_v23  ;;  %v5034_v25 = vld [vmem:[#allocation10 + $0x294] ss:$8 sps:$4 sm:$0xff]   ;;  %v2747_v23 = vpop.f32.mrf.mxu1 }
 0x43c   :  { %v3060_v36 = vmax.f32 %v2664_v63, 0.0 }
 0x43d   :  { %4321 = vmatpush3.bf16.msra.mxu1 %v4825_v40  ;;  %v2704_v40 = vpop.f32.mrf.mxu0 }
 0x43e   :  { %3021 = vmatpush1.bf16.msra.mxu0 %v5019_v1  ;;  %4322 = vmatprep.subr.bf16.mxu1 %v4826_v37  ;;  %v2617_v37 = vadd.f32 %v6670_v17, %v2574_v6  ;;  %v5037_v17 = vld [vmem:[#allocation10 + $0x280] ss:$8 sps:$4 sm:$0xff]   ;;  %v2705_v11 = vadd.f32 %v2704_v40, %v6653_v32  ;;  %v4872_v6 = vld [vmem:[#allocation11 + $0x1d0] sm:$0xff]  }
 0x43f   :  { %3022 = vmatprep.subr.bf16.mxu0 %v5020_v9  ;;  %v6703_v19 = vpop.f32.mrf.mxu0  ;;  %v4873_v40 = vld [vmem:[#allocation11 + $0x190] sm:$0xff]  }
 0x440   :  { %v2660_v38 = vadd.f32 %v6672_v51, %v2617_v37  ;;  %v4863_v51 = vld [vmem:[#allocation11 + $0x1b8] sm:$0xff]   ;;  %v4874_v37 = vld [vmem:[#allocation11 + $0x1c8] sm:$0xff]  }
 0x441   :  { %4323 = vmatpush3.bf16.msra.mxu1 %v4827_v16  ;;  %v4845_v16 = vld [vmem:[#allocation11 + $0x80] sm:$0xff]   ;;  %v2708_v1 = vpop.f32.mrf.mxu0 }
 0x442   :  { %3023 = vmatpush1.bf16.msra.mxu0 %v5021_v15  ;;  %4324 = vmatprep.subr.bf16.mxu1 %v4828_v54  ;;  %v6706_v54 = vpop.f32.mrf.mxu1  ;;  %v3051_v9 = vmax.f32 %v2660_v38, 0.0  ;;  %v2709_v15 = vadd.f32 %v2708_v1, %v6653_v32  ;;  %v4877_v38 = vld [vmem:[#allocation11 + $0x180] sm:$0xff]  }
 0x443   :  { %3024 = vmatprep.subr.bf16.mxu0 %v5022_v26 }
 0x444   :  { %v3069_v3 = vpack.c.bf16 %v3060_v36, %v3051_v9  ;;  %v2751_v26 = vpop.f32.mrf.mxu1  ;;  %v4878_v36 = vld [vmem:[#allocation11 + $0x238] sm:$0xff]  }
 0x445   :  { %4325 = vmatpush3.bf16.msra.mxu1 %v4829_v47  ;;  %v7167_v47 = vld [vmem:[#allocation60_spill] sm:$0xff] }
 0x446   :  { %3025 = vmatpush2.bf16.msra.mxu0 %v5023_v31  ;;  %4332 = vmatprep.subr.bf16.mxu1 %v4830_v22  ;;  %v4849_v22 = vld [vmem:[#allocation11 + $0x130] sm:$0xff]  }
 0x447   :  { %3026 = vmatprep.subr.bf16.mxu0 %v5024_v57  ;;  %v4865_v31 = vld [vmem:[#allocation11 + $0x1b0] sm:$0xff]   ;;  %v4851_v57 = vld [vmem:[#allocation11 + $0x128] sm:$0xff]  }
 0x448   :  { %3692 = vmatmul.mubr.bf16.vlgmr.msra.gmra.mxu1 %v3067_v39 }
 0x449   :  { %4333 = vmatpush3.bf16.msra.mxu1 %v4831_v61  ;;  %3732 = vmatprep.mubr.bf16.mxu1 %v3070_v8  ;;  %v2748_v61 = vadd.f32 %v2747_v23, %v2705_v11  ;;  %v4876_v23 = vld [vmem:[#allocation11 + $0x1c0] sm:$0xff]   ;;  %v4883_v11 = vld [vmem:[#allocation11 + $0x210] sm:$0xff]  }
 0x44a   :  { %3027 = vmatpush2.bf16.msra.mxu0 %v5025_v18  ;;  %4334 = vmatprep.subr.bf16.mxu1 %v4832_v59  ;;  %v2752_v59 = vadd.f32 %v2751_v26, %v2709_v15  ;;  %v4884_v15 = vld [vmem:[#allocation11 + $0x208] sm:$0xff]  }
 0x44b   :  { %3028 = vmatprep.subr.bf16.mxu0 %v5026_v21 }
 0x44d   :  { %4335 = vmatpush3.bf16.msra.mxu1 %v4833_v56  ;;  %v4866_v56 = vld [vmem:[#allocation11 + $0x1e8] sm:$0xff]  }
 0x44e   :  { %3029 = vmatpush2.bf16.msra.mxu0 %v5027_v44  ;;  %4336 = vmatprep.subr.bf16.mxu1 %v4834_v10  ;;  %v4852_v10 = vld [vmem:[#allocation11 + $0x160] sm:$0xff]  }
 0x44f   :  { %3030 = vmatprep.subr.bf16.mxu0 %v5028_v24  ;;  %v4853_v24 = vld [vmem:[#allocation11 + $0x120] sm:$0xff]  }
 0x451   :  { %4337 = vmatpush3.bf16.msra.mxu1 %v4835_v52  ;;  %v4867_v52 = vld [vmem:[#allocation11 + $0x1a8] sm:$0xff]  }
 0x452   :  { %3031 = vmatpush2.bf16.msra.mxu0 %v5029_v5  ;;  %4338 = vmatprep.subr.bf16.mxu1 %v4836_v30  ;;  %v4868_v5 = vld [vmem:[#allocation11 + $0x1e0] sm:$0xff]  }
 0x453   :  { %3032 = vmatprep.subr.bf16.mxu0 %v5030_v55  ;;  %v4869_v55 = vld [vmem:[#allocation11 + $0x1a0] sm:$0xff]  }
 0x455   :  { %4339 = vmatpush3.bf16.msra.mxu1 %v4837_v27  ;;  %v4854_v27 = vld [vmem:[#allocation11 + $0x158] sm:$0xff]  }
 0x456   :  { %3033 = vmatpush2.bf16.msra.mxu0 %v5031_v43  ;;  %4340 = vmatprep.subr.bf16.mxu1 %v4838_v28  ;;  %v4870_v43 = vld [vmem:[#allocation11 + $0x1d8] sm:$0xff]  }
 0x457   :  { %3034 = vmatprep.subr.bf16.mxu0 %v5032_v13  ;;  %v2707_v13 = vadd.f32 %v6703_v19, %v6678_v53  ;;  %v4875_v19 = vld [vmem:[#allocation11 + $0x188] sm:$0xff]  }
 0x459   :  { %4341 = vmatpush3.bf16.msra.mxu1 %v4839_v14  ;;  %v4855_v14 = vld [vmem:[#allocation11 + $0x118] sm:$0xff]  }
 0x45a   :  { %3035 = vmatpush2.bf16.msra.mxu0 %v5033_v20  ;;  %4342 = vmatprep.subr.bf16.mxu1 %v4840_v7  ;;  %v4856_v7 = vld [vmem:[#allocation11 + $0x150] sm:$0xff]   ;;  %v4858_v20 = vld [vmem:[#allocation11 + $0x148] sm:$0xff]  }
 0x45b   :  { %3036 = vmatprep.subr.bf16.mxu0 %v5034_v25  ;;  %v4859_v25 = vld [vmem:[#allocation11 + $0x108] sm:$0xff]  }
 0x45d   :  { %4343 = vmatpush3.bf16.msra.mxu1 %v4841_v60  ;;  %v4857_v60 = vld [vmem:[#allocation11 + $0x110] sm:$0xff]  }
 0x45e   :  { %3037 = vmatpush2.bf16.msra.mxu0 %v5035_v49  ;;  %4344 = vmatprep.subr.bf16.mxu1 %v4842_v50  ;;  %v2750_v50 = vadd.f32 %v6706_v54, %v2707_v13  ;;  %v4860_v49 = vld [vmem:[#allocation11 + $0x140] sm:$0xff]   ;;  %v4882_v54 = vld [vmem:[#allocation11 + $0x218] sm:$0xff]  }
 0x45f   :  { %3038 = vmatprep.subr.bf16.mxu0 %v5036_v35 }
 0x461   :  { %4345 = vmatpush3.bf16.msra.mxu1 %v4843_v62  ;;  %v2746_v62 = vadd.f32 %v6699_v34, %v2703_v58  ;;  %v7168_v34 = vmov 0.0  }
 0x462   :  { %3039 = vmatpush2.bf16.msra.mxu0 %v5037_v17  ;;  %4346 = vmatprep.subr.bf16.mxu1 %v4844_v33  ;;  %v4879_v17 = vld [vmem:[#allocation11 + $0x230] sm:$0xff]  }
 0x463   :  { %4354 = vmatprep.subr.bf16.mxu0 %v4846_v29 }
 0x465   :  { %v6709_v45 = vpop.f32.mrf.mxu0  ;;  %3041 = vmatmul.mubr.bf16.vlgmr.msra.gmra.mxu0 %v7167_v47  ;;  %4347 = vmatpush3.bf16.msra.mxu1 %v4845_v16 }
 0x466   :  { %4355 = vmatpush3.bf16.msra.mxu0 %v4847_v46  ;;  %4376 = vmatprep.subr.bf16.mxu1 %v4862_v41  ;;  %v2789_v33 = vadd.f32 %v6709_v45, %v2746_v62  ;;  %v4880_v46 = vld [vmem:[#allocation11 + $0x228] sm:$0xff]   ;;  %v4881_v41 = vld [vmem:[#allocation11 + $0x220] sm:$0xff]  }
 0x467   :  { %v2790_v0 = vpop.f32.mrf.mxu0  ;;  %4356 = vmatprep.subr.bf16.mxu0 %v4848_v2 }
 0x468   :  { %3733 = vmatmul.mubr.bf16.vlgmr.msra.gmra.mxu1 %v3069_v3  ;;  %v2791_v8 = vadd.f32 %v2790_v0, %v2748_v61  ;;  %v3053_v29 = vmax.f32 %v2789_v33, 0.0  ;;  %v2831_v1 = vpop.f32.mrf.mxu1 }
 0x469   :  { %v2792_v39 = vpop.f32.mrf.mxu0  ;;  %4377 = vmatpush3.bf16.msra.mxu1 %v4863_v51 }
 0x46a   :  { %4357 = vmatpush3.bf16.msra.mxu0 %v4849_v22  ;;  %4378 = vmatprep.subr.bf16.mxu1 %v4864_v42  ;;  %v3054_v44 = vmax.f32 %v2791_v8, 0.0  ;;  %v2793_v63 = vadd.f32 %v2792_v39, %v2750_v50  ;;  %v2833_v2 = vpop.f32.mrf.mxu1  ;;  %v2832_v22 = vadd.f32 %v2831_v1, %v6678_v53  ;;  %v4887_v50 = vld [vmem:[#allocation13 + $0x30] sm:$0xff]  }
 0x46b   :  { %v2794_v18 = vpop.f32.mrf.mxu0  ;;  %4358 = vmatprep.subr.bf16.mxu0 %v4850_v48  ;;  %v2834_v51 = vadd.f32 %v2833_v2, %v6653_v32 }
 0x46c   :  { %v2795_v21 = vadd.f32 %v2794_v18, %v2752_v59  ;;  %v3062_v35 = vmax.f32 %v2793_v63, 0.0  ;;  %v2835_v9 = vpop.f32.mrf.mxu1 }
 0x46d   :  { %4379 = vmatpush3.bf16.msra.mxu1 %v4865_v31  ;;  %v2836_v42 = vadd.f32 %v2835_v9, %v6678_v53 }
 0x46e   :  { %v3063_v30 = vmax.f32 %v2795_v21, 0.0  ;;  %4359 = vmatpush3.bf16.msra.mxu0 %v4851_v57  ;;  %4380 = vmatprep.subr.bf16.mxu1 %v4866_v56  ;;  %v3071_v16 = vpack.c.bf16 %v3062_v35, %v3053_v29  ;;  %v2837_v47 = vpop.f32.mrf.mxu1  ;;  %v4885_v57 = vld [vmem:[#allocation11 + $0x200] sm:$0xff]  }
 0x46f   :  { %4360 = vmatprep.subr.bf16.mxu0 %v4852_v10  ;;  %v2838_v61 = vadd.f32 %v2837_v47, %v6653_v32 }
 0x470   :  { %v3072_v28 = vpack.c.bf16 %v3063_v30, %v3054_v44 }
 0x471   :  { %4381 = vmatpush3.bf16.msra.mxu1 %v4867_v52 }
 0x472   :  { %4361 = vmatpush3.bf16.msra.mxu0 %v4853_v24  ;;  %3773 = vmatprep.mubr.bf16.mxu0 %v3072_v28 }
 0x473   :  { %4362 = vmatprep.subr.bf16.mxu0 %v4854_v27  ;;  %4382 = vmatprep.subr.bf16.mxu1 %v4868_v5 }
 0x475   :  { %4383 = vmatpush3.bf16.msra.mxu1 %v4869_v55 }
 0x476   :  { %4363 = vmatpush3.bf16.msra.mxu0 %v4855_v14  ;;  %4384 = vmatprep.subr.bf16.mxu1 %v4870_v43 }
 0x477   :  { %4364 = vmatprep.subr.bf16.mxu0 %v4856_v7 }
 0x479   :  { %4385 = vmatpush3.bf16.msra.mxu1 %v4871_v4 }
 0x47a   :  { %4365 = vmatpush3.bf16.msra.mxu0 %v4857_v60  ;;  %4386 = vmatprep.subr.bf16.mxu1 %v4872_v6 }
 0x47b   :  { %4366 = vmatprep.subr.bf16.mxu0 %v4858_v20  ;;  %v4886_v20 = vld [vmem:[#allocation13 + $0x38] sm:$0xff]  }
 0x47d   :  { %4387 = vmatpush3.bf16.msra.mxu1 %v4873_v40  ;;  %v4888_v40 = vld [vmem:[#allocation13 + $0x28] sm:$0xff]  }
 0x47e   :  { %4367 = vmatpush3.bf16.msra.mxu0 %v4859_v25  ;;  %4388 = vmatprep.subr.bf16.mxu1 %v4874_v37  ;;  %v4889_v25 = vld [vmem:[#allocation13 + $0x20] sm:$0xff]   ;;  %v4890_v37 = vld [vmem:[#allocation13 + $0x18] sm:$0xff]  }
 0x47f   :  { %4368 = vmatprep.subr.bf16.mxu0 %v4860_v49 }
 0x481   :  { %4389 = vmatpush3.bf16.msra.mxu1 %v4875_v19 }
 0x482   :  { %4369 = vmatpush3.bf16.msra.mxu0 %v4861_v12  ;;  %4390 = vmatprep.subr.bf16.mxu1 %v4876_v23 }
 0x483   :  { %4436 = vmatprep.subr.bf16.mxu0 %v7168_v34 }
 0x485   :  { %3774 = vmatmul.mubr.bf16.vlgmr.msra.gmra.mxu0 %v3071_v16  ;;  %4391 = vmatpush3.bf16.msra.mxu1 %v4877_v38 }
 0x486   :  { %4452 = vmatprep.mubr.msk.bf16.mxu0 %vm5223_vm0, %v7168_v34  ;;  %4456 = vmatprep.subr.bf16.mxu1 %v7168_v34 }
 0x487   :  { %4437 = vmatpush3.bf16.msra.mxu0 %v4878_v36 }
 0x488   :  { %4438 = vmatprep.subr.bf16.mxu0 %v7168_v34 }
 0x48b   :  { %4439 = vmatpush3.bf16.msra.mxu0 %v4879_v17 }
 0x48c   :  { %4440 = vmatprep.subr.bf16.mxu0 %v7168_v34 }
 0x48f   :  { %4441 = vmatpush3.bf16.msra.mxu0 %v4880_v46  ;;  %v4891_v46 = vld [vmem:[#allocation13 + $0x10] sm:$0xff]  }
 0x490   :  { %4442 = vmatprep.subr.bf16.mxu0 %v7168_v34 }
 0x493   :  { %4443 = vmatpush3.bf16.msra.mxu0 %v4881_v41  ;;  %v4892_v41 = vld [vmem:[#allocation13 + $0x8] sm:$0xff]  }
 0x494   :  { %4444 = vmatprep.subr.bf16.mxu0 %v7168_v34 }
 0x497   :  { %4445 = vmatpush3.bf16.msra.mxu0 %v4882_v54 }
 0x498   :  { %4446 = vmatprep.subr.bf16.mxu0 %v7168_v34 }
 0x49b   :  { %4447 = vmatpush3.bf16.msra.mxu0 %v4883_v11 }
 0x49c   :  { %4448 = vmatprep.subr.bf16.mxu0 %v7168_v34 }
 0x49f   :  { %4449 = vmatpush3.bf16.msra.mxu0 %v4884_v15 }
 0x4a0   :  { %4450 = vmatprep.subr.bf16.mxu0 %v7168_v34 }
 0x4a3   :  { %4451 = vmatpush3.bf16.msra.mxu0 %v4885_v57 }
 0x4a5   :  { %v2874_v45 = vpop.f32.mrf.mxu0 }
 0x4a6   :  { %v2875_v39 = vadd.f32 %v2874_v45, %v2832_v22 }
 0x4a7   :  { %v2876_v3 = vpop.f32.mrf.mxu0 }
 0x4a8   :  { %v2917_v26 = vpop.f32.mrf.mxu1  ;;  %v2877_v0 = vadd.f32 %v2876_v3, %v2834_v51 }
 0x4a9   :  { %v2878_v48 = vpop.f32.mrf.mxu0  ;;  %v2918_v52 = vadd.f32 %v2917_v26, %v2875_v39 }
 0x4aa   :  { %v2879_v31 = vadd.f32 %v2878_v48, %v2836_v42  ;;  %v2919_v59 = vpop.f32.mrf.mxu1 }
 0x4ab   :  { %v2880_v8 = vpop.f32.mrf.mxu0  ;;  %v2920_v10 = vadd.f32 %v2919_v59, %v2877_v0  ;;  %v3055_v28 = vmax.f32 %v2918_v52, 0.0 }
 0x4ac   :  { %v2881_v56 = vadd.f32 %v2880_v8, %v2838_v61  ;;  %v2921_v18 = vpop.f32.mrf.mxu1 }
 0x4ad   :  { %v2922_v21 = vadd.f32 %v2921_v18, %v2879_v31  ;;  %v3056_v27 = vmax.f32 %v2920_v10, 0.0 }
 0x4ae   :  { %v2923_v44 = vpop.f32.mrf.mxu1 }
 0x4af   :  { %v2924_v30 = vadd.f32 %v2923_v44, %v2881_v56  ;;  %v3064_v24 = vmax.f32 %v2922_v21, 0.0 }
 0x4b1   :  { %v3065_v5 = vmax.f32 %v2924_v30, 0.0  ;;  %v3073_v55 = vpack.c.bf16 %v3064_v24, %v3055_v28 }
 0x4b3   :  { %v3074_v32 = vpack.c.bf16 %v3065_v5, %v3056_v27 }
 0x4b5   :  { %3814 = vmatprep.mubr.bf16.mxu1 %v3074_v32 }
 0x4b6   :  { %3815 = vmatmul.mubr.bf16.vlgmr.msra.gmra.mxu1 %v3073_v55 }
 0x4b7   :  { %4472 = vmatprep.mubr.msk.bf16.mxu1 %vm5223_vm0, %v7168_v34  ;;  %4457 = vmatpush3.bf16.msra.mxu1 %v4886_v20 }
 0x4b8   :  { %4458 = vmatprep.subr.bf16.mxu1 %v7168_v34 }
 0x4bb   :  { %4459 = vmatpush3.bf16.msra.mxu1 %v4887_v50 }
 0x4bc   :  { %4460 = vmatprep.subr.bf16.mxu1 %v7168_v34 }
 0x4bf   :  { %4461 = vmatpush3.bf16.msra.mxu1 %v4888_v40 }
 0x4c0   :  { %4462 = vmatprep.subr.bf16.mxu1 %v7168_v34 }
 0x4c3   :  { %4463 = vmatpush3.bf16.msra.mxu1 %v4889_v25 }
 0x4c4   :  { %4464 = vmatprep.subr.bf16.mxu1 %v7168_v34 }
 0x4c7   :  { %4465 = vmatpush3.bf16.msra.mxu1 %v4890_v37 }
 0x4c8   :  { %4466 = vmatprep.subr.bf16.mxu1 %v7168_v34 }
 0x4cb   :  { %4467 = vmatpush3.bf16.msra.mxu1 %v4891_v46 }
 0x4cc   :  { %4468 = vmatprep.subr.bf16.mxu1 %v7168_v34 }
 0x4cf   :  { %4469 = vmatpush3.bf16.msra.mxu1 %v4892_v41 }
 0x4d0   :  { %4470 = vmatprep.subr.bf16.mxu1 %v7168_v34  ;;  %v4219_v34 = vld [vmem:[%s6766_s8] ss:$0 sm:$0xff] }
 0x4e5   :  { %v2960_v14 = vpop.f32.mrf.mxu0 }
 0x4e6   :  { %v2961_v62 = vadd.f32 %v2960_v14, %v6678_v53 }
 0x4e7   :  { %v2962_v43 = vpop.f32.mrf.mxu0 }
 0x4e8   :  { %v3001_v7 = vpop.f32.mrf.mxu1 }
 0x4e9   :  { %v2963_v13 = vpop.f32.mrf.mxu0  ;;  %v3002_v33 = vadd.f32 %v3001_v7, %v2961_v62 }
 0x4ea   :  { %v3003_v4 = vpop.f32.mrf.mxu1  ;;  %v2964_v63 = vadd.f32 %v2963_v13, %v6678_v53  ;;  %v4893_v53 = vld [vmem:[#allocation13] sm:$0xff]  }
 0x4eb   :  { %v2965_v60 = vpop.f32.mrf.mxu0  ;;  %4471 = vmatpush3.bf16.msra.mxu1 %v4893_v53 }
 0x4ec   :  { %v3004_v6 = vpop.f32.mrf.mxu1 }
 0x4ed   :  { %v3005_v12 = vadd.f32 %v3004_v6, %v2964_v63 }
 0x4ee   :  { %v3006_v58 = vpop.f32.mrf.mxu1 }
 0x4ef   :  { %v4292_v58 = vld [vmem:[%s6768_s10] ss:$0 sm:$0xff] }
 0x508   :  { %v4326_v1 = vpop.f32.mrf.mxu1 }
 0x50a   :  { %v4327_v54 = vpop.f32.mrf.mxu1 }
 0x50b   :  { %v4328_v0 = vadd.f32 %v4327_v54, %v4326_v1 }
 0x50c   :  { %v4329_v2 = vpop.f32.mrf.mxu1 }
 0x50d   :  { %v3694_v59 = vadd.f32 %v4328_v0, %v4219_v34 }
 0x50e   :  { %v4330_v9 = vpop.f32.mrf.mxu1 }
 0x50f   :  { %v4331_v61 = vadd.f32 %v4330_v9, %v4329_v2 }
 0x511   :  { %v3697_v18 = vadd.f32 %v4331_v61, %v4219_v34 }
 0x525   :  { %v3042_v49 = vpop.f32.mrf.mxu0 }
 0x526   :  { %v3043_v23 = vadd.f32 %v3042_v49, %v3002_v33 }
 0x527   :  { %v3044_v19 = vpop.f32.mrf.mxu0 }
 0x528   :  { %v3057_v16 = vmax.f32 %v3043_v23, 0.0  ;;  %v4348_v11 = vpop.f32.mrf.mxu1 }
 0x529   :  { %v3045_v35 = vpop.f32.mrf.mxu0 }
 0x52a   :  { %v3046_v29 = vadd.f32 %v3045_v35, %v3005_v12  ;;  %v4349_v45 = vpop.f32.mrf.mxu1 }
 0x52b   :  { %v3047_v38 = vpop.f32.mrf.mxu0  ;;  %v4350_v39 = vadd.f32 %v4349_v45, %v4348_v11 }
 0x52c   :  { %v3066_v36 = vmax.f32 %v3046_v29, 0.0  ;;  %v4351_v47 = vpop.f32.mrf.mxu1 }
 0x52d   :  { %v3735_v10 = vadd.f32 %v4350_v39, %v3694_v59 }
 0x52e   :  { %v3075_v17 = vpack.c.bf16 %v3066_v36, %v3057_v16  ;;  %v4352_v51 = vpop.f32.mrf.mxu1 }
 0x52f   :  { %v4353_v8 = vadd.f32 %v4352_v51, %v4351_v47 }
 0x530   :  { %4453 = vmatmul.mubr.bf16.vlgmr.msra.gmra.mxu0 %v3075_v17 }
 0x531   :  { %v3738_v44 = vadd.f32 %v4353_v8, %v3697_v18 }
 0x545   :  { %v4370_v3 = vpop.f32.mrf.mxu0 }
 0x547   :  { %v4371_v22 = vpop.f32.mrf.mxu0 }
 0x548   :  { %v4372_v57 = vadd.f32 %v4371_v22, %v4370_v3 }
 0x549   :  { %v4373_v26 = vpop.f32.mrf.mxu0 }
 0x54a   :  { %v3776_v30 = vadd.f32 %v4372_v57, %v3735_v10 }
 0x54b   :  { %v4374_v31 = vpop.f32.mrf.mxu0 }
 0x54c   :  { %v4375_v21 = vadd.f32 %v4374_v31, %v4373_v26 }
 0x54e   :  { %v3779_v5 = vadd.f32 %v4375_v21, %v3738_v44 }
 0x576   :  { %v4392_v15 = vpop.f32.mrf.mxu1 }
 0x578   :  { %v4393_v42 = vpop.f32.mrf.mxu1 }
 0x579   :  { %v4394_v52 = vadd.f32 %v4393_v42, %v4392_v15 }
 0x57a   :  { %v4395_v48 = vpop.f32.mrf.mxu1 }
 0x57b   :  { %v3817_v28 = vadd.f32 %v4394_v52, %v3776_v30 }
 0x57c   :  { %v4396_v56 = vpop.f32.mrf.mxu1 }
 0x57d   :  { %v4397_v24 = vadd.f32 %v4396_v56, %v4395_v48 }
 0x57f   :  { %v3820_v14 = vadd.f32 %v4397_v24, %v3779_v5 }
 0x5f0   :  { %v3857_v27 = vpop.f32.mrf.mxu0 }
 0x5f1   :  { %v3858_v55 = vadd.f32 %v3857_v27, %v3817_v28 }
 0x5f2   :  { %v4454_v32 = vpop.f32.mrf.mxu0 }
 0x5f3   :  { %v3864_v4 = vmax.f32 %v3858_v55, 0.0 }
 0x5f4   :  { %v3860_v43 = vpop.f32.mrf.mxu0 }
 0x5f5   :  { %v3861_v7 = vadd.f32 %v3860_v43, %v3820_v14 }
 0x5f6   :  { %v4455_v13 = vpop.f32.mrf.mxu0 }
 0x5f7   :  { %v3865_v60 = vmax.f32 %v3861_v7, 0.0 }
 0x5f9   :  { %v3866_v6 = vpack.c.bf16 %v3865_v60, %v3864_v4 }
 0x5fb   :  { %4473 = vmatmul.mubr.bf16.vlgmr.msra.gmra.mxu1 %v3866_v6 }
 0x6bb   :  { %v3972_v20 = vpop.f32.mrf.mxu1 }
 0x6bc   :  { %v3973_v50 = vadd.f32 %v4292_v58, %v3972_v20 }
 0x6bd   :  { %v4474_v40 = vpop.f32.mrf.mxu1 }
 0x6be   :  { %3979 = vst [vmem:[#allocation14] sm:$0xff] %v3973_v50 }
 0x6bf   :  { %v3975_v25 = vpop.f32.mrf.mxu1 }
 0x6c0   :  { %v3976_v37 = vadd.f32 %v4292_v58, %v3975_v25 }
 0x6c1   :  { %v4475_v62 = vpop.f32.mrf.mxu1 }
 0x6c2   :  { %3980 = vst [vmem:[#allocation14 + $0x8] sm:$0xff] %v3976_v37 }
 0x6c3   :  { %5189 = shalt.err (!%p5186_p11)
}
 0x6c4   :  { %3992 = dma.vmem_to_hbm [thread:$0]  %s3987_s20, 256, %s6769_s11, [#allocation4], %s5212_s27, %s5212_s27, %s5213_s28  }
 0x6c5   :  { %5206 = dma.done.wait [#allocation4], 256  }
 0x6c6   :  { %5207 = vsyncadd [#allocation4], 4294967040 }
 0x6c7   :  { %3996 = vsyncpa [#allocation3], 1 }
 0x6c8   :  { %3997 = vsyncpa [#allocation6], 1 }
 0x6c9   :  { %3998 = vsyncpa [#allocation9], 1 }
 0x6ca   :  { %3999 = vsyncpa [#allocation12], 1 }
 0x6cb   :  { %4000 = vsyncpa [#allocation4], 1 }

// kernel: tpu_custom_call.1
= control target key start
LH: loop header
LB: loop body
LE: loop exit
PB: predicated region body
PF: predicated region fallthrough
CT: control target
= control target key end

     0   :  { %16 = vsyncpa [#allocation3], 0  ;;  %s6758_s0 = inlined_call_operand.hbm [shape: bf16[16,128], index: 0, kind: input, shape index: {}]   ;;  %s6759_s1 = inlined_call_operand.hbm [shape: bf16[128,1152], index: 1, kind: input, shape index: {}]   ;;  %s6760_s2 = inlined_call_operand.hbm [shape: f32[1,1152], index: 2, kind: input, shape index: {}]   ;;  %s6761_s3 = inlined_call_operand.hbm [shape: bf16[384,256], index: 3, kind: input, shape index: {}]   ;;  %s6762_s4 = inlined_call_operand.vmem [shape: f32[1,256], index: 4, kind: input, shape index: {}]   ;;  %s6763_s5 = inlined_call_operand.hbm [shape: bf16[768,256], index: 5, kind: input, shape index: {}]   ;;  %s6764_s6 = inlined_call_operand.vmem [shape: f32[1,256], index: 6, kind: input, shape index: {}]   ;;  %s6765_s7 = inlined_call_operand.hbm [shape: bf16[1152,128], index: 7, kind: input, shape index: {}]   ;;  %s6766_s8 = inlined_call_operand.vmem [shape: f32[1,128], index: 8, kind: input, shape index: {}]   ;;  %s6767_s9 = inlined_call_operand.hbm [shape: bf16[128,128], index: 9, kind: input, shape index: {}]   ;;  %s6768_s10 = inlined_call_operand.vmem [shape: f32[1,128], index: 10, kind: input, shape index: {}]   ;;  %s6769_s11 = inlined_call_operand.hbm [shape: f32[16,128], index: 11, kind: output, shape index: {}]  }
   0x1   :  { %17 = vsyncpa [#allocation6], 0 }
   0x2   :  { %18 = vsyncpa [#allocation9], 0 }
   0x3   :  { %19 = vsyncpa [#allocation12], 0 }
   0x4   :  { %20 = vsyncpa [#allocation4], 0  ;;  %s5208_s17 = smov [#allocation5]  }
   0x5   :  { %s38_s18 = sshll.u32 %s5208_s17, 4  ;;  %s39_s18 = int_to_ptr.vmem [resolvable:$true] %s38_s18 }
   0x6   :  { %s5046_s19 = scalar_lea.vmem %s39_s18, 9216  ;;  %p5051_p1 = scmp.lt.s32.totalorder %s39_s18, %s39_s18 }
   0x7   :  { %p5047_p0 = scmp.ne.s32.totalorder %s39_s18, %s5046_s19  ;;  %p5052_p2 = scmp.lt.s32.totalorder %s5046_s19, %s5046_s19 }
   0x9   :  { %p5053_p3 = por %p5052_p2, %p5051_p1 }
   0xb   :  { %p5054_p4 = pnand %p5053_p3, %p5047_p0 }
   0xd   :  { %5057 = shalt.err (!%p5054_p4)
}
   0xe   :  { %s5209_s20 = smov 576   ;;  %s5210_s21 = smov 36  }
   0xf   :  { %44 = dma.hbm_to_vmem [thread:$0]  %s6759_s1, 9216, %s39_s18, [#allocation6], %s5209_s20, %s5209_s20, %s5210_s21  }
  0x10   :  { %s5211_s24 = smov [#allocation8]  }
  0x11   :  { %s60_s25 = sshll.u32 %s5211_s24, 4  ;;  %s61_s25 = int_to_ptr.vmem [resolvable:$true] %s60_s25 }
  0x12   :  { %s5066_s26 = scalar_lea.vmem %s61_s25, 6144  ;;  %p5071_p6 = scmp.lt.s32.totalorder %s61_s25, %s61_s25 }
  0x13   :  { %p5067_p5 = scmp.ne.s32.totalorder %s61_s25, %s5066_s26  ;;  %p5072_p7 = scmp.lt.s32.totalorder %s5066_s26, %s5066_s26 }
  0x15   :  { %p5073_p8 = por %p5072_p7, %p5071_p6 }
  0x17   :  { %p5074_p9 = pnand %p5073_p8, %p5067_p5 }
  0x19   :  { %5077 = shalt.err (!%p5074_p9)
}
  0x1a   :  { %s5212_s27 = smov 128   ;;  %s5213_s28 = smov 8  }
  0x1b   :  { %66 = dma.hbm_to_vmem [thread:$0]  %s6761_s3, 6144, %s61_s25, [#allocation9], %s5212_s27, %s5212_s27, %s5213_s28  }
  0x1c   :  { %s5214_s1 = smov [#allocation11]   ;;  %s5215_s13 = smov [#allocation2]  }
  0x1d   :  { %s88_s12 = sshll.u32 %s5214_s1, 4  ;;  %s26_s14 = sshll.u32 %s5215_s13, 4  ;;  %s89_s12 = int_to_ptr.vmem [resolvable:$true] %s88_s12  ;;  %s27_s14 = int_to_ptr.vmem [resolvable:$true] %s26_s14 }
  0x1e   :  { %s5086_s15 = scalar_lea.vmem %s89_s12, 9216  ;;  %p5091_p11 = scmp.lt.s32.totalorder %s89_s12, %s89_s12 }
  0x1f   :  { %p5087_p10 = scmp.ne.s32.totalorder %s89_s12, %s5086_s15  ;;  %p5092_p12 = scmp.lt.s32.totalorder %s5086_s15, %s5086_s15 }
  0x21   :  { %p5093_p13 = por %p5092_p12, %p5091_p11 }
  0x23   :  { %p5094_p0 = pnand %p5093_p13, %p5087_p10 }
  0x25   :  { %5097 = shalt.err (!%p5094_p0)
}
  0x26   :  { %s5216_s16 = smov 64   ;;  %s5217_s17 = smov 4  }
  0x27   :  { %94 = dma.hbm_to_vmem [thread:$0]  %s6765_s7, 9216, %s89_s12, [#allocation12], %s5216_s16, %s5216_s16, %s5217_s17  }
  0x28   :  { %s5106_s19 = scalar_lea.vmem %s27_s14, 128  ;;  %p5111_p2 = scmp.lt.s32.totalorder %s27_s14, %s27_s14 }
  0x29   :  { %p5107_p1 = scmp.ne.s32.totalorder %s27_s14, %s5106_s19  ;;  %p5112_p3 = scmp.lt.s32.totalorder %s5106_s19, %s5106_s19 }
  0x2b   :  { %p5113_p4 = por %p5112_p3, %p5111_p2 }
  0x2d   :  { %p5114_p5 = pnand %p5113_p4, %p5107_p1 }
  0x2f   :  { %5117 = shalt.err (!%p5114_p5)
}
  0x30   :  { %32 = dma.hbm_to_vmem [thread:$0]  %s6758_s0, 128, %s27_s14, [#allocation3], %s5216_s16, %s5216_s16, %s5217_s17  }
  0x31   :  { %s5218_s22 = smov [#allocation7]   ;;  %s5219_s24 = smov [#allocation10]  }
  0x32   :  { %s51_s23 = sshll.u32 %s5218_s22, 4  ;;  %s74_s25 = sshll.u32 %s5219_s24, 4  ;;  %s52_s23 = int_to_ptr.vmem [resolvable:$true] %s51_s23  ;;  %s75_s25 = int_to_ptr.vmem [resolvable:$true] %s74_s25 }
  0x33   :  { %s5126_s7 = scalar_lea.vmem %s52_s23, 144  ;;  %s5130_s26 = scalar_lea.vmem %s52_s23, 160 }
  0x34   :  { %p5127_p6 = scmp.ne.s32.totalorder %s52_s23, %s5126_s7  ;;  %p5131_p7 = scmp.lt.s32.totalorder %s52_s23, %s52_s23 }
  0x35   :  { %p5132_p8 = scmp.lt.s32.totalorder %s5130_s26, %s5126_s7 }
  0x37   :  { %p5133_p9 = por %p5132_p8, %p5131_p7 }
  0x39   :  { %p5134_p10 = pnand %p5133_p9, %p5127_p6 }
  0x3b   :  { %5137 = shalt.err (!%p5134_p10)
}
  0x3c   :  { %54 = dma.hbm_to_vmem [thread:$0]  %s6760_s2, 144, %s52_s23, [#allocation6]  }
  0x3d   :  { %s5146_s1 = scalar_lea.vmem %s75_s25, 12288  ;;  %p5151_p12 = scmp.lt.s32.totalorder %s75_s25, %s75_s25 }
  0x3e   :  { %p5147_p11 = scmp.ne.s32.totalorder %s75_s25, %s5146_s1  ;;  %p5152_p13 = scmp.lt.s32.totalorder %s5146_s1, %s5146_s1 }
  0x40   :  { %p5153_p0 = por %p5152_p13, %p5151_p12 }
  0x42   :  { %p5154_p1 = pnand %p5153_p0, %p5147_p11 }
  0x44   :  { %5157 = shalt.err (!%p5154_p1)
}
  0x45   :  { %80 = dma.hbm_to_vmem [thread:$0]  %s6763_s5, 12288, %s75_s25, [#allocation9], %s5212_s27, %s5212_s27, %s5213_s28  }
  0x46   :  { %s5220_s13 = smov [#allocation13]  }
  0x47   :  { %s102_s14 = sshll.u32 %s5220_s13, 4  ;;  %s103_s14 = int_to_ptr.vmem [resolvable:$true] %s102_s14 }
  0x48   :  { %s5166_s15 = scalar_lea.vmem %s103_s14, 1024  ;;  %p5171_p3 = scmp.lt.s32.totalorder %s103_s14, %s103_s14 }
  0x49   :  { %p5167_p2 = scmp.ne.s32.totalorder %s103_s14, %s5166_s15  ;;  %p5172_p4 = scmp.lt.s32.totalorder %s5166_s15, %s5166_s15 }
  0x4b   :  { %p5173_p5 = por %p5172_p4, %p5171_p3 }
  0x4d   :  { %p5174_p6 = pnand %p5173_p5, %p5167_p2 }
  0x4f   :  { %5177 = shalt.err (!%p5174_p6)
}
  0x50   :  { %108 = dma.hbm_to_vmem [thread:$0]  %s6767_s9, 1024, %s103_s14, [#allocation12], %s5216_s16, %s5216_s16, %s5217_s17  }
  0x51   :  { %5198 = dma.done.wait [#allocation3], 128  }
  0x52   :  { %5199 = vsyncadd [#allocation3], 4294967168 }
  0x53   :  { %5200 = dma.done.wait [#allocation6], 9360  }
  0x54   :  { %5201 = vsyncadd [#allocation6], 4294957936 }
  0x55   :  { %5202 = dma.done.wait [#allocation9], 18432  }
  0x56   :  { %5203 = vsyncadd [#allocation9], 4294948864 }
  0x57   :  { %5204 = dma.done.wait [#allocation12], 10240  }
  0x58   :  { %5205 = vsyncadd [#allocation12], 4294957056  ;;  %v6772_v0 = vmov 0   ;;  %v4493_v1 = vld [vmem:[#allocation5 + $0x1fc] ss:$36 sps:$4 sm:$0xff]   ;;  %vm5223_vm0 = vmmov 0  }
  0x59   :  { %670 = vmatprep.mubr.bf16.mxu0 %v6772_v0  ;;  %713 = vmatprep.mubr.bf16.mxu1 %v6772_v0  ;;  %v4495_v2 = vld [vmem:[#allocation5 + $0x204] ss:$36 sps:$4 sm:$0xff]   ;;  %v4497_v3 = vld [vmem:[#allocation5 + $0x1f8] ss:$36 sps:$4 sm:$0xff]   ;;  %v4503_v7 = vld [vmem:[#allocation5 + $0x1b0] ss:$36 sps:$4 sm:$0xff]  }
  0x5a   :  { %638 = vmatprep.subr.bf16.mxu0 %v4493_v1  ;;  %v4498_v4 = vld [vmem:[#allocation5 + $0x200] ss:$36 sps:$4 sm:$0xff]   ;;  %681 = vmatprep.subr.bf16.mxu1 %v4495_v2  ;;  %v4499_v5 = vld [vmem:[#allocation5 + $0x1b4] ss:$36 sps:$4 sm:$0xff]   ;;  %v4505_v9 = vld [vmem:[#allocation5 + $0x16c] ss:$36 sps:$4 sm:$0xff]  }
  0x5b   :  { %639 = vmatpush1.bf16.msra.mxu0 %v4497_v3  ;;  %682 = vmatpush1.bf16.msra.mxu1 %v4498_v4  ;;  %v4501_v6 = vld [vmem:[#allocation5 + $0x1bc] ss:$36 sps:$4 sm:$0xff]   ;;  %v4507_v10 = vld [vmem:[#allocation5 + $0x174] ss:$36 sps:$4 sm:$0xff]   ;;  %v4509_v11 = vld [vmem:[#allocation5 + $0x168] ss:$36 sps:$4 sm:$0xff]  }
  0x5c   :  { %640 = vmatprep.subr.bf16.mxu0 %v4499_v5  ;;  %v4504_v8 = vld [vmem:[#allocation5 + $0x1b8] ss:$36 sps:$4 sm:$0xff]   ;;  %683 = vmatprep.subr.bf16.mxu1 %v4501_v6  ;;  %v4510_v12 = vld [vmem:[#allocation5 + $0x170] ss:$36 sps:$4 sm:$0xff]   ;;  %v4511_v13 = vld [vmem:[#allocation5 + $0x124] ss:$36 sps:$4 sm:$0xff]  }
  0x5d   :  { %v4513_v14 = vld [vmem:[#allocation5 + $0x12c] ss:$36 sps:$4 sm:$0xff]   ;;  %v4515_v15 = vld [vmem:[#allocation5 + $0x120] ss:$36 sps:$4 sm:$0xff]   ;;  %v4521_v19 = vld [vmem:[#allocation5 + $0xd8] ss:$36 sps:$4 sm:$0xff]  }
  0x5e   :  { %v4516_v16 = vld [vmem:[#allocation5 + $0x128] ss:$36 sps:$4 sm:$0xff]   ;;  %v4517_v17 = vld [vmem:[#allocation5 + $0xdc] ss:$36 sps:$4 sm:$0xff]   ;;  %v4523_v21 = vld [vmem:[#allocation5 + $0x94] ss:$36 sps:$4 sm:$0xff]  }
  0x5f   :  { %641 = vmatpush1.bf16.msra.mxu0 %v4503_v7  ;;  %684 = vmatpush1.bf16.msra.mxu1 %v4504_v8  ;;  %v4519_v18 = vld [vmem:[#allocation5 + $0xe4] ss:$36 sps:$4 sm:$0xff]   ;;  %v4525_v22 = vld [vmem:[#allocation5 + $0x9c] ss:$36 sps:$4 sm:$0xff]   ;;  %v4527_v23 = vld [vmem:[#allocation5 + $0x90] ss:$36 sps:$4 sm:$0xff]  }
  0x60   :  { %642 = vmatprep.subr.bf16.mxu0 %v4505_v9  ;;  %685 = vmatprep.subr.bf16.mxu1 %v4507_v10  ;;  %v4522_v20 = vld [vmem:[#allocation5 + $0xe0] ss:$36 sps:$4 sm:$0xff]   ;;  %v4528_v24 = vld [vmem:[#allocation5 + $0x98] ss:$36 sps:$4 sm:$0xff]   ;;  %v4529_v25 = vld [vmem:[#allocation5 + $0x4c] ss:$36 sps:$4 sm:$0xff]  }
  0x61   :  { %v4531_v26 = vld [vmem:[#allocation5 + $0x54] ss:$36 sps:$4 sm:$0xff]   ;;  %v4533_v27 = vld [vmem:[#allocation5 + $0x48] ss:$36 sps:$4 sm:$0xff]   ;;  %v4539_v31 = vld [vmem:[#allocation5] ss:$36 sps:$4 sm:$0xff]  }
  0x62   :  { %v4534_v28 = vld [vmem:[#allocation5 + $0x50] ss:$36 sps:$4 sm:$0xff]   ;;  %v4535_v29 = vld [vmem:[#allocation5 + $0x4] ss:$36 sps:$4 sm:$0xff]   ;;  %v5323_v34 = vld [vmem:[#allocation2] sm:$0xff]   ;;  %v6770_v5 = vmov 0.0  }
  0x63   :  { %643 = vmatpush1.bf16.msra.mxu0 %v4509_v11  ;;  %686 = vmatpush1.bf16.msra.mxu1 %v4510_v12  ;;  %v4537_v30 = vld [vmem:[#allocation5 + $0xc] ss:$36 sps:$4 sm:$0xff]   ;;  %v4547_v36 = vld [vmem:[#allocation5 + $0x1c4] ss:$36 sps:$4 sm:$0xff]   ;;  %v4568_v38 = vld [vmem:[#allocation5 + $0x214] ss:$36 sps:$4 sm:$0xff]  }
  0x64   :  { %644 = vmatprep.subr.bf16.mxu0 %v4511_v13  ;;  %687 = vmatprep.subr.bf16.mxu1 %v4513_v14  ;;  %v4540_v32 = vld [vmem:[#allocation5 + $0x8] ss:$36 sps:$4 sm:$0xff]   ;;  %v4566_v37 = vld [vmem:[#allocation5 + $0x210] ss:$36 sps:$4 sm:$0xff]   ;;  %v4545_v40 = vld [vmem:[#allocation5 + $0x1c0] ss:$36 sps:$4 sm:$0xff]  }
  0x65   :  { %v4544_v33 = vld [vmem:[#allocation5 + $0x20c] ss:$36 sps:$4 sm:$0xff]   ;;  %v4550_v41 = vld [vmem:[#allocation5 + $0x17c] ss:$36 sps:$4 sm:$0xff]   ;;  %v4574_v43 = vld [vmem:[#allocation5 + $0x184] ss:$36 sps:$4 sm:$0xff]  }
  0x66   :  { %v4542_v35 = vld [vmem:[#allocation5 + $0x208] ss:$36 sps:$4 sm:$0xff]   ;;  %v4548_v44 = vld [vmem:[#allocation5 + $0x178] ss:$36 sps:$4 sm:$0xff]   ;;  %v4572_v46 = vld [vmem:[#allocation5 + $0x180] ss:$36 sps:$4 sm:$0xff]  }
  0x67   :  { %645 = vmatpush1.bf16.msra.mxu0 %v4515_v15  ;;  %688 = vmatpush1.bf16.msra.mxu1 %v4516_v16  ;;  %v4571_v39 = vld [vmem:[#allocation5 + $0x1cc] ss:$36 sps:$4 sm:$0xff]   ;;  %v4553_v45 = vld [vmem:[#allocation5 + $0x134] ss:$36 sps:$4 sm:$0xff]   ;;  %v4577_v47 = vld [vmem:[#allocation5 + $0x13c] ss:$36 sps:$4 sm:$0xff]  }
  0x68   :  { %646 = vmatprep.subr.bf16.mxu0 %v4517_v17  ;;  %689 = vmatprep.subr.bf16.mxu1 %v4519_v18  ;;  %v4569_v42 = vld [vmem:[#allocation5 + $0x1c8] ss:$36 sps:$4 sm:$0xff]   ;;  %v4551_v48 = vld [vmem:[#allocation5 + $0x130] ss:$36 sps:$4 sm:$0xff]   ;;  %v4575_v50 = vld [vmem:[#allocation5 + $0x138] ss:$36 sps:$4 sm:$0xff]  }
  0x69   :  { %v4556_v49 = vld [vmem:[#allocation5 + $0xec] ss:$36 sps:$4 sm:$0xff]   ;;  %v4580_v51 = vld [vmem:[#allocation5 + $0xf4] ss:$36 sps:$4 sm:$0xff]   ;;  %v4559_v53 = vld [vmem:[#allocation5 + $0xa4] ss:$36 sps:$4 sm:$0xff]  }
  0x6a   :  { %v4554_v52 = vld [vmem:[#allocation5 + $0xe8] ss:$36 sps:$4 sm:$0xff]   ;;  %v4578_v54 = vld [vmem:[#allocation5 + $0xf0] ss:$36 sps:$4 sm:$0xff]   ;;  %v4557_v56 = vld [vmem:[#allocation5 + $0xa0] ss:$36 sps:$4 sm:$0xff]  }
  0x6b   :  { %647 = vmatpush1.bf16.msra.mxu0 %v4521_v19  ;;  %690 = vmatpush1.bf16.msra.mxu1 %v4522_v20  ;;  %v4583_v55 = vld [vmem:[#allocation5 + $0xac] ss:$36 sps:$4 sm:$0xff]   ;;  %v4562_v57 = vld [vmem:[#allocation5 + $0x5c] ss:$36 sps:$4 sm:$0xff]   ;;  %v4586_v59 = vld [vmem:[#allocation5 + $0x64] ss:$36 sps:$4 sm:$0xff]  }
  0x6c   :  { %648 = vmatprep.subr.bf16.mxu0 %v4523_v21  ;;  %691 = vmatprep.subr.bf16.mxu1 %v4525_v22  ;;  %v4581_v58 = vld [vmem:[#allocation5 + $0xa8] ss:$36 sps:$4 sm:$0xff]   ;;  %v4560_v60 = vld [vmem:[#allocation5 + $0x58] ss:$36 sps:$4 sm:$0xff]   ;;  %v4584_v62 = vld [vmem:[#allocation5 + $0x60] ss:$36 sps:$4 sm:$0xff]  }
  0x6d   :  { %v4565_v61 = vld [vmem:[#allocation5 + $0x14] ss:$36 sps:$4 sm:$0xff]   ;;  %v4590_v63 = vld [vmem:[#allocation5 + $0x1c] ss:$36 sps:$4 sm:$0xff]   ;;  %v4594_v11 = vld [vmem:[#allocation5 + $0x188] ss:$36 sps:$4 sm:$0xff]  }
  0x6e   :  { %v4563_v1 = vld [vmem:[#allocation5 + $0x10] ss:$36 sps:$4 sm:$0xff]   ;;  %v4588_v2 = vld [vmem:[#allocation5 + $0x18] ss:$36 sps:$4 sm:$0xff]   ;;  %v4598_v14 = vld [vmem:[#allocation5 + $0x140] ss:$36 sps:$4 sm:$0xff]  }
  0x6f   :  { %649 = vmatpush1.bf16.msra.mxu0 %v4527_v23  ;;  %692 = vmatpush1.bf16.msra.mxu1 %v4528_v24  ;;  %v5329_v3 = vld [vmem:[#allocation8 + $0x74] ss:$8 sps:$4 sm:$0xff]   ;;  %v5332_v6 = vld [vmem:[#allocation8 + $0x70] ss:$8 sps:$4 sm:$0xff]   ;;  %v5336_v7 = vld [vmem:[#allocation8 + $0x64] ss:$8 sps:$4 sm:$0xff]  }
  0x70   :  { %650 = vmatprep.subr.bf16.mxu0 %v4529_v25  ;;  %693 = vmatprep.subr.bf16.mxu1 %v4531_v26  ;;  %v4587_v4 = vld [vmem:[#allocation5 + $0x218] ss:$36 sps:$4 sm:$0xff]   ;;  %v4591_v8 = vld [vmem:[#allocation5 + $0x1d0] ss:$36 sps:$4 sm:$0xff]   ;;  %v4610_v23 = vld [vmem:[#allocation5 + $0x68] ss:$36 sps:$4 sm:$0xff]  }
  0x71   :  { %v5343_v9 = vld [vmem:[#allocation8 + $0x60] ss:$8 sps:$4 sm:$0xff]   ;;  %v5346_v10 = vld [vmem:[#allocation8 + $0x54] ss:$8 sps:$4 sm:$0xff]   ;;  %v5350_v12 = vld [vmem:[#allocation8 + $0x50] ss:$8 sps:$4 sm:$0xff]  }
  0x72   :  { %v5353_v13 = vld [vmem:[#allocation8 + $0x44] ss:$8 sps:$4 sm:$0xff]   ;;  %v5355_v15 = vld [vmem:[#allocation8 + $0x40] ss:$8 sps:$4 sm:$0xff]   ;;  %v5358_v16 = vld [vmem:[#allocation8 + $0x34] ss:$8 sps:$4 sm:$0xff]  }
  0x73   :  { %651 = vmatpush1.bf16.msra.mxu0 %v4533_v27  ;;  %694 = vmatpush1.bf16.msra.mxu1 %v4534_v28  ;;  %v4602_v17 = vld [vmem:[#allocation5 + $0xf8] ss:$36 sps:$4 sm:$0xff]   ;;  %v4606_v20 = vld [vmem:[#allocation5 + $0xb0] ss:$36 sps:$4 sm:$0xff]   ;;  %v4614_v26 = vld [vmem:[#allocation5 + $0x20] ss:$36 sps:$4 sm:$0xff]  }
  0x74   :  { %652 = vmatprep.subr.bf16.mxu0 %v4535_v29  ;;  %695 = vmatprep.subr.bf16.mxu1 %v4537_v30  ;;  %v5362_v18 = vld [vmem:[#allocation8 + $0x30] ss:$8 sps:$4 sm:$0xff]   ;;  %v5365_v19 = vld [vmem:[#allocation8 + $0x24] ss:$8 sps:$4 sm:$0xff]   ;;  %v5369_v21 = vld [vmem:[#allocation8 + $0x20] ss:$8 sps:$4 sm:$0xff]  }
  0x75   :  { %v5372_v22 = vld [vmem:[#allocation8 + $0x14] ss:$8 sps:$4 sm:$0xff]   ;;  %v5376_v24 = vld [vmem:[#allocation8 + $0x10] ss:$8 sps:$4 sm:$0xff]   ;;  %v5379_v25 = vld [vmem:[#allocation8 + $0x4] ss:$8 sps:$4 sm:$0xff]  }
  0x76   :  { %v5383_v27 = vld [vmem:[#allocation8 + $0x174] ss:$8 sps:$4 sm:$0xff]   ;;  %v5385_v28 = vld [vmem:[#allocation8] ss:$8 sps:$4 sm:$0xff]   ;;  %v5391_v30 = vld [vmem:[#allocation8 + $0x170] ss:$8 sps:$4 sm:$0xff]  }
  0x77   :  { %653 = vmatpush1.bf16.msra.mxu0 %v4539_v31  ;;  %696 = vmatpush1.bf16.msra.mxu1 %v4540_v32  ;;  %6958 = vst [vmem:[#allocation20_spill] sm:$0xff] %v5383_v27  ;;  %v5388_v29 = vld [vmem:[#allocation8 + $0xf4] ss:$8 sps:$4 sm:$0xff]   ;;  %v5394_v31 = vld [vmem:[#allocation8 + $0x164] ss:$8 sps:$4 sm:$0xff]   ;;  %s5224_s19 = smov [#allocation14]  }
  0x78   :  { %724 = vmatprep.subr.bf16.mxu0 %v4544_v33  ;;  %767 = vmatprep.subr.bf16.mxu1 %v4568_v38  ;;  %v5398_v32 = vld [vmem:[#allocation8 + $0xf0] ss:$8 sps:$4 sm:$0xff]   ;;  %v5402_v33 = vld [vmem:[#allocation8 + $0x160] ss:$8 sps:$4 sm:$0xff]   ;;  %v5417_v38 = vld [vmem:[#allocation8 + $0xd4] ss:$8 sps:$4 sm:$0xff]  }
  0x79   :  { %s3986_s20 = sshll.u32 %s5224_s19, 4  ;;  %s3987_s20 = int_to_ptr.vmem [resolvable:$true] %s3986_s20 }
  0x7a   :  { %671 = vmatmul.mubr.bf16.vlgmr.msra.gmra.mxu0 %v5323_v34  ;;  %714 = vmatmul.mubr.bf16.vlgmr.msra.gmra.mxu1 %v5323_v34  ;;  %s5178_s21 = scalar_lea.vmem %s3987_s20, 256  ;;  %p5183_p8 = scmp.lt.s32.totalorder %s3987_s20, %s3987_s20 }
  0x7b   :  { %725 = vmatpush1.bf16.msra.mxu0 %v4542_v35  ;;  %756 = vmatprep.mubr.bf16.mxu0 %v6772_v0  ;;  %v5404_v35 = vld [vmem:[#allocation8 + $0xe4] ss:$8 sps:$4 sm:$0xff]   ;;  %p5179_p7 = scmp.ne.s32.totalorder %s3987_s20, %s5178_s21  ;;  %p5184_p9 = scmp.lt.s32.totalorder %s5178_s21, %s5178_s21 }
  0x7c   :  { %726 = vmatprep.subr.bf16.mxu0 %v4547_v36  ;;  %768 = vmatpush1.bf16.msra.mxu1 %v4566_v37  ;;  %v5407_v36 = vld [vmem:[#allocation8 + $0x154] ss:$8 sps:$4 sm:$0xff]   ;;  %v5412_v37 = vld [vmem:[#allocation8 + $0xe0] ss:$8 sps:$4 sm:$0xff]  }
  0x7d   :  { %799 = vmatprep.mubr.bf16.mxu1 %v6772_v0  ;;  %769 = vmatprep.subr.bf16.mxu1 %v4571_v39  ;;  %v5420_v39 = vld [vmem:[#allocation8 + $0xd0] ss:$8 sps:$4 sm:$0xff]   ;;  %p5185_p10 = por %p5184_p9, %p5183_p8 }
  0x7f   :  { %727 = vmatpush1.bf16.msra.mxu0 %v4545_v40  ;;  %v5422_v40 = vld [vmem:[#allocation8 + $0x144] ss:$8 sps:$4 sm:$0xff]   ;;  %p5186_p11 = pnand %p5185_p10, %p5179_p7 }
  0x80   :  { %728 = vmatprep.subr.bf16.mxu0 %v4550_v41  ;;  %770 = vmatpush1.bf16.msra.mxu1 %v4569_v42  ;;  %v5426_v41 = vld [vmem:[#allocation8 + $0x140] ss:$8 sps:$4 sm:$0xff]   ;;  %v5428_v42 = vld [vmem:[#allocation8 + $0xc4] ss:$8 sps:$4 sm:$0xff]  }
  0x81   :  { %771 = vmatprep.subr.bf16.mxu1 %v4574_v43  ;;  %v5431_v43 = vld [vmem:[#allocation8 + $0x134] ss:$8 sps:$4 sm:$0xff]  }
  0x83   :  { %729 = vmatpush1.bf16.msra.mxu0 %v4548_v44  ;;  %v5434_v44 = vld [vmem:[#allocation8 + $0xc0] ss:$8 sps:$4 sm:$0xff]  }
  0x84   :  { %730 = vmatprep.subr.bf16.mxu0 %v4553_v45  ;;  %772 = vmatpush1.bf16.msra.mxu1 %v4572_v46  ;;  %6959 = vst [vmem:[#allocation21_spill] sm:$0xff] %v5434_v44  ;;  %v5437_v45 = vld [vmem:[#allocation8 + $0xb4] ss:$8 sps:$4 sm:$0xff]   ;;  %v5440_v46 = vld [vmem:[#allocation8 + $0x130] ss:$8 sps:$4 sm:$0xff]  }
  0x85   :  { %773 = vmatprep.subr.bf16.mxu1 %v4577_v47  ;;  %6960 = vst [vmem:[#allocation22_spill] sm:$0xff] %v5437_v45  ;;  %v5443_v47 = vld [vmem:[#allocation8 + $0x124] ss:$8 sps:$4 sm:$0xff]  }
  0x87   :  { %731 = vmatpush1.bf16.msra.mxu0 %v4551_v48  ;;  %v5446_v48 = vld [vmem:[#allocation8 + $0xb0] ss:$8 sps:$4 sm:$0xff]  }
  0x88   :  { %732 = vmatprep.subr.bf16.mxu0 %v4556_v49  ;;  %774 = vmatpush1.bf16.msra.mxu1 %v4575_v50  ;;  %6961 = vst [vmem:[#allocation23_spill] sm:$0xff] %v5446_v48  ;;  %v5449_v49 = vld [vmem:[#allocation8 + $0xa4] ss:$8 sps:$4 sm:$0xff]   ;;  %v5452_v50 = vld [vmem:[#allocation8 + $0x120] ss:$8 sps:$4 sm:$0xff]  }
  0x89   :  { %775 = vmatprep.subr.bf16.mxu1 %v4580_v51  ;;  %6962 = vst [vmem:[#allocation24_spill] sm:$0xff] %v5449_v49  ;;  %v5455_v51 = vld [vmem:[#allocation8 + $0x114] ss:$8 sps:$4 sm:$0xff]  }
  0x8b   :  { %733 = vmatpush1.bf16.msra.mxu0 %v4554_v52  ;;  %v5458_v52 = vld [vmem:[#allocation8 + $0xa0] ss:$8 sps:$4 sm:$0xff]  }
  0x8c   :  { %734 = vmatprep.subr.bf16.mxu0 %v4559_v53  ;;  %776 = vmatpush1.bf16.msra.mxu1 %v4578_v54  ;;  %6963 = vst [vmem:[#allocation25_spill] sm:$0xff] %v5458_v52  ;;  %v5461_v53 = vld [vmem:[#allocation8 + $0x94] ss:$8 sps:$4 sm:$0xff]   ;;  %v5464_v54 = vld [vmem:[#allocation8 + $0x110] ss:$8 sps:$4 sm:$0xff]  }
  0x8d   :  { %777 = vmatprep.subr.bf16.mxu1 %v4583_v55  ;;  %6964 = vst [vmem:[#allocation26_spill] sm:$0xff] %v5461_v53  ;;  %v5467_v55 = vld [vmem:[#allocation8 + $0x104] ss:$8 sps:$4 sm:$0xff]  }
  0x8f   :  { %735 = vmatpush1.bf16.msra.mxu0 %v4557_v56  ;;  %v5470_v56 = vld [vmem:[#allocation8 + $0x90] ss:$8 sps:$4 sm:$0xff]  }
  0x90   :  { %736 = vmatprep.subr.bf16.mxu0 %v4562_v57  ;;  %778 = vmatpush1.bf16.msra.mxu1 %v4581_v58  ;;  %6965 = vst [vmem:[#allocation27_spill] sm:$0xff] %v5470_v56  ;;  %v5473_v57 = vld [vmem:[#allocation8 + $0x84] ss:$8 sps:$4 sm:$0xff]   ;;  %v5476_v58 = vld [vmem:[#allocation8 + $0x100] ss:$8 sps:$4 sm:$0xff]  }
  0x91   :  { %779 = vmatprep.subr.bf16.mxu1 %v4586_v59  ;;  %6966 = vst [vmem:[#allocation28_spill] sm:$0xff] %v5473_v57  ;;  %v5480_v59 = vld [vmem:[#allocation8 + $0x80] ss:$8 sps:$4 sm:$0xff]  }
  0x92   :  { %6967 = vst [vmem:[#allocation29_spill] sm:$0xff] %v5480_v59 }
  0x93   :  { %737 = vmatpush1.bf16.msra.mxu0 %v4560_v60  ;;  %v219_v60 = vlaneseq }
  0x94   :  { %738 = vmatprep.subr.bf16.mxu0 %v4565_v61  ;;  %780 = vmatpush1.bf16.msra.mxu1 %v4584_v62 }
  0x95   :  { %781 = vmatprep.subr.bf16.mxu1 %v4590_v63  ;;  %v5489_v61 = vshrl.u32 %v219_v60, 7 }
  0x97   :  { %739 = vmatpush1.bf16.msra.mxu0 %v4563_v1  ;;  %v5492_v62 = vsub.s32 0, %v5489_v61  ;;  %v229_v63 = vsub.s32 2, %v5489_v61  ;;  %v5495_v1 = vld [vmem:[#allocation7] sm:$0xff] }
  0x98   :  { %4416 = vmatprep.subr.bf16.mxu0 %v6770_v5  ;;  %782 = vmatpush1.bf16.msra.mxu1 %v4588_v2  ;;  %v5498_v2 = vsub.s32 1, %v5489_v61 }
  0x99   :  { %1178 = vmatprep.subr.bf16.mxu1 %v5329_v3  ;;  %6968 = vst [vmem:[#allocation30_spill] sm:$0xff] %v5492_v62 }
  0x9a   :  { %757 = vmatmul.mubr.bf16.vlgmr.msra.gmra.mxu0 %v5323_v34  ;;  %6969 = vst [vmem:[#allocation31_spill] sm:$0xff] %v5498_v2 }
  0x9b   :  { %4417 = vmatpush3.bf16.msra.mxu0 %v4587_v4  ;;  %4432 = vmatprep.mubr.msk.bf16.mxu0 %vm5223_vm0, %v6770_v5  ;;  %v222_v4 = vrot.slane %v5495_v1, %v5492_v62 }
  0x9c   :  { %4418 = vmatprep.subr.bf16.mxu0 %v6770_v5  ;;  %800 = vmatmul.mubr.bf16.vlgmr.msra.gmra.mxu1 %v5323_v34 }
  0x9d   :  { %1179 = vmatpush1.bf16.msra.mxu1 %v5332_v6 }
  0x9e   :  { %1180 = vmatprep.subr.bf16.mxu1 %v5336_v7 }
  0x9f   :  { %4419 = vmatpush3.bf16.msra.mxu0 %v4591_v8  ;;  %v230_v8 = vrot.slane %v5495_v1, %v229_v63 }
  0xa0   :  { %4420 = vmatprep.subr.bf16.mxu0 %v6770_v5 }
  0xa1   :  { %1181 = vmatpush1.bf16.msra.mxu1 %v5343_v9 }
  0xa2   :  { %1182 = vmatprep.subr.bf16.mxu1 %v5346_v10 }
  0xa3   :  { %4421 = vmatpush3.bf16.msra.mxu0 %v4594_v11  ;;  %v226_v11 = vrot.slane %v5495_v1, %v5498_v2 }
  0xa4   :  { %4422 = vmatprep.subr.bf16.mxu0 %v6770_v5 }
  0xa5   :  { %1183 = vmatpush1.bf16.msra.mxu1 %v5350_v12 }
  0xa6   :  { %1184 = vmatprep.subr.bf16.mxu1 %v5353_v13 }
  0xa7   :  { %4423 = vmatpush3.bf16.msra.mxu0 %v4598_v14 }
  0xa8   :  { %4424 = vmatprep.subr.bf16.mxu0 %v6770_v5 }
  0xa9   :  { %1185 = vmatpush1.bf16.msra.mxu1 %v5355_v15 }
  0xaa   :  { %1186 = vmatprep.subr.bf16.mxu1 %v5358_v16 }
  0xab   :  { %4425 = vmatpush3.bf16.msra.mxu0 %v4602_v17 }
  0xac   :  { %4426 = vmatprep.subr.bf16.mxu0 %v6770_v5 }
  0xad   :  { %1187 = vmatpush1.bf16.msra.mxu1 %v5362_v18 }
  0xae   :  { %1188 = vmatprep.subr.bf16.mxu1 %v5365_v19 }
  0xaf   :  { %4427 = vmatpush3.bf16.msra.mxu0 %v4606_v20 }
  0xb0   :  { %4428 = vmatprep.subr.bf16.mxu0 %v6770_v5 }
  0xb1   :  { %1189 = vmatpush1.bf16.msra.mxu1 %v5369_v21 }
  0xb2   :  { %1190 = vmatprep.subr.bf16.mxu1 %v5372_v22 }
  0xb3   :  { %4429 = vmatpush3.bf16.msra.mxu0 %v4610_v23 }
  0xb4   :  { %4430 = vmatprep.subr.bf16.mxu0 %v6770_v5 }
  0xb5   :  { %1191 = vmatpush1.bf16.msra.mxu1 %v5376_v24 }
  0xb6   :  { %1192 = vmatprep.subr.bf16.mxu1 %v5379_v25 }
  0xb7   :  { %4431 = vmatpush3.bf16.msra.mxu0 %v4614_v26 }
  0xb8   :  { %1221 = vmatprep.subr.bf16.mxu0 %v5383_v27 }
  0xb9   :  { %1193 = vmatpush1.bf16.msra.mxu1 %v5385_v28 }
  0xba   :  { %4433 = vmatmul.mubr.bf16.vlgmr.msra.gmra.mxu0 %v5323_v34  ;;  %1194 = vmatprep.subr.bf16.mxu1 %v5388_v29  ;;  %v5415_v34 = vld [vmem:[#allocation8 + $0x150] ss:$8 sps:$4 sm:$0xff]  }
  0xbb   :  { %1222 = vmatpush1.bf16.msra.mxu0 %v5391_v30  ;;  %1253 = vmatprep.mubr.bf16.mxu0 %v6772_v0 }
  0xbc   :  { %1223 = vmatprep.subr.bf16.mxu0 %v5394_v31 }
  0xbd   :  { %1195 = vmatpush2.bf16.msra.mxu1 %v5398_v32 }
  0xbe   :  { %1196 = vmatprep.subr.bf16.mxu1 %v5404_v35 }
  0xbf   :  { %1224 = vmatpush1.bf16.msra.mxu0 %v5402_v33 }
  0xc0   :  { %1225 = vmatprep.subr.bf16.mxu0 %v5407_v36 }
  0xc1   :  { %1197 = vmatpush2.bf16.msra.mxu1 %v5412_v37 }
  0xc2   :  { %1198 = vmatprep.subr.bf16.mxu1 %v5417_v38 }
  0xc3   :  { %1226 = vmatpush1.bf16.msra.mxu0 %v5415_v34 }
  0xc4   :  { %1227 = vmatprep.subr.bf16.mxu0 %v5422_v40 }
  0xc5   :  { %1199 = vmatpush2.bf16.msra.mxu1 %v5420_v39 }
  0xc6   :  { %1200 = vmatprep.subr.bf16.mxu1 %v5428_v42 }
  0xc7   :  { %1228 = vmatpush1.bf16.msra.mxu0 %v5426_v41 }
  0xc8   :  { %1229 = vmatprep.subr.bf16.mxu0 %v5431_v43 }
  0xc9   :  { %1201 = vmatpush2.bf16.msra.mxu1 %v5434_v44 }
  0xca   :  { %1202 = vmatprep.subr.bf16.mxu1 %v5437_v45 }
  0xcb   :  { %1230 = vmatpush1.bf16.msra.mxu0 %v5440_v46 }
  0xcc   :  { %1231 = vmatprep.subr.bf16.mxu0 %v5443_v47 }
  0xcd   :  { %1203 = vmatpush2.bf16.msra.mxu1 %v5446_v48 }
  0xce   :  { %1204 = vmatprep.subr.bf16.mxu1 %v5449_v49 }
  0xcf   :  { %1232 = vmatpush1.bf16.msra.mxu0 %v5452_v50 }
  0xd0   :  { %1233 = vmatprep.subr.bf16.mxu0 %v5455_v51 }
  0xd1   :  { %1205 = vmatpush2.bf16.msra.mxu1 %v5458_v52 }
  0xd2   :  { %1206 = vmatprep.subr.bf16.mxu1 %v5461_v53 }
  0xd3   :  { %1234 = vmatpush1.bf16.msra.mxu0 %v5464_v54 }
  0xd4   :  { %1235 = vmatprep.subr.bf16.mxu0 %v5467_v55 }
  0xd5   :  { %1207 = vmatpush2.bf16.msra.mxu1 %v5470_v56 }
  0xd6   :  { %1208 = vmatprep.subr.bf16.mxu1 %v5473_v57 }
  0xd7   :  { %1236 = vmatpush1.bf16.msra.mxu0 %v5476_v58 }
  0xd8   :  { %1264 = vmatprep.subr.bf16.mxu0 %v5329_v3 }
  0xd9   :  { %1209 = vmatpush2.bf16.msra.mxu1 %v5480_v59 }
  0xda   :  { %1307 = vmatprep.subr.bf16.mxu1 %v5383_v27 }
 0x13a   :  { %v672_v14 = vpop.f32.mrf.mxu0  ;;  %v715_v17 = vpop.f32.mrf.mxu1 }
 0x13b   :  { %v673_v20 = vadd.f32 %v672_v14, %v222_v4  ;;  %v716_v23 = vadd.f32 %v715_v17, %v230_v8 }
 0x13c   :  { %v674_v26 = vpop.f32.mrf.mxu0  ;;  %v717_v60 = vpop.f32.mrf.mxu1 }
 0x13d   :  { %v675_v5 = vadd.f32 %v674_v26, %v226_v11  ;;  %v851_v56 = vmax.f32 %v673_v20, 0.0  ;;  %v853_v53 = vmax.f32 %v716_v23, 0.0 }
 0x13e   :  { %v676_v0 = vpop.f32.mrf.mxu0  ;;  %v719_v27 = vpop.f32.mrf.mxu1 }
 0x13f   :  { %v677_v59 = vadd.f32 %v676_v0, %v222_v4  ;;  %v720_v57 = vadd.f32 %v719_v27, %v230_v8  ;;  %v852_v62 = vmax.f32 %v675_v5, 0.0  ;;  %v6970_v0 = vmov 0  }
 0x140   :  { %v678_v52 = vpop.f32.mrf.mxu0  ;;  %v241_v5 = vsub.s32 5, %v5489_v61  ;;  %v233_v27 = vsub.s32 3, %v5489_v61 }
 0x141   :  { %v860_v49 = vmax.f32 %v677_v59, 0.0  ;;  %v862_v63 = vmax.f32 %v720_v57, 0.0  ;;  %v679_v48 = vadd.f32 %v678_v52, %v226_v11 }
 0x142   :  { %v234_v52 = vrot.slane %v5495_v1, %v233_v27  ;;  %v6978_v27 = vld [vmem:[#allocation28_spill] sm:$0xff] }
 0x143   :  { %v5505_v45 = vpack.c.bf16 %v862_v63, %v853_v53  ;;  %v861_v2 = vmax.f32 %v679_v48, 0.0  ;;  %v869_v44 = vpack.c.bf16 %v860_v49, %v851_v56  ;;  %v721_v49 = vpop.f32.mrf.mxu1  ;;  %v6976_v63 = vld [vmem:[#allocation26_spill] sm:$0xff] }
 0x144   :  { %v722_v57 = vadd.f32 %v721_v49, %v234_v52 }
 0x145   :  { %v5507_v14 = vpack.c.bf16 %v861_v2, %v852_v62  ;;  %1254 = vmatmul.mubr.bf16.vlgmr.msra.gmra.mxu0 %v5505_v45  ;;  %v718_v62 = vadd.f32 %v717_v60, %v234_v52  ;;  %v4001_v60 = vld [vmem:[#allocation7 + $0x8] ss:$0 sm:$0xff] }
 0x146   :  { %1265 = vmatpush1.bf16.msra.mxu0 %v5332_v6  ;;  %1296 = vmatprep.mubr.bf16.mxu0 %v5505_v45  ;;  %v863_v11 = vmax.f32 %v722_v57, 0.0  ;;  %v6979_v52 = vld [vmem:[#allocation29_spill] sm:$0xff] }
 0x147   :  { %1210 = vmatprep.mubr.bf16.mxu1 %v5507_v14  ;;  %1266 = vmatprep.subr.bf16.mxu0 %v5336_v7  ;;  %v854_v20 = vmax.f32 %v718_v62, 0.0 }
 0x148   :  { %1211 = vmatmul.mubr.bf16.vlgmr.msra.gmra.mxu1 %v869_v44  ;;  %v242_v44 = vrot.slane %v5495_v1, %v241_v5 }
 0x149   :  { %1308 = vmatpush1.bf16.msra.mxu1 %v5391_v30  ;;  %1339 = vmatprep.mubr.bf16.mxu1 %v6970_v0  ;;  %v5554_v26 = vpack.c.bf16 %v863_v11, %v854_v20  ;;  %v5650_v11 = vld [vmem:[#allocation8 + $0x54] ss:$8 sps:$4 sm:$0xff]   ;;  %v5670_v20 = vld [vmem:[#allocation8 + $0x30] ss:$8 sps:$4 sm:$0xff]  }
 0x14a   :  { %1267 = vmatpush1.bf16.msra.mxu0 %v5343_v9  ;;  %1309 = vmatprep.subr.bf16.mxu1 %v5394_v31 }
 0x14b   :  { %1268 = vmatprep.subr.bf16.mxu0 %v5346_v10 }
 0x14d   :  { %1310 = vmatpush1.bf16.msra.mxu1 %v5402_v33 }
 0x14e   :  { %1269 = vmatpush1.bf16.msra.mxu0 %v5350_v12  ;;  %1311 = vmatprep.subr.bf16.mxu1 %v5407_v36 }
 0x14f   :  { %1270 = vmatprep.subr.bf16.mxu0 %v5353_v13 }
 0x151   :  { %1312 = vmatpush1.bf16.msra.mxu1 %v5415_v34 }
 0x152   :  { %1271 = vmatpush1.bf16.msra.mxu0 %v5355_v15  ;;  %1313 = vmatprep.subr.bf16.mxu1 %v5422_v40 }
 0x153   :  { %1272 = vmatprep.subr.bf16.mxu0 %v5358_v16 }
 0x155   :  { %1314 = vmatpush1.bf16.msra.mxu1 %v5426_v41 }
 0x156   :  { %1273 = vmatpush1.bf16.msra.mxu0 %v5362_v18  ;;  %1315 = vmatprep.subr.bf16.mxu1 %v5431_v43 }
 0x157   :  { %1274 = vmatprep.subr.bf16.mxu0 %v5365_v19 }
 0x159   :  { %1316 = vmatpush1.bf16.msra.mxu1 %v5440_v46 }
 0x15a   :  { %1275 = vmatpush1.bf16.msra.mxu0 %v5369_v21  ;;  %1317 = vmatprep.subr.bf16.mxu1 %v5443_v47  ;;  %v5537_v48 = vpop.f32.mrf.mxu0 }
 0x15b   :  { %1276 = vmatprep.subr.bf16.mxu0 %v5372_v22 }
 0x15c   :  { %v760_v53 = vpop.f32.mrf.mxu0 }
 0x15d   :  { %1318 = vmatpush1.bf16.msra.mxu1 %v5452_v50  ;;  %v761_v56 = vadd.f32 %v760_v53, %v242_v44  ;;  %v6980_v53 = vld [vmem:[#allocation20_spill] sm:$0xff] }
 0x15e   :  { %1277 = vmatpush1.bf16.msra.mxu0 %v5376_v24  ;;  %1319 = vmatprep.subr.bf16.mxu1 %v5455_v51  ;;  %v5544_v59 = vpop.f32.mrf.mxu0 }
 0x15f   :  { %1278 = vmatprep.subr.bf16.mxu0 %v5379_v25  ;;  %v856_v4 = vmax.f32 %v761_v56, 0.0 }
 0x160   :  { %v764_v2 = vpop.f32.mrf.mxu0 }
 0x161   :  { %1320 = vmatpush1.bf16.msra.mxu1 %v5464_v54  ;;  %v765_v8 = vadd.f32 %v764_v2, %v242_v44  ;;  %v5635_v2 = vld [vmem:[#allocation8 + $0x70] ss:$8 sps:$4 sm:$0xff]  }
 0x162   :  { %1279 = vmatpush1.bf16.msra.mxu0 %v5385_v28  ;;  %1321 = vmatprep.subr.bf16.mxu1 %v5467_v55 }
 0x163   :  { %1280 = vmatprep.subr.bf16.mxu0 %v5388_v29  ;;  %v865_v17 = vmax.f32 %v765_v8, 0.0  ;;  %v5646_v8 = vld [vmem:[#allocation8 + $0x60] ss:$8 sps:$4 sm:$0xff]  }
 0x165   :  { %1322 = vmatpush1.bf16.msra.mxu1 %v5476_v58  ;;  %v5552_v23 = vpack.c.bf16 %v865_v17, %v856_v4  ;;  %v5640_v4 = vld [vmem:[#allocation8 + $0x64] ss:$8 sps:$4 sm:$0xff]   ;;  %v5654_v17 = vld [vmem:[#allocation8 + $0x50] ss:$8 sps:$4 sm:$0xff]  }
 0x166   :  { %1281 = vmatpush2.bf16.msra.mxu0 %v5398_v32  ;;  %1350 = vmatprep.subr.bf16.mxu1 %v5329_v3  ;;  %v6971_v3 = vld [vmem:[#allocation21_spill] sm:$0xff] }
 0x167   :  { %1282 = vmatprep.subr.bf16.mxu0 %v5404_v35 }
 0x168   :  { %1340 = vmatmul.mubr.bf16.vlgmr.msra.gmra.mxu1 %v5554_v26 }
 0x169   :  { %1351 = vmatpush1.bf16.msra.mxu1 %v5332_v6  ;;  %1382 = vmatprep.mubr.bf16.mxu1 %v5554_v26  ;;  %v6972_v6 = vld [vmem:[#allocation22_spill] sm:$0xff] }
 0x16a   :  { %1283 = vmatpush2.bf16.msra.mxu0 %v5412_v37  ;;  %1352 = vmatprep.subr.bf16.mxu1 %v5336_v7  ;;  %v6973_v7 = vld [vmem:[#allocation23_spill] sm:$0xff] }
 0x16b   :  { %1284 = vmatprep.subr.bf16.mxu0 %v5417_v38 }
 0x16d   :  { %1353 = vmatpush1.bf16.msra.mxu1 %v5343_v9  ;;  %v6974_v9 = vld [vmem:[#allocation24_spill] sm:$0xff] }
 0x16e   :  { %1285 = vmatpush2.bf16.msra.mxu0 %v5420_v39  ;;  %1354 = vmatprep.subr.bf16.mxu1 %v5346_v10  ;;  %v6975_v10 = vld [vmem:[#allocation25_spill] sm:$0xff] }
 0x16f   :  { %1286 = vmatprep.subr.bf16.mxu0 %v5428_v42 }
 0x171   :  { %1355 = vmatpush1.bf16.msra.mxu1 %v5350_v12 }
 0x172   :  { %1287 = vmatpush2.bf16.msra.mxu0 %v6971_v3  ;;  %1356 = vmatprep.subr.bf16.mxu1 %v5353_v13 }
 0x173   :  { %1288 = vmatprep.subr.bf16.mxu0 %v6972_v6 }
 0x175   :  { %1357 = vmatpush1.bf16.msra.mxu1 %v5355_v15  ;;  %v6977_v15 = vld [vmem:[#allocation27_spill] sm:$0xff] }
 0x176   :  { %1289 = vmatpush2.bf16.msra.mxu0 %v6973_v7  ;;  %1358 = vmatprep.subr.bf16.mxu1 %v5358_v16 }
 0x177   :  { %1290 = vmatprep.subr.bf16.mxu0 %v6974_v9 }
 0x179   :  { %1359 = vmatpush1.bf16.msra.mxu1 %v5362_v18 }
 0x17a   :  { %1291 = vmatpush2.bf16.msra.mxu0 %v6975_v10  ;;  %1360 = vmatprep.subr.bf16.mxu1 %v5365_v19  ;;  %v844_v12 = vpop.f32.mrf.mxu0 }
 0x17b   :  { %1292 = vmatprep.subr.bf16.mxu0 %v6976_v63  ;;  %v845_v13 = vadd.f32 %v4001_v60, %v844_v12  ;;  %v5678_v12 = vld [vmem:[#allocation8 + $0x20] ss:$8 sps:$4 sm:$0xff]  }
 0x17c   :  { %v4434_v5 = vpop.f32.mrf.mxu0 }
 0x17d   :  { %1361 = vmatpush1.bf16.msra.mxu1 %v5369_v21  ;;  %v859_v44 = vmax.f32 %v845_v13, 0.0  ;;  %v5682_v13 = vld [vmem:[#allocation8 + $0x14] ss:$8 sps:$4 sm:$0xff]   ;;  %v5686_v5 = vld [vmem:[#allocation8 + $0x10] ss:$8 sps:$4 sm:$0xff]  }
 0x17e   :  { %1293 = vmatpush2.bf16.msra.mxu0 %v6977_v15  ;;  %1362 = vmatprep.subr.bf16.mxu1 %v5372_v22  ;;  %v847_v16 = vpop.f32.mrf.mxu0  ;;  %v237_v22 = vsub.s32 4, %v5489_v61 }
 0x17f   :  { %1294 = vmatprep.subr.bf16.mxu0 %v6978_v27  ;;  %v848_v18 = vadd.f32 %v4001_v60, %v847_v16  ;;  %v5674_v60 = vld [vmem:[#allocation8 + $0x24] ss:$8 sps:$4 sm:$0xff]   ;;  %v5740_v16 = vld [vmem:[#allocation8 + $0xf4] ss:$8 sps:$4 sm:$0xff]  }
 0x180   :  { %v4435_v49 = vpop.f32.mrf.mxu0 }
 0x181   :  { %1363 = vmatpush1.bf16.msra.mxu1 %v5376_v24  ;;  %v868_v19 = vmax.f32 %v848_v18, 0.0  ;;  %v238_v24 = vrot.slane %v5495_v1, %v237_v22  ;;  %v5747_v18 = vld [vmem:[#allocation8 + $0xf0] ss:$8 sps:$4 sm:$0xff]   ;;  %v5814_v49 = vld [vmem:[#allocation8 + $0x154] ss:$8 sps:$4 sm:$0xff]  }
 0x182   :  { %1295 = vmatpush2.bf16.msra.mxu0 %v6979_v52  ;;  %1364 = vmatprep.subr.bf16.mxu1 %v5379_v25  ;;  %v5818_v22 = vld [vmem:[#allocation8 + $0x150] ss:$8 sps:$4 sm:$0xff]  }
 0x183   :  { %1393 = vmatprep.subr.bf16.mxu0 %v6980_v53  ;;  %v5589_v21 = vpack.c.bf16 %v868_v19, %v859_v44  ;;  %v763_v56 = vadd.f32 %v5544_v59, %v238_v24  ;;  %v5630_v59 = vld [vmem:[#allocation8 + $0x74] ss:$8 sps:$4 sm:$0xff]   ;;  %v5743_v44 = vld [vmem:[#allocation8 + $0x164] ss:$8 sps:$4 sm:$0xff]  }
 0x185   :  { %1297 = vmatmul.mubr.bf16.vlgmr.msra.gmra.mxu0 %v5507_v14  ;;  %1365 = vmatpush1.bf16.msra.mxu1 %v5385_v28  ;;  %v759_v14 = vadd.f32 %v5537_v48, %v238_v24  ;;  %v864_v62 = vmax.f32 %v763_v56, 0.0  ;;  %v5822_v24 = vld [vmem:[#allocation8 + $0x144] ss:$8 sps:$4 sm:$0xff]   ;;  %v5828_v56 = vld [vmem:[#allocation8 + $0x140] ss:$8 sps:$4 sm:$0xff]  }
 0x186   :  { %1394 = vmatpush1.bf16.msra.mxu0 %v5391_v30  ;;  %1366 = vmatprep.subr.bf16.mxu1 %v5388_v29 }
 0x187   :  { %1395 = vmatprep.subr.bf16.mxu0 %v5394_v31  ;;  %1425 = vmatprep.mubr.bf16.mxu0 %v6970_v0  ;;  %v855_v57 = vmax.f32 %v759_v14, 0.0 }
 0x189   :  { %1367 = vmatpush2.bf16.msra.mxu1 %v5398_v32  ;;  %v5628_v48 = vpack.c.bf16 %v864_v62, %v855_v57  ;;  %v249_v57 = vsub.s32 7, %v5489_v61  ;;  %v5833_v62 = vld [vmem:[#allocation8 + $0x134] ss:$8 sps:$4 sm:$0xff]  }
 0x18a   :  { %1396 = vmatpush1.bf16.msra.mxu0 %v5402_v33  ;;  %1368 = vmatprep.subr.bf16.mxu1 %v5404_v35 }
 0x18b   :  { %1397 = vmatprep.subr.bf16.mxu0 %v5407_v36 }
 0x18d   :  { %1369 = vmatpush2.bf16.msra.mxu1 %v5412_v37 }
 0x18e   :  { %1398 = vmatpush1.bf16.msra.mxu0 %v5415_v34  ;;  %1370 = vmatprep.subr.bf16.mxu1 %v5417_v38 }
 0x18f   :  { %1399 = vmatprep.subr.bf16.mxu0 %v5422_v40 }
 0x191   :  { %1371 = vmatpush2.bf16.msra.mxu1 %v5420_v39 }
 0x192   :  { %1400 = vmatpush1.bf16.msra.mxu0 %v5426_v41  ;;  %1372 = vmatprep.subr.bf16.mxu1 %v5428_v42 }
 0x193   :  { %1401 = vmatprep.subr.bf16.mxu0 %v5431_v43 }
 0x195   :  { %1373 = vmatpush2.bf16.msra.mxu1 %v6971_v3 }
 0x196   :  { %1402 = vmatpush1.bf16.msra.mxu0 %v5440_v46  ;;  %1374 = vmatprep.subr.bf16.mxu1 %v6972_v6 }
 0x197   :  { %1403 = vmatprep.subr.bf16.mxu0 %v5443_v47 }
 0x199   :  { %1375 = vmatpush2.bf16.msra.mxu1 %v6973_v7 }
 0x19a   :  { %1404 = vmatpush1.bf16.msra.mxu0 %v5452_v50  ;;  %1376 = vmatprep.subr.bf16.mxu1 %v6974_v9 }
 0x19b   :  { %1405 = vmatprep.subr.bf16.mxu0 %v5455_v51 }
 0x19d   :  { %1377 = vmatpush2.bf16.msra.mxu1 %v6975_v10 }
 0x19e   :  { %1406 = vmatpush1.bf16.msra.mxu0 %v5464_v54  ;;  %1378 = vmatprep.subr.bf16.mxu1 %v6976_v63 }
 0x19f   :  { %1407 = vmatprep.subr.bf16.mxu0 %v5467_v55 }
 0x1a1   :  { %1379 = vmatpush2.bf16.msra.mxu1 %v6977_v15 }
 0x1a2   :  { %1408 = vmatpush1.bf16.msra.mxu0 %v5476_v58  ;;  %1380 = vmatprep.subr.bf16.mxu1 %v6978_v27 }
 0x1a3   :  { %1436 = vmatprep.subr.bf16.mxu0 %v5630_v59 }
 0x1a5   :  { %1381 = vmatpush2.bf16.msra.mxu1 %v6979_v52  ;;  %1426 = vmatmul.mubr.bf16.vlgmr.msra.gmra.mxu0 %v5628_v48 }
 0x1a6   :  { %1437 = vmatpush1.bf16.msra.mxu0 %v5635_v2  ;;  %1468 = vmatprep.mubr.bf16.mxu0 %v5628_v48 }
 0x1a7   :  { %1479 = vmatprep.subr.bf16.mxu1 %v6980_v53  ;;  %1438 = vmatprep.subr.bf16.mxu0 %v5640_v4 }
 0x1a8   :  { %1383 = vmatmul.mubr.bf16.vlgmr.msra.gmra.mxu1 %v5505_v45  ;;  %v5662_v45 = vld [vmem:[#allocation8 + $0x40] ss:$8 sps:$4 sm:$0xff]  }
 0x1a9   :  { %1480 = vmatpush1.bf16.msra.mxu1 %v5391_v30  ;;  %1511 = vmatprep.mubr.bf16.mxu1 %v6970_v0  ;;  %v5658_v30 = vld [vmem:[#allocation8 + $0x44] ss:$8 sps:$4 sm:$0xff]  }
 0x1aa   :  { %1439 = vmatpush1.bf16.msra.mxu0 %v5646_v8  ;;  %1481 = vmatprep.subr.bf16.mxu1 %v5394_v31  ;;  %v5666_v31 = vld [vmem:[#allocation8 + $0x34] ss:$8 sps:$4 sm:$0xff]  }
 0x1ab   :  { %1440 = vmatprep.subr.bf16.mxu0 %v5650_v11 }
 0x1ad   :  { %1482 = vmatpush1.bf16.msra.mxu1 %v5402_v33 }
 0x1ae   :  { %1441 = vmatpush1.bf16.msra.mxu0 %v5654_v17  ;;  %1483 = vmatprep.subr.bf16.mxu1 %v5407_v36 }
 0x1af   :  { %1442 = vmatprep.subr.bf16.mxu0 %v5658_v30 }
 0x1b1   :  { %1484 = vmatpush1.bf16.msra.mxu1 %v5415_v34 }
 0x1b2   :  { %1443 = vmatpush1.bf16.msra.mxu0 %v5662_v45  ;;  %1485 = vmatprep.subr.bf16.mxu1 %v5422_v40 }
 0x1b3   :  { %1444 = vmatprep.subr.bf16.mxu0 %v5666_v31 }
 0x1b5   :  { %1486 = vmatpush1.bf16.msra.mxu1 %v5426_v41 }
 0x1b6   :  { %1445 = vmatpush1.bf16.msra.mxu0 %v5670_v20  ;;  %1487 = vmatprep.subr.bf16.mxu1 %v5431_v43 }
 0x1b7   :  { %1446 = vmatprep.subr.bf16.mxu0 %v5674_v60 }
 0x1b9   :  { %1488 = vmatpush1.bf16.msra.mxu1 %v5440_v46 }
 0x1ba   :  { %1447 = vmatpush1.bf16.msra.mxu0 %v5678_v12  ;;  %1489 = vmatprep.subr.bf16.mxu1 %v5443_v47 }
 0x1bb   :  { %1448 = vmatprep.subr.bf16.mxu0 %v5682_v13 }
 0x1bd   :  { %1490 = vmatpush1.bf16.msra.mxu1 %v5452_v50 }
 0x1be   :  { %1449 = vmatpush1.bf16.msra.mxu0 %v5686_v5  ;;  %1491 = vmatprep.subr.bf16.mxu1 %v5455_v51 }
 0x1bf   :  { %1450 = vmatprep.subr.bf16.mxu0 %v5379_v25  ;;  %v5727_v25 = vld [vmem:[#allocation8 + $0x4] ss:$8 sps:$4 sm:$0xff]  }
 0x1c1   :  { %1492 = vmatpush1.bf16.msra.mxu1 %v5464_v54 }
 0x1c2   :  { %1451 = vmatpush1.bf16.msra.mxu0 %v5385_v28  ;;  %1493 = vmatprep.subr.bf16.mxu1 %v5467_v55  ;;  %v5730_v28 = vld [vmem:[#allocation8 + $0x174] ss:$8 sps:$4 sm:$0xff]  }
 0x1c3   :  { %1452 = vmatprep.subr.bf16.mxu0 %v5388_v29  ;;  %v5734_v29 = vld [vmem:[#allocation8] ss:$8 sps:$4 sm:$0xff]  }
 0x1c5   :  { %1494 = vmatpush1.bf16.msra.mxu1 %v5476_v58 }
 0x1c6   :  { %1453 = vmatpush2.bf16.msra.mxu0 %v5398_v32  ;;  %1522 = vmatprep.subr.bf16.mxu1 %v5630_v59  ;;  %v5737_v32 = vld [vmem:[#allocation8 + $0x170] ss:$8 sps:$4 sm:$0xff]  }
 0x1c7   :  { %1454 = vmatprep.subr.bf16.mxu0 %v5404_v35 }
 0x1c8   :  { %1512 = vmatmul.mubr.bf16.vlgmr.msra.gmra.mxu1 %v5552_v23 }
 0x1c9   :  { %1523 = vmatpush1.bf16.msra.mxu1 %v5635_v2  ;;  %1554 = vmatprep.mubr.bf16.mxu1 %v5552_v23 }
 0x1ca   :  { %1455 = vmatpush2.bf16.msra.mxu0 %v5412_v37  ;;  %1524 = vmatprep.subr.bf16.mxu1 %v5640_v4 }
 0x1cb   :  { %1456 = vmatprep.subr.bf16.mxu0 %v5417_v38 }
 0x1cd   :  { %1525 = vmatpush1.bf16.msra.mxu1 %v5646_v8 }
 0x1ce   :  { %1457 = vmatpush2.bf16.msra.mxu0 %v5420_v39  ;;  %1526 = vmatprep.subr.bf16.mxu1 %v5650_v11 }
 0x1cf   :  { %1458 = vmatprep.subr.bf16.mxu0 %v5428_v42 }
 0x1d1   :  { %1527 = vmatpush1.bf16.msra.mxu1 %v5654_v17 }
 0x1d2   :  { %1459 = vmatpush2.bf16.msra.mxu0 %v6971_v3  ;;  %1528 = vmatprep.subr.bf16.mxu1 %v5658_v30 }
 0x1d3   :  { %1460 = vmatprep.subr.bf16.mxu0 %v6972_v6 }
 0x1d5   :  { %1529 = vmatpush1.bf16.msra.mxu1 %v5662_v45 }
 0x1d6   :  { %1461 = vmatpush2.bf16.msra.mxu0 %v6973_v7  ;;  %1530 = vmatprep.subr.bf16.mxu1 %v5666_v31 }
 0x1d7   :  { %1462 = vmatprep.subr.bf16.mxu0 %v6974_v9 }
 0x1d9   :  { %1531 = vmatpush1.bf16.msra.mxu1 %v5670_v20 }
 0x1da   :  { %1463 = vmatpush2.bf16.msra.mxu0 %v6975_v10  ;;  %1532 = vmatprep.subr.bf16.mxu1 %v5674_v60 }
 0x1db   :  { %1464 = vmatprep.subr.bf16.mxu0 %v6976_v63 }
 0x1dd   :  { %1533 = vmatpush1.bf16.msra.mxu1 %v5678_v12 }
 0x1de   :  { %1465 = vmatpush2.bf16.msra.mxu0 %v6977_v15  ;;  %1534 = vmatprep.subr.bf16.mxu1 %v5682_v13 }
 0x1df   :  { %1466 = vmatprep.subr.bf16.mxu0 %v6978_v27 }
 0x1e1   :  { %1535 = vmatpush1.bf16.msra.mxu1 %v5686_v5 }
 0x1e2   :  { %1467 = vmatpush2.bf16.msra.mxu0 %v6979_v52  ;;  %1536 = vmatprep.subr.bf16.mxu1 %v5727_v25 }
 0x1e3   :  { %1565 = vmatprep.subr.bf16.mxu0 %v5730_v28 }
 0x1e5   :  { %1469 = vmatmul.mubr.bf16.vlgmr.msra.gmra.mxu0 %v5554_v26  ;;  %1537 = vmatpush1.bf16.msra.mxu1 %v5734_v29  ;;  %v801_v26 = vpop.f32.mrf.mxu1 }
 0x1e6   :  { %1566 = vmatpush1.bf16.msra.mxu0 %v5737_v32  ;;  %1538 = vmatprep.subr.bf16.mxu1 %v5740_v16 }
 0x1e7   :  { %1567 = vmatprep.subr.bf16.mxu0 %v5743_v44  ;;  %1597 = vmatprep.mubr.bf16.mxu0 %v6970_v0 }
 0x1e9   :  { %1539 = vmatpush2.bf16.msra.mxu1 %v5747_v18 }
 0x1ea   :  { %1568 = vmatpush1.bf16.msra.mxu0 %v5402_v33  ;;  %1540 = vmatprep.subr.bf16.mxu1 %v5404_v35  ;;  %v245_v33 = vsub.s32 6, %v5489_v61  ;;  %v5764_v35 = vpop.f32.mrf.mxu1  ;;  %v5846_v61 = vld [vmem:[#allocation8 + $0x120] ss:$8 sps:$4 sm:$0xff]  }
 0x1eb   :  { %1569 = vmatprep.subr.bf16.mxu0 %v5407_v36 }
 0x1ec   :  { %v246_v36 = vrot.slane %v5495_v1, %v245_v33  ;;  %v5842_v33 = vld [vmem:[#allocation8 + $0x124] ss:$8 sps:$4 sm:$0xff]  }
 0x1ed   :  { %1541 = vmatpush2.bf16.msra.mxu1 %v5412_v37  ;;  %v805_v37 = vpop.f32.mrf.mxu1 }
 0x1ee   :  { %1570 = vmatpush1.bf16.msra.mxu0 %v5415_v34  ;;  %1542 = vmatprep.subr.bf16.mxu1 %v5417_v38  ;;  %v802_v34 = vadd.f32 %v801_v26, %v246_v36  ;;  %v806_v38 = vadd.f32 %v805_v37, %v246_v36  ;;  %v250_v26 = vrot.slane %v5495_v1, %v249_v57  ;;  %v4941_v57 = vld [vmem:[#allocation8 + $0x100] ss:$8 sps:$4 sm:$0xff]  }
 0x1ef   :  { %1571 = vmatprep.subr.bf16.mxu0 %v5422_v40 }
 0x1f0   :  { %v866_v40 = vmax.f32 %v806_v38, 0.0  ;;  %v804_v36 = vadd.f32 %v5764_v35, %v250_v26 }
 0x1f1   :  { %1543 = vmatpush2.bf16.msra.mxu1 %v5420_v39  ;;  %v857_v39 = vmax.f32 %v802_v34, 0.0  ;;  %v5851_v34 = vld [vmem:[#allocation8 + $0x114] ss:$8 sps:$4 sm:$0xff]  }
 0x1f2   :  { %1572 = vmatpush1.bf16.msra.mxu0 %v5426_v41  ;;  %1544 = vmatprep.subr.bf16.mxu1 %v5428_v42  ;;  %v5781_v41 = vld [vmem:[%s6762_s4] sm:$0x3]  ;;  %v858_v1 = vmax.f32 %v804_v36, 0.0  ;;  %v5942_v36 = vld [vmem:[#allocation10 + $0x170] ss:$8 sps:$4 sm:$0xff]  }
 0x1f3   :  { %1573 = vmatprep.subr.bf16.mxu0 %v5431_v43  ;;  %v5785_v42 = vpack.c.bf16 %v866_v40, %v857_v39  ;;  %v6981_v43 = vld [vmem:[#allocation30_spill] sm:$0xff]  ;;  %v4931_v40 = vld [vmem:[#allocation8 + $0xb4] ss:$8 sps:$4 sm:$0xff]  }
 0x1f4   :  { %v4925_v39 = vld [vmem:[#allocation8 + $0xe4] ss:$8 sps:$4 sm:$0xff]  }
 0x1f5   :  { %1545 = vmatpush2.bf16.msra.mxu1 %v6971_v3 }
 0x1f6   :  { %1574 = vmatpush1.bf16.msra.mxu0 %v5440_v46  ;;  %1546 = vmatprep.subr.bf16.mxu1 %v6972_v6  ;;  %v5790_v46 = vrot.slane %v5781_v41, %v6981_v43  ;;  %v6102_v43 = vld [vmem:[#allocation10 + $0xa0] ss:$8 sps:$4 sm:$0xff]  }
 0x1f7   :  { %1575 = vmatprep.subr.bf16.mxu0 %v5443_v47  ;;  %v807_v47 = vpop.f32.mrf.mxu1  ;;  %7020 = vst [vmem:[#allocation59_spill] sm:$0xff] %v6102_v43 }
 0x1f8   :  { %v808_v37 = vadd.f32 %v807_v47, %v250_v26  ;;  %v5938_v26 = vld [vmem:[#allocation10 + $0x64] ss:$8 sps:$4 sm:$0xff]  }
 0x1f9   :  { %1547 = vmatpush2.bf16.msra.mxu1 %v6973_v7  ;;  %6986 = vst [vmem:[#allocation24_spill] sm:$0xff] %v5938_v26 }
 0x1fa   :  { %1576 = vmatpush1.bf16.msra.mxu0 %v5452_v50  ;;  %1548 = vmatprep.subr.bf16.mxu1 %v6974_v9  ;;  %v867_v38 = vmax.f32 %v808_v37, 0.0 }
 0x1fb   :  { %1577 = vmatprep.subr.bf16.mxu0 %v5455_v51 }
 0x1fc   :  { %v876_v35 = vpack.c.bf16 %v867_v38, %v858_v1  ;;  %v5947_v1 = vld [vmem:[#allocation10 + $0x164] ss:$8 sps:$4 sm:$0xff]  }
 0x1fd   :  { %1549 = vmatpush2.bf16.msra.mxu1 %v6975_v10 }
 0x1fe   :  { %1578 = vmatpush1.bf16.msra.mxu0 %v5464_v54  ;;  %1550 = vmatprep.subr.bf16.mxu1 %v6976_v63 }
 0x1ff   :  { %1579 = vmatprep.subr.bf16.mxu0 %v5467_v55 }
 0x201   :  { %1551 = vmatpush2.bf16.msra.mxu1 %v6977_v15  ;;  %v5810_v15 = vld [vmem:[#allocation8 + $0x160] ss:$8 sps:$4 sm:$0xff]  }
 0x202   :  { %1580 = vmatpush1.bf16.msra.mxu0 %v5476_v58  ;;  %1552 = vmatprep.subr.bf16.mxu1 %v6978_v27 }
 0x203   :  { %1608 = vmatprep.subr.bf16.mxu0 %v5630_v59 }
 0x205   :  { %1553 = vmatpush2.bf16.msra.mxu1 %v6979_v52  ;;  %1598 = vmatmul.mubr.bf16.vlgmr.msra.gmra.mxu0 %v5785_v42  ;;  %v1255_v50 = vpop.f32.mrf.mxu0 }
 0x206   :  { %1609 = vmatpush1.bf16.msra.mxu0 %v5635_v2  ;;  %1640 = vmatprep.mubr.bf16.mxu0 %v5785_v42 }
 0x207   :  { %1651 = vmatprep.subr.bf16.mxu1 %v5730_v28  ;;  %1610 = vmatprep.subr.bf16.mxu0 %v5640_v4  ;;  %v5802_v6 = vpop.f32.mrf.mxu0 }
 0x208   :  { %1555 = vmatmul.mubr.bf16.vlgmr.msra.gmra.mxu1 %v5628_v48  ;;  %v1212_v51 = vpop.f32.mrf.mxu1  ;;  %v5837_v48 = vld [vmem:[#allocation8 + $0x130] ss:$8 sps:$4 sm:$0xff]  }
 0x209   :  { %v1213_v3 = vadd.f32 %v1212_v51, %v5790_v46  ;;  %1652 = vmatpush1.bf16.msra.mxu1 %v5737_v32  ;;  %1683 = vmatprep.mubr.bf16.mxu1 %v6970_v0  ;;  %v1259_v27 = vpop.f32.mrf.mxu0 }
 0x20a   :  { %1611 = vmatpush1.bf16.msra.mxu0 %v5646_v8  ;;  %v5805_v7 = vpop.f32.mrf.mxu1  ;;  %1653 = vmatprep.subr.bf16.mxu1 %v5743_v44 }
 0x20b   :  { %v1256_v9 = vadd.f32 %v1255_v50, %v1213_v3  ;;  %1612 = vmatprep.subr.bf16.mxu0 %v5650_v11 }
 0x20c   :  { %v1216_v10 = vpop.f32.mrf.mxu1 }
 0x20d   :  { %v1217_v63 = vadd.f32 %v1216_v10, %v5790_v46  ;;  %1654 = vmatpush1.bf16.msra.mxu1 %v5810_v15  ;;  %v1780_v52 = vmax.f32 %v1256_v9, 0.0 }
 0x20e   :  { %1613 = vmatpush1.bf16.msra.mxu0 %v5654_v17  ;;  %1655 = vmatprep.subr.bf16.mxu1 %v5814_v49 }
 0x20f   :  { %v1260_v19 = vadd.f32 %v1259_v27, %v1217_v63  ;;  %1614 = vmatprep.subr.bf16.mxu0 %v5658_v30 }
 0x211   :  { %v1794_v53 = vmax.f32 %v1260_v19, 0.0  ;;  %1656 = vmatpush1.bf16.msra.mxu1 %v5818_v22  ;;  %v4939_v19 = vld [vmem:[#allocation8 + $0x110] ss:$8 sps:$4 sm:$0xff]  }
 0x212   :  { %1615 = vmatpush1.bf16.msra.mxu0 %v5662_v45  ;;  %1657 = vmatprep.subr.bf16.mxu1 %v5822_v24 }
 0x213   :  { %v5825_v14 = vpack.c.bf16 %v1794_v53, %v1780_v52  ;;  %1616 = vmatprep.subr.bf16.mxu0 %v5666_v31  ;;  %v4940_v52 = vld [vmem:[#allocation8 + $0x104] ss:$8 sps:$4 sm:$0xff]   ;;  %v5929_v53 = vld [vmem:[#allocation10 + $0x74] ss:$8 sps:$4 sm:$0xff]  }
 0x214   :  { %6984 = vst [vmem:[#allocation22_spill] sm:$0xff] %v5929_v53 }
 0x215   :  { %1658 = vmatpush1.bf16.msra.mxu1 %v5828_v56 }
 0x216   :  { %1617 = vmatpush1.bf16.msra.mxu0 %v5670_v20  ;;  %1659 = vmatprep.subr.bf16.mxu1 %v5833_v62 }
 0x217   :  { %1618 = vmatprep.subr.bf16.mxu0 %v5674_v60 }
 0x219   :  { %1660 = vmatpush1.bf16.msra.mxu1 %v5837_v48 }
 0x21a   :  { %1619 = vmatpush1.bf16.msra.mxu0 %v5678_v12  ;;  %1661 = vmatprep.subr.bf16.mxu1 %v5842_v33 }
 0x21b   :  { %1620 = vmatprep.subr.bf16.mxu0 %v5682_v13 }
 0x21d   :  { %1662 = vmatpush1.bf16.msra.mxu1 %v5846_v61 }
 0x21e   :  { %1621 = vmatpush1.bf16.msra.mxu0 %v5686_v5  ;;  %1663 = vmatprep.subr.bf16.mxu1 %v5851_v34 }
 0x21f   :  { %1622 = vmatprep.subr.bf16.mxu0 %v5727_v25 }
 0x221   :  { %1664 = vmatpush1.bf16.msra.mxu1 %v5464_v54  ;;  %v4926_v54 = vld [vmem:[#allocation8 + $0xe0] ss:$8 sps:$4 sm:$0xff]  }
 0x222   :  { %1623 = vmatpush1.bf16.msra.mxu0 %v5734_v29  ;;  %1665 = vmatprep.subr.bf16.mxu1 %v5467_v55  ;;  %v4927_v55 = vld [vmem:[#allocation8 + $0xd4] ss:$8 sps:$4 sm:$0xff]  }
 0x223   :  { %1624 = vmatprep.subr.bf16.mxu0 %v5740_v16 }
 0x225   :  { %1666 = vmatpush1.bf16.msra.mxu1 %v5476_v58  ;;  %v5865_v58 = vld [vmem:[#allocation8 + $0xd0] ss:$8 sps:$4 sm:$0xff]  }
 0x226   :  { %1625 = vmatpush2.bf16.msra.mxu0 %v5747_v18  ;;  %1694 = vmatprep.subr.bf16.mxu1 %v5630_v59  ;;  %v4929_v59 = vld [vmem:[#allocation8 + $0xc4] ss:$8 sps:$4 sm:$0xff]  }
 0x227   :  { %1626 = vmatprep.subr.bf16.mxu0 %v4925_v39 }
 0x228   :  { %1684 = vmatmul.mubr.bf16.vlgmr.msra.gmra.mxu1 %v876_v35 }
 0x229   :  { %1695 = vmatpush1.bf16.msra.mxu1 %v5635_v2  ;;  %1726 = vmatprep.mubr.bf16.mxu1 %v876_v35  ;;  %v4930_v2 = vld [vmem:[#allocation8 + $0xc0] ss:$8 sps:$4 sm:$0xff]   ;;  %v5953_v35 = vld [vmem:[#allocation10 + $0x54] ss:$8 sps:$4 sm:$0xff]  }
 0x22a   :  { %1627 = vmatpush2.bf16.msra.mxu0 %v4926_v54  ;;  %1696 = vmatprep.subr.bf16.mxu1 %v5640_v4  ;;  %v4932_v4 = vld [vmem:[#allocation8 + $0xb0] ss:$8 sps:$4 sm:$0xff]   ;;  %6988 = vst [vmem:[#allocation26_spill] sm:$0xff] %v5953_v35 }
 0x22b   :  { %1628 = vmatprep.subr.bf16.mxu0 %v4927_v55 }
 0x22d   :  { %1697 = vmatpush1.bf16.msra.mxu1 %v5646_v8  ;;  %v4933_v8 = vld [vmem:[#allocation8 + $0xa4] ss:$8 sps:$4 sm:$0xff]  }
 0x22e   :  { %1629 = vmatpush2.bf16.msra.mxu0 %v5865_v58  ;;  %1698 = vmatprep.subr.bf16.mxu1 %v5650_v11  ;;  %v5874_v11 = vld [vmem:[#allocation8 + $0xa0] ss:$8 sps:$4 sm:$0xff]  }
 0x22f   :  { %1630 = vmatprep.subr.bf16.mxu0 %v4929_v59 }
 0x231   :  { %1699 = vmatpush1.bf16.msra.mxu1 %v5654_v17  ;;  %v5878_v17 = vld [vmem:[#allocation8 + $0x94] ss:$8 sps:$4 sm:$0xff]  }
 0x232   :  { %1631 = vmatpush2.bf16.msra.mxu0 %v4930_v2  ;;  %1700 = vmatprep.subr.bf16.mxu1 %v5658_v30  ;;  %v5882_v30 = vld [vmem:[#allocation8 + $0x90] ss:$8 sps:$4 sm:$0xff]  }
 0x233   :  { %1632 = vmatprep.subr.bf16.mxu0 %v4931_v40 }
 0x235   :  { %1701 = vmatpush1.bf16.msra.mxu1 %v5662_v45  ;;  %v5886_v45 = vld [vmem:[#allocation8 + $0x84] ss:$8 sps:$4 sm:$0xff]  }
 0x236   :  { %1633 = vmatpush2.bf16.msra.mxu0 %v4932_v4  ;;  %1702 = vmatprep.subr.bf16.mxu1 %v5666_v31  ;;  %v1218_v31 = vpop.f32.mrf.mxu1 }
 0x237   :  { %1634 = vmatprep.subr.bf16.mxu0 %v4933_v8 }
 0x239   :  { %1703 = vmatpush1.bf16.msra.mxu1 %v5670_v20  ;;  %v5890_v20 = vld [vmem:[#allocation8 + $0x80] ss:$8 sps:$4 sm:$0xff]  }
 0x23a   :  { %1635 = vmatpush2.bf16.msra.mxu0 %v5874_v11  ;;  %1704 = vmatprep.subr.bf16.mxu1 %v5674_v60  ;;  %v1261_v60 = vpop.f32.mrf.mxu0 }
 0x23b   :  { %1636 = vmatprep.subr.bf16.mxu0 %v5878_v17 }
 0x23d   :  { %1705 = vmatpush1.bf16.msra.mxu1 %v5678_v12  ;;  %v1341_v12 = vpop.f32.mrf.mxu1 }
 0x23e   :  { %1637 = vmatpush2.bf16.msra.mxu0 %v5882_v30  ;;  %1706 = vmatprep.subr.bf16.mxu1 %v5682_v13 }
 0x23f   :  { %1638 = vmatprep.subr.bf16.mxu0 %v5886_v45 }
 0x241   :  { %1707 = vmatpush1.bf16.msra.mxu1 %v5686_v5  ;;  %v1343_v5 = vpop.f32.mrf.mxu1 }
 0x242   :  { %1639 = vmatpush2.bf16.msra.mxu0 %v5890_v20  ;;  %1708 = vmatprep.subr.bf16.mxu1 %v5727_v25 }
 0x243   :  { %1737 = vmatprep.subr.bf16.mxu0 %v5730_v28  ;;  %v1345_v28 = vpop.f32.mrf.mxu1 }
 0x245   :  { %v1298_v47 = vpop.f32.mrf.mxu0  ;;  %1641 = vmatmul.mubr.bf16.vlgmr.msra.gmra.mxu0 %v5552_v23  ;;  %1709 = vmatpush1.bf16.msra.mxu1 %v5734_v29 }
 0x246   :  { %v1299_v13 = vadd.f32 %v1298_v47, %v5790_v46  ;;  %1738 = vmatpush1.bf16.msra.mxu0 %v5737_v32  ;;  %1710 = vmatprep.subr.bf16.mxu1 %v5740_v16  ;;  %v5988_v47 = vld [vmem:[#allocation10 + $0x140] ss:$8 sps:$4 sm:$0xff]  }
 0x247   :  { %v1300_v50 = vpop.f32.mrf.mxu0  ;;  %1739 = vmatprep.subr.bf16.mxu0 %v5743_v44  ;;  %1769 = vmatprep.mubr.bf16.mxu0 %v6970_v0  ;;  %v6982_v44 = vld [vmem:[#allocation31_spill] sm:$0xff] }
 0x248   :  { %v1342_v25 = vadd.f32 %v1341_v12, %v1299_v13  ;;  %v5992_v13 = vld [vmem:[#allocation10 + $0x30] ss:$8 sps:$4 sm:$0xff]  }
 0x249   :  { %v1302_v51 = vpop.f32.mrf.mxu0  ;;  %1711 = vmatpush2.bf16.msra.mxu1 %v5747_v18  ;;  %v5915_v18 = vrot.slane %v5781_v41, %v6982_v44  ;;  %6993 = vst [vmem:[#allocation32_spill] sm:$0xff] %v5992_v13  ;;  %v6104_v44 = vld [vmem:[#allocation10 + $0x1a4] ss:$8 sps:$4 sm:$0xff]  }
 0x24a   :  { %v1303_v23 = vadd.f32 %v1302_v51, %v5790_v46  ;;  %1740 = vmatpush1.bf16.msra.mxu0 %v5810_v15  ;;  %1712 = vmatprep.subr.bf16.mxu1 %v4925_v39  ;;  %v1782_v32 = vmax.f32 %v1342_v25, 0.0  ;;  %v5999_v25 = vld [vmem:[#allocation10 + $0x24] ss:$8 sps:$4 sm:$0xff]   ;;  %v6002_v51 = vld [vmem:[#allocation10 + $0x130] ss:$8 sps:$4 sm:$0xff]   ;;  %7021 = vst [vmem:[#allocation60_spill] sm:$0xff] %v6104_v44 }
 0x24b   :  { %1741 = vmatprep.subr.bf16.mxu0 %v5814_v49  ;;  %6983 = vst [vmem:[#allocation21_spill] sm:$0xff] %v5915_v18  ;;  %v1219_v3 = vadd.f32 %v1218_v31, %v5915_v18  ;;  %v1304_v9 = vpop.f32.mrf.mxu0  ;;  %v1215_v10 = vadd.f32 %v5805_v7, %v5915_v18  ;;  %v1301_v15 = vadd.f32 %v1300_v50, %v5915_v18  ;;  %v1347_v49 = vpop.f32.mrf.mxu1  ;;  %6994 = vst [vmem:[#allocation33_spill] sm:$0xff] %v5999_v25 }
 0x24c   :  { %v1346_v29 = vadd.f32 %v1345_v28, %v1303_v23  ;;  %v1305_v63 = vadd.f32 %v1304_v9, %v5915_v18  ;;  %v6006_v23 = vld [vmem:[#allocation10 + $0x20] ss:$8 sps:$4 sm:$0xff]   ;;  %v6008_v28 = vld [vmem:[#allocation10 + $0x124] ss:$8 sps:$4 sm:$0xff]  }
 0x24d   :  { %1713 = vmatpush2.bf16.msra.mxu1 %v4926_v54  ;;  %v1262_v41 = vadd.f32 %v1261_v60, %v1219_v3  ;;  %v1258_v27 = vadd.f32 %v5802_v6, %v1215_v10  ;;  %v5933_v6 = vld [vmem:[#allocation10 + $0x70] ss:$8 sps:$4 sm:$0xff]   ;;  %v5959_v54 = vld [vmem:[#allocation10 + $0x160] ss:$8 sps:$4 sm:$0xff]   ;;  %6995 = vst [vmem:[#allocation34_spill] sm:$0xff] %v6006_v23 }
 0x24e   :  { %v1796_v16 = vmax.f32 %v1346_v29, 0.0  ;;  %1742 = vmatpush1.bf16.msra.mxu0 %v5818_v22  ;;  %1714 = vmatprep.subr.bf16.mxu1 %v4927_v55  ;;  %v1348_v7 = vadd.f32 %v1347_v49, %v1305_v63  ;;  %6985 = vst [vmem:[#allocation23_spill] sm:$0xff] %v5933_v6  ;;  %v6011_v29 = vld [vmem:[#allocation10 + $0x14] ss:$8 sps:$4 sm:$0xff]   ;;  %v6023_v9 = vld [vmem:[#allocation10 + $0x4] ss:$8 sps:$4 sm:$0xff]  }
 0x24f   :  { %1743 = vmatprep.subr.bf16.mxu0 %v5822_v24  ;;  %v1795_v22 = vmax.f32 %v1262_v41, 0.0  ;;  %v1344_v24 = vadd.f32 %v1343_v5, %v1301_v15  ;;  %v5994_v5 = vld [vmem:[#allocation10 + $0x134] ss:$8 sps:$4 sm:$0xff]   ;;  %6996 = vst [vmem:[#allocation35_spill] sm:$0xff] %v6011_v29  ;;  %6999 = vst [vmem:[#allocation38_spill] sm:$0xff] %v6023_v9 }
 0x250   :  { %v5908_v0 = vpack.c.bf16 %v1796_v16, %v1782_v32  ;;  %v6014_v32 = vld [vmem:[#allocation10 + $0x120] ss:$8 sps:$4 sm:$0xff]   ;;  %v6018_v16 = vld [vmem:[#allocation10 + $0x10] ss:$8 sps:$4 sm:$0xff]   ;;  %v6020_v3 = vld [vmem:[#allocation10 + $0x114] ss:$8 sps:$4 sm:$0xff]  }
 0x251   :  { %1715 = vmatpush2.bf16.msra.mxu1 %v5865_v58  ;;  %6997 = vst [vmem:[#allocation36_spill] sm:$0xff] %v6018_v16  ;;  %6998 = vst [vmem:[#allocation37_spill] sm:$0xff] %v6020_v3  ;;  %v6026_v10 = vld [vmem:[#allocation10 + $0x110] ss:$8 sps:$4 sm:$0xff]   ;;  %v6030_v63 = vld [vmem:[#allocation10] ss:$8 sps:$4 sm:$0xff]  }
 0x252   :  { %1744 = vmatpush1.bf16.msra.mxu0 %v5828_v56  ;;  %1716 = vmatprep.subr.bf16.mxu1 %v4929_v59  ;;  %v1781_v56 = vmax.f32 %v1258_v27, 0.0  ;;  %v5967_v59 = vld [vmem:[#allocation10 + $0x50] ss:$8 sps:$4 sm:$0xff]   ;;  %7000 = vst [vmem:[#allocation39_spill] sm:$0xff] %v6026_v10  ;;  %7001 = vst [vmem:[#allocation40_spill] sm:$0xff] %v6030_v63 }
 0x253   :  { %1745 = vmatprep.subr.bf16.mxu0 %v5833_v62  ;;  %v1797_v62 = vmax.f32 %v1348_v7, 0.0  ;;  %6989 = vst [vmem:[#allocation27_spill] sm:$0xff] %v5967_v59  ;;  %v6032_v41 = vld [vmem:[#allocation10 + $0x104] ss:$8 sps:$4 sm:$0xff]   ;;  %v6035_v15 = vld [vmem:[#allocation10 + $0xf4] ss:$8 sps:$4 sm:$0xff]  }
 0x254   :  { %7002 = vst [vmem:[#allocation41_spill] sm:$0xff] %v6032_v41  ;;  %7003 = vst [vmem:[#allocation42_spill] sm:$0xff] %v6035_v15  ;;  %v6038_v27 = vld [vmem:[#allocation10 + $0x100] ss:$8 sps:$4 sm:$0xff]   ;;  %v6042_v49 = vld [vmem:[#allocation10 + $0xf0] ss:$8 sps:$4 sm:$0xff]  }
 0x255   :  { %1717 = vmatpush2.bf16.msra.mxu1 %v4930_v2  ;;  %v5969_v2 = vld [vmem:[#allocation10 + $0x154] ss:$8 sps:$4 sm:$0xff]   ;;  %7004 = vst [vmem:[#allocation43_spill] sm:$0xff] %v6038_v27  ;;  %7005 = vst [vmem:[#allocation44_spill] sm:$0xff] %v6042_v49  ;;  %v6047_v7 = vld [vmem:[#allocation10 + $0xe4] ss:$8 sps:$4 sm:$0xff]  }
 0x256   :  { %1746 = vmatpush1.bf16.msra.mxu0 %v5837_v48  ;;  %1718 = vmatprep.subr.bf16.mxu1 %v4931_v40  ;;  %v5936_v48 = vld [vmem:[#allocation10 + $0x174] ss:$8 sps:$4 sm:$0xff]   ;;  %v5972_v40 = vld [vmem:[#allocation10 + $0x44] ss:$8 sps:$4 sm:$0xff]   ;;  %7007 = vst [vmem:[#allocation46_spill] sm:$0xff] %v6047_v7 }
 0x257   :  { %1747 = vmatprep.subr.bf16.mxu0 %v5842_v33  ;;  %v1809_v33 = vpack.c.bf16 %v1795_v22, %v1781_v56  ;;  %6990 = vst [vmem:[#allocation28_spill] sm:$0xff] %v5972_v40  ;;  %v6054_v22 = vld [vmem:[#allocation10 + $0xe0] ss:$8 sps:$4 sm:$0xff]   ;;  %v6059_v56 = vld [vmem:[#allocation10 + $0xd4] ss:$8 sps:$4 sm:$0xff]  }
 0x258   :  { %7009 = vst [vmem:[#allocation48_spill] sm:$0xff] %v6054_v22  ;;  %7011 = vst [vmem:[#allocation50_spill] sm:$0xff] %v6059_v56 }
 0x259   :  { %1719 = vmatpush2.bf16.msra.mxu1 %v4932_v4 }
 0x25a   :  { %1748 = vmatpush1.bf16.msra.mxu0 %v5846_v61  ;;  %1720 = vmatprep.subr.bf16.mxu1 %v4933_v8  ;;  %v1783_v61 = vmax.f32 %v1344_v24, 0.0  ;;  %v6056_v24 = vld [vmem:[#allocation10 + $0x1e4] ss:$8 sps:$4 sm:$0xff]  }
 0x25b   :  { %1749 = vmatprep.subr.bf16.mxu0 %v5851_v34  ;;  %v5945_v34 = vld [vmem:[#allocation10 + $0x60] ss:$8 sps:$4 sm:$0xff]   ;;  %7010 = vst [vmem:[#allocation49_spill] sm:$0xff] %v6056_v24 }
 0x25c   :  { %6987 = vst [vmem:[#allocation25_spill] sm:$0xff] %v5945_v34  ;;  %v5951_v38 = vpack.c.bf16 %v1797_v62, %v1783_v61  ;;  %v6066_v62 = vld [vmem:[#allocation10 + $0xd0] ss:$8 sps:$4 sm:$0xff]   ;;  %v6071_v61 = vld [vmem:[#allocation10 + $0xc4] ss:$8 sps:$4 sm:$0xff]  }
 0x25d   :  { %1721 = vmatpush2.bf16.msra.mxu1 %v5874_v11  ;;  %v5976_v11 = vld [vmem:[#allocation10 + $0x150] ss:$8 sps:$4 sm:$0xff]  }
 0x25e   :  { %1750 = vmatpush1.bf16.msra.mxu0 %v4939_v19  ;;  %1722 = vmatprep.subr.bf16.mxu1 %v5878_v17  ;;  %v6044_v19 = vld [vmem:[#allocation10 + $0x1f4] ss:$8 sps:$4 sm:$0xff]  }
 0x25f   :  { %1751 = vmatprep.subr.bf16.mxu0 %v4940_v52  ;;  %7006 = vst [vmem:[#allocation45_spill] sm:$0xff] %v6044_v19  ;;  %v6050_v52 = vld [vmem:[#allocation10 + $0x1f0] ss:$8 sps:$4 sm:$0xff]  }
 0x260   :  { %7008 = vst [vmem:[#allocation47_spill] sm:$0xff] %v6050_v52 }
 0x261   :  { %1723 = vmatpush2.bf16.msra.mxu1 %v5882_v30  ;;  %v5980_v30 = vld [vmem:[#allocation10 + $0x40] ss:$8 sps:$4 sm:$0xff]  }
 0x262   :  { %1752 = vmatpush1.bf16.msra.mxu0 %v4941_v57  ;;  %1724 = vmatprep.subr.bf16.mxu1 %v5886_v45  ;;  %6991 = vst [vmem:[#allocation29_spill] sm:$0xff] %v5980_v30  ;;  %v5982_v45 = vld [vmem:[#allocation10 + $0x144] ss:$8 sps:$4 sm:$0xff]   ;;  %v6062_v57 = vld [vmem:[#allocation10 + $0x1e0] ss:$8 sps:$4 sm:$0xff]  }
 0x263   :  { %2410 = vmatprep.subr.bf16.mxu0 %v5929_v53  ;;  %7012 = vst [vmem:[#allocation51_spill] sm:$0xff] %v6062_v57 }
 0x265   :  { %1725 = vmatpush2.bf16.msra.mxu1 %v5890_v20  ;;  %1770 = vmatmul.mubr.bf16.vlgmr.msra.gmra.mxu0 %v5589_v21  ;;  %v1427_v37 = vpop.f32.mrf.mxu0  ;;  %v5985_v20 = vld [vmem:[#allocation10 + $0x34] ss:$8 sps:$4 sm:$0xff]  }
 0x266   :  { %2411 = vmatpush1.bf16.msra.mxu0 %v5933_v6  ;;  %2442 = vmatprep.mubr.bf16.mxu0 %v1809_v33  ;;  %6992 = vst [vmem:[#allocation20_spill] sm:$0xff] %v5985_v20  ;;  %v6068_v33 = vld [vmem:[#allocation10 + $0x1d4] ss:$8 sps:$4 sm:$0xff]  }
 0x267   :  { %2453 = vmatprep.subr.bf16.mxu1 %v5936_v48  ;;  %2412 = vmatprep.subr.bf16.mxu0 %v5938_v26  ;;  %v5961_v55 = vpop.f32.mrf.mxu0  ;;  %7013 = vst [vmem:[#allocation52_spill] sm:$0xff] %v6068_v33 }
 0x268   :  { %v1384_v39 = vpop.f32.mrf.mxu1  ;;  %1727 = vmatmul.mubr.bf16.vlgmr.msra.gmra.mxu1 %v5785_v42 }
 0x269   :  { %v1385_v21 = vadd.f32 %v1384_v39, %v5790_v46  ;;  %2454 = vmatpush1.bf16.msra.mxu1 %v5942_v36  ;;  %2485 = vmatprep.mubr.bf16.mxu1 %v5951_v38  ;;  %v1431_v17 = vpop.f32.mrf.mxu0  ;;  %v6078_v39 = vld [vmem:[#allocation10 + $0xc0] ss:$8 sps:$4 sm:$0xff]  }
 0x26a   :  { %v5963_v58 = vpop.f32.mrf.mxu1  ;;  %2413 = vmatpush1.bf16.msra.mxu0 %v5945_v34  ;;  %2455 = vmatprep.subr.bf16.mxu1 %v5947_v1 }
 0x26b   :  { %v1428_v42 = vadd.f32 %v1427_v37, %v1385_v21  ;;  %2414 = vmatprep.subr.bf16.mxu0 %v5953_v35  ;;  %v6074_v37 = vld [vmem:[#allocation10 + $0x1d0] ss:$8 sps:$4 sm:$0xff]   ;;  %v6080_v21 = vld [vmem:[#allocation10 + $0x1c4] ss:$8 sps:$4 sm:$0xff]  }
 0x26c   :  { %v1388_v4 = vpop.f32.mrf.mxu1  ;;  %7014 = vst [vmem:[#allocation53_spill] sm:$0xff] %v6074_v37  ;;  %7015 = vst [vmem:[#allocation54_spill] sm:$0xff] %v6080_v21 }
 0x26d   :  { %v1389_v8 = vadd.f32 %v1388_v4, %v5790_v46  ;;  %2456 = vmatpush1.bf16.msra.mxu1 %v5959_v54  ;;  %v1784_v60 = vmax.f32 %v1428_v42, 0.0  ;;  %v6083_v42 = vld [vmem:[#allocation10 + $0xb4] ss:$8 sps:$4 sm:$0xff]   ;;  %v6086_v4 = vld [vmem:[#allocation10 + $0x1c0] ss:$8 sps:$4 sm:$0xff]  }
 0x26e   :  { %2415 = vmatpush1.bf16.msra.mxu0 %v5967_v59  ;;  %2457 = vmatprep.subr.bf16.mxu1 %v5969_v2  ;;  %7016 = vst [vmem:[#allocation55_spill] sm:$0xff] %v6086_v4 }
 0x26f   :  { %v1432_v31 = vadd.f32 %v1431_v17, %v1389_v8  ;;  %2416 = vmatprep.subr.bf16.mxu0 %v5972_v40  ;;  %v6090_v8 = vld [vmem:[#allocation10 + $0xb0] ss:$8 sps:$4 sm:$0xff]   ;;  %v6092_v17 = vld [vmem:[#allocation10 + $0x1b4] ss:$8 sps:$4 sm:$0xff]  }
 0x270   :  { %7017 = vst [vmem:[#allocation56_spill] sm:$0xff] %v6092_v17 }
 0x271   :  { %v1798_v12 = vmax.f32 %v1432_v31, 0.0  ;;  %2458 = vmatpush1.bf16.msra.mxu1 %v5976_v11  ;;  %v6095_v31 = vld [vmem:[#allocation10 + $0xa4] ss:$8 sps:$4 sm:$0xff]  }
 0x272   :  { %2417 = vmatpush1.bf16.msra.mxu0 %v5980_v30  ;;  %2459 = vmatprep.subr.bf16.mxu1 %v5982_v45  ;;  %7018 = vst [vmem:[#allocation57_spill] sm:$0xff] %v6095_v31 }
 0x273   :  { %v5996_v50 = vpack.c.bf16 %v1798_v12, %v1784_v60  ;;  %2418 = vmatprep.subr.bf16.mxu0 %v5985_v20  ;;  %v1390_v60 = vpop.f32.mrf.mxu1  ;;  %v6098_v12 = vld [vmem:[#allocation10 + $0x1b0] ss:$8 sps:$4 sm:$0xff]  }
 0x274   :  { %7019 = vst [vmem:[#allocation58_spill] sm:$0xff] %v6098_v12 }
 0x275   :  { %2460 = vmatpush1.bf16.msra.mxu1 %v5988_v47 }
 0x276   :  { %2419 = vmatpush1.bf16.msra.mxu0 %v5992_v13  ;;  %2461 = vmatprep.subr.bf16.mxu1 %v5994_v5 }
 0x277   :  { %2420 = vmatprep.subr.bf16.mxu0 %v5999_v25 }
 0x279   :  { %2462 = vmatpush1.bf16.msra.mxu1 %v6002_v51 }
 0x27a   :  { %2421 = vmatpush1.bf16.msra.mxu0 %v6006_v23  ;;  %2463 = vmatprep.subr.bf16.mxu1 %v6008_v28 }
 0x27b   :  { %2422 = vmatprep.subr.bf16.mxu0 %v6011_v29 }
 0x27d   :  { %2464 = vmatpush1.bf16.msra.mxu1 %v6014_v32 }
 0x27e   :  { %2423 = vmatpush1.bf16.msra.mxu0 %v6018_v16  ;;  %2465 = vmatprep.subr.bf16.mxu1 %v6020_v3  ;;  %v6173_v3 = vld [vmem:[#allocation10 + $0x244] ss:$8 sps:$4 sm:$0xff]  }
 0x27f   :  { %2424 = vmatprep.subr.bf16.mxu0 %v6023_v9  ;;  %7031 = vst [vmem:[#allocation70_spill] sm:$0xff] %v6173_v3 }
 0x281   :  { %2466 = vmatpush1.bf16.msra.mxu1 %v6026_v10 }
 0x282   :  { %2425 = vmatpush1.bf16.msra.mxu0 %v6030_v63  ;;  %2467 = vmatprep.subr.bf16.mxu1 %v6032_v41 }
 0x283   :  { %2426 = vmatprep.subr.bf16.mxu0 %v6035_v15 }
 0x285   :  { %2468 = vmatpush1.bf16.msra.mxu1 %v6038_v27  ;;  %v6135_v27 = vld [vmem:[#allocation10 + $0x274] ss:$8 sps:$4 sm:$0xff]  }
 0x286   :  { %2427 = vmatpush2.bf16.msra.mxu0 %v6042_v49  ;;  %2469 = vmatprep.subr.bf16.mxu1 %v6044_v19  ;;  %v6132_v19 = vld [vmem:[#allocation10 + $0x184] ss:$8 sps:$4 sm:$0xff]  }
 0x287   :  { %2428 = vmatprep.subr.bf16.mxu0 %v6047_v7  ;;  %7025 = vst [vmem:[#allocation64_spill] sm:$0xff] %v6132_v19 }
 0x289   :  { %2470 = vmatpush2.bf16.msra.mxu1 %v6050_v52  ;;  %v6122_v52 = vld [vmem:[#allocation10 + $0x84] ss:$8 sps:$4 sm:$0xff]  }
 0x28a   :  { %2429 = vmatpush2.bf16.msra.mxu0 %v6054_v22  ;;  %2471 = vmatprep.subr.bf16.mxu1 %v6056_v24  ;;  %v1433_v24 = vpop.f32.mrf.mxu0 }
 0x28b   :  { %2430 = vmatprep.subr.bf16.mxu0 %v6059_v56 }
 0x28d   :  { %2472 = vmatpush2.bf16.msra.mxu1 %v6062_v57  ;;  %v6119_v57 = vld [vmem:[#allocation10 + $0x194] ss:$8 sps:$4 sm:$0xff]  }
 0x28e   :  { %2431 = vmatpush2.bf16.msra.mxu0 %v6066_v62  ;;  %2473 = vmatprep.subr.bf16.mxu1 %v6068_v33  ;;  %v6111_v33 = vld [vmem:[#allocation10 + $0x1a0] ss:$8 sps:$4 sm:$0xff]   ;;  %7023 = vst [vmem:[#allocation62_spill] sm:$0xff] %v6119_v57 }
 0x28f   :  { %2432 = vmatprep.subr.bf16.mxu0 %v6071_v61  ;;  %7022 = vst [vmem:[#allocation61_spill] sm:$0xff] %v6111_v33 }
 0x291   :  { %2474 = vmatpush2.bf16.msra.mxu1 %v6074_v37  ;;  %v1391_v37 = vadd.f32 %v1390_v60, %v5915_v18 }
 0x292   :  { %2433 = vmatpush2.bf16.msra.mxu0 %v6078_v39  ;;  %2475 = vmatprep.subr.bf16.mxu1 %v6080_v21  ;;  %v6107_v21 = vld [vmem:[#allocation10 + $0x94] ss:$8 sps:$4 sm:$0xff]  }
 0x293   :  { %2434 = vmatprep.subr.bf16.mxu0 %v6083_v42  ;;  %v1434_v60 = vadd.f32 %v1433_v24, %v1391_v37  ;;  %v6138_v24 = vld [vmem:[#allocation10 + $0x180] ss:$8 sps:$4 sm:$0xff]  }
 0x294   :  { %7026 = vst [vmem:[#allocation65_spill] sm:$0xff] %v6138_v24 }
 0x295   :  { %2476 = vmatpush2.bf16.msra.mxu1 %v6086_v4  ;;  %v1387_v4 = vadd.f32 %v5963_v58, %v5915_v18  ;;  %v1799_v41 = vmax.f32 %v1434_v60, 0.0 }
 0x296   :  { %2435 = vmatpush2.bf16.msra.mxu0 %v6090_v8  ;;  %2477 = vmatprep.subr.bf16.mxu1 %v6092_v17  ;;  %v6117_v17 = vld [vmem:[#allocation10 + $0x90] ss:$8 sps:$4 sm:$0xff]  }
 0x297   :  { %2436 = vmatprep.subr.bf16.mxu0 %v6095_v31  ;;  %v1430_v58 = vadd.f32 %v5961_v55, %v1387_v4  ;;  %v6142_v55 = vld [vmem:[#allocation10 + $0x270] ss:$8 sps:$4 sm:$0xff]   ;;  %v1513_v4 = vpop.f32.mrf.mxu1 }
 0x299   :  { %2478 = vmatpush2.bf16.msra.mxu1 %v6098_v12  ;;  %v6125_v12 = vld [vmem:[#allocation10 + $0x190] ss:$8 sps:$4 sm:$0xff]   ;;  %v1785_v37 = vmax.f32 %v1430_v58, 0.0  ;;  %v6154_v58 = vld [vmem:[#allocation10 + $0x260] ss:$8 sps:$4 sm:$0xff]  }
 0x29a   :  { %2437 = vmatpush2.bf16.msra.mxu0 %v6102_v43  ;;  %2479 = vmatprep.subr.bf16.mxu1 %v6104_v44  ;;  %7024 = vst [vmem:[#allocation63_spill] sm:$0xff] %v6125_v12  ;;  %v6130_v44 = vld [vmem:[#allocation10 + $0x80] ss:$8 sps:$4 sm:$0xff]   ;;  %7028 = vst [vmem:[#allocation67_spill] sm:$0xff] %v6154_v58 }
 0x29b   :  { %2438 = vmatprep.subr.bf16.mxu0 %v6107_v21 }
 0x29d   :  { %2480 = vmatpush2.bf16.msra.mxu1 %v6111_v33  ;;  %v6147_v33 = vpack.c.bf16 %v1799_v41, %v1785_v37  ;;  %v6162_v41 = vld [vmem:[#allocation10 + $0x254] ss:$8 sps:$4 sm:$0xff]  }
 0x29e   :  { %2439 = vmatpush2.bf16.msra.mxu0 %v6117_v17  ;;  %2481 = vmatprep.subr.bf16.mxu1 %v6119_v57  ;;  %v6145_v57 = vld [vmem:[#allocation10 + $0x264] ss:$8 sps:$4 sm:$0xff]   ;;  %7029 = vst [vmem:[#allocation68_spill] sm:$0xff] %v6162_v41 }
 0x29f   :  { %2440 = vmatprep.subr.bf16.mxu0 %v6122_v52  ;;  %7027 = vst [vmem:[#allocation66_spill] sm:$0xff] %v6145_v57 }
 0x2a1   :  { %2482 = vmatpush2.bf16.msra.mxu1 %v6125_v12 }
 0x2a2   :  { %2441 = vmatpush2.bf16.msra.mxu0 %v6130_v44  ;;  %2483 = vmatprep.subr.bf16.mxu1 %v6132_v19  ;;  %v6156_v19 = vpop.f32.mrf.mxu1 }
 0x2a3   :  { %2496 = vmatprep.subr.bf16.mxu0 %v6135_v27 }
 0x2a5   :  { %v1470_v10 = vpop.f32.mrf.mxu0  ;;  %2443 = vmatmul.mubr.bf16.vlgmr.msra.gmra.mxu0 %v5825_v14  ;;  %2484 = vmatpush2.bf16.msra.mxu1 %v6138_v24  ;;  %v6170_v24 = vld [vmem:[#allocation10 + $0x250] ss:$8 sps:$4 sm:$0xff]  }
 0x2a6   :  { %v1471_v60 = vadd.f32 %v1470_v10, %v5790_v46  ;;  %2497 = vmatpush1.bf16.msra.mxu0 %v6142_v55  ;;  %2528 = vmatprep.mubr.bf16.mxu0 %v6147_v33  ;;  %7030 = vst [vmem:[#allocation69_spill] sm:$0xff] %v6170_v24 }
 0x2a7   :  { %v6158_v12 = vpop.f32.mrf.mxu0  ;;  %2539 = vmatprep.subr.bf16.mxu1 %v5929_v53  ;;  %2498 = vmatprep.subr.bf16.mxu0 %v6145_v57  ;;  %v1517_v53 = vpop.f32.mrf.mxu1 }
 0x2a8   :  { %v1514_v14 = vadd.f32 %v1513_v4, %v1471_v60  ;;  %2486 = vmatmul.mubr.bf16.vlgmr.msra.gmra.mxu1 %v5908_v0 }
 0x2a9   :  { %v1474_v10 = vpop.f32.mrf.mxu0  ;;  %2540 = vmatpush1.bf16.msra.mxu1 %v5933_v6  ;;  %2571 = vmatprep.mubr.bf16.mxu1 %v5951_v38  ;;  %v6178_v38 = vld [vmem:[#allocation10 + $0x240] ss:$8 sps:$4 sm:$0xff]  }
 0x2aa   :  { %v1475_v37 = vadd.f32 %v1474_v10, %v5790_v46  ;;  %2499 = vmatpush1.bf16.msra.mxu0 %v6154_v58  ;;  %2541 = vmatprep.subr.bf16.mxu1 %v5938_v26  ;;  %v1786_v60 = vmax.f32 %v1514_v14, 0.0  ;;  %7032 = vst [vmem:[#allocation71_spill] sm:$0xff] %v6178_v38  ;;  %v6181_v10 = vld [vmem:[#allocation10 + $0x234] ss:$8 sps:$4 sm:$0xff]   ;;  %v6191_v14 = vld [vmem:[#allocation10 + $0x224] ss:$8 sps:$4 sm:$0xff]  }
 0x2ab   :  { %2500 = vmatprep.subr.bf16.mxu0 %v6162_v41  ;;  %7033 = vst [vmem:[#allocation72_spill] sm:$0xff] %v6181_v10  ;;  %7036 = vst [vmem:[#allocation75_spill] sm:$0xff] %v6191_v14 }
 0x2ac   :  { %v1518_v4 = vadd.f32 %v1517_v53, %v1475_v37  ;;  %v6188_v53 = vld [vmem:[#allocation10 + $0x230] ss:$8 sps:$4 sm:$0xff]   ;;  %v6199_v37 = vld [vmem:[#allocation10 + $0x214] ss:$8 sps:$4 sm:$0xff]  }
 0x2ad   :  { %2542 = vmatpush1.bf16.msra.mxu1 %v5945_v34  ;;  %7035 = vst [vmem:[#allocation74_spill] sm:$0xff] %v6188_v53  ;;  %7038 = vst [vmem:[#allocation77_spill] sm:$0xff] %v6199_v37 }
 0x2ae   :  { %v1800_v6 = vmax.f32 %v1518_v4, 0.0  ;;  %2501 = vmatpush1.bf16.msra.mxu0 %v6170_v24  ;;  %2543 = vmatprep.subr.bf16.mxu1 %v5953_v35  ;;  %v6204_v4 = vld [vmem:[#allocation10 + $0x210] ss:$8 sps:$4 sm:$0xff]  }
 0x2af   :  { %2502 = vmatprep.subr.bf16.mxu0 %v6173_v3  ;;  %7039 = vst [vmem:[#allocation78_spill] sm:$0xff] %v6204_v4 }
 0x2b0   :  { %v6183_v26 = vpack.c.bf16 %v1800_v6, %v1786_v60  ;;  %v6196_v6 = vld [vmem:[#allocation10 + $0x220] ss:$8 sps:$4 sm:$0xff]   ;;  %v6207_v60 = vld [vmem:[#allocation10 + $0x204] ss:$8 sps:$4 sm:$0xff]  }
 0x2b1   :  { %2544 = vmatpush1.bf16.msra.mxu1 %v5967_v59  ;;  %7037 = vst [vmem:[#allocation76_spill] sm:$0xff] %v6196_v6  ;;  %7040 = vst [vmem:[#allocation79_spill] sm:$0xff] %v6207_v60 }
 0x2b2   :  { %7034 = vst [vmem:[#allocation73_spill] sm:$0xff] %v6183_v26  ;;  %2503 = vmatpush1.bf16.msra.mxu0 %v6178_v38  ;;  %2545 = vmatprep.subr.bf16.mxu1 %v5972_v40 }
 0x2b3   :  { %2504 = vmatprep.subr.bf16.mxu0 %v6181_v10 }
 0x2b5   :  { %2546 = vmatpush1.bf16.msra.mxu1 %v5980_v30  ;;  %v1476_v30 = vpop.f32.mrf.mxu0 }
 0x2b6   :  { %2505 = vmatpush1.bf16.msra.mxu0 %v6188_v53  ;;  %2547 = vmatprep.subr.bf16.mxu1 %v5985_v20  ;;  %v6212_v20 = vld [vmem:[#allocation10 + $0x200] ss:$8 sps:$4 sm:$0xff]  }
 0x2b7   :  { %2506 = vmatprep.subr.bf16.mxu0 %v6191_v14  ;;  %7041 = vst [vmem:[#allocation80_spill] sm:$0xff] %v6212_v20 }
 0x2b9   :  { %2548 = vmatpush1.bf16.msra.mxu1 %v5992_v13  ;;  %v6215_v13 = vld [vmem:[#allocation10 + $0x2f4] ss:$8 sps:$4 sm:$0xff]  }
 0x2ba   :  { %2507 = vmatpush1.bf16.msra.mxu0 %v6196_v6  ;;  %2549 = vmatprep.subr.bf16.mxu1 %v5999_v25  ;;  %7042 = vst [vmem:[#allocation81_spill] sm:$0xff] %v6215_v13  ;;  %v6220_v25 = vld [vmem:[#allocation10 + $0x2f0] ss:$8 sps:$4 sm:$0xff]  }
 0x2bb   :  { %2508 = vmatprep.subr.bf16.mxu0 %v6199_v37  ;;  %7043 = vst [vmem:[#allocation82_spill] sm:$0xff] %v6220_v25 }
 0x2bd   :  { %2550 = vmatpush1.bf16.msra.mxu1 %v6006_v23  ;;  %v6223_v23 = vld [vmem:[#allocation10 + $0x2e4] ss:$8 sps:$4 sm:$0xff]  }
 0x2be   :  { %2509 = vmatpush1.bf16.msra.mxu0 %v6204_v4  ;;  %2551 = vmatprep.subr.bf16.mxu1 %v6011_v29  ;;  %7044 = vst [vmem:[#allocation83_spill] sm:$0xff] %v6223_v23  ;;  %v1519_v29 = vpop.f32.mrf.mxu1 }
 0x2bf   :  { %2510 = vmatprep.subr.bf16.mxu0 %v6207_v60 }
 0x2c1   :  { %2552 = vmatpush1.bf16.msra.mxu1 %v6018_v16  ;;  %v6228_v16 = vld [vmem:[#allocation10 + $0x2e0] ss:$8 sps:$4 sm:$0xff]  }
 0x2c2   :  { %2511 = vmatpush1.bf16.msra.mxu0 %v6212_v20  ;;  %2553 = vmatprep.subr.bf16.mxu1 %v6023_v9  ;;  %7045 = vst [vmem:[#allocation84_spill] sm:$0xff] %v6228_v16  ;;  %v6231_v9 = vld [vmem:[#allocation10 + $0x2d4] ss:$8 sps:$4 sm:$0xff]  }
 0x2c3   :  { %2512 = vmatprep.subr.bf16.mxu0 %v6215_v13  ;;  %7046 = vst [vmem:[#allocation85_spill] sm:$0xff] %v6231_v9 }
 0x2c5   :  { %2554 = vmatpush1.bf16.msra.mxu1 %v6030_v63  ;;  %v1599_v40 = vpop.f32.mrf.mxu0 }
 0x2c6   :  { %2513 = vmatpush2.bf16.msra.mxu0 %v6220_v25  ;;  %2555 = vmatprep.subr.bf16.mxu1 %v6035_v15  ;;  %v6241_v15 = vld [vmem:[#allocation10 + $0x2d0] ss:$8 sps:$4 sm:$0xff]  }
 0x2c7   :  { %2514 = vmatprep.subr.bf16.mxu0 %v6223_v23  ;;  %v6235_v34 = vpop.f32.mrf.mxu0  ;;  %7049 = vst [vmem:[#allocation88_spill] sm:$0xff] %v6241_v15  ;;  %v6244_v23 = vld [vmem:[#allocation10 + $0x2c4] ss:$8 sps:$4 sm:$0xff]  }
 0x2c8   :  { %v1556_v59 = vpop.f32.mrf.mxu1  ;;  %7047 = vst [vmem:[#allocation86_spill] sm:$0xff] %v6235_v34  ;;  %7050 = vst [vmem:[#allocation89_spill] sm:$0xff] %v6244_v23  ;;  %v6250_v34 = vld [vmem:[#allocation10 + $0x2c0] ss:$8 sps:$4 sm:$0xff]  }
 0x2c9   :  { %v1557_v35 = vadd.f32 %v1556_v59, %v5790_v46  ;;  %2556 = vmatpush2.bf16.msra.mxu1 %v6042_v49  ;;  %v1603_v49 = vpop.f32.mrf.mxu0  ;;  %7051 = vst [vmem:[#allocation90_spill] sm:$0xff] %v6250_v34 }
 0x2ca   :  { %v6237_v63 = vpop.f32.mrf.mxu1  ;;  %2515 = vmatpush2.bf16.msra.mxu0 %v6228_v16  ;;  %2557 = vmatprep.subr.bf16.mxu1 %v6047_v7 }
 0x2cb   :  { %7048 = vst [vmem:[#allocation87_spill] sm:$0xff] %v6237_v63  ;;  %v1600_v26 = vadd.f32 %v1599_v40, %v1557_v35  ;;  %2516 = vmatprep.subr.bf16.mxu0 %v6231_v9  ;;  %v6253_v35 = vld [vmem:[#allocation10 + $0x2b4] ss:$8 sps:$4 sm:$0xff]  }
 0x2cc   :  { %v1560_v25 = vpop.f32.mrf.mxu1  ;;  %7052 = vst [vmem:[#allocation91_spill] sm:$0xff] %v6253_v35 }
 0x2cd   :  { %v1561_v59 = vadd.f32 %v1560_v25, %v5790_v46  ;;  %2558 = vmatpush2.bf16.msra.mxu1 %v6054_v22  ;;  %v1788_v40 = vmax.f32 %v1600_v26, 0.0  ;;  %v6258_v25 = vld [vmem:[#allocation10 + $0x2b0] ss:$8 sps:$4 sm:$0xff]   ;;  %v6268_v26 = vld [vmem:[#allocation10 + $0x2a0] ss:$8 sps:$4 sm:$0xff]  }
 0x2ce   :  { %2517 = vmatpush2.bf16.msra.mxu0 %v6241_v15  ;;  %2559 = vmatprep.subr.bf16.mxu1 %v6059_v56  ;;  %7053 = vst [vmem:[#allocation92_spill] sm:$0xff] %v6258_v25  ;;  %v6263_v56 = vld [vmem:[#allocation10 + $0x2a4] ss:$8 sps:$4 sm:$0xff]   ;;  %7056 = vst [vmem:[#allocation95_spill] sm:$0xff] %v6268_v26 }
 0x2cf   :  { %v1604_v63 = vadd.f32 %v1603_v49, %v1561_v59  ;;  %2518 = vmatprep.subr.bf16.mxu0 %v6244_v23  ;;  %7055 = vst [vmem:[#allocation94_spill] sm:$0xff] %v6263_v56  ;;  %v6276_v49 = vld [vmem:[#allocation10 + $0x290] ss:$8 sps:$4 sm:$0xff]   ;;  %v6280_v59 = vld [vmem:[#allocation10 + $0x284] ss:$8 sps:$4 sm:$0xff]  }
 0x2d0   :  { %7058 = vst [vmem:[#allocation97_spill] sm:$0xff] %v6276_v49  ;;  %7059 = vst [vmem:[#allocation98_spill] sm:$0xff] %v6280_v59 }
 0x2d1   :  { %v1802_v7 = vmax.f32 %v1604_v63, 0.0  ;;  %2560 = vmatpush2.bf16.msra.mxu1 %v6066_v62  ;;  %v6271_v63 = vld [vmem:[#allocation10 + $0x294] ss:$8 sps:$4 sm:$0xff]  }
 0x2d2   :  { %2519 = vmatpush2.bf16.msra.mxu0 %v6250_v34  ;;  %2561 = vmatprep.subr.bf16.mxu1 %v6071_v61  ;;  %7057 = vst [vmem:[#allocation96_spill] sm:$0xff] %v6271_v63 }
 0x2d3   :  { %v6260_v22 = vpack.c.bf16 %v1802_v7, %v1788_v40  ;;  %2520 = vmatprep.subr.bf16.mxu0 %v6253_v35  ;;  %v1477_v7 = vadd.f32 %v1476_v30, %v5915_v18  ;;  %v1473_v40 = vadd.f32 %v6158_v12, %v5915_v18 }
 0x2d5   :  { %7054 = vst [vmem:[#allocation93_spill] sm:$0xff] %v6260_v22  ;;  %2562 = vmatpush2.bf16.msra.mxu1 %v6078_v39  ;;  %v6287_v22 = vld [vmem:[#allocation10 + $0x280] ss:$8 sps:$4 sm:$0xff]   ;;  %v1516_v30 = vadd.f32 %v6156_v19, %v1473_v40  ;;  %v7063_v19 = vld [vmem:[#allocation41_spill] sm:$0xff]  ;;  %v6334_v40 = vpop.f32.mrf.mxu0 }
 0x2d6   :  { %2521 = vmatpush2.bf16.msra.mxu0 %v6258_v25  ;;  %2563 = vmatprep.subr.bf16.mxu1 %v6083_v42  ;;  %7060 = vst [vmem:[#allocation99_spill] sm:$0xff] %v6287_v22 }
 0x2d7   :  { %2522 = vmatprep.subr.bf16.mxu0 %v6263_v56 }
 0x2d9   :  { %2564 = vmatpush2.bf16.msra.mxu1 %v6090_v8 }
 0x2da   :  { %2523 = vmatpush2.bf16.msra.mxu0 %v6268_v26  ;;  %2565 = vmatprep.subr.bf16.mxu1 %v6095_v31  ;;  %v1520_v31 = vadd.f32 %v1519_v29, %v1477_v7  ;;  %v7064_v7 = vld [vmem:[#allocation43_spill] sm:$0xff] }
 0x2db   :  { %2524 = vmatprep.subr.bf16.mxu0 %v6271_v63 }
 0x2dc   :  { %v1801_v12 = vmax.f32 %v1520_v31, 0.0  ;;  %v6329_v31 = vpop.f32.mrf.mxu1 }
 0x2dd   :  { %2566 = vmatpush2.bf16.msra.mxu1 %v6102_v43  ;;  %v1787_v43 = vmax.f32 %v1516_v30, 0.0 }
 0x2de   :  { %2525 = vmatpush2.bf16.msra.mxu0 %v6276_v49  ;;  %2567 = vmatprep.subr.bf16.mxu1 %v6107_v21 }
 0x2df   :  { %2526 = vmatprep.subr.bf16.mxu0 %v6280_v59  ;;  %v6301_v29 = vpack.c.bf16 %v1801_v12, %v1787_v43  ;;  %v7061_v43 = vld [vmem:[#allocation37_spill] sm:$0xff] }
 0x2e0   :  { %v7065_v12 = vld [vmem:[#allocation45_spill] sm:$0xff] }
 0x2e1   :  { %2568 = vmatpush2.bf16.msra.mxu1 %v6117_v17 }
 0x2e2   :  { %2527 = vmatpush2.bf16.msra.mxu0 %v6287_v22  ;;  %2569 = vmatprep.subr.bf16.mxu1 %v6122_v52 }
 0x2e3   :  { %2582 = vmatprep.subr.bf16.mxu0 %v5936_v48 }
 0x2e5   :  { %2529 = vmatmul.mubr.bf16.vlgmr.msra.gmra.mxu0 %v5996_v50  ;;  %2570 = vmatpush2.bf16.msra.mxu1 %v6130_v44 }
 0x2e6   :  { %2583 = vmatpush1.bf16.msra.mxu0 %v5942_v36  ;;  %2614 = vmatprep.mubr.bf16.mxu0 %v6147_v33 }
 0x2e7   :  { %2625 = vmatprep.subr.bf16.mxu1 %v6135_v27  ;;  %2584 = vmatprep.subr.bf16.mxu0 %v5947_v1 }
 0x2e8   :  { %2572 = vmatmul.mubr.bf16.vlgmr.msra.gmra.mxu1 %v5908_v0  ;;  %v7062_v0 = vld [vmem:[#allocation39_spill] sm:$0xff]  ;;  %v1685_v30 = vpop.f32.mrf.mxu1 }
 0x2e9   :  { %2626 = vmatpush1.bf16.msra.mxu1 %v6142_v55  ;;  %2657 = vmatprep.mubr.bf16.mxu1 %v6301_v29 }
 0x2ea   :  { %2585 = vmatpush1.bf16.msra.mxu0 %v5959_v54  ;;  %2627 = vmatprep.subr.bf16.mxu1 %v6145_v57  ;;  %v7074_v57 = vld [vmem:[#allocation53_spill] sm:$0xff] }
 0x2eb   :  { %2586 = vmatprep.subr.bf16.mxu0 %v5969_v2 }
 0x2ed   :  { %2628 = vmatpush1.bf16.msra.mxu1 %v6154_v58  ;;  %v7073_v58 = vld [vmem:[#allocation52_spill] sm:$0xff] }
 0x2ee   :  { %2587 = vmatpush1.bf16.msra.mxu0 %v5976_v11  ;;  %2629 = vmatprep.subr.bf16.mxu1 %v6162_v41  ;;  %v7071_v41 = vld [vmem:[#allocation51_spill] sm:$0xff] }
 0x2ef   :  { %2588 = vmatprep.subr.bf16.mxu0 %v5982_v45 }
 0x2f1   :  { %2630 = vmatpush1.bf16.msra.mxu1 %v6170_v24 }
 0x2f2   :  { %2589 = vmatpush1.bf16.msra.mxu0 %v5988_v47  ;;  %2631 = vmatprep.subr.bf16.mxu1 %v6173_v3  ;;  %v7070_v3 = vld [vmem:[#allocation82_spill] sm:$0xff] }
 0x2f3   :  { %2590 = vmatprep.subr.bf16.mxu0 %v5994_v5 }
 0x2f5   :  { %2632 = vmatpush1.bf16.msra.mxu1 %v6178_v38 }
 0x2f6   :  { %2591 = vmatpush1.bf16.msra.mxu0 %v6002_v51  ;;  %2633 = vmatprep.subr.bf16.mxu1 %v6181_v10  ;;  %v7069_v10 = vld [vmem:[#allocation49_spill] sm:$0xff] }
 0x2f7   :  { %2592 = vmatprep.subr.bf16.mxu0 %v6008_v28 }
 0x2f9   :  { %2634 = vmatpush1.bf16.msra.mxu1 %v6188_v53  ;;  %v6341_v53 = vpop.f32.mrf.mxu1 }
 0x2fa   :  { %2593 = vmatpush1.bf16.msra.mxu0 %v6014_v32  ;;  %2635 = vmatprep.subr.bf16.mxu1 %v6191_v14  ;;  %v7066_v14 = vld [vmem:[#allocation47_spill] sm:$0xff]  ;;  %7067 = vst [vmem:[#allocation37_spill] sm:$0xff] %v6341_v53 }
 0x2fb   :  { %2594 = vmatprep.subr.bf16.mxu0 %v7061_v43 }
 0x2fd   :  { %2636 = vmatpush1.bf16.msra.mxu1 %v6196_v6 }
 0x2fe   :  { %2595 = vmatpush1.bf16.msra.mxu0 %v7062_v0  ;;  %2637 = vmatprep.subr.bf16.mxu1 %v6199_v37 }
 0x2ff   :  { %2596 = vmatprep.subr.bf16.mxu0 %v7063_v19 }
 0x301   :  { %2638 = vmatpush1.bf16.msra.mxu1 %v6204_v4 }
 0x302   :  { %2597 = vmatpush1.bf16.msra.mxu0 %v7064_v7  ;;  %2639 = vmatprep.subr.bf16.mxu1 %v6207_v60 }
 0x303   :  { %2598 = vmatprep.subr.bf16.mxu0 %v7065_v12 }
 0x305   :  { %v1642_v6 = vpop.f32.mrf.mxu0  ;;  %2640 = vmatpush1.bf16.msra.mxu1 %v6212_v20  ;;  %v7072_v20 = vld [vmem:[#allocation83_spill] sm:$0xff] }
 0x306   :  { %v1643_v37 = vadd.f32 %v1642_v6, %v5790_v46  ;;  %2599 = vmatpush2.bf16.msra.mxu0 %v7066_v14  ;;  %2641 = vmatprep.subr.bf16.mxu1 %v6215_v13  ;;  %v1689_v6 = vpop.f32.mrf.mxu1 }
 0x307   :  { %v6343_v4 = vpop.f32.mrf.mxu0  ;;  %2600 = vmatprep.subr.bf16.mxu0 %v7069_v10 }
 0x308   :  { %7068 = vst [vmem:[#allocation39_spill] sm:$0xff] %v6343_v4  ;;  %v1686_v60 = vadd.f32 %v1685_v30, %v1643_v37  ;;  %v7075_v37 = vld [vmem:[#allocation54_spill] sm:$0xff] }
 0x309   :  { %v1646_v38 = vpop.f32.mrf.mxu0  ;;  %2642 = vmatpush2.bf16.msra.mxu1 %v7070_v3 }
 0x30a   :  { %v1647_v24 = vadd.f32 %v1646_v38, %v5790_v46  ;;  %2601 = vmatpush2.bf16.msra.mxu0 %v7071_v41  ;;  %2643 = vmatprep.subr.bf16.mxu1 %v7072_v20  ;;  %v1790_v53 = vmax.f32 %v1686_v60, 0.0  ;;  %v7077_v38 = vld [vmem:[#allocation55_spill] sm:$0xff]  ;;  %v7078_v20 = vld [vmem:[#allocation56_spill] sm:$0xff] }
 0x30b   :  { %2602 = vmatprep.subr.bf16.mxu0 %v7073_v58  ;;  %v7083_v60 = vld [vmem:[#allocation63_spill] sm:$0xff] }
 0x30c   :  { %v1690_v13 = vadd.f32 %v1689_v6, %v1647_v24  ;;  %v7079_v24 = vld [vmem:[#allocation58_spill] sm:$0xff]  ;;  %v7084_v6 = vld [vmem:[#allocation64_spill] sm:$0xff] }
 0x30d   :  { %2644 = vmatpush2.bf16.msra.mxu1 %v6228_v16  ;;  %v7097_v16 = vld [vmem:[#allocation28_spill] sm:$0xff] }
 0x30e   :  { %v1804_v4 = vmax.f32 %v1690_v13, 0.0  ;;  %2603 = vmatpush2.bf16.msra.mxu0 %v7074_v57  ;;  %2645 = vmatprep.subr.bf16.mxu1 %v6231_v9  ;;  %v7080_v13 = vld [vmem:[#allocation60_spill] sm:$0xff] }
 0x30f   :  { %2604 = vmatprep.subr.bf16.mxu0 %v7075_v37 }
 0x310   :  { %v6355_v30 = vpack.c.bf16 %v1804_v4, %v1790_v53  ;;  %v7081_v53 = vld [vmem:[#allocation61_spill] sm:$0xff]  ;;  %v7082_v4 = vld [vmem:[#allocation62_spill] sm:$0xff] }
 0x311   :  { %2646 = vmatpush2.bf16.msra.mxu1 %v6241_v15 }
 0x312   :  { %7076 = vst [vmem:[#allocation41_spill] sm:$0xff] %v6355_v30  ;;  %2605 = vmatpush2.bf16.msra.mxu0 %v7077_v38  ;;  %2647 = vmatprep.subr.bf16.mxu1 %v6244_v23  ;;  %v7085_v30 = vld [vmem:[#allocation65_spill] sm:$0xff] }
 0x313   :  { %2606 = vmatprep.subr.bf16.mxu0 %v7078_v20  ;;  %v7094_v23 = vld [vmem:[#allocation25_spill] sm:$0xff] }
 0x315   :  { %2648 = vmatpush2.bf16.msra.mxu1 %v6250_v34  ;;  %v7091_v34 = vld [vmem:[#allocation73_spill] sm:$0xff] }
 0x316   :  { %2607 = vmatpush2.bf16.msra.mxu0 %v7079_v24  ;;  %2649 = vmatprep.subr.bf16.mxu1 %v6253_v35  ;;  %v6377_v35 = vpop.f32.mrf.mxu0 }
 0x317   :  { %2608 = vmatprep.subr.bf16.mxu0 %v7080_v13  ;;  %7087 = vst [vmem:[#allocation43_spill] sm:$0xff] %v6377_v35 }
 0x319   :  { %2650 = vmatpush2.bf16.msra.mxu1 %v6258_v25  ;;  %v7086_v25 = vld [vmem:[#allocation22_spill] sm:$0xff] }
 0x31a   :  { %2609 = vmatpush2.bf16.msra.mxu0 %v7081_v53  ;;  %2651 = vmatprep.subr.bf16.mxu1 %v6263_v56 }
 0x31b   :  { %2610 = vmatprep.subr.bf16.mxu0 %v7082_v4 }
 0x31d   :  { %2652 = vmatpush2.bf16.msra.mxu1 %v6268_v26  ;;  %v6381_v26 = vpop.f32.mrf.mxu1 }
 0x31e   :  { %2611 = vmatpush2.bf16.msra.mxu0 %v7083_v60  ;;  %2653 = vmatprep.subr.bf16.mxu1 %v6271_v63  ;;  %7088 = vst [vmem:[#allocation45_spill] sm:$0xff] %v6381_v26  ;;  %v7089_v63 = vld [vmem:[#allocation23_spill] sm:$0xff] }
 0x31f   :  { %2612 = vmatprep.subr.bf16.mxu0 %v7084_v6 }
 0x321   :  { %2654 = vmatpush2.bf16.msra.mxu1 %v6276_v49  ;;  %v7090_v49 = vld [vmem:[#allocation24_spill] sm:$0xff] }
 0x322   :  { %2613 = vmatpush2.bf16.msra.mxu0 %v7085_v30  ;;  %2655 = vmatprep.subr.bf16.mxu1 %v6280_v59 }
 0x323   :  { %2668 = vmatprep.subr.bf16.mxu0 %v7086_v25 }
 0x325   :  { %2615 = vmatmul.mubr.bf16.vlgmr.msra.gmra.mxu0 %v5996_v50  ;;  %2656 = vmatpush2.bf16.msra.mxu1 %v6287_v22  ;;  %v1771_v56 = vpop.f32.mrf.mxu0 }
 0x326   :  { %2669 = vmatpush1.bf16.msra.mxu0 %v7089_v63  ;;  %2700 = vmatprep.mubr.bf16.mxu0 %v6147_v33  ;;  %v7095_v33 = vld [vmem:[#allocation26_spill] sm:$0xff] }
 0x327   :  { %2711 = vmatprep.subr.bf16.mxu1 %v5936_v48  ;;  %2670 = vmatprep.subr.bf16.mxu0 %v7090_v49  ;;  %v6391_v22 = vpop.f32.mrf.mxu0 }
 0x328   :  { %v1728_v59 = vpop.f32.mrf.mxu1  ;;  %2658 = vmatmul.mubr.bf16.vlgmr.msra.gmra.mxu1 %v7091_v34  ;;  %7092 = vst [vmem:[#allocation47_spill] sm:$0xff] %v6391_v22 }
 0x329   :  { %v1729_v35 = vadd.f32 %v1728_v59, %v5790_v46  ;;  %2712 = vmatpush1.bf16.msra.mxu1 %v5942_v36  ;;  %2743 = vmatprep.mubr.bf16.mxu1 %v6301_v29  ;;  %v1775_v59 = vpop.f32.mrf.mxu0  ;;  %v7096_v36 = vld [vmem:[#allocation27_spill] sm:$0xff] }
 0x32a   :  { %v6393_v26 = vpop.f32.mrf.mxu1  ;;  %2671 = vmatpush1.bf16.msra.mxu0 %v7094_v23  ;;  %2713 = vmatprep.subr.bf16.mxu1 %v5947_v1  ;;  %v7098_v1 = vld [vmem:[#allocation29_spill] sm:$0xff] }
 0x32b   :  { %7093 = vst [vmem:[#allocation58_spill] sm:$0xff] %v6393_v26  ;;  %v1772_v48 = vadd.f32 %v1771_v56, %v1729_v35  ;;  %2672 = vmatprep.subr.bf16.mxu0 %v7095_v33  ;;  %v7109_v35 = vld [vmem:[#allocation44_spill] sm:$0xff] }
 0x32c   :  { %v1732_v15 = vpop.f32.mrf.mxu1 }
 0x32d   :  { %v1733_v9 = vadd.f32 %v1732_v15, %v5790_v46  ;;  %2714 = vmatpush1.bf16.msra.mxu1 %v5959_v54  ;;  %v1792_v26 = vmax.f32 %v1772_v48, 0.0  ;;  %v7100_v46 = vld [vmem:[#allocation20_spill] sm:$0xff] }
 0x32e   :  { %2673 = vmatpush1.bf16.msra.mxu0 %v7096_v36  ;;  %2715 = vmatprep.subr.bf16.mxu1 %v5969_v2  ;;  %v7101_v54 = vld [vmem:[#allocation32_spill] sm:$0xff]  ;;  %v7102_v2 = vld [vmem:[#allocation33_spill] sm:$0xff] }
 0x32f   :  { %v1776_v22 = vadd.f32 %v1775_v59, %v1733_v9  ;;  %2674 = vmatprep.subr.bf16.mxu0 %v7097_v16  ;;  %v7103_v9 = vld [vmem:[#allocation34_spill] sm:$0xff]  ;;  %v7107_v15 = vld [vmem:[#allocation40_spill] sm:$0xff] }
 0x330   :  { %v7111_v48 = vld [vmem:[#allocation48_spill] sm:$0xff]  ;;  %v7112_v59 = vld [vmem:[#allocation50_spill] sm:$0xff] }
 0x331   :  { %v1806_v3 = vmax.f32 %v1776_v22, 0.0  ;;  %2716 = vmatpush1.bf16.msra.mxu1 %v5976_v11  ;;  %v7104_v11 = vld [vmem:[#allocation35_spill] sm:$0xff]  ;;  %v7108_v22 = vld [vmem:[#allocation42_spill] sm:$0xff] }
 0x332   :  { %2675 = vmatpush1.bf16.msra.mxu0 %v7098_v1  ;;  %2717 = vmatprep.subr.bf16.mxu1 %v5982_v45  ;;  %v7105_v45 = vld [vmem:[#allocation36_spill] sm:$0xff] }
 0x333   :  { %v6406_v56 = vpack.c.bf16 %v1806_v3, %v1792_v26  ;;  %2676 = vmatprep.subr.bf16.mxu0 %v7100_v46  ;;  %v7106_v3 = vld [vmem:[#allocation38_spill] sm:$0xff] }
 0x334   :  { %v7110_v26 = vld [vmem:[#allocation46_spill] sm:$0xff] }
 0x335   :  { %7099 = vst [vmem:[#allocation60_spill] sm:$0xff] %v6406_v56  ;;  %2718 = vmatpush1.bf16.msra.mxu1 %v5988_v47  ;;  %v7113_v56 = vld [vmem:[#allocation57_spill] sm:$0xff] }
 0x336   :  { %2677 = vmatpush1.bf16.msra.mxu0 %v7101_v54  ;;  %2719 = vmatprep.subr.bf16.mxu1 %v5994_v5 }
 0x337   :  { %2678 = vmatprep.subr.bf16.mxu0 %v7102_v2 }
 0x339   :  { %2720 = vmatpush1.bf16.msra.mxu1 %v6002_v51 }
 0x33a   :  { %2679 = vmatpush1.bf16.msra.mxu0 %v7103_v9  ;;  %2721 = vmatprep.subr.bf16.mxu1 %v6008_v28 }
 0x33b   :  { %2680 = vmatprep.subr.bf16.mxu0 %v7104_v11 }
 0x33d   :  { %2722 = vmatpush1.bf16.msra.mxu1 %v6014_v32 }
 0x33e   :  { %2681 = vmatpush1.bf16.msra.mxu0 %v7105_v45  ;;  %2723 = vmatprep.subr.bf16.mxu1 %v7061_v43 }
 0x33f   :  { %2682 = vmatprep.subr.bf16.mxu0 %v7106_v3 }
 0x341   :  { %2724 = vmatpush1.bf16.msra.mxu1 %v7062_v0 }
 0x342   :  { %2683 = vmatpush1.bf16.msra.mxu0 %v7107_v15  ;;  %2725 = vmatprep.subr.bf16.mxu1 %v7063_v19 }
 0x343   :  { %2684 = vmatprep.subr.bf16.mxu0 %v7108_v22 }
 0x345   :  { %2726 = vmatpush1.bf16.msra.mxu1 %v7064_v7 }
 0x346   :  { %2685 = vmatpush2.bf16.msra.mxu0 %v7109_v35  ;;  %2727 = vmatprep.subr.bf16.mxu1 %v7065_v12 }
 0x347   :  { %2686 = vmatprep.subr.bf16.mxu0 %v7110_v26 }
 0x349   :  { %2728 = vmatpush2.bf16.msra.mxu1 %v7066_v14 }
 0x34a   :  { %2687 = vmatpush2.bf16.msra.mxu0 %v7111_v48  ;;  %2729 = vmatprep.subr.bf16.mxu1 %v7069_v10  ;;  %v7115_v10 = vld [vmem:[#allocation59_spill] sm:$0xff] }
 0x34b   :  { %2688 = vmatprep.subr.bf16.mxu0 %v7112_v59 }
 0x34d   :  { %2730 = vmatpush2.bf16.msra.mxu1 %v7071_v41 }
 0x34e   :  { %2689 = vmatpush2.bf16.msra.mxu0 %v6066_v62  ;;  %2731 = vmatprep.subr.bf16.mxu1 %v7073_v58  ;;  %v1563_v58 = vadd.f32 %v6329_v31, %v5915_v18 }
 0x34f   :  { %2690 = vmatprep.subr.bf16.mxu0 %v6071_v61 }
 0x351   :  { %2732 = vmatpush2.bf16.msra.mxu1 %v7074_v57  ;;  %v7114_v57 = vld [vmem:[#allocation87_spill] sm:$0xff] }
 0x352   :  { %2691 = vmatpush2.bf16.msra.mxu0 %v6078_v39  ;;  %2733 = vmatprep.subr.bf16.mxu1 %v7075_v37  ;;  %v1559_v41 = vadd.f32 %v7114_v57, %v5915_v18 }
 0x353   :  { %2692 = vmatprep.subr.bf16.mxu0 %v6083_v42 }
 0x355   :  { %2734 = vmatpush2.bf16.msra.mxu1 %v7077_v38  ;;  %v1606_v38 = vadd.f32 %v6334_v40, %v1563_v58  ;;  %v7120_v40 = vld [vmem:[#allocation69_spill] sm:$0xff] }
 0x356   :  { %2693 = vmatpush2.bf16.msra.mxu0 %v6090_v8  ;;  %2735 = vmatprep.subr.bf16.mxu1 %v7078_v20  ;;  %v7116_v20 = vld [vmem:[#allocation86_spill] sm:$0xff] }
 0x357   :  { %2694 = vmatprep.subr.bf16.mxu0 %v7113_v56  ;;  %v1602_v37 = vadd.f32 %v7116_v20, %v1559_v41  ;;  %v1803_v31 = vmax.f32 %v1606_v38, 0.0  ;;  %v7117_v20 = vld [vmem:[#allocation66_spill] sm:$0xff]  ;;  %v7118_v41 = vld [vmem:[#allocation67_spill] sm:$0xff]  ;;  %v7127_v38 = vld [vmem:[#allocation77_spill] sm:$0xff] }
 0x359   :  { %2736 = vmatpush2.bf16.msra.mxu1 %v7079_v24  ;;  %v1789_v57 = vmax.f32 %v1602_v37, 0.0  ;;  %v7122_v37 = vld [vmem:[#allocation71_spill] sm:$0xff] }
 0x35a   :  { %2695 = vmatpush2.bf16.msra.mxu0 %v7115_v10  ;;  %2737 = vmatprep.subr.bf16.mxu1 %v7080_v13 }
 0x35b   :  { %2696 = vmatprep.subr.bf16.mxu0 %v6107_v21  ;;  %v6463_v58 = vpack.c.bf16 %v1803_v31, %v1789_v57  ;;  %v7146_v31 = vld [vmem:[#allocation97_spill] sm:$0xff]  ;;  %v7148_v57 = vld [vmem:[#allocation98_spill] sm:$0xff] }
 0x35d   :  { %2738 = vmatpush2.bf16.msra.mxu1 %v7081_v53 }
 0x35e   :  { %2697 = vmatpush2.bf16.msra.mxu0 %v6117_v17  ;;  %2739 = vmatprep.subr.bf16.mxu1 %v7082_v4 }
 0x35f   :  { %2698 = vmatprep.subr.bf16.mxu0 %v6122_v52 }
 0x361   :  { %2740 = vmatpush2.bf16.msra.mxu1 %v7083_v60 }
 0x362   :  { %2699 = vmatpush2.bf16.msra.mxu0 %v6130_v44  ;;  %2741 = vmatprep.subr.bf16.mxu1 %v7084_v6 }
 0x363   :  { %2754 = vmatprep.subr.bf16.mxu0 %v6135_v27 }
 0x365   :  { %2701 = vmatmul.mubr.bf16.vlgmr.msra.gmra.mxu0 %v5996_v50  ;;  %2742 = vmatpush2.bf16.msra.mxu1 %v7085_v30  ;;  %v7119_v50 = vld [vmem:[#allocation68_spill] sm:$0xff]  ;;  %v7149_v30 = vld [vmem:[#allocation37_spill] sm:$0xff] }
 0x366   :  { %2755 = vmatpush1.bf16.msra.mxu0 %v6142_v55  ;;  %2786 = vmatprep.mubr.bf16.mxu0 %v6463_v58 }
 0x367   :  { %2797 = vmatprep.subr.bf16.mxu1 %v7086_v25  ;;  %2756 = vmatprep.subr.bf16.mxu0 %v7117_v20  ;;  %v7121_v25 = vld [vmem:[#allocation70_spill] sm:$0xff] }
 0x368   :  { %2744 = vmatmul.mubr.bf16.vlgmr.msra.gmra.mxu1 %v7091_v34 }
 0x369   :  { %2798 = vmatpush1.bf16.msra.mxu1 %v7089_v63  ;;  %2829 = vmatprep.mubr.bf16.mxu1 %v6301_v29  ;;  %v7123_v63 = vld [vmem:[#allocation72_spill] sm:$0xff] }
 0x36a   :  { %2757 = vmatpush1.bf16.msra.mxu0 %v7118_v41  ;;  %2799 = vmatprep.subr.bf16.mxu1 %v7090_v49  ;;  %v7124_v49 = vld [vmem:[#allocation74_spill] sm:$0xff]  ;;  %v7126_v29 = vld [vmem:[#allocation76_spill] sm:$0xff] }
 0x36b   :  { %2758 = vmatprep.subr.bf16.mxu0 %v7119_v50 }
 0x36d   :  { %2800 = vmatpush1.bf16.msra.mxu1 %v7094_v23  ;;  %v7125_v23 = vld [vmem:[#allocation75_spill] sm:$0xff] }
 0x36e   :  { %2759 = vmatpush1.bf16.msra.mxu0 %v7120_v40  ;;  %2801 = vmatprep.subr.bf16.mxu1 %v7095_v33  ;;  %v7129_v33 = vld [vmem:[#allocation79_spill] sm:$0xff] }
 0x36f   :  { %2760 = vmatprep.subr.bf16.mxu0 %v7121_v25 }
 0x371   :  { %2802 = vmatpush1.bf16.msra.mxu1 %v7096_v36  ;;  %v7130_v36 = vld [vmem:[#allocation80_spill] sm:$0xff] }
 0x372   :  { %2761 = vmatpush1.bf16.msra.mxu0 %v7122_v37  ;;  %2803 = vmatprep.subr.bf16.mxu1 %v7097_v16  ;;  %v7128_v16 = vld [vmem:[#allocation78_spill] sm:$0xff] }
 0x373   :  { %2762 = vmatprep.subr.bf16.mxu0 %v7123_v63 }
 0x375   :  { %2804 = vmatpush1.bf16.msra.mxu1 %v7098_v1  ;;  %v7131_v1 = vld [vmem:[#allocation81_spill] sm:$0xff] }
 0x376   :  { %2763 = vmatpush1.bf16.msra.mxu0 %v7124_v49  ;;  %2805 = vmatprep.subr.bf16.mxu1 %v7100_v46  ;;  %v7132_v46 = vld [vmem:[#allocation82_spill] sm:$0xff] }
 0x377   :  { %2764 = vmatprep.subr.bf16.mxu0 %v7125_v23 }
 0x379   :  { %2806 = vmatpush1.bf16.msra.mxu1 %v7101_v54  ;;  %v7133_v54 = vld [vmem:[#allocation83_spill] sm:$0xff] }
 0x37a   :  { %2765 = vmatpush1.bf16.msra.mxu0 %v7126_v29  ;;  %2807 = vmatprep.subr.bf16.mxu1 %v7102_v2  ;;  %v7134_v2 = vld [vmem:[#allocation84_spill] sm:$0xff] }
 0x37b   :  { %2766 = vmatprep.subr.bf16.mxu0 %v7127_v38 }
 0x37d   :  { %2808 = vmatpush1.bf16.msra.mxu1 %v7103_v9  ;;  %v7135_v9 = vld [vmem:[#allocation85_spill] sm:$0xff] }
 0x37e   :  { %2767 = vmatpush1.bf16.msra.mxu0 %v7128_v16  ;;  %2809 = vmatprep.subr.bf16.mxu1 %v7104_v11  ;;  %v7136_v11 = vld [vmem:[#allocation88_spill] sm:$0xff] }
 0x37f   :  { %2768 = vmatprep.subr.bf16.mxu0 %v7129_v33 }
 0x381   :  { %2810 = vmatpush1.bf16.msra.mxu1 %v7105_v45  ;;  %v7137_v45 = vld [vmem:[#allocation89_spill] sm:$0xff] }
 0x382   :  { %2769 = vmatpush1.bf16.msra.mxu0 %v7130_v36  ;;  %2811 = vmatprep.subr.bf16.mxu1 %v7106_v3  ;;  %v7138_v3 = vld [vmem:[#allocation90_spill] sm:$0xff] }
 0x383   :  { %2770 = vmatprep.subr.bf16.mxu0 %v7131_v1 }
 0x385   :  { %2812 = vmatpush1.bf16.msra.mxu1 %v7107_v15  ;;  %v7139_v15 = vld [vmem:[#allocation91_spill] sm:$0xff] }
 0x386   :  { %2771 = vmatpush2.bf16.msra.mxu0 %v7132_v46  ;;  %2813 = vmatprep.subr.bf16.mxu1 %v7108_v22  ;;  %v7140_v22 = vld [vmem:[#allocation92_spill] sm:$0xff] }
 0x387   :  { %2772 = vmatprep.subr.bf16.mxu0 %v7133_v54 }
 0x389   :  { %2814 = vmatpush2.bf16.msra.mxu1 %v7109_v35  ;;  %v7141_v35 = vld [vmem:[#allocation94_spill] sm:$0xff] }
 0x38a   :  { %2773 = vmatpush2.bf16.msra.mxu0 %v7134_v2  ;;  %2815 = vmatprep.subr.bf16.mxu1 %v7110_v26  ;;  %v7142_v26 = vld [vmem:[#allocation95_spill] sm:$0xff] }
 0x38b   :  { %2774 = vmatprep.subr.bf16.mxu0 %v7135_v9 }
 0x38d   :  { %2816 = vmatpush2.bf16.msra.mxu1 %v7111_v48 }
 0x38e   :  { %2775 = vmatpush2.bf16.msra.mxu0 %v7136_v11  ;;  %2817 = vmatprep.subr.bf16.mxu1 %v7112_v59  ;;  %v7145_v59 = vld [vmem:[#allocation39_spill] sm:$0xff] }
 0x38f   :  { %2776 = vmatprep.subr.bf16.mxu0 %v7137_v45 }
 0x391   :  { %2818 = vmatpush2.bf16.msra.mxu1 %v6066_v62  ;;  %v7143_v62 = vld [vmem:[#allocation43_spill] sm:$0xff] }
 0x392   :  { %2777 = vmatpush2.bf16.msra.mxu0 %v7138_v3  ;;  %2819 = vmatprep.subr.bf16.mxu1 %v6071_v61  ;;  %v1649_v48 = vadd.f32 %v7143_v62, %v5915_v18  ;;  %v7144_v61 = vld [vmem:[#allocation96_spill] sm:$0xff]  ;;  %v7150_v62 = vld [vmem:[#allocation99_spill] sm:$0xff] }
 0x393   :  { %2778 = vmatprep.subr.bf16.mxu0 %v7139_v15 }
 0x395   :  { %2820 = vmatpush2.bf16.msra.mxu1 %v6078_v39  ;;  %v1645_v39 = vadd.f32 %v7145_v59, %v5915_v18  ;;  %v6538_v59 = vld [vmem:[#allocation10 + $0x174] ss:$8 sps:$4 sm:$0xff]  }
 0x396   :  { %2779 = vmatpush2.bf16.msra.mxu0 %v7140_v22  ;;  %2821 = vmatprep.subr.bf16.mxu1 %v6083_v42  ;;  %v7147_v42 = vld [vmem:[#allocation45_spill] sm:$0xff] }
 0x397   :  { %2780 = vmatprep.subr.bf16.mxu0 %v7141_v35  ;;  %v7151_v18 = vld [vmem:[#allocation93_spill] sm:$0xff] }
 0x399   :  { %2822 = vmatpush2.bf16.msra.mxu1 %v6090_v8  ;;  %v1692_v8 = vadd.f32 %v7147_v42, %v1649_v48  ;;  %v4980_v48 = vld [vmem:[#allocation10 + $0x1e4] ss:$8 sps:$4 sm:$0xff]  }
 0x39a   :  { %2781 = vmatpush2.bf16.msra.mxu0 %v7142_v26  ;;  %2823 = vmatprep.subr.bf16.mxu1 %v7113_v56  ;;  %v1688_v56 = vadd.f32 %v7149_v30, %v1645_v39  ;;  %v6560_v30 = vld [vmem:[#allocation10 + $0x154] ss:$8 sps:$4 sm:$0xff]   ;;  %v1734_v39 = vpop.f32.mrf.mxu1 }
 0x39b   :  { %2782 = vmatprep.subr.bf16.mxu0 %v7144_v61  ;;  %v1805_v6 = vmax.f32 %v1692_v8, 0.0 }
 0x39c   :  { %v6640_v42 = vpop.f32.mrf.mxu1 }
 0x39d   :  { %2824 = vmatpush2.bf16.msra.mxu1 %v7115_v10  ;;  %v1791_v10 = vmax.f32 %v1688_v56, 0.0  ;;  %v4984_v56 = vld [vmem:[#allocation10 + $0x1d4] ss:$8 sps:$4 sm:$0xff]  }
 0x39e   :  { %2783 = vmatpush2.bf16.msra.mxu0 %v7146_v31  ;;  %2825 = vmatprep.subr.bf16.mxu1 %v6107_v21  ;;  %v6543_v21 = vld [vmem:[#allocation10 + $0x170] ss:$8 sps:$4 sm:$0xff]  }
 0x39f   :  { %2784 = vmatprep.subr.bf16.mxu0 %v7148_v57 }
 0x3a1   :  { %2826 = vmatpush2.bf16.msra.mxu1 %v6117_v17  ;;  %v6548_v17 = vld [vmem:[#allocation10 + $0x164] ss:$8 sps:$4 sm:$0xff]  }
 0x3a2   :  { %2785 = vmatpush2.bf16.msra.mxu0 %v7150_v62  ;;  %2827 = vmatprep.subr.bf16.mxu1 %v6122_v52  ;;  %v6551_v52 = vpack.c.bf16 %v1805_v6, %v1791_v10  ;;  %v4956_v6 = vld [vmem:[#allocation10 + $0x40] ss:$8 sps:$4 sm:$0xff]   ;;  %v4986_v10 = vld [vmem:[#allocation10 + $0x1d0] ss:$8 sps:$4 sm:$0xff]  }
 0x3a3   :  { %2840 = vmatprep.subr.bf16.mxu0 %v6538_v59 }
 0x3a5   :  { %2787 = vmatmul.mubr.bf16.vlgmr.msra.gmra.mxu0 %v7151_v18  ;;  %2828 = vmatpush2.bf16.msra.mxu1 %v6130_v44  ;;  %v6556_v44 = vld [vmem:[#allocation10 + $0x160] ss:$8 sps:$4 sm:$0xff]  }
 0x3a6   :  { %2841 = vmatpush1.bf16.msra.mxu0 %v6543_v21  ;;  %2872 = vmatprep.mubr.bf16.mxu0 %v6463_v58 }
 0x3a7   :  { %2883 = vmatprep.subr.bf16.mxu1 %v6135_v27  ;;  %2842 = vmatprep.subr.bf16.mxu0 %v6548_v17  ;;  %v6564_v27 = vld [vmem:[#allocation10 + $0x150] ss:$8 sps:$4 sm:$0xff]  }
 0x3a8   :  { %2830 = vmatmul.mubr.bf16.vlgmr.msra.gmra.mxu1 %v7091_v34  ;;  %v6568_v34 = vld [vmem:[#allocation10 + $0x144] ss:$8 sps:$4 sm:$0xff]  }
 0x3a9   :  { %2884 = vmatpush1.bf16.msra.mxu1 %v6142_v55  ;;  %2915 = vmatprep.mubr.bf16.mxu1 %v6551_v52  ;;  %v7157_v55 = vld [vmem:[#allocation55_spill] sm:$0xff] }
 0x3aa   :  { %2843 = vmatpush1.bf16.msra.mxu0 %v6556_v44  ;;  %2885 = vmatprep.subr.bf16.mxu1 %v7117_v20  ;;  %v4958_v20 = vld [vmem:[#allocation10 + $0x140] ss:$8 sps:$4 sm:$0xff]  }
 0x3ab   :  { %2844 = vmatprep.subr.bf16.mxu0 %v6560_v30 }
 0x3ad   :  { %2886 = vmatpush1.bf16.msra.mxu1 %v7118_v41  ;;  %v4959_v41 = vld [vmem:[#allocation10 + $0x30] ss:$8 sps:$4 sm:$0xff]  }
 0x3ae   :  { %2845 = vmatpush1.bf16.msra.mxu0 %v6564_v27  ;;  %2887 = vmatprep.subr.bf16.mxu1 %v7119_v50  ;;  %v4960_v50 = vld [vmem:[#allocation10 + $0x134] ss:$8 sps:$4 sm:$0xff]  }
 0x3af   :  { %2846 = vmatprep.subr.bf16.mxu0 %v6568_v34 }
 0x3b1   :  { %2888 = vmatpush1.bf16.msra.mxu1 %v7120_v40  ;;  %v4961_v40 = vld [vmem:[#allocation10 + $0x24] ss:$8 sps:$4 sm:$0xff]  }
 0x3b2   :  { %2847 = vmatpush1.bf16.msra.mxu0 %v5988_v47  ;;  %2889 = vmatprep.subr.bf16.mxu1 %v7121_v25  ;;  %v7152_v47 = vld [vmem:[#allocation49_spill] sm:$0xff] }
 0x3b3   :  { %2848 = vmatprep.subr.bf16.mxu0 %v5994_v5  ;;  %v7153_v5 = vld [vmem:[#allocation51_spill] sm:$0xff]  ;;  %v4962_v25 = vld [vmem:[#allocation10 + $0x130] ss:$8 sps:$4 sm:$0xff]  }
 0x3b5   :  { %2890 = vmatpush1.bf16.msra.mxu1 %v7122_v37  ;;  %v4963_v37 = vld [vmem:[#allocation10 + $0x20] ss:$8 sps:$4 sm:$0xff]  }
 0x3b6   :  { %2849 = vmatpush1.bf16.msra.mxu0 %v6002_v51  ;;  %2891 = vmatprep.subr.bf16.mxu1 %v7123_v63  ;;  %v7154_v51 = vld [vmem:[#allocation52_spill] sm:$0xff]  ;;  %v4964_v63 = vld [vmem:[#allocation10 + $0x124] ss:$8 sps:$4 sm:$0xff]  }
 0x3b7   :  { %2850 = vmatprep.subr.bf16.mxu0 %v6008_v28  ;;  %v7155_v28 = vld [vmem:[#allocation53_spill] sm:$0xff] }
 0x3b9   :  { %2892 = vmatpush1.bf16.msra.mxu1 %v7124_v49  ;;  %v4965_v49 = vld [vmem:[#allocation10 + $0x14] ss:$8 sps:$4 sm:$0xff]  }
 0x3ba   :  { %2851 = vmatpush1.bf16.msra.mxu0 %v6014_v32  ;;  %2893 = vmatprep.subr.bf16.mxu1 %v7125_v23  ;;  %v7156_v32 = vld [vmem:[#allocation54_spill] sm:$0xff] }
 0x3bb   :  { %2852 = vmatprep.subr.bf16.mxu0 %v7061_v43  ;;  %v7159_v43 = vld [vmem:[#allocation64_spill] sm:$0xff]  ;;  %v4966_v23 = vld [vmem:[#allocation10 + $0x120] ss:$8 sps:$4 sm:$0xff]  }
 0x3bd   :  { %2894 = vmatpush1.bf16.msra.mxu1 %v7126_v29  ;;  %v4967_v29 = vld [vmem:[#allocation10 + $0x10] ss:$8 sps:$4 sm:$0xff]  }
 0x3be   :  { %2853 = vmatpush1.bf16.msra.mxu0 %v7062_v0  ;;  %2895 = vmatprep.subr.bf16.mxu1 %v7127_v38  ;;  %v7160_v0 = vld [vmem:[#allocation65_spill] sm:$0xff] }
 0x3bf   :  { %2854 = vmatprep.subr.bf16.mxu0 %v7063_v19  ;;  %v4949_v19 = vld [vmem:[#allocation10 + $0x74] ss:$8 sps:$4 sm:$0xff]  }
 0x3c0   :  { %v4968_v38 = vld [vmem:[#allocation10 + $0x114] ss:$8 sps:$4 sm:$0xff]  }
 0x3c1   :  { %2896 = vmatpush1.bf16.msra.mxu1 %v7128_v16  ;;  %v4969_v16 = vld [vmem:[#allocation10 + $0x4] ss:$8 sps:$4 sm:$0xff]  }
 0x3c2   :  { %2855 = vmatpush1.bf16.msra.mxu0 %v7064_v7  ;;  %2897 = vmatprep.subr.bf16.mxu1 %v7129_v33  ;;  %v4950_v7 = vld [vmem:[#allocation10 + $0x70] ss:$8 sps:$4 sm:$0xff]   ;;  %v6634_v33 = vpop.f32.mrf.mxu0 }
 0x3c3   :  { %2856 = vmatprep.subr.bf16.mxu0 %v7065_v12  ;;  %v4951_v12 = vld [vmem:[#allocation10 + $0x64] ss:$8 sps:$4 sm:$0xff]  }
 0x3c5   :  { %2898 = vmatpush1.bf16.msra.mxu1 %v7130_v36  ;;  %v4970_v36 = vld [vmem:[#allocation10 + $0x110] ss:$8 sps:$4 sm:$0xff]  }
 0x3c6   :  { %2857 = vmatpush2.bf16.msra.mxu0 %v7066_v14  ;;  %2899 = vmatprep.subr.bf16.mxu1 %v7131_v1  ;;  %v7158_v14 = vld [vmem:[#allocation56_spill] sm:$0xff]  ;;  %v6636_v1 = vpop.f32.mrf.mxu0 }
 0x3c7   :  { %2858 = vmatprep.subr.bf16.mxu0 %v7152_v47 }
 0x3c9   :  { %2900 = vmatpush2.bf16.msra.mxu1 %v7132_v46  ;;  %v4971_v46 = vld [vmem:[#allocation10] ss:$8 sps:$4 sm:$0xff]  }
 0x3ca   :  { %2859 = vmatpush2.bf16.msra.mxu0 %v7153_v5  ;;  %2901 = vmatprep.subr.bf16.mxu1 %v7133_v54  ;;  %v4972_v54 = vld [vmem:[#allocation10 + $0x104] ss:$8 sps:$4 sm:$0xff]   ;;  %v4991_v5 = vld [vmem:[#allocation10 + $0xb0] ss:$8 sps:$4 sm:$0xff]  }
 0x3cb   :  { %2860 = vmatprep.subr.bf16.mxu0 %v7154_v51  ;;  %v4992_v51 = vld [vmem:[#allocation10 + $0x1b4] ss:$8 sps:$4 sm:$0xff]  }
 0x3cd   :  { %2902 = vmatpush2.bf16.msra.mxu1 %v7134_v2  ;;  %v4973_v2 = vld [vmem:[#allocation10 + $0xf4] ss:$8 sps:$4 sm:$0xff]  }
 0x3ce   :  { %2861 = vmatpush2.bf16.msra.mxu0 %v7155_v28  ;;  %2903 = vmatprep.subr.bf16.mxu1 %v7135_v9  ;;  %v4974_v9 = vld [vmem:[#allocation10 + $0x100] ss:$8 sps:$4 sm:$0xff]  }
 0x3cf   :  { %2862 = vmatprep.subr.bf16.mxu0 %v7156_v32  ;;  %v7162_v28 = vld [vmem:[#allocation31_spill] sm:$0xff] }
 0x3d1   :  { %2904 = vmatpush2.bf16.msra.mxu1 %v7136_v11  ;;  %v2446_v11 = vpop.f32.mrf.mxu0 }
 0x3d2   :  { %2863 = vmatpush2.bf16.msra.mxu0 %v7157_v55  ;;  %2905 = vmatprep.subr.bf16.mxu1 %v7137_v45  ;;  %v4975_v45 = vld [vmem:[#allocation10 + $0xf0] ss:$8 sps:$4 sm:$0xff]   ;;  %v4993_v55 = vld [vmem:[#allocation10 + $0xa4] ss:$8 sps:$4 sm:$0xff]  }
 0x3d3   :  { %2864 = vmatprep.subr.bf16.mxu0 %v7158_v14  ;;  %v7163_v14 = vld [vmem:[#allocation21_spill] sm:$0xff] }
 0x3d5   :  { %2906 = vmatpush2.bf16.msra.mxu1 %v7138_v3  ;;  %v4976_v3 = vld [vmem:[#allocation10 + $0x1f4] ss:$8 sps:$4 sm:$0xff]  }
 0x3d6   :  { %2865 = vmatpush2.bf16.msra.mxu0 %v7079_v24  ;;  %2907 = vmatprep.subr.bf16.mxu1 %v7139_v15  ;;  %v7161_v24 = vld [vmem:[#allocation41_spill] sm:$0xff]  ;;  %v4977_v15 = vld [vmem:[#allocation10 + $0xe4] ss:$8 sps:$4 sm:$0xff]  }
 0x3d7   :  { %2866 = vmatprep.subr.bf16.mxu0 %v7080_v13  ;;  %v4952_v13 = vld [vmem:[#allocation10 + $0x60] ss:$8 sps:$4 sm:$0xff]  }
 0x3d9   :  { %2908 = vmatpush2.bf16.msra.mxu1 %v7140_v22  ;;  %v4978_v22 = vld [vmem:[#allocation10 + $0x1f0] ss:$8 sps:$4 sm:$0xff]  }
 0x3da   :  { %2867 = vmatpush2.bf16.msra.mxu0 %v7081_v53  ;;  %2909 = vmatprep.subr.bf16.mxu1 %v7141_v35  ;;  %v4953_v53 = vld [vmem:[#allocation10 + $0x54] ss:$8 sps:$4 sm:$0xff]   ;;  %v6638_v35 = vpop.f32.mrf.mxu0 }
 0x3db   :  { %2868 = vmatprep.subr.bf16.mxu0 %v7082_v4  ;;  %v4954_v4 = vld [vmem:[#allocation10 + $0x50] ss:$8 sps:$4 sm:$0xff]  }
 0x3dc   :  { %v2450_v8 = vpop.f32.mrf.mxu0 }
 0x3dd   :  { %2910 = vmatpush2.bf16.msra.mxu1 %v7142_v26  ;;  %v4979_v26 = vld [vmem:[#allocation10 + $0xe0] ss:$8 sps:$4 sm:$0xff]  }
 0x3de   :  { %2869 = vmatpush2.bf16.msra.mxu0 %v7083_v60  ;;  %2911 = vmatprep.subr.bf16.mxu1 %v7144_v61  ;;  %v4955_v60 = vld [vmem:[#allocation10 + $0x44] ss:$8 sps:$4 sm:$0xff]   ;;  %v4981_v61 = vld [vmem:[#allocation10 + $0xd4] ss:$8 sps:$4 sm:$0xff]  }
 0x3df   :  { %2870 = vmatprep.subr.bf16.mxu0 %v7159_v43  ;;  %v1735_v43 = vadd.f32 %v1734_v39, %v7163_v14  ;;  %v5007_v39 = vld [vmem:[#allocation10 + $0x270] ss:$8 sps:$4 sm:$0xff]  }
 0x3e1   :  { %2912 = vmatpush2.bf16.msra.mxu1 %v7146_v31  ;;  %v4982_v31 = vld [vmem:[#allocation10 + $0x1e0] ss:$8 sps:$4 sm:$0xff]  }
 0x3e2   :  { %2871 = vmatpush2.bf16.msra.mxu0 %v7160_v0  ;;  %2913 = vmatprep.subr.bf16.mxu1 %v7148_v57  ;;  %v4983_v57 = vld [vmem:[#allocation10 + $0xd0] ss:$8 sps:$4 sm:$0xff]  }
 0x3e3   :  { %2926 = vmatprep.subr.bf16.mxu0 %v4949_v19 }
 0x3e5   :  { %2873 = vmatmul.mubr.bf16.vlgmr.msra.gmra.mxu0 %v7151_v18  ;;  %2914 = vmatpush2.bf16.msra.mxu1 %v7150_v62  ;;  %v4985_v62 = vld [vmem:[#allocation10 + $0xc4] ss:$8 sps:$4 sm:$0xff]  }
 0x3e6   :  { %2927 = vmatpush1.bf16.msra.mxu0 %v4950_v7  ;;  %2958 = vmatprep.mubr.bf16.mxu0 %v6463_v58  ;;  %v4957_v58 = vld [vmem:[#allocation10 + $0x34] ss:$8 sps:$4 sm:$0xff]   ;;  %v4994_v7 = vld [vmem:[#allocation10 + $0x1b0] ss:$8 sps:$4 sm:$0xff]  }
 0x3e7   :  { %2967 = vmatprep.subr.bf16.mxu1 %v6538_v59  ;;  %2928 = vmatprep.subr.bf16.mxu0 %v4951_v12  ;;  %v6642_v59 = vpop.f32.mrf.mxu0  ;;  %v7164_v12 = vld [vmem:[#allocation58_spill] sm:$0xff] }
 0x3e8   :  { %2916 = vmatmul.mubr.bf16.vlgmr.msra.gmra.mxu1 %v7161_v24 }
 0x3e9   :  { %2968 = vmatpush1.bf16.msra.mxu1 %v6543_v21  ;;  %2999 = vmatprep.mubr.bf16.mxu1 %v6551_v52  ;;  %v2489_v21 = vpop.f32.mrf.mxu1  ;;  %v4988_v52 = vld [vmem:[#allocation10 + $0x1c4] ss:$8 sps:$4 sm:$0xff]  }
 0x3ea   :  { %2929 = vmatpush1.bf16.msra.mxu0 %v4952_v13  ;;  %2969 = vmatprep.subr.bf16.mxu1 %v6548_v17  ;;  %v4987_v17 = vld [vmem:[#allocation10 + $0xc0] ss:$8 sps:$4 sm:$0xff]   ;;  %v1731_v13 = vadd.f32 %v7164_v12, %v7163_v14  ;;  %v4822_v14 = vld [vmem:[#allocation11 + $0x58] sm:$0xff]  }
 0x3eb   :  { %2930 = vmatprep.subr.bf16.mxu0 %v4953_v53  ;;  %v6649_v47 = vpop.f32.mrf.mxu1  ;;  %v4823_v12 = vld [vmem:[#allocation11 + $0x18] sm:$0xff]  }
 0x3ed   :  { %2970 = vmatpush1.bf16.msra.mxu1 %v6556_v44  ;;  %v4989_v44 = vld [vmem:[#allocation10 + $0xb4] ss:$8 sps:$4 sm:$0xff]   ;;  %v2493_v53 = vpop.f32.mrf.mxu1 }
 0x3ee   :  { %2931 = vmatpush1.bf16.msra.mxu0 %v4954_v4  ;;  %2971 = vmatprep.subr.bf16.mxu1 %v6560_v30  ;;  %v2532_v30 = vpop.f32.mrf.mxu0  ;;  %v4995_v4 = vld [vmem:[#allocation10 + $0xa0] ss:$8 sps:$4 sm:$0xff]  }
 0x3ef   :  { %2932 = vmatprep.subr.bf16.mxu0 %v4955_v60  ;;  %v4996_v60 = vld [vmem:[#allocation10 + $0x1a4] ss:$8 sps:$4 sm:$0xff]  }
 0x3f0   :  { %v6656_v0 = vpop.f32.mrf.mxu0 }
 0x3f1   :  { %2972 = vmatpush1.bf16.msra.mxu1 %v6564_v27  ;;  %v4990_v27 = vld [vmem:[#allocation10 + $0x1c0] ss:$8 sps:$4 sm:$0xff]  }
 0x3f2   :  { %2933 = vmatpush1.bf16.msra.mxu0 %v4956_v6  ;;  %2973 = vmatprep.subr.bf16.mxu1 %v6568_v34  ;;  %v6647_v34 = vld [vmem:[%s6764_s6] sm:$0x3] }
 0x3f3   :  { %2934 = vmatprep.subr.bf16.mxu0 %v4957_v58  ;;  %v6653_v32 = vrot.slane %v6647_v34, %v7162_v28  ;;  %v4997_v58 = vld [vmem:[#allocation10 + $0x94] ss:$8 sps:$4 sm:$0xff]   ;;  %v4821_v28 = vld [vmem:[#allocation11 + $0x20] sm:$0xff]  }
 0x3f5   :  { %2974 = vmatpush1.bf16.msra.mxu1 %v4958_v20  ;;  %v2451_v19 = vadd.f32 %v2450_v8, %v6653_v32  ;;  %v2447_v6 = vadd.f32 %v2446_v11, %v6653_v32  ;;  %v1778_v20 = vadd.f32 %v6634_v33, %v1735_v43  ;;  %v6664_v33 = vpop.f32.mrf.mxu1  ;;  %v5014_v43 = vld [vmem:[#allocation10 + $0x234] ss:$8 sps:$4 sm:$0xff]  }
 0x3f6   :  { %2935 = vmatpush1.bf16.msra.mxu0 %v4959_v41  ;;  %2975 = vmatprep.subr.bf16.mxu1 %v4960_v50  ;;  %v2536_v41 = vpop.f32.mrf.mxu0 }
 0x3f7   :  { %2936 = vmatprep.subr.bf16.mxu0 %v4961_v40  ;;  %v2494_v50 = vadd.f32 %v2493_v53, %v2451_v19  ;;  %v4998_v40 = vld [vmem:[#allocation10 + $0x1a0] ss:$8 sps:$4 sm:$0xff]  }
 0x3f9   :  { %2976 = vmatpush1.bf16.msra.mxu1 %v4962_v25  ;;  %v7165_v25 = vld [vmem:[#allocation47_spill] sm:$0xff] }
 0x3fa   :  { %2937 = vmatpush1.bf16.msra.mxu0 %v4963_v37  ;;  %2977 = vmatprep.subr.bf16.mxu1 %v4964_v63  ;;  %v1774_v37 = vadd.f32 %v7165_v25, %v1731_v13  ;;  %v4999_v63 = vld [vmem:[#allocation10 + $0x90] ss:$8 sps:$4 sm:$0xff]   ;;  %v7166_v13 = vld [vmem:[#allocation30_spill] sm:$0xff] }
 0x3fb   :  { %2938 = vmatprep.subr.bf16.mxu0 %v4965_v49  ;;  %v5000_v49 = vld [vmem:[#allocation10 + $0x194] ss:$8 sps:$4 sm:$0xff]   ;;  %v6678_v53 = vrot.slane %v6647_v34, %v7166_v13  ;;  %v5017_v25 = vld [vmem:[#allocation10 + $0x220] ss:$8 sps:$4 sm:$0xff]   ;;  %v5032_v13 = vld [vmem:[#allocation10 + $0x2a4] ss:$8 sps:$4 sm:$0xff]  }
 0x3fd   :  { %2978 = vmatpush1.bf16.msra.mxu1 %v4966_v23  ;;  %v2490_v23 = vadd.f32 %v2489_v21, %v2447_v6  ;;  %v5010_v21 = vld [vmem:[#allocation10 + $0x254] ss:$8 sps:$4 sm:$0xff]   ;;  %v5016_v6 = vld [vmem:[#allocation10 + $0x224] ss:$8 sps:$4 sm:$0xff]   ;;  %v2445_v34 = vadd.f32 %v6636_v1, %v6678_v53  ;;  %v5019_v1 = vld [vmem:[#allocation10 + $0x210] ss:$8 sps:$4 sm:$0xff]  }
 0x3fe   :  { %2939 = vmatpush1.bf16.msra.mxu0 %v4967_v29  ;;  %2979 = vmatprep.subr.bf16.mxu1 %v4968_v38  ;;  %v2537_v29 = vadd.f32 %v2536_v41, %v2494_v50  ;;  %v5001_v38 = vld [vmem:[#allocation10 + $0x84] ss:$8 sps:$4 sm:$0xff]  }
 0x3ff   :  { %2940 = vmatprep.subr.bf16.mxu0 %v4969_v16  ;;  %v1807_v16 = vmax.f32 %v1778_v20, 0.0 }
 0x400   :  { %v3059_v11 = vmax.f32 %v2537_v29, 0.0 }
 0x401   :  { %2980 = vmatpush1.bf16.msra.mxu1 %v4970_v36  ;;  %v2533_v36 = vadd.f32 %v2532_v30, %v2490_v23  ;;  %v5011_v30 = vld [vmem:[#allocation10 + $0x250] ss:$8 sps:$4 sm:$0xff]   ;;  %v5018_v23 = vld [vmem:[#allocation10 + $0x214] ss:$8 sps:$4 sm:$0xff]  }
 0x402   :  { %2941 = vmatpush1.bf16.msra.mxu0 %v4971_v46  ;;  %2981 = vmatprep.subr.bf16.mxu1 %v4972_v54  ;;  %v5002_v46 = vld [vmem:[#allocation10 + $0x190] ss:$8 sps:$4 sm:$0xff]   ;;  %v1793_v54 = vmax.f32 %v1774_v37, 0.0  ;;  %v4826_v37 = vld [vmem:[#allocation11 + $0x48] sm:$0xff]  }
 0x403   :  { %2942 = vmatprep.subr.bf16.mxu0 %v4973_v2  ;;  %v5003_v2 = vld [vmem:[#allocation10 + $0x80] ss:$8 sps:$4 sm:$0xff]  }
 0x405   :  { %2982 = vmatpush1.bf16.msra.mxu1 %v4974_v9  ;;  %v5004_v9 = vld [vmem:[#allocation10 + $0x184] ss:$8 sps:$4 sm:$0xff]  }
 0x406   :  { %2943 = vmatpush2.bf16.msra.mxu0 %v4975_v45  ;;  %2983 = vmatprep.subr.bf16.mxu1 %v4976_v3  ;;  %v5005_v45 = vld [vmem:[#allocation10 + $0x274] ss:$8 sps:$4 sm:$0xff]  }
 0x407   :  { %2944 = vmatprep.subr.bf16.mxu0 %v4977_v15  ;;  %v4814_v3 = vld [vmem:[#allocation11 + $0x78] sm:$0xff]   ;;  %v1821_v15 = vpack.c.bf16 %v1807_v16, %v1793_v54  ;;  %v4827_v16 = vld [vmem:[#allocation11 + $0x8] sm:$0xff]   ;;  %v4828_v54 = vld [vmem:[#allocation11 + $0x40] sm:$0xff]  }
 0x409   :  { %2984 = vmatpush2.bf16.msra.mxu1 %v4978_v22  ;;  %v3050_v22 = vmax.f32 %v2533_v36, 0.0  ;;  %v2488_v36 = vadd.f32 %v6640_v42, %v2445_v34 }
 0x40a   :  { %2945 = vmatpush2.bf16.msra.mxu0 %v4979_v26  ;;  %2985 = vmatprep.subr.bf16.mxu1 %v4980_v48  ;;  %v5006_v26 = vld [vmem:[#allocation10 + $0x180] ss:$8 sps:$4 sm:$0xff]   ;;  %v4815_v48 = vld [vmem:[#allocation11 + $0x38] sm:$0xff]  }
 0x40b   :  { %2946 = vmatprep.subr.bf16.mxu0 %v4981_v61  ;;  %v2575_v61 = vpop.f32.mrf.mxu1  ;;  %v3068_v8 = vpack.c.bf16 %v3059_v11, %v3050_v22  ;;  %v2531_v11 = vadd.f32 %v6642_v59, %v2488_v36  ;;  %v4830_v22 = vld [vmem:[#allocation11 + $0xf8] sm:$0xff]   ;;  %v4832_v59 = vld [vmem:[#allocation11 + $0xf0] sm:$0xff]  }
 0x40d   :  { %2986 = vmatpush2.bf16.msra.mxu1 %v4982_v31  ;;  %v4816_v31 = vld [vmem:[#allocation11 + $0x70] sm:$0xff]  }
 0x40e   :  { %2947 = vmatpush2.bf16.msra.mxu0 %v4983_v57  ;;  %2987 = vmatprep.subr.bf16.mxu1 %v4984_v56  ;;  %v5008_v57 = vld [vmem:[#allocation10 + $0x264] ss:$8 sps:$4 sm:$0xff]   ;;  %v4817_v56 = vld [vmem:[#allocation11 + $0x30] sm:$0xff]  }
 0x40f   :  { %2948 = vmatprep.subr.bf16.mxu0 %v4985_v62  ;;  %v6668_v62 = vpop.f32.mrf.mxu1 }
 0x411   :  { %2988 = vmatpush2.bf16.msra.mxu1 %v4986_v10  ;;  %v4818_v10 = vld [vmem:[#allocation11 + $0x68] sm:$0xff]  }
 0x412   :  { %2949 = vmatpush2.bf16.msra.mxu0 %v4987_v17  ;;  %2989 = vmatprep.subr.bf16.mxu1 %v4988_v52  ;;  %v6670_v17 = vpop.f32.mrf.mxu0  ;;  %v4819_v52 = vld [vmem:[#allocation11 + $0x28] sm:$0xff]  }
 0x413   :  { %2950 = vmatprep.subr.bf16.mxu0 %v4989_v44  ;;  %v2579_v44 = vpop.f32.mrf.mxu1 }
 0x414   :  { %v2580_v50 = vadd.f32 %v2579_v44, %v6653_v32  ;;  %v5027_v44 = vld [vmem:[#allocation10 + $0x2d0] ss:$8 sps:$4 sm:$0xff]  }
 0x415   :  { %2990 = vmatpush2.bf16.msra.mxu1 %v4990_v27  ;;  %v5012_v27 = vld [vmem:[#allocation10 + $0x244] ss:$8 sps:$4 sm:$0xff]  }
 0x416   :  { %2951 = vmatpush2.bf16.msra.mxu0 %v4991_v5  ;;  %2991 = vmatprep.subr.bf16.mxu1 %v4992_v51  ;;  %v2618_v5 = vpop.f32.mrf.mxu0  ;;  %v6672_v51 = vpop.f32.mrf.mxu1 }
 0x417   :  { %2952 = vmatprep.subr.bf16.mxu0 %v4993_v55  ;;  %v5013_v55 = vld [vmem:[#allocation10 + $0x240] ss:$8 sps:$4 sm:$0xff]  }
 0x418   :  { %v6674_v19 = vpop.f32.mrf.mxu0 }
 0x419   :  { %2992 = vmatpush2.bf16.msra.mxu1 %v4994_v7  ;;  %v2661_v7 = vpop.f32.mrf.mxu1 }
 0x41a   :  { %2953 = vmatpush2.bf16.msra.mxu0 %v4995_v4  ;;  %2993 = vmatprep.subr.bf16.mxu1 %v4996_v60  ;;  %v5015_v4 = vld [vmem:[#allocation10 + $0x230] ss:$8 sps:$4 sm:$0xff]   ;;  %v2622_v20 = vpop.f32.mrf.mxu0 }
 0x41b   :  { %2954 = vmatprep.subr.bf16.mxu0 %v4997_v58  ;;  %v4824_v60 = vld [vmem:[#allocation11 + $0x50] sm:$0xff]   ;;  %v2449_v58 = vadd.f32 %v6638_v35, %v6678_v53  ;;  %v6682_v41 = vpop.f32.mrf.mxu1 }
 0x41d   :  { %2994 = vmatpush2.bf16.msra.mxu1 %v4998_v40  ;;  %v4825_v40 = vld [vmem:[#allocation11 + $0x10] sm:$0xff]   ;;  %v2492_v35 = vadd.f32 %v6649_v47, %v2449_v58  ;;  %v2665_v29 = vpop.f32.mrf.mxu1  ;;  %v4829_v47 = vld [vmem:[#allocation11] sm:$0xff]  }
 0x41e   :  { %2955 = vmatpush2.bf16.msra.mxu0 %v4999_v63  ;;  %2995 = vmatprep.subr.bf16.mxu1 %v5000_v49  ;;  %v2576_v63 = vadd.f32 %v2575_v61, %v6653_v32  ;;  %v2623_v49 = vadd.f32 %v2622_v20, %v2580_v50  ;;  %v4831_v61 = vld [vmem:[#allocation11 + $0xb8] sm:$0xff]   ;;  %v5033_v20 = vld [vmem:[#allocation10 + $0x2a0] ss:$8 sps:$4 sm:$0xff]  }
 0x41f   :  { %2956 = vmatprep.subr.bf16.mxu0 %v5001_v38  ;;  %v4842_v50 = vld [vmem:[#allocation11 + $0xc8] sm:$0xff]  }
 0x420   :  { %v2619_v38 = vadd.f32 %v2618_v5, %v2576_v63  ;;  %v5029_v5 = vld [vmem:[#allocation10 + $0x2c0] ss:$8 sps:$4 sm:$0xff]  }
 0x421   :  { %2996 = vmatpush2.bf16.msra.mxu1 %v5002_v46  ;;  %v2535_v46 = vadd.f32 %v6656_v0, %v2492_v35  ;;  %v3049_v0 = vmax.f32 %v2531_v11, 0.0  ;;  %v5036_v35 = vld [vmem:[#allocation10 + $0x284] ss:$8 sps:$4 sm:$0xff]  }
 0x422   :  { %2957 = vmatpush2.bf16.msra.mxu0 %v5003_v2  ;;  %2997 = vmatprep.subr.bf16.mxu1 %v5004_v9  ;;  %v2666_v2 = vadd.f32 %v2665_v29, %v2623_v49  ;;  %v5020_v9 = vld [vmem:[#allocation10 + $0x204] ss:$8 sps:$4 sm:$0xff]   ;;  %v5035_v49 = vld [vmem:[#allocation10 + $0x290] ss:$8 sps:$4 sm:$0xff]  }
 0x423   :  { %3008 = vmatprep.subr.bf16.mxu0 %v5005_v45  ;;  %v2662_v45 = vadd.f32 %v2661_v7, %v2619_v38  ;;  %v4840_v7 = vld [vmem:[#allocation11 + $0xd0] sm:$0xff]   ;;  %v4846_v29 = vld [vmem:[#allocation11 + $0x178] sm:$0xff]  }
 0x424   :  { %v3061_v42 = vmax.f32 %v2666_v2, 0.0  ;;  %v4848_v2 = vld [vmem:[#allocation11 + $0x170] sm:$0xff]  }
 0x425   :  { %2959 = vmatmul.mubr.bf16.vlgmr.msra.gmra.mxu0 %v7151_v18  ;;  %2998 = vmatpush2.bf16.msra.mxu1 %v5006_v26  ;;  %v5009_v18 = vld [vmem:[#allocation10 + $0x260] ss:$8 sps:$4 sm:$0xff]   ;;  %v5022_v26 = vld [vmem:[#allocation10 + $0x2f4] ss:$8 sps:$4 sm:$0xff]  }
 0x426   :  { %3009 = vmatpush1.bf16.msra.mxu0 %v5007_v39  ;;  %3040 = vmatprep.mubr.bf16.mxu0 %v1821_v15  ;;  %v5021_v15 = vld [vmem:[#allocation10 + $0x200] ss:$8 sps:$4 sm:$0xff]  }
 0x427   :  { %4310 = vmatprep.subr.bf16.mxu1 %v4814_v3  ;;  %3010 = vmatprep.subr.bf16.mxu0 %v5008_v57  ;;  %v3058_v3 = vmax.f32 %v2535_v46, 0.0  ;;  %v5024_v57 = vld [vmem:[#allocation10 + $0x2e4] ss:$8 sps:$4 sm:$0xff]   ;;  %v4847_v46 = vld [vmem:[#allocation11 + $0x138] sm:$0xff]  }
 0x428   :  { %3000 = vmatmul.mubr.bf16.vlgmr.msra.gmra.mxu1 %v7161_v24  ;;  %v4820_v24 = vld [vmem:[#allocation11 + $0x60] sm:$0xff]   ;;  %v6699_v34 = vpop.f32.mrf.mxu1 }
 0x429   :  { %4311 = vmatpush3.bf16.msra.mxu1 %v4815_v48  ;;  %3691 = vmatprep.mubr.bf16.mxu1 %v3068_v8  ;;  %v3052_v48 = vmax.f32 %v2662_v45, 0.0  ;;  %v3067_v39 = vpack.c.bf16 %v3058_v3, %v3049_v0 }
 0x42a   :  { %3011 = vmatpush1.bf16.msra.mxu0 %v5009_v18  ;;  %4312 = vmatprep.subr.bf16.mxu1 %v4816_v31  ;;  %v5023_v31 = vld [vmem:[#allocation10 + $0x2f0] ss:$8 sps:$4 sm:$0xff]   ;;  %v5025_v18 = vld [vmem:[#allocation10 + $0x2e0] ss:$8 sps:$4 sm:$0xff]  }
 0x42b   :  { %3012 = vmatprep.subr.bf16.mxu0 %v5010_v21  ;;  %v3070_v8 = vpack.c.bf16 %v3061_v42, %v3052_v48  ;;  %v5026_v21 = vld [vmem:[#allocation10 + $0x2d4] ss:$8 sps:$4 sm:$0xff]   ;;  %v4850_v48 = vld [vmem:[#allocation11 + $0x168] sm:$0xff]  }
 0x42c   :  { %v4864_v42 = vld [vmem:[#allocation11 + $0x1f0] sm:$0xff]  }
 0x42d   :  { %4313 = vmatpush3.bf16.msra.mxu1 %v4817_v56  ;;  %v4833_v56 = vld [vmem:[#allocation11 + $0xb0] sm:$0xff]  }
 0x42e   :  { %3013 = vmatpush1.bf16.msra.mxu0 %v5011_v30  ;;  %4314 = vmatprep.subr.bf16.mxu1 %v4818_v10  ;;  %v4834_v10 = vld [vmem:[#allocation11 + $0xe8] sm:$0xff]   ;;  %v4836_v30 = vld [vmem:[#allocation11 + $0xe0] sm:$0xff]  }
 0x42f   :  { %3014 = vmatprep.subr.bf16.mxu0 %v5012_v27  ;;  %v4837_v27 = vld [vmem:[#allocation11 + $0xa0] sm:$0xff]  }
 0x431   :  { %4315 = vmatpush3.bf16.msra.mxu1 %v4819_v52  ;;  %v4835_v52 = vld [vmem:[#allocation11 + $0xa8] sm:$0xff]  }
 0x432   :  { %3015 = vmatpush1.bf16.msra.mxu0 %v5013_v55  ;;  %4316 = vmatprep.subr.bf16.mxu1 %v4820_v24  ;;  %v5028_v24 = vld [vmem:[#allocation10 + $0x2c4] ss:$8 sps:$4 sm:$0xff]   ;;  %v5030_v55 = vld [vmem:[#allocation10 + $0x2b4] ss:$8 sps:$4 sm:$0xff]  }
 0x433   :  { %3016 = vmatprep.subr.bf16.mxu0 %v5014_v43  ;;  %v5031_v43 = vld [vmem:[#allocation10 + $0x2b0] ss:$8 sps:$4 sm:$0xff]  }
 0x435   :  { %4317 = vmatpush3.bf16.msra.mxu1 %v4821_v28  ;;  %v4838_v28 = vld [vmem:[#allocation11 + $0xd8] sm:$0xff]  }
 0x436   :  { %3017 = vmatpush1.bf16.msra.mxu0 %v5015_v4  ;;  %4318 = vmatprep.subr.bf16.mxu1 %v4822_v14  ;;  %v4839_v14 = vld [vmem:[#allocation11 + $0x98] sm:$0xff]   ;;  %v2578_v4 = vadd.f32 %v6668_v62, %v6678_v53  ;;  %v4843_v62 = vld [vmem:[#allocation11 + $0x88] sm:$0xff]  }
 0x437   :  { %3018 = vmatprep.subr.bf16.mxu0 %v5016_v6  ;;  %v2574_v6 = vadd.f32 %v6664_v33, %v6678_v53  ;;  %v4844_v33 = vld [vmem:[#allocation11 + $0xc0] sm:$0xff]  }
 0x438   :  { %v2621_v58 = vadd.f32 %v6674_v19, %v2578_v4  ;;  %v4871_v4 = vld [vmem:[#allocation11 + $0x198] sm:$0xff]  }
 0x439   :  { %4319 = vmatpush3.bf16.msra.mxu1 %v4823_v12  ;;  %v6692_v12 = vpop.f32.mrf.mxu0 }
 0x43a   :  { %3019 = vmatpush1.bf16.msra.mxu0 %v5017_v25  ;;  %4320 = vmatprep.subr.bf16.mxu1 %v4824_v60  ;;  %v4841_v60 = vld [vmem:[#allocation11 + $0x90] sm:$0xff]   ;;  %v2664_v63 = vadd.f32 %v6682_v41, %v2621_v58  ;;  %v4862_v41 = vld [vmem:[#allocation11 + $0x1f8] sm:$0xff]   ;;  %v2703_v58 = vadd.f32 %v6692_v12, %v6678_v53  ;;  %v4861_v12 = vld [vmem:[#allocation11 + $0x100] sm:$0xff]  }
 0x43b   :  { %3020 = vmatprep.subr.bf16.mxu0 %v5018_v23  ;;  %v5034_v25 = vld [vmem:[#allocation10 + $0x294] ss:$8 sps:$4 sm:$0xff]   ;;  %v2747_v23 = vpop.f32.mrf.mxu1 }
 0x43c   :  { %v3060_v36 = vmax.f32 %v2664_v63, 0.0 }
 0x43d   :  { %4321 = vmatpush3.bf16.msra.mxu1 %v4825_v40  ;;  %v2704_v40 = vpop.f32.mrf.mxu0 }
 0x43e   :  { %3021 = vmatpush1.bf16.msra.mxu0 %v5019_v1  ;;  %4322 = vmatprep.subr.bf16.mxu1 %v4826_v37  ;;  %v2617_v37 = vadd.f32 %v6670_v17, %v2574_v6  ;;  %v5037_v17 = vld [vmem:[#allocation10 + $0x280] ss:$8 sps:$4 sm:$0xff]   ;;  %v2705_v11 = vadd.f32 %v2704_v40, %v6653_v32  ;;  %v4872_v6 = vld [vmem:[#allocation11 + $0x1d0] sm:$0xff]  }
 0x43f   :  { %3022 = vmatprep.subr.bf16.mxu0 %v5020_v9  ;;  %v6703_v19 = vpop.f32.mrf.mxu0  ;;  %v4873_v40 = vld [vmem:[#allocation11 + $0x190] sm:$0xff]  }
 0x440   :  { %v2660_v38 = vadd.f32 %v6672_v51, %v2617_v37  ;;  %v4863_v51 = vld [vmem:[#allocation11 + $0x1b8] sm:$0xff]   ;;  %v4874_v37 = vld [vmem:[#allocation11 + $0x1c8] sm:$0xff]  }
 0x441   :  { %4323 = vmatpush3.bf16.msra.mxu1 %v4827_v16  ;;  %v4845_v16 = vld [vmem:[#allocation11 + $0x80] sm:$0xff]   ;;  %v2708_v1 = vpop.f32.mrf.mxu0 }
 0x442   :  { %3023 = vmatpush1.bf16.msra.mxu0 %v5021_v15  ;;  %4324 = vmatprep.subr.bf16.mxu1 %v4828_v54  ;;  %v6706_v54 = vpop.f32.mrf.mxu1  ;;  %v3051_v9 = vmax.f32 %v2660_v38, 0.0  ;;  %v2709_v15 = vadd.f32 %v2708_v1, %v6653_v32  ;;  %v4877_v38 = vld [vmem:[#allocation11 + $0x180] sm:$0xff]  }
 0x443   :  { %3024 = vmatprep.subr.bf16.mxu0 %v5022_v26 }
 0x444   :  { %v3069_v3 = vpack.c.bf16 %v3060_v36, %v3051_v9  ;;  %v2751_v26 = vpop.f32.mrf.mxu1  ;;  %v4878_v36 = vld [vmem:[#allocation11 + $0x238] sm:$0xff]  }
 0x445   :  { %4325 = vmatpush3.bf16.msra.mxu1 %v4829_v47  ;;  %v7167_v47 = vld [vmem:[#allocation60_spill] sm:$0xff] }
 0x446   :  { %3025 = vmatpush2.bf16.msra.mxu0 %v5023_v31  ;;  %4332 = vmatprep.subr.bf16.mxu1 %v4830_v22  ;;  %v4849_v22 = vld [vmem:[#allocation11 + $0x130] sm:$0xff]  }
 0x447   :  { %3026 = vmatprep.subr.bf16.mxu0 %v5024_v57  ;;  %v4865_v31 = vld [vmem:[#allocation11 + $0x1b0] sm:$0xff]   ;;  %v4851_v57 = vld [vmem:[#allocation11 + $0x128] sm:$0xff]  }
 0x448   :  { %3692 = vmatmul.mubr.bf16.vlgmr.msra.gmra.mxu1 %v3067_v39 }
 0x449   :  { %4333 = vmatpush3.bf16.msra.mxu1 %v4831_v61  ;;  %3732 = vmatprep.mubr.bf16.mxu1 %v3070_v8  ;;  %v2748_v61 = vadd.f32 %v2747_v23, %v2705_v11  ;;  %v4876_v23 = vld [vmem:[#allocation11 + $0x1c0] sm:$0xff]   ;;  %v4883_v11 = vld [vmem:[#allocation11 + $0x210] sm:$0xff]  }
 0x44a   :  { %3027 = vmatpush2.bf16.msra.mxu0 %v5025_v18  ;;  %4334 = vmatprep.subr.bf16.mxu1 %v4832_v59  ;;  %v2752_v59 = vadd.f32 %v2751_v26, %v2709_v15  ;;  %v4884_v15 = vld [vmem:[#allocation11 + $0x208] sm:$0xff]  }
 0x44b   :  { %3028 = vmatprep.subr.bf16.mxu0 %v5026_v21 }
 0x44d   :  { %4335 = vmatpush3.bf16.msra.mxu1 %v4833_v56  ;;  %v4866_v56 = vld [vmem:[#allocation11 + $0x1e8] sm:$0xff]  }
 0x44e   :  { %3029 = vmatpush2.bf16.msra.mxu0 %v5027_v44  ;;  %4336 = vmatprep.subr.bf16.mxu1 %v4834_v10  ;;  %v4852_v10 = vld [vmem:[#allocation11 + $0x160] sm:$0xff]  }
 0x44f   :  { %3030 = vmatprep.subr.bf16.mxu0 %v5028_v24  ;;  %v4853_v24 = vld [vmem:[#allocation11 + $0x120] sm:$0xff]  }
 0x451   :  { %4337 = vmatpush3.bf16.msra.mxu1 %v4835_v52  ;;  %v4867_v52 = vld [vmem:[#allocation11 + $0x1a8] sm:$0xff]  }
 0x452   :  { %3031 = vmatpush2.bf16.msra.mxu0 %v5029_v5  ;;  %4338 = vmatprep.subr.bf16.mxu1 %v4836_v30  ;;  %v4868_v5 = vld [vmem:[#allocation11 + $0x1e0] sm:$0xff]  }
 0x453   :  { %3032 = vmatprep.subr.bf16.mxu0 %v5030_v55  ;;  %v4869_v55 = vld [vmem:[#allocation11 + $0x1a0] sm:$0xff]  }
 0x455   :  { %4339 = vmatpush3.bf16.msra.mxu1 %v4837_v27  ;;  %v4854_v27 = vld [vmem:[#allocation11 + $0x158] sm:$0xff]  }
 0x456   :  { %3033 = vmatpush2.bf16.msra.mxu0 %v5031_v43  ;;  %4340 = vmatprep.subr.bf16.mxu1 %v4838_v28  ;;  %v4870_v43 = vld [vmem:[#allocation11 + $0x1d8] sm:$0xff]  }
 0x457   :  { %3034 = vmatprep.subr.bf16.mxu0 %v5032_v13  ;;  %v2707_v13 = vadd.f32 %v6703_v19, %v6678_v53  ;;  %v4875_v19 = vld [vmem:[#allocation11 + $0x188] sm:$0xff]  }
 0x459   :  { %4341 = vmatpush3.bf16.msra.mxu1 %v4839_v14  ;;  %v4855_v14 = vld [vmem:[#allocation11 + $0x118] sm:$0xff]  }
 0x45a   :  { %3035 = vmatpush2.bf16.msra.mxu0 %v5033_v20  ;;  %4342 = vmatprep.subr.bf16.mxu1 %v4840_v7  ;;  %v4856_v7 = vld [vmem:[#allocation11 + $0x150] sm:$0xff]   ;;  %v4858_v20 = vld [vmem:[#allocation11 + $0x148] sm:$0xff]  }
 0x45b   :  { %3036 = vmatprep.subr.bf16.mxu0 %v5034_v25  ;;  %v4859_v25 = vld [vmem:[#allocation11 + $0x108] sm:$0xff]  }
 0x45d   :  { %4343 = vmatpush3.bf16.msra.mxu1 %v4841_v60  ;;  %v4857_v60 = vld [vmem:[#allocation11 + $0x110] sm:$0xff]  }
 0x45e   :  { %3037 = vmatpush2.bf16.msra.mxu0 %v5035_v49  ;;  %4344 = vmatprep.subr.bf16.mxu1 %v4842_v50  ;;  %v2750_v50 = vadd.f32 %v6706_v54, %v2707_v13  ;;  %v4860_v49 = vld [vmem:[#allocation11 + $0x140] sm:$0xff]   ;;  %v4882_v54 = vld [vmem:[#allocation11 + $0x218] sm:$0xff]  }
 0x45f   :  { %3038 = vmatprep.subr.bf16.mxu0 %v5036_v35 }
 0x461   :  { %4345 = vmatpush3.bf16.msra.mxu1 %v4843_v62  ;;  %v2746_v62 = vadd.f32 %v6699_v34, %v2703_v58  ;;  %v7168_v34 = vmov 0.0  }
 0x462   :  { %3039 = vmatpush2.bf16.msra.mxu0 %v5037_v17  ;;  %4346 = vmatprep.subr.bf16.mxu1 %v4844_v33  ;;  %v4879_v17 = vld [vmem:[#allocation11 + $0x230] sm:$0xff]  }
 0x463   :  { %4354 = vmatprep.subr.bf16.mxu0 %v4846_v29 }
 0x465   :  { %v6709_v45 = vpop.f32.mrf.mxu0  ;;  %3041 = vmatmul.mubr.bf16.vlgmr.msra.gmra.mxu0 %v7167_v47  ;;  %4347 = vmatpush3.bf16.msra.mxu1 %v4845_v16 }
 0x466   :  { %4355 = vmatpush3.bf16.msra.mxu0 %v4847_v46  ;;  %4376 = vmatprep.subr.bf16.mxu1 %v4862_v41  ;;  %v2789_v33 = vadd.f32 %v6709_v45, %v2746_v62  ;;  %v4880_v46 = vld [vmem:[#allocation11 + $0x228] sm:$0xff]   ;;  %v4881_v41 = vld [vmem:[#allocation11 + $0x220] sm:$0xff]  }
 0x467   :  { %v2790_v0 = vpop.f32.mrf.mxu0  ;;  %4356 = vmatprep.subr.bf16.mxu0 %v4848_v2 }
 0x468   :  { %3733 = vmatmul.mubr.bf16.vlgmr.msra.gmra.mxu1 %v3069_v3  ;;  %v2791_v8 = vadd.f32 %v2790_v0, %v2748_v61  ;;  %v3053_v29 = vmax.f32 %v2789_v33, 0.0  ;;  %v2831_v1 = vpop.f32.mrf.mxu1 }
 0x469   :  { %v2792_v39 = vpop.f32.mrf.mxu0  ;;  %4377 = vmatpush3.bf16.msra.mxu1 %v4863_v51 }
 0x46a   :  { %4357 = vmatpush3.bf16.msra.mxu0 %v4849_v22  ;;  %4378 = vmatprep.subr.bf16.mxu1 %v4864_v42  ;;  %v3054_v44 = vmax.f32 %v2791_v8, 0.0  ;;  %v2793_v63 = vadd.f32 %v2792_v39, %v2750_v50  ;;  %v2833_v2 = vpop.f32.mrf.mxu1  ;;  %v2832_v22 = vadd.f32 %v2831_v1, %v6678_v53  ;;  %v4887_v50 = vld [vmem:[#allocation13 + $0x30] sm:$0xff]  }
 0x46b   :  { %v2794_v18 = vpop.f32.mrf.mxu0  ;;  %4358 = vmatprep.subr.bf16.mxu0 %v4850_v48  ;;  %v2834_v51 = vadd.f32 %v2833_v2, %v6653_v32 }
 0x46c   :  { %v2795_v21 = vadd.f32 %v2794_v18, %v2752_v59  ;;  %v3062_v35 = vmax.f32 %v2793_v63, 0.0  ;;  %v2835_v9 = vpop.f32.mrf.mxu1 }
 0x46d   :  { %4379 = vmatpush3.bf16.msra.mxu1 %v4865_v31  ;;  %v2836_v42 = vadd.f32 %v2835_v9, %v6678_v53 }
 0x46e   :  { %v3063_v30 = vmax.f32 %v2795_v21, 0.0  ;;  %4359 = vmatpush3.bf16.msra.mxu0 %v4851_v57  ;;  %4380 = vmatprep.subr.bf16.mxu1 %v4866_v56  ;;  %v3071_v16 = vpack.c.bf16 %v3062_v35, %v3053_v29  ;;  %v2837_v47 = vpop.f32.mrf.mxu1  ;;  %v4885_v57 = vld [vmem:[#allocation11 + $0x200] sm:$0xff]  }
 0x46f   :  { %4360 = vmatprep.subr.bf16.mxu0 %v4852_v10  ;;  %v2838_v61 = vadd.f32 %v2837_v47, %v6653_v32 }
 0x470   :  { %v3072_v28 = vpack.c.bf16 %v3063_v30, %v3054_v44 }
 0x471   :  { %4381 = vmatpush3.bf16.msra.mxu1 %v4867_v52 }
 0x472   :  { %4361 = vmatpush3.bf16.msra.mxu0 %v4853_v24  ;;  %3773 = vmatprep.mubr.bf16.mxu0 %v3072_v28 }
 0x473   :  { %4362 = vmatprep.subr.bf16.mxu0 %v4854_v27  ;;  %4382 = vmatprep.subr.bf16.mxu1 %v4868_v5 }
 0x475   :  { %4383 = vmatpush3.bf16.msra.mxu1 %v4869_v55 }
 0x476   :  { %4363 = vmatpush3.bf16.msra.mxu0 %v4855_v14  ;;  %4384 = vmatprep.subr.bf16.mxu1 %v4870_v43 }
 0x477   :  { %4364 = vmatprep.subr.bf16.mxu0 %v4856_v7 }
 0x479   :  { %4385 = vmatpush3.bf16.msra.mxu1 %v4871_v4 }
 0x47a   :  { %4365 = vmatpush3.bf16.msra.mxu0 %v4857_v60  ;;  %4386 = vmatprep.subr.bf16.mxu1 %v4872_v6 }
 0x47b   :  { %4366 = vmatprep.subr.bf16.mxu0 %v4858_v20  ;;  %v4886_v20 = vld [vmem:[#allocation13 + $0x38] sm:$0xff]  }
 0x47d   :  { %4387 = vmatpush3.bf16.msra.mxu1 %v4873_v40  ;;  %v4888_v40 = vld [vmem:[#allocation13 + $0x28] sm:$0xff]  }
 0x47e   :  { %4367 = vmatpush3.bf16.msra.mxu0 %v4859_v25  ;;  %4388 = vmatprep.subr.bf16.mxu1 %v4874_v37  ;;  %v4889_v25 = vld [vmem:[#allocation13 + $0x20] sm:$0xff]   ;;  %v4890_v37 = vld [vmem:[#allocation13 + $0x18] sm:$0xff]  }
 0x47f   :  { %4368 = vmatprep.subr.bf16.mxu0 %v4860_v49 }
 0x481   :  { %4389 = vmatpush3.bf16.msra.mxu1 %v4875_v19 }
 0x482   :  { %4369 = vmatpush3.bf16.msra.mxu0 %v4861_v12  ;;  %4390 = vmatprep.subr.bf16.mxu1 %v4876_v23 }
 0x483   :  { %4436 = vmatprep.subr.bf16.mxu0 %v7168_v34 }
 0x485   :  { %3774 = vmatmul.mubr.bf16.vlgmr.msra.gmra.mxu0 %v3071_v16  ;;  %4391 = vmatpush3.bf16.msra.mxu1 %v4877_v38 }
 0x486   :  { %4452 = vmatprep.mubr.msk.bf16.mxu0 %vm5223_vm0, %v7168_v34  ;;  %4456 = vmatprep.subr.bf16.mxu1 %v7168_v34 }
 0x487   :  { %4437 = vmatpush3.bf16.msra.mxu0 %v4878_v36 }
 0x488   :  { %4438 = vmatprep.subr.bf16.mxu0 %v7168_v34 }
 0x48b   :  { %4439 = vmatpush3.bf16.msra.mxu0 %v4879_v17 }
 0x48c   :  { %4440 = vmatprep.subr.bf16.mxu0 %v7168_v34 }
 0x48f   :  { %4441 = vmatpush3.bf16.msra.mxu0 %v4880_v46  ;;  %v4891_v46 = vld [vmem:[#allocation13 + $0x10] sm:$0xff]  }
 0x490   :  { %4442 = vmatprep.subr.bf16.mxu0 %v7168_v34 }
 0x493   :  { %4443 = vmatpush3.bf16.msra.mxu0 %v4881_v41  ;;  %v4892_v41 = vld [vmem:[#allocation13 + $0x8] sm:$0xff]  }
 0x494   :  { %4444 = vmatprep.subr.bf16.mxu0 %v7168_v34 }
 0x497   :  { %4445 = vmatpush3.bf16.msra.mxu0 %v4882_v54 }
 0x498   :  { %4446 = vmatprep.subr.bf16.mxu0 %v7168_v34 }
 0x49b   :  { %4447 = vmatpush3.bf16.msra.mxu0 %v4883_v11 }
 0x49c   :  { %4448 = vmatprep.subr.bf16.mxu0 %v7168_v34 }
 0x49f   :  { %4449 = vmatpush3.bf16.msra.mxu0 %v4884_v15 }
 0x4a0   :  { %4450 = vmatprep.subr.bf16.mxu0 %v7168_v34 }
 0x4a3   :  { %4451 = vmatpush3.bf16.msra.mxu0 %v4885_v57 }
 0x4a5   :  { %v2874_v45 = vpop.f32.mrf.mxu0 }
 0x4a6   :  { %v2875_v39 = vadd.f32 %v2874_v45, %v2832_v22 }
 0x4a7   :  { %v2876_v3 = vpop.f32.mrf.mxu0 }
 0x4a8   :  { %v2917_v26 = vpop.f32.mrf.mxu1  ;;  %v2877_v0 = vadd.f32 %v2876_v3, %v2834_v51 }
 0x4a9   :  { %v2878_v48 = vpop.f32.mrf.mxu0  ;;  %v2918_v52 = vadd.f32 %v2917_v26, %v2875_v39 }
 0x4aa   :  { %v2879_v31 = vadd.f32 %v2878_v48, %v2836_v42  ;;  %v2919_v59 = vpop.f32.mrf.mxu1 }
 0x4ab   :  { %v2880_v8 = vpop.f32.mrf.mxu0  ;;  %v2920_v10 = vadd.f32 %v2919_v59, %v2877_v0  ;;  %v3055_v28 = vmax.f32 %v2918_v52, 0.0 }
 0x4ac   :  { %v2881_v56 = vadd.f32 %v2880_v8, %v2838_v61  ;;  %v2921_v18 = vpop.f32.mrf.mxu1 }
 0x4ad   :  { %v2922_v21 = vadd.f32 %v2921_v18, %v2879_v31  ;;  %v3056_v27 = vmax.f32 %v2920_v10, 0.0 }
 0x4ae   :  { %v2923_v44 = vpop.f32.mrf.mxu1 }
 0x4af   :  { %v2924_v30 = vadd.f32 %v2923_v44, %v2881_v56  ;;  %v3064_v24 = vmax.f32 %v2922_v21, 0.0 }
 0x4b1   :  { %v3065_v5 = vmax.f32 %v2924_v30, 0.0  ;;  %v3073_v55 = vpack.c.bf16 %v3064_v24, %v3055_v28 }
 0x4b3   :  { %v3074_v32 = vpack.c.bf16 %v3065_v5, %v3056_v27 }
 0x4b5   :  { %3814 = vmatprep.mubr.bf16.mxu1 %v3074_v32 }
 0x4b6   :  { %3815 = vmatmul.mubr.bf16.vlgmr.msra.gmra.mxu1 %v3073_v55 }
 0x4b7   :  { %4472 = vmatprep.mubr.msk.bf16.mxu1 %vm5223_vm0, %v7168_v34  ;;  %4457 = vmatpush3.bf16.msra.mxu1 %v4886_v20 }
 0x4b8   :  { %4458 = vmatprep.subr.bf16.mxu1 %v7168_v34 }
 0x4bb   :  { %4459 = vmatpush3.bf16.msra.mxu1 %v4887_v50 }
 0x4bc   :  { %4460 = vmatprep.subr.bf16.mxu1 %v7168_v34 }
 0x4bf   :  { %4461 = vmatpush3.bf16.msra.mxu1 %v4888_v40 }
 0x4c0   :  { %4462 = vmatprep.subr.bf16.mxu1 %v7168_v34 }
 0x4c3   :  { %4463 = vmatpush3.bf16.msra.mxu1 %v4889_v25 }
 0x4c4   :  { %4464 = vmatprep.subr.bf16.mxu1 %v7168_v34 }
 0x4c7   :  { %4465 = vmatpush3.bf16.msra.mxu1 %v4890_v37 }
 0x4c8   :  { %4466 = vmatprep.subr.bf16.mxu1 %v7168_v34 }
 0x4cb   :  { %4467 = vmatpush3.bf16.msra.mxu1 %v4891_v46 }
 0x4cc   :  { %4468 = vmatprep.subr.bf16.mxu1 %v7168_v34 }
 0x4cf   :  { %4469 = vmatpush3.bf16.msra.mxu1 %v4892_v41 }
 0x4d0   :  { %4470 = vmatprep.subr.bf16.mxu1 %v7168_v34  ;;  %v4219_v34 = vld [vmem:[%s6766_s8] ss:$0 sm:$0xff] }
 0x4e5   :  { %v2960_v14 = vpop.f32.mrf.mxu0 }
 0x4e6   :  { %v2961_v62 = vadd.f32 %v2960_v14, %v6678_v53 }
 0x4e7   :  { %v2962_v43 = vpop.f32.mrf.mxu0 }
 0x4e8   :  { %v3001_v7 = vpop.f32.mrf.mxu1 }
 0x4e9   :  { %v2963_v13 = vpop.f32.mrf.mxu0  ;;  %v3002_v33 = vadd.f32 %v3001_v7, %v2961_v62 }
 0x4ea   :  { %v3003_v4 = vpop.f32.mrf.mxu1  ;;  %v2964_v63 = vadd.f32 %v2963_v13, %v6678_v53  ;;  %v4893_v53 = vld [vmem:[#allocation13] sm:$0xff]  }
 0x4eb   :  { %v2965_v60 = vpop.f32.mrf.mxu0  ;;  %4471 = vmatpush3.bf16.msra.mxu1 %v4893_v53 }
 0x4ec   :  { %v3004_v6 = vpop.f32.mrf.mxu1 }
 0x4ed   :  { %v3005_v12 = vadd.f32 %v3004_v6, %v2964_v63 }
 0x4ee   :  { %v3006_v58 = vpop.f32.mrf.mxu1 }
 0x4ef   :  { %v4292_v58 = vld [vmem:[%s6768_s10] ss:$0 sm:$0xff] }
 0x508   :  { %v4326_v1 = vpop.f32.mrf.mxu1 }
 0x50a   :  { %v4327_v54 = vpop.f32.mrf.mxu1 }
 0x50b   :  { %v4328_v0 = vadd.f32 %v4327_v54, %v4326_v1 }
 0x50c   :  { %v4329_v2 = vpop.f32.mrf.mxu1 }
 0x50d   :  { %v3694_v59 = vadd.f32 %v4328_v0, %v4219_v34 }
 0x50e   :  { %v4330_v9 = vpop.f32.mrf.mxu1 }
 0x50f   :  { %v4331_v61 = vadd.f32 %v4330_v9, %v4329_v2 }
 0x511   :  { %v3697_v18 = vadd.f32 %v4331_v61, %v4219_v34 }
 0x525   :  { %v3042_v49 = vpop.f32.mrf.mxu0 }
 0x526   :  { %v3043_v23 = vadd.f32 %v3042_v49, %v3002_v33 }
 0x527   :  { %v3044_v19 = vpop.f32.mrf.mxu0 }
 0x528   :  { %v3057_v16 = vmax.f32 %v3043_v23, 0.0  ;;  %v4348_v11 = vpop.f32.mrf.mxu1 }
 0x529   :  { %v3045_v35 = vpop.f32.mrf.mxu0 }
 0x52a   :  { %v3046_v29 = vadd.f32 %v3045_v35, %v3005_v12  ;;  %v4349_v45 = vpop.f32.mrf.mxu1 }
 0x52b   :  { %v3047_v38 = vpop.f32.mrf.mxu0  ;;  %v4350_v39 = vadd.f32 %v4349_v45, %v4348_v11 }
 0x52c   :  { %v3066_v36 = vmax.f32 %v3046_v29, 0.0  ;;  %v4351_v47 = vpop.f32.mrf.mxu1 }
 0x52d   :  { %v3735_v10 = vadd.f32 %v4350_v39, %v3694_v59 }
 0x52e   :  { %v3075_v17 = vpack.c.bf16 %v3066_v36, %v3057_v16  ;;  %v4352_v51 = vpop.f32.mrf.mxu1 }
 0x52f   :  { %v4353_v8 = vadd.f32 %v4352_v51, %v4351_v47 }
 0x530   :  { %4453 = vmatmul.mubr.bf16.vlgmr.msra.gmra.mxu0 %v3075_v17 }
 0x531   :  { %v3738_v44 = vadd.f32 %v4353_v8, %v3697_v18 }
 0x545   :  { %v4370_v3 = vpop.f32.mrf.mxu0 }
 0x547   :  { %v4371_v22 = vpop.f32.mrf.mxu0 }
 0x548   :  { %v4372_v57 = vadd.f32 %v4371_v22, %v4370_v3 }
 0x549   :  { %v4373_v26 = vpop.f32.mrf.mxu0 }
 0x54a   :  { %v3776_v30 = vadd.f32 %v4372_v57, %v3735_v10 }
 0x54b   :  { %v4374_v31 = vpop.f32.mrf.mxu0 }
 0x54c   :  { %v4375_v21 = vadd.f32 %v4374_v31, %v4373_v26 }
 0x54e   :  { %v3779_v5 = vadd.f32 %v4375_v21, %v3738_v44 }
 0x576   :  { %v4392_v15 = vpop.f32.mrf.mxu1 }
 0x578   :  { %v4393_v42 = vpop.f32.mrf.mxu1 }
 0x579   :  { %v4394_v52 = vadd.f32 %v4393_v42, %v4392_v15 }
 0x57a   :  { %v4395_v48 = vpop.f32.mrf.mxu1 }
 0x57b   :  { %v3817_v28 = vadd.f32 %v4394_v52, %v3776_v30 }
 0x57c   :  { %v4396_v56 = vpop.f32.mrf.mxu1 }
 0x57d   :  { %v4397_v24 = vadd.f32 %v4396_v56, %v4395_v48 }
 0x57f   :  { %v3820_v14 = vadd.f32 %v4397_v24, %v3779_v5 }
 0x5f0   :  { %v3857_v27 = vpop.f32.mrf.mxu0 }
 0x5f1   :  { %v3858_v55 = vadd.f32 %v3857_v27, %v3817_v28 }
 0x5f2   :  { %v4454_v32 = vpop.f32.mrf.mxu0 }
 0x5f3   :  { %v3864_v4 = vmax.f32 %v3858_v55, 0.0 }
 0x5f4   :  { %v3860_v43 = vpop.f32.mrf.mxu0 }
 0x5f5   :  { %v3861_v7 = vadd.f32 %v3860_v43, %v3820_v14 }
 0x5f6   :  { %v4455_v13 = vpop.f32.mrf.mxu0 }
 0x5f7   :  { %v3865_v60 = vmax.f32 %v3861_v7, 0.0 }
 0x5f9   :  { %v3866_v6 = vpack.c.bf16 %v3865_v60, %v3864_v4 }
 0x5fb   :  { %4473 = vmatmul.mubr.bf16.vlgmr.msra.gmra.mxu1 %v3866_v6 }
 0x6bb   :  { %v3972_v20 = vpop.f32.mrf.mxu1 }
 0x6bc   :  { %v3973_v50 = vadd.f32 %v4292_v58, %v3972_v20 }
 0x6bd   :  { %v4474_v40 = vpop.f32.mrf.mxu1 }
 0x6be   :  { %3979 = vst [vmem:[#allocation14] sm:$0xff] %v3973_v50 }
 0x6bf   :  { %v3975_v25 = vpop.f32.mrf.mxu1 }
 0x6c0   :  { %v3976_v37 = vadd.f32 %v4292_v58, %v3975_v25 }
 0x6c1   :  { %v4475_v62 = vpop.f32.mrf.mxu1 }
 0x6c2   :  { %3980 = vst [vmem:[#allocation14 + $0x8] sm:$0xff] %v3976_v37 }
 0x6c3   :  { %5189 = shalt.err (!%p5186_p11)
}
 0x6c4   :  { %3992 = dma.vmem_to_hbm [thread:$0]  %s3987_s20, 256, %s6769_s11, [#allocation4], %s5212_s27, %s5212_s27, %s5213_s28  }
 0x6c5   :  { %5206 = dma.done.wait [#allocation4], 256  }
 0x6c6   :  { %5207 = vsyncadd [#allocation4], 4294967040 }
 0x6c7   :  { %3996 = vsyncpa [#allocation3], 1 }
 0x6c8   :  { %3997 = vsyncpa [#allocation6], 1 }
 0x6c9   :  { %3998 = vsyncpa [#allocation9], 1 }
 0x6ca   :  { %3999 = vsyncpa [#allocation12], 1 }
 0x6cb   :  { %4000 = vsyncpa [#allocation4], 1 }

</bundles_post_ra>
